<compile_context>
chip_gen: v5e
topology: v5e:2x2
jax: 0.10.0
libtpu: 0.0.40
codegen_flags: <defaults>
</compile_context>

<pallas_src>
import functools

import numpy as np
import jax
import jax.numpy as jnp
from jax import lax
from jax.experimental import pallas as pl
from jax.experimental.pallas import tpu as pltpu

# ----------------------------- model sizes -----------------------------------
N_NODES = 16            # nodes per graph
HIDDEN = 32             # hidden_dim == out_dim
HEADS = 4
DK = HIDDEN // HEADS
POS_ENC = 8
NUM_ATOM = 10
NUM_BOND = 5
N_LAYERS = 2

LANES = 128
GB = LANES // HIDDEN    # graphs folded into the lane dim per grid step (= 4)
NB = 2                  # grid steps; "parallel" -> sharded over v7x's 2 TCs
BATCH = NB * GB         # graphs per call (= 8)


# --------------------------- host-side packing --------------------------------
def _round8(x):
    return -(-x // 8) * 8


class _SlabPacker:
    """Packs matrices into one [R,128] f32 slab; offsets are 8-row aligned."""

    def __init__(self, width=LANES):
        self.width = width
        self.chunks = []
        self.off = {}
        self.rows = 0

    def add(self, name, mat, fill=0.0):
        mat = np.asarray(mat, np.float32)
        if mat.ndim == 1:
            mat = mat[None, :]
        r, c = mat.shape
        assert c <= self.width, name
        buf = np.full((_round8(r), self.width), fill, np.float32)
        buf[:r, :c] = mat
        self.off[name] = self.rows
        self.rows += buf.shape[0]
        self.chunks.append(buf)

    def finish(self):
        return jnp.asarray(np.concatenate(self.chunks, axis=0)), dict(self.off)


def _bdiag(m, g=GB):
    """Block-diagonal replication of a per-graph weight (built once, host)."""
    m = np.asarray(m, np.float32)
    k, n = m.shape
    out = np.zeros((g * k, g * n), np.float32)
    for i in range(g):
        out[i * k:(i + 1) * k, i * n:(i + 1) * n] = m
    return out


def _tile(v, g=GB):
    return np.tile(np.asarray(v, np.float32).reshape(1, -1), (1, g))


def pack_params(params):
    p = jax.tree_util.tree_map(np.asarray, params)
    pk = _SlabPacker()

    # ---- constant matrices (per-head sum, LN averaging, mask lane-expand) ----
    hs = (np.arange(HIDDEN)[:, None] // DK ==
          np.arange(HIDDEN)[None, :] // DK).astype(np.float32)
    pk.add("HS", _bdiag(hs))
    pk.add("AVG", _bdiag(np.full((HIDDEN, HIDDEN), 1.0 / HIDDEN, np.float32)))
    pk.add("EXPAND", _bdiag(np.ones((1, HIDDEN), np.float32)))

    # ---- in-kernel one-hot helpers (id lane-replicate + class pattern) -------
    # Padded pattern lanes are -1 so zero-padded id lanes never match.
    pk.add("SEL_A", _bdiag(np.ones((1, NUM_ATOM), np.float32)))
    pk.add("PAT_A", _tile(np.arange(NUM_ATOM, dtype=np.float32)), fill=-1.0)
    pk.add("SEL_B", _bdiag(np.ones((1, NUM_BOND), np.float32)))
    pk.add("PAT_B", _tile(np.arange(NUM_BOND, dtype=np.float32)), fill=-1.0)

    emb_h = np.zeros((LANES, LANES), np.float32)
    emb_h[:GB * NUM_ATOM] = _bdiag(p["emb_h"])
    pk.add("EMB_H", emb_h)
    emb_e = np.zeros((LANES, LANES), np.float32)
    emb_e[:GB * NUM_BOND] = _bdiag(p["emb_e"])
    pk.add("EMB_E", emb_e)
    pk.add("W_LAP", _bdiag(p["W_lap"]))
    pk.add("B_LAP", _tile(p["b_lap"]))

    scale = 1.0 / np.sqrt(DK)
    for l, lp in enumerate(p["layers"]):
        pre = f"L{l}_"
        pk.add(pre + "WQ", _bdiag(lp["Wq"] * scale))   # 1/sqrt(dk) folded here
        pk.add(pre + "WK", _bdiag(lp["Wk"]))
        pk.add(pre + "WV", _bdiag(lp["Wv"]))
        pk.add(pre + "WE", _bdiag(lp["We"]))
        pk.add(pre + "WOH", _bdiag(lp["Wo_h"]))
        pk.add(pre + "BOH", _tile(lp["bo_h"]))
        pk.add(pre + "WOE", _bdiag(lp["Wo_e"]))
        pk.add(pre + "BOE", _tile(lp["bo_e"]))
        for nm in ("ln1_h_g", "ln1_h_b", "ln1_e_g", "ln1_e_b",
                   "ln2_h_g", "ln2_h_b", "ln2_e_g", "ln2_e_b"):
            pk.add(pre + nm.upper(), _tile(lp[nm]))
        for s in ("h", "e"):
            w1 = _bdiag(lp[f"W1_{s}"])        # [128, 256] -> two 128-lane halves
            b1 = _tile(lp[f"b1_{s}"])         # [1, 256]
            w2 = _bdiag(lp[f"W2_{s}"])        # [256, 128] -> two 128-row halves
            su = s.upper()
            pk.add(pre + f"W1{su}A", w1[:, :LANES])
            pk.add(pre + f"W1{su}B", w1[:, LANES:])
            pk.add(pre + f"B1{su}A", b1[:, :LANES])
            pk.add(pre + f"B1{su}B", b1[:, LANES:])
            pk.add(pre + f"W2{su}A", w2[:LANES, :])
            pk.add(pre + f"W2{su}B", w2[LANES:, :])
            pk.add(pre + f"B2{su}", _tile(lp[f"b2_{s}"]))

    # ---- MLPReadout, packed so every matmul stays 128 lanes wide and the last
    # weight puts graph g's scalar prediction at output lane g (lane-dense) ----
    w0 = np.zeros((LANES, LANES), np.float32)
    w0[:, :GB * (HIDDEN // 2)] = _bdiag(p["mlp_w0"])
    pk.add("MLP_W0", w0)
    pk.add("MLP_B0", _tile(p["mlp_b0"]))
    w1 = np.zeros((LANES, LANES), np.float32)
    w1[:GB * (HIDDEN // 2), :GB * (HIDDEN // 4)] = _bdiag(p["mlp_w1"])
    pk.add("MLP_W1", w1)
    pk.add("MLP_B1", _tile(p["mlp_b1"]))
    w2 = np.zeros((LANES, LANES), np.float32)
    w2[:GB * (HIDDEN // 4), :GB] = _bdiag(p["mlp_w2"])
    pk.add("MLP_W2", w2)
    b2 = np.zeros((1, LANES), np.float32)
    b2[0, :GB] = p["mlp_b2"][0, 0]
    pk.add("MLP_B2", b2)

    return pk.finish()


# ----------------------------- fused kernel -----------------------------------
def _fused_kernel(slab_ref, atom_ref, bond_ref, adj_ref, lap_ref, out_ref, *, off):
    n = N_NODES
    f32 = jnp.float32

    def mat(name, rows=LANES):
        o = off[name]
        return slab_ref[o:o + rows, :]

    def vec(name):
        o = off[name]
        return slab_ref[o:o + 1, :]

    def mm(a, b):
        # TODO(synk): cast operands to bf16 (keeping f32 accumulation) once the
        # MXU becomes a real fraction of the kernel on v6e/v7x.
        return jnp.dot(a, b, preferred_element_type=f32)

    def ln(x, gname, bname):
        # Per-(node, graph) LayerNorm over each 32-lane graph group; the
        # block-diagonal averaging matrix keeps the stats on the MXU and
        # avoids segmented lane reductions.
        avg = mat("AVG")
        mu = mm(x, avg)
        xc = x - mu
        var = mm(xc * xc, avg)
        return xc * lax.rsqrt(var + 1e-5) * vec(gname) + vec(bname)

    def one_hot(ids_f, sel, pat):
        rep = mm(ids_f, mat(sel, GB))                 # replicate id into its slots
        return (rep == vec(pat)).astype(f32)          # exact small-int compare

    # ------------------------------ embeddings --------------------------------
    atom_f = atom_ref[0].astype(f32)                  # [n, GB]
    bond_f = bond_ref[0].astype(f32)                  # [n*n, GB]
    adj_f = adj_ref[0].astype(f32)                    # [n*n, GB]  exact 0/1
    lap = lap_ref[0]                                  # [n, GB*POS_ENC]

    h = mm(one_hot(atom_f, "SEL_A", "PAT_A"), mat("EMB_H"))           # [n, 128]
    h = h + mm(lap, mat("W_LAP", GB * POS_ENC)) + vec("B_LAP")
    e = mm(one_hot(bond_f, "SEL_B", "PAT_B"), mat("EMB_E"))           # [n*n, 128]

    # 0/1 mask expanded once to all 32 lanes of each graph group (tiny matmul),
    # reused by both layers -- no per-layer re-broadcast.
    mask_d = mm(adj_f, mat("EXPAND", GB))                             # [n*n, 128]

    for l in range(N_LAYERS):                         # static 2-layer unroll
        pre = f"L{l}_"
        h_in, e_in = h, e

        q = mm(h, mat(pre + "WQ"))                    # scale pre-folded into WQ
        k = mm(h, mat(pre + "WK"))
        v = mm(h, mat(pre + "WV"))
        pe = mm(e, mat(pre + "WE"))                   # [n*n, 128]

        # score[s*n+d, g*hid+c] = K[g,s,c] * Q[g,d,c] * proj_e[g,s,d,c]
        k_b = jnp.broadcast_to(k[:, None, :], (n, n, LANES)).reshape(n * n, LANES)
        q_b = jnp.broadcast_to(q[None, :, :], (n, n, LANES)).reshape(n * n, LANES)
        score = k_b * q_b * pe                        # lane-dense; also e_out

        # per-head channel sum broadcast back to the head's lanes (block-diag)
        logit = mm(score, mat("HS"))
        attn = jnp.exp(jnp.clip(logit, -5.0, 5.0)) * mask_d

        v_b = jnp.broadcast_to(v[:, None, :], (n, n, LANES)).reshape(n * n, LANES)
        wv = jnp.sum((attn * v_b).reshape(n, n, LANES), axis=0)       # sum over src
        z = jnp.sum(attn.reshape(n, n, LANES), axis=0)
        h_att = wv * pl.reciprocal(z + 1e-6, approx=True)             # EUP recip

        h1 = mm(h_att, mat(pre + "WOH")) + vec(pre + "BOH")
        e1 = mm(score, mat(pre + "WOE")) + vec(pre + "BOE")
        h1 = ln(h1 + h_in, pre + "LN1_H_G", pre + "LN1_H_B")
        e1 = ln(e1 + e_in, pre + "LN1_E_G", pre + "LN1_E_B")

        # FFNs (2*hid hidden -> two 128-lane halves to keep lane-dense tiles)
        ha = jnp.maximum(mm(h1, mat(pre + "W1HA")) + vec(pre + "B1HA"), 0.0)
        hb = jnp.maximum(mm(h1, mat(pre + "W1HB")) + vec(pre + "B1HB"), 0.0)
        h2 = mm(ha, mat(pre + "W2HA")) + mm(hb, mat(pre + "W2HB")) + vec(pre + "B2H")
        ea = jnp.maximum(mm(e1, mat(pre + "W1EA")) + vec(pre + "B1EA"), 0.0)
        eb = jnp.maximum(mm(e1, mat(pre + "W1EB")) + vec(pre + "B1EB"), 0.0)
        e2 = mm(ea, mat(pre + "W2EA")) + mm(eb, mat(pre + "W2EB")) + vec(pre + "B2E")

        h = ln(h2 + h1, pre + "LN2_H_G", pre + "LN2_H_B")
        e = ln(e2 + e1, pre + "LN2_E_G", pre + "LN2_E_B")

    # mean readout over nodes (per lane group == per graph) + MLPReadout
    hg = jnp.mean(h, axis=0, keepdims=True)                           # [1, 128]
    y = jnp.maximum(mm(hg, mat("MLP_W0")) + vec("MLP_B0"), 0.0)
    y = jnp.maximum(mm(y, mat("MLP_W1")) + vec("MLP_B1"), 0.0)
    y = mm(y, mat("MLP_W2")) + vec("MLP_B2")          # graph g's pred at lane g
    out_ref[0] = y                                    # lane-dense [1,128] store


# ------------------------------- wrapper ---------------------------------------
def build_forward(offsets):
    kernel = functools.partial(_fused_kernel, off=offsets)
    n2 = N_NODES * N_NODES

    def fwd(slab, atom_ids, bond_ids, adj, lap):
        rows = slab.shape[0]
        out = pl.pallas_call(
            kernel,
            out_shape=jax.ShapeDtypeStruct((NB, 1, LANES), jnp.float32),
            grid=(NB,),
            in_specs=[
                # single parameter slab; constant block index -> fetched once
                pl.BlockSpec((rows, LANES), lambda b: (0, 0)),
                pl.BlockSpec((1, N_NODES, GB), lambda b: (b, 0, 0)),
                pl.BlockSpec((1, n2, GB), lambda b: (b, 0, 0)),
                pl.BlockSpec((1, n2, GB), lambda b: (b, 0, 0)),
                pl.BlockSpec((1, N_NODES, GB * POS_ENC), lambda b: (b, 0, 0)),
            ],
            out_specs=pl.BlockSpec((1, 1, LANES), lambda b: (b, 0, 0)),
            compiler_params=pltpu.CompilerParams(
                dimension_semantics=("parallel",),        # 2 TCs on v7x
                vmem_limit_bytes=32 * 1024 * 1024),
        )(slab, atom_ids, bond_ids, adj, lap)
        # graph (b, g)'s prediction sits at lane g of block b
        return out[:, 0, :GB].reshape(BATCH, 1)

    return jax.jit(fwd)


# ----------------------------- parameter init ----------------------------------
def init_params(key):
    keys = iter(jax.random.split(key, 256))

    def dense(shape, scale=0.1):
        return scale * jax.random.normal(next(keys), shape, jnp.float32)

    def ones_p(shape):
        return jnp.ones(shape, jnp.float32) + dense(shape, 0.1)

    params = {
        "emb_h": dense((NUM_ATOM, HIDDEN)),
        "emb_e": dense((NUM_BOND, HIDDEN)),
        "W_lap": dense((POS_ENC, HIDDEN)),
        "b_lap": dense((1, HIDDEN), 0.05),
        "layers": [],
        "mlp_w0": dense((HIDDEN, HIDDEN // 2)),
        "mlp_b0": dense((1, HIDDEN // 2), 0.05),
        "mlp_w1": dense((HIDDEN // 2, HIDDEN // 4)),
        "mlp_b1": dense((1, HIDDEN // 4), 0.05),
        "mlp_w2": dense((HIDDEN // 4, 1)),
        "mlp_b2": dense((1, 1), 0.05),
    }
    for _ in range(N_LAYERS):
        lp = {
            "Wq": dense((HIDDEN, HIDDEN)),           # use_bias=False in reference
            "Wk": dense((HIDDEN, HIDDEN)),
            "Wv": dense((HIDDEN, HIDDEN)),
            "We": dense((HIDDEN, HIDDEN)),
            "Wo_h": dense((HIDDEN, HIDDEN)), "bo_h": dense((1, HIDDEN), 0.05),
            "Wo_e": dense((HIDDEN, HIDDEN)), "bo_e": dense((1, HIDDEN), 0.05),
            "ln1_h_g": ones_p((1, HIDDEN)), "ln1_h_b": dense((1, HIDDEN), 0.05),
            "ln1_e_g": ones_p((1, HIDDEN)), "ln1_e_b": dense((1, HIDDEN), 0.05),
            "W1_h": dense((HIDDEN, 2 * HIDDEN)), "b1_h": dense((1, 2 * HIDDEN), 0.05),
            "W2_h": dense((2 * HIDDEN, HIDDEN)), "b2_h": dense((1, HIDDEN), 0.05),
            "W1_e": dense((HIDDEN, 2 * HIDDEN)), "b1_e": dense((1, 2 * HIDDEN), 0.05),
            "W2_e": dense((2 * HIDDEN, HIDDEN)), "b2_e": dense((1, HIDDEN), 0.05),
            "ln2_h_g": ones_p((1, HIDDEN)), "ln2_h_b": dense((1, HIDDEN), 0.05),
            "ln2_e_g": ones_p((1, HIDDEN)), "ln2_e_b": dense((1, HIDDEN), 0.05),
        }
        params["layers"].append(lp)
    return params


# -------------------------- pure-JAX reference ----------------------------------
def _ref_ln(x, gamma, beta, eps=1e-5):
    mu = jnp.mean(x, axis=-1, keepdims=True)
    xc = x - mu
    var = jnp.mean(xc * xc, axis=-1, keepdims=True)
    return xc * lax.rsqrt(var + eps) * gamma + beta


def _ref_layer(h, e, mask, lp):
    n = N_NODES
    scale = 1.0 / (DK ** 0.5)
    q = h @ lp["Wq"]
    k = h @ lp["Wk"]
    v = h @ lp["Wv"]
    pe = (e @ lp["We"]).reshape(n, n, HIDDEN)
    score = (k[:, None, :] * q[None, :, :]) * pe * scale            # [s, d, c]
    e_att = score.reshape(n * n, HIDDEN)
    logit = score.reshape(n, n, HEADS, DK).sum(-1, keepdims=True)
    logit = jnp.broadcast_to(logit, (n, n, HEADS, DK)).reshape(n, n, HIDDEN)
    attn = jnp.exp(jnp.clip(logit, -5.0, 5.0)) * mask[:, :, None]
    wv = jnp.sum(attn * v[:, None, :], axis=0)
    z = jnp.sum(attn, axis=0)
    h_att = wv / (z + 1e-6)
    h1 = h_att @ lp["Wo_h"] + lp["bo_h"]
    e1 = e_att @ lp["Wo_e"] + lp["bo_e"]
    h1 = _ref_ln(h1 + h, lp["ln1_h_g"], lp["ln1_h_b"])
    e1 = _ref_ln(e1 + e, lp["ln1_e_g"], lp["ln1_e_b"])
    h2 = jnp.maximum(h1 @ lp["W1_h"] + lp["b1_h"], 0.0) @ lp["W2_h"] + lp["b2_h"]
    e2 = jnp.maximum(e1 @ lp["W1_e"] + lp["b1_e"], 0.0) @ lp["W2_e"] + lp["b2_e"]
    h_out = _ref_ln(h2 + h1, lp["ln2_h_g"], lp["ln2_h_b"])
    e_out = _ref_ln(e2 + e1, lp["ln2_e_g"], lp["ln2_e_b"])
    return h_out, e_out


def _ref_forward(params, atom_g, bond_g, adj_g, lap_g):
    h = params["emb_h"][atom_g]
    h = h + lap_g @ params["W_lap"] + params["b_lap"]
    e = params["emb_e"][bond_g.reshape(-1)]
    mask = adj_g.astype(jnp.float32)
    for lp in params["layers"]:
        h, e = _ref_layer(h, e, mask, lp)
    hg = jnp.mean(h, axis=0, keepdims=True)
    y = jnp.maximum(hg @ params["mlp_w0"] + params["mlp_b0"], 0.0)
    y = jnp.maximum(y @ params["mlp_w1"] + params["mlp_b1"], 0.0)
    y = y @ params["mlp_w2"] + params["mlp_b2"]
    return y[0]


# ----------------------------------- main ----------------------------------------
if __name__ == "__main__":
    key = jax.random.PRNGKey(0)
    k_par, k_atom, k_bond, k_adj, k_lap = jax.random.split(key, 5)
    n, n2 = N_NODES, N_NODES * N_NODES

    params = init_params(k_par)
    slab, offsets = pack_params(params)
    fwd = build_forward(offsets)

    # TODO(synk): DGL ragged batched graphs (variable node counts) would need
    # per-graph node counts + masked readout; fixed 16-node dense graphs here.
    atom_ids = jax.random.randint(k_atom, (NB, n, GB), 0, NUM_ATOM, jnp.int32)
    bond4 = jax.random.randint(k_bond, (NB, n, n, GB), 0, NUM_BOND, jnp.int32)
    adj4 = jax.random.uniform(k_adj, (NB, n, n, GB)) < 0.3
    # self loops keep the softmax denominator z >= exp(-5) (invariant)
    adj4 = jnp.logical_or(adj4, jnp.eye(n, dtype=bool)[None, :, :, None])
    lap4 = jax.random.normal(k_lap, (NB, n, GB, POS_ENC), jnp.float32)

    bond_ids = bond4.reshape(NB, n2, GB)
    adj = adj4.reshape(NB, n2, GB).astype(jnp.int32)      # exact 0/1
    lap = lap4.reshape(NB, n, GB * POS_ENC)

    out = fwd(slab, atom_ids, bond_ids, adj, lap)
    out = jax.block_until_ready(out)
    assert out.shape == (BATCH, 1) and bool(jnp.isfinite(out).all())

    # pure-JAX reference; graph index = block*GB + lane-group g
    atom_pg = atom_ids.transpose(0, 2, 1).reshape(BATCH, n)
    bond_pg = bond4.transpose(0, 3, 1, 2).reshape(BATCH, n, n)
    adj_pg = adj4.transpose(0, 3, 1, 2).reshape(BATCH, n, n)
    lap_pg = lap4.transpose(0, 2, 1, 3).reshape(BATCH, n, POS_ENC)
    ref = jax.jit(jax.vmap(_ref_forward, in_axes=(None, 0, 0, 0, 0)))(
        params, atom_pg, bond_pg, adj_pg, lap_pg)
    ref = jax.block_until_ready(ref)
    err = float(jnp.max(jnp.abs(out - ref)))
    # loose tolerance: kernel uses pl.reciprocal(approx=True) for 1/z
    assert err < 5e-2, f"kernel/reference mismatch: {err}"

    print("KERNEL_OK")
</pallas_src>

<mosaic_0001>
module attributes {stable_mosaic.version = 11 : i64} {
  func.func @_fused_kernel(%arg0: i32, %arg1: memref<4840x128xf32, #tpu.memory_space<vmem>>, %arg2: memref<1x16x4xi32, #tpu.memory_space<vmem>>, %arg3: memref<1x256x4xi32, #tpu.memory_space<vmem>>, %arg4: memref<1x256x4xi32, #tpu.memory_space<vmem>>, %arg5: memref<1x16x32xf32, #tpu.memory_space<vmem>>, %arg6: memref<1x1x128xf32, #tpu.memory_space<vmem>>) attributes {dimension_semantics = [#tpu.dimension_semantics<parallel>], iteration_bounds = array<i64: 2>, scalar_prefetch = 0 : i64, scratch_operands = 0 : i64, tpu.core_type = #tpu.core_type<tc>, window_params = [{pipeline_mode = #tpu.pipeline_mode<synchronous>, transform_indices = @transform_0, window_bounds = array<i64: 4840, 128>}, {transform_indices = @transform_1, window_bounds = array<i64: 1, 16, 4>}, {transform_indices = @transform_2, window_bounds = array<i64: 1, 256, 4>}, {transform_indices = @transform_3, window_bounds = array<i64: 1, 256, 4>}, {transform_indices = @transform_4, window_bounds = array<i64: 1, 16, 32>}, {transform_indices = @transform_5, window_bounds = array<i64: 1, 1, 128>}]} {
    %c0 = arith.constant 0 : index
    %c0_0 = arith.constant 0 : index
    %c0_1 = arith.constant 0 : index
    %0 = vector.load %arg2[%c0, %c0_0, %c0_1] : memref<1x16x4xi32, #tpu.memory_space<vmem>>, vector<1x16x4xi32>
    %1 = vector.shape_cast %0 : vector<1x16x4xi32> to vector<16x4xi32>
    %2 = arith.sitofp %1 : vector<16x4xi32> to vector<16x4xf32>
    %c0_2 = arith.constant 0 : index
    %c0_3 = arith.constant 0 : index
    %c0_4 = arith.constant 0 : index
    %3 = vector.load %arg3[%c0_2, %c0_3, %c0_4] : memref<1x256x4xi32, #tpu.memory_space<vmem>>, vector<1x256x4xi32>
    %4 = vector.shape_cast %3 : vector<1x256x4xi32> to vector<256x4xi32>
    %5 = arith.sitofp %4 : vector<256x4xi32> to vector<256x4xf32>
    %c0_5 = arith.constant 0 : index
    %c0_6 = arith.constant 0 : index
    %c0_7 = arith.constant 0 : index
    %6 = vector.load %arg4[%c0_5, %c0_6, %c0_7] : memref<1x256x4xi32, #tpu.memory_space<vmem>>, vector<1x256x4xi32>
    %7 = vector.shape_cast %6 : vector<1x256x4xi32> to vector<256x4xi32>
    %8 = arith.sitofp %7 : vector<256x4xi32> to vector<256x4xf32>
    %c0_8 = arith.constant 0 : index
    %c0_9 = arith.constant 0 : index
    %c0_10 = arith.constant 0 : index
    %9 = vector.load %arg5[%c0_8, %c0_9, %c0_10] : memref<1x16x32xf32, #tpu.memory_space<vmem>>, vector<1x16x32xf32>
    %10 = vector.shape_cast %9 : vector<1x16x32xf32> to vector<16x32xf32>
    %c264 = arith.constant 264 : index
    %c0_11 = arith.constant 0 : index
    %11 = vector.load %arg1[%c264, %c0_11] : memref<4840x128xf32, #tpu.memory_space<vmem>>, vector<4x128xf32>
    %cst = arith.constant dense<0.000000e+00> : vector<16x128xf32>
    %12 = tpu.matmul %2, %11, %cst {dimension_numbers = #tpu.dot_dimension_numbers<[1], [0], [0], [1], [0, 0, 1, 1], [], []>} : vector<16x4xf32>, vector<4x128xf32>, vector<16x128xf32> -> vector<16x128xf32>
    %c272 = arith.constant 272 : index
    %c0_12 = arith.constant 0 : index
    %13 = vector.load %arg1[%c272, %c0_12] : memref<4840x128xf32, #tpu.memory_space<vmem>>, vector<1x128xf32>
    %14 = vector.broadcast %13 : vector<1x128xf32> to vector<16x128xf32>
    %15 = arith.cmpf oeq, %12, %14 : vector<16x128xf32>
    %16 = arith.extui %15 : vector<16x128xi1> to vector<16x128xi32>
    %17 = arith.sitofp %16 : vector<16x128xi32> to vector<16x128xf32>
    %c296 = arith.constant 296 : index
    %c0_13 = arith.constant 0 : index
    %18 = vector.load %arg1[%c296, %c0_13] : memref<4840x128xf32, #tpu.memory_space<vmem>>, vector<128x128xf32>
    %cst_14 = arith.constant dense<0.000000e+00> : vector<16x128xf32>
    %19 = tpu.matmul %17, %18, %cst_14 {dimension_numbers = #tpu.dot_dimension_numbers<[1], [0], [0], [1], [0, 0, 1, 1], [], []>} : vector<16x128xf32>, vector<128x128xf32>, vector<16x128xf32> -> vector<16x128xf32>
    %c552 = arith.constant 552 : index
    %c0_15 = arith.constant 0 : index
    %20 = vector.load %arg1[%c552, %c0_15] : memref<4840x128xf32, #tpu.memory_space<vmem>>, vector<32x128xf32>
    %cst_16 = arith.constant dense<0.000000e+00> : vector<16x128xf32>
    %21 = tpu.matmul %10, %20, %cst_16 {dimension_numbers = #tpu.dot_dimension_numbers<[1], [0], [0], [1], [0, 0, 1, 1], [], []>} : vector<16x32xf32>, vector<32x128xf32>, vector<16x128xf32> -> vector<16x128xf32>
    %22 = arith.addf %19, %21 : vector<16x128xf32>
    %c584 = arith.constant 584 : index
    %c0_17 = arith.constant 0 : index
    %23 = vector.load %arg1[%c584, %c0_17] : memref<4840x128xf32, #tpu.memory_space<vmem>>, vector<1x128xf32>
    %24 = vector.broadcast %23 : vector<1x128xf32> to vector<16x128xf32>
    %25 = arith.addf %22, %24 : vector<16x128xf32>
    %c280 = arith.constant 280 : index
    %c0_18 = arith.constant 0 : index
    %26 = vector.load %arg1[%c280, %c0_18] : memref<4840x128xf32, #tpu.memory_space<vmem>>, vector<4x128xf32>
    %cst_19 = arith.constant dense<0.000000e+00> : vector<256x128xf32>
    %27 = tpu.matmul %5, %26, %cst_19 {dimension_numbers = #tpu.dot_dimension_numbers<[1], [0], [0], [1], [0, 0, 1, 1], [], []>} : vector<256x4xf32>, vector<4x128xf32>, vector<256x128xf32> -> vector<256x128xf32>
    %c288 = arith.constant 288 : index
    %c0_20 = arith.constant 0 : index
    %28 = vector.load %arg1[%c288, %c0_20] : memref<4840x128xf32, #tpu.memory_space<vmem>>, vector<1x128xf32>
    %29 = vector.broadcast %28 : vector<1x128xf32> to vector<256x128xf32>
    %30 = arith.cmpf oeq, %27, %29 : vector<256x128xf32>
    %31 = arith.extui %30 : vector<256x128xi1> to vector<256x128xi32>
    %32 = arith.sitofp %31 : vector<256x128xi32> to vector<256x128xf32>
    %c424 = arith.constant 424 : index
    %c0_21 = arith.constant 0 : index
    %33 = vector.load %arg1[%c424, %c0_21] : memref<4840x128xf32, #tpu.memory_space<vmem>>, vector<128x128xf32>
    %cst_22 = arith.constant dense<0.000000e+00> : vector<256x128xf32>
    %34 = tpu.matmul %32, %33, %cst_22 {dimension_numbers = #tpu.dot_dimension_numbers<[1], [0], [0], [1], [0, 0, 1, 1], [], []>} : vector<256x128xf32>, vector<128x128xf32>, vector<256x128xf32> -> vector<256x128xf32>
    %c256 = arith.constant 256 : index
    %c0_23 = arith.constant 0 : index
    %35 = vector.load %arg1[%c256, %c0_23] : memref<4840x128xf32, #tpu.memory_space<vmem>>, vector<4x128xf32>
    %cst_24 = arith.constant dense<0.000000e+00> : vector<256x128xf32>
    %36 = tpu.matmul %8, %35, %cst_24 {dimension_numbers = #tpu.dot_dimension_numbers<[1], [0], [0], [1], [0, 0, 1, 1], [], []>} : vector<256x4xf32>, vector<4x128xf32>, vector<256x128xf32> -> vector<256x128xf32>
    %c592 = arith.constant 592 : index
    %c0_25 = arith.constant 0 : index
    %37 = vector.load %arg1[%c592, %c0_25] : memref<4840x128xf32, #tpu.memory_space<vmem>>, vector<128x128xf32>
    %cst_26 = arith.constant dense<0.000000e+00> : vector<16x128xf32>
    %38 = tpu.matmul %25, %37, %cst_26 {dimension_numbers = #tpu.dot_dimension_numbers<[1], [0], [0], [1], [0, 0, 1, 1], [], []>} : vector<16x128xf32>, vector<128x128xf32>, vector<16x128xf32> -> vector<16x128xf32>
    %c720 = arith.constant 720 : index
    %c0_27 = arith.constant 0 : index
    %39 = vector.load %arg1[%c720, %c0_27] : memref<4840x128xf32, #tpu.memory_space<vmem>>, vector<128x128xf32>
    %cst_28 = arith.constant dense<0.000000e+00> : vector<16x128xf32>
    %40 = tpu.matmul %25, %39, %cst_28 {dimension_numbers = #tpu.dot_dimension_numbers<[1], [0], [0], [1], [0, 0, 1, 1], [], []>} : vector<16x128xf32>, vector<128x128xf32>, vector<16x128xf32> -> vector<16x128xf32>
    %c848 = arith.constant 848 : index
    %c0_29 = arith.constant 0 : index
    %41 = vector.load %arg1[%c848, %c0_29] : memref<4840x128xf32, #tpu.memory_space<vmem>>, vector<128x128xf32>
    %cst_30 = arith.constant dense<0.000000e+00> : vector<16x128xf32>
    %42 = tpu.matmul %25, %41, %cst_30 {dimension_numbers = #tpu.dot_dimension_numbers<[1], [0], [0], [1], [0, 0, 1, 1], [], []>} : vector<16x128xf32>, vector<128x128xf32>, vector<16x128xf32> -> vector<16x128xf32>
    %c976 = arith.constant 976 : index
    %c0_31 = arith.constant 0 : index
    %43 = vector.load %arg1[%c976, %c0_31] : memref<4840x128xf32, #tpu.memory_space<vmem>>, vector<128x128xf32>
    %cst_32 = arith.constant dense<0.000000e+00> : vector<256x128xf32>
    %44 = tpu.matmul %34, %43, %cst_32 {dimension_numbers = #tpu.dot_dimension_numbers<[1], [0], [0], [1], [0, 0, 1, 1], [], []>} : vector<256x128xf32>, vector<128x128xf32>, vector<256x128xf32> -> vector<256x128xf32>
    %45 = vector.shape_cast %40 : vector<16x128xf32> to vector<16x1x128xf32>
    %46 = vector.shape_cast %45 : vector<16x1x128xf32> to vector<16x1x128xf32>
    %47 = vector.broadcast %46 : vector<16x1x128xf32> to vector<16x16x128xf32>
    %48 = vector.shape_cast %47 : vector<16x16x128xf32> to vector<256x128xf32>
    %49 = vector.shape_cast %38 : vector<16x128xf32> to vector<1x16x128xf32>
    %50 = vector.shape_cast %49 : vector<1x16x128xf32> to vector<1x16x128xf32>
    %51 = vector.broadcast %50 : vector<1x16x128xf32> to vector<16x16x128xf32>
    %52 = vector.shape_cast %51 : vector<16x16x128xf32> to vector<256x128xf32>
    %53 = arith.mulf %48, %52 : vector<256x128xf32>
    %54 = arith.mulf %53, %44 : vector<256x128xf32>
    %c0_33 = arith.constant 0 : index
    %c0_34 = arith.constant 0 : index
    %55 = vector.load %arg1[%c0_33, %c0_34] : memref<4840x128xf32, #tpu.memory_space<vmem>>, vector<128x128xf32>
    %cst_35 = arith.constant dense<0.000000e+00> : vector<256x128xf32>
    %56 = tpu.matmul %54, %55, %cst_35 {dimension_numbers = #tpu.dot_dimension_numbers<[1], [0], [0], [1], [0, 0, 1, 1], [], []>} : vector<256x128xf32>, vector<128x128xf32>, vector<256x128xf32> -> vector<256x128xf32>
    %cst_36 = arith.constant -5.000000e+00 : f32
    %cst_37 = arith.constant 5.000000e+00 : f32
    %57 = vector.broadcast %cst_36 : f32 to vector<256x128xf32>
    %58 = arith.maximumf %57, %56 : vector<256x128xf32>
    %59 = vector.broadcast %cst_37 : f32 to vector<256x128xf32>
    %60 = arith.minimumf %59, %58 : vector<256x128xf32>
    %61 = math.exp %60 : vector<256x128xf32>
    %62 = arith.mulf %61, %36 : vector<256x128xf32>
    %63 = vector.shape_cast %42 : vector<16x128xf32> to vector<16x1x128xf32>
    %64 = vector.shape_cast %63 : vector<16x1x128xf32> to vector<16x1x128xf32>
    %65 = vector.broadcast %64 : vector<16x1x128xf32> to vector<16x16x128xf32>
    %66 = vector.shape_cast %65 : vector<16x16x128xf32> to vector<256x128xf32>
    %67 = arith.mulf %62, %66 : vector<256x128xf32>
    %68 = vector.shape_cast %67 : vector<256x128xf32> to vector<16x16x128xf32>
    %cst_38 = arith.constant dense<0.000000e+00> : vector<16x128xf32>
    %69 = vector.multi_reduction <add>, %68, %cst_38 [0] : vector<16x16x128xf32> to vector<16x128xf32>
    %70 = vector.shape_cast %62 : vector<256x128xf32> to vector<16x16x128xf32>
    %cst_39 = arith.constant dense<0.000000e+00> : vector<16x128xf32>
    %71 = vector.multi_reduction <add>, %70, %cst_39 [0] : vector<16x16x128xf32> to vector<16x128xf32>
    %cst_40 = arith.constant 9.99999997E-7 : f32
    %72 = vector.broadcast %cst_40 : f32 to vector<16x128xf32>
    %73 = arith.addf %71, %72 : vector<16x128xf32>
    %74 = tpu.reciprocal %73 {approx = true} : vector<16x128xf32> -> vector<16x128xf32>
    %75 = arith.mulf %69, %74 : vector<16x128xf32>
    %c1104 = arith.constant 1104 : index
    %c0_41 = arith.constant 0 : index
    %76 = vector.load %arg1[%c1104, %c0_41] : memref<4840x128xf32, #tpu.memory_space<vmem>>, vector<128x128xf32>
    %cst_42 = arith.constant dense<0.000000e+00> : vector<16x128xf32>
    %77 = tpu.matmul %75, %76, %cst_42 {dimension_numbers = #tpu.dot_dimension_numbers<[1], [0], [0], [1], [0, 0, 1, 1], [], []>} : vector<16x128xf32>, vector<128x128xf32>, vector<16x128xf32> -> vector<16x128xf32>
    %c1232 = arith.constant 1232 : index
    %c0_43 = arith.constant 0 : index
    %78 = vector.load %arg1[%c1232, %c0_43] : memref<4840x128xf32, #tpu.memory_space<vmem>>, vector<1x128xf32>
    %79 = vector.broadcast %78 : vector<1x128xf32> to vector<16x128xf32>
    %80 = arith.addf %77, %79 : vector<16x128xf32>
    %c1240 = arith.constant 1240 : index
    %c0_44 = arith.constant 0 : index
    %81 = vector.load %arg1[%c1240, %c0_44] : memref<4840x128xf32, #tpu.memory_space<vmem>>, vector<128x128xf32>
    %cst_45 = arith.constant dense<0.000000e+00> : vector<256x128xf32>
    %82 = tpu.matmul %54, %81, %cst_45 {dimension_numbers = #tpu.dot_dimension_numbers<[1], [0], [0], [1], [0, 0, 1, 1], [], []>} : vector<256x128xf32>, vector<128x128xf32>, vector<256x128xf32> -> vector<256x128xf32>
    %c1368 = arith.constant 1368 : index
    %c0_46 = arith.constant 0 : index
    %83 = vector.load %arg1[%c1368, %c0_46] : memref<4840x128xf32, #tpu.memory_space<vmem>>, vector<1x128xf32>
    %84 = vector.broadcast %83 : vector<1x128xf32> to vector<256x128xf32>
    %85 = arith.addf %82, %84 : vector<256x128xf32>
    %86 = arith.addf %80, %25 : vector<16x128xf32>
    %c128 = arith.constant 128 : index
    %c0_47 = arith.constant 0 : index
    %87 = vector.load %arg1[%c128, %c0_47] : memref<4840x128xf32, #tpu.memory_space<vmem>>, vector<128x128xf32>
    %cst_48 = arith.constant dense<0.000000e+00> : vector<16x128xf32>
    %88 = tpu.matmul %86, %87, %cst_48 {dimension_numbers = #tpu.dot_dimension_numbers<[1], [0], [0], [1], [0, 0, 1, 1], [], []>} : vector<16x128xf32>, vector<128x128xf32>, vector<16x128xf32> -> vector<16x128xf32>
    %89 = arith.subf %86, %88 : vector<16x128xf32>
    %90 = arith.mulf %89, %89 : vector<16x128xf32>
    %cst_49 = arith.constant dense<0.000000e+00> : vector<16x128xf32>
    %91 = tpu.matmul %90, %87, %cst_49 {dimension_numbers = #tpu.dot_dimension_numbers<[1], [0], [0], [1], [0, 0, 1, 1], [], []>} : vector<16x128xf32>, vector<128x128xf32>, vector<16x128xf32> -> vector<16x128xf32>
    %cst_50 = arith.constant 9.99999974E-6 : f32
    %92 = vector.broadcast %cst_50 : f32 to vector<16x128xf32>
    %93 = arith.addf %91, %92 : vector<16x128xf32>
    %94 = math.rsqrt %93 : vector<16x128xf32>
    %95 = arith.mulf %89, %94 : vector<16x128xf32>
    %c1376 = arith.constant 1376 : index
    %c0_51 = arith.constant 0 : index
    %96 = vector.load %arg1[%c1376, %c0_51] : memref<4840x128xf32, #tpu.memory_space<vmem>>, vector<1x128xf32>
    %97 = vector.broadcast %96 : vector<1x128xf32> to vector<16x128xf32>
    %98 = arith.mulf %95, %97 : vector<16x128xf32>
    %c1384 = arith.constant 1384 : index
    %c0_52 = arith.constant 0 : index
    %99 = vector.load %arg1[%c1384, %c0_52] : memref<4840x128xf32, #tpu.memory_space<vmem>>, vector<1x128xf32>
    %100 = vector.broadcast %99 : vector<1x128xf32> to vector<16x128xf32>
    %101 = arith.addf %98, %100 : vector<16x128xf32>
    %102 = arith.addf %85, %34 : vector<256x128xf32>
    %c128_53 = arith.constant 128 : index
    %c0_54 = arith.constant 0 : index
    %103 = vector.load %arg1[%c128_53, %c0_54] : memref<4840x128xf32, #tpu.memory_space<vmem>>, vector<128x128xf32>
    %cst_55 = arith.constant dense<0.000000e+00> : vector<256x128xf32>
    %104 = tpu.matmul %102, %103, %cst_55 {dimension_numbers = #tpu.dot_dimension_numbers<[1], [0], [0], [1], [0, 0, 1, 1], [], []>} : vector<256x128xf32>, vector<128x128xf32>, vector<256x128xf32> -> vector<256x128xf32>
    %105 = arith.subf %102, %104 : vector<256x128xf32>
    %106 = arith.mulf %105, %105 : vector<256x128xf32>
    %cst_56 = arith.constant dense<0.000000e+00> : vector<256x128xf32>
    %107 = tpu.matmul %106, %103, %cst_56 {dimension_numbers = #tpu.dot_dimension_numbers<[1], [0], [0], [1], [0, 0, 1, 1], [], []>} : vector<256x128xf32>, vector<128x128xf32>, vector<256x128xf32> -> vector<256x128xf32>
    %cst_57 = arith.constant 9.99999974E-6 : f32
    %108 = vector.broadcast %cst_57 : f32 to vector<256x128xf32>
    %109 = arith.addf %107, %108 : vector<256x128xf32>
    %110 = math.rsqrt %109 : vector<256x128xf32>
    %111 = arith.mulf %105, %110 : vector<256x128xf32>
    %c1392 = arith.constant 1392 : index
    %c0_58 = arith.constant 0 : index
    %112 = vector.load %arg1[%c1392, %c0_58] : memref<4840x128xf32, #tpu.memory_space<vmem>>, vector<1x128xf32>
    %113 = vector.broadcast %112 : vector<1x128xf32> to vector<256x128xf32>
    %114 = arith.mulf %111, %113 : vector<256x128xf32>
    %c1400 = arith.constant 1400 : index
    %c0_59 = arith.constant 0 : index
    %115 = vector.load %arg1[%c1400, %c0_59] : memref<4840x128xf32, #tpu.memory_space<vmem>>, vector<1x128xf32>
    %116 = vector.broadcast %115 : vector<1x128xf32> to vector<256x128xf32>
    %117 = arith.addf %114, %116 : vector<256x128xf32>
    %c1440 = arith.constant 1440 : index
    %c0_60 = arith.constant 0 : index
    %118 = vector.load %arg1[%c1440, %c0_60] : memref<4840x128xf32, #tpu.memory_space<vmem>>, vector<128x128xf32>
    %cst_61 = arith.constant dense<0.000000e+00> : vector<16x128xf32>
    %119 = tpu.matmul %101, %118, %cst_61 {dimension_numbers = #tpu.dot_dimension_numbers<[1], [0], [0], [1], [0, 0, 1, 1], [], []>} : vector<16x128xf32>, vector<128x128xf32>, vector<16x128xf32> -> vector<16x128xf32>
    %c1696 = arith.constant 1696 : index
    %c0_62 = arith.constant 0 : index
    %120 = vector.load %arg1[%c1696, %c0_62] : memref<4840x128xf32, #tpu.memory_space<vmem>>, vector<1x128xf32>
    %121 = vector.broadcast %120 : vector<1x128xf32> to vector<16x128xf32>
    %122 = arith.addf %119, %121 : vector<16x128xf32>
    %cst_63 = arith.constant 0.000000e+00 : f32
    %123 = vector.broadcast %cst_63 : f32 to vector<16x128xf32>
    %124 = arith.maximumf %122, %123 : vector<16x128xf32>
    %c1568 = arith.constant 1568 : index
    %c0_64 = arith.constant 0 : index
    %125 = vector.load %arg1[%c1568, %c0_64] : memref<4840x128xf32, #tpu.memory_space<vmem>>, vector<128x128xf32>
    %cst_65 = arith.constant dense<0.000000e+00> : vector<16x128xf32>
    %126 = tpu.matmul %101, %125, %cst_65 {dimension_numbers = #tpu.dot_dimension_numbers<[1], [0], [0], [1], [0, 0, 1, 1], [], []>} : vector<16x128xf32>, vector<128x128xf32>, vector<16x128xf32> -> vector<16x128xf32>
    %c1704 = arith.constant 1704 : index
    %c0_66 = arith.constant 0 : index
    %127 = vector.load %arg1[%c1704, %c0_66] : memref<4840x128xf32, #tpu.memory_space<vmem>>, vector<1x128xf32>
    %128 = vector.broadcast %127 : vector<1x128xf32> to vector<16x128xf32>
    %129 = arith.addf %126, %128 : vector<16x128xf32>
    %cst_67 = arith.constant 0.000000e+00 : f32
    %130 = vector.broadcast %cst_67 : f32 to vector<16x128xf32>
    %131 = arith.maximumf %129, %130 : vector<16x128xf32>
    %c1712 = arith.constant 1712 : index
    %c0_68 = arith.constant 0 : index
    %132 = vector.load %arg1[%c1712, %c0_68] : memref<4840x128xf32, #tpu.memory_space<vmem>>, vector<128x128xf32>
    %cst_69 = arith.constant dense<0.000000e+00> : vector<16x128xf32>
    %133 = tpu.matmul %124, %132, %cst_69 {dimension_numbers = #tpu.dot_dimension_numbers<[1], [0], [0], [1], [0, 0, 1, 1], [], []>} : vector<16x128xf32>, vector<128x128xf32>, vector<16x128xf32> -> vector<16x128xf32>
    %c1840 = arith.constant 1840 : index
    %c0_70 = arith.constant 0 : index
    %134 = vector.load %arg1[%c1840, %c0_70] : memref<4840x128xf32, #tpu.memory_space<vmem>>, vector<128x128xf32>
    %cst_71 = arith.constant dense<0.000000e+00> : vector<16x128xf32>
    %135 = tpu.matmul %131, %134, %cst_71 {dimension_numbers = #tpu.dot_dimension_numbers<[1], [0], [0], [1], [0, 0, 1, 1], [], []>} : vector<16x128xf32>, vector<128x128xf32>, vector<16x128xf32> -> vector<16x128xf32>
    %136 = arith.addf %133, %135 : vector<16x128xf32>
    %c1968 = arith.constant 1968 : index
    %c0_72 = arith.constant 0 : index
    %137 = vector.load %arg1[%c1968, %c0_72] : memref<4840x128xf32, #tpu.memory_space<vmem>>, vector<1x128xf32>
    %138 = vector.broadcast %137 : vector<1x128xf32> to vector<16x128xf32>
    %139 = arith.addf %136, %138 : vector<16x128xf32>
    %c1976 = arith.constant 1976 : index
    %c0_73 = arith.constant 0 : index
    %140 = vector.load %arg1[%c1976, %c0_73] : memref<4840x128xf32, #tpu.memory_space<vmem>>, vector<128x128xf32>
    %cst_74 = arith.constant dense<0.000000e+00> : vector<256x128xf32>
    %141 = tpu.matmul %117, %140, %cst_74 {dimension_numbers = #tpu.dot_dimension_numbers<[1], [0], [0], [1], [0, 0, 1, 1], [], []>} : vector<256x128xf32>, vector<128x128xf32>, vector<256x128xf32> -> vector<256x128xf32>
    %c2232 = arith.constant 2232 : index
    %c0_75 = arith.constant 0 : index
    %142 = vector.load %arg1[%c2232, %c0_75] : memref<4840x128xf32, #tpu.memory_space<vmem>>, vector<1x128xf32>
    %143 = vector.broadcast %142 : vector<1x128xf32> to vector<256x128xf32>
    %144 = arith.addf %141, %143 : vector<256x128xf32>
    %cst_76 = arith.constant 0.000000e+00 : f32
    %145 = vector.broadcast %cst_76 : f32 to vector<256x128xf32>
    %146 = arith.maximumf %144, %145 : vector<256x128xf32>
    %c2104 = arith.constant 2104 : index
    %c0_77 = arith.constant 0 : index
    %147 = vector.load %arg1[%c2104, %c0_77] : memref<4840x128xf32, #tpu.memory_space<vmem>>, vector<128x128xf32>
    %cst_78 = arith.constant dense<0.000000e+00> : vector<256x128xf32>
    %148 = tpu.matmul %117, %147, %cst_78 {dimension_numbers = #tpu.dot_dimension_numbers<[1], [0], [0], [1], [0, 0, 1, 1], [], []>} : vector<256x128xf32>, vector<128x128xf32>, vector<256x128xf32> -> vector<256x128xf32>
    %c2240 = arith.constant 2240 : index
    %c0_79 = arith.constant 0 : index
    %149 = vector.load %arg1[%c2240, %c0_79] : memref<4840x128xf32, #tpu.memory_space<vmem>>, vector<1x128xf32>
    %150 = vector.broadcast %149 : vector<1x128xf32> to vector<256x128xf32>
    %151 = arith.addf %148, %150 : vector<256x128xf32>
    %cst_80 = arith.constant 0.000000e+00 : f32
    %152 = vector.broadcast %cst_80 : f32 to vector<256x128xf32>
    %153 = arith.maximumf %151, %152 : vector<256x128xf32>
    %c2248 = arith.constant 2248 : index
    %c0_81 = arith.constant 0 : index
    %154 = vector.load %arg1[%c2248, %c0_81] : memref<4840x128xf32, #tpu.memory_space<vmem>>, vector<128x128xf32>
    %cst_82 = arith.constant dense<0.000000e+00> : vector<256x128xf32>
    %155 = tpu.matmul %146, %154, %cst_82 {dimension_numbers = #tpu.dot_dimension_numbers<[1], [0], [0], [1], [0, 0, 1, 1], [], []>} : vector<256x128xf32>, vector<128x128xf32>, vector<256x128xf32> -> vector<256x128xf32>
    %c2376 = arith.constant 2376 : index
    %c0_83 = arith.constant 0 : index
    %156 = vector.load %arg1[%c2376, %c0_83] : memref<4840x128xf32, #tpu.memory_space<vmem>>, vector<128x128xf32>
    %cst_84 = arith.constant dense<0.000000e+00> : vector<256x128xf32>
    %157 = tpu.matmul %153, %156, %cst_84 {dimension_numbers = #tpu.dot_dimension_numbers<[1], [0], [0], [1], [0, 0, 1, 1], [], []>} : vector<256x128xf32>, vector<128x128xf32>, vector<256x128xf32> -> vector<256x128xf32>
    %158 = arith.addf %155, %157 : vector<256x128xf32>
    %c2504 = arith.constant 2504 : index
    %c0_85 = arith.constant 0 : index
    %159 = vector.load %arg1[%c2504, %c0_85] : memref<4840x128xf32, #tpu.memory_space<vmem>>, vector<1x128xf32>
    %160 = vector.broadcast %159 : vector<1x128xf32> to vector<256x128xf32>
    %161 = arith.addf %158, %160 : vector<256x128xf32>
    %162 = arith.addf %139, %101 : vector<16x128xf32>
    %c128_86 = arith.constant 128 : index
    %c0_87 = arith.constant 0 : index
    %163 = vector.load %arg1[%c128_86, %c0_87] : memref<4840x128xf32, #tpu.memory_space<vmem>>, vector<128x128xf32>
    %cst_88 = arith.constant dense<0.000000e+00> : vector<16x128xf32>
    %164 = tpu.matmul %162, %163, %cst_88 {dimension_numbers = #tpu.dot_dimension_numbers<[1], [0], [0], [1], [0, 0, 1, 1], [], []>} : vector<16x128xf32>, vector<128x128xf32>, vector<16x128xf32> -> vector<16x128xf32>
    %165 = arith.subf %162, %164 : vector<16x128xf32>
    %166 = arith.mulf %165, %165 : vector<16x128xf32>
    %cst_89 = arith.constant dense<0.000000e+00> : vector<16x128xf32>
    %167 = tpu.matmul %166, %163, %cst_89 {dimension_numbers = #tpu.dot_dimension_numbers<[1], [0], [0], [1], [0, 0, 1, 1], [], []>} : vector<16x128xf32>, vector<128x128xf32>, vector<16x128xf32> -> vector<16x128xf32>
    %cst_90 = arith.constant 9.99999974E-6 : f32
    %168 = vector.broadcast %cst_90 : f32 to vector<16x128xf32>
    %169 = arith.addf %167, %168 : vector<16x128xf32>
    %170 = math.rsqrt %169 : vector<16x128xf32>
    %171 = arith.mulf %165, %170 : vector<16x128xf32>
    %c1408 = arith.constant 1408 : index
    %c0_91 = arith.constant 0 : index
    %172 = vector.load %arg1[%c1408, %c0_91] : memref<4840x128xf32, #tpu.memory_space<vmem>>, vector<1x128xf32>
    %173 = vector.broadcast %172 : vector<1x128xf32> to vector<16x128xf32>
    %174 = arith.mulf %171, %173 : vector<16x128xf32>
    %c1416 = arith.constant 1416 : index
    %c0_92 = arith.constant 0 : index
    %175 = vector.load %arg1[%c1416, %c0_92] : memref<4840x128xf32, #tpu.memory_space<vmem>>, vector<1x128xf32>
    %176 = vector.broadcast %175 : vector<1x128xf32> to vector<16x128xf32>
    %177 = arith.addf %174, %176 : vector<16x128xf32>
    %178 = arith.addf %161, %117 : vector<256x128xf32>
    %c128_93 = arith.constant 128 : index
    %c0_94 = arith.constant 0 : index
    %179 = vector.load %arg1[%c128_93, %c0_94] : memref<4840x128xf32, #tpu.memory_space<vmem>>, vector<128x128xf32>
    %cst_95 = arith.constant dense<0.000000e+00> : vector<256x128xf32>
    %180 = tpu.matmul %178, %179, %cst_95 {dimension_numbers = #tpu.dot_dimension_numbers<[1], [0], [0], [1], [0, 0, 1, 1], [], []>} : vector<256x128xf32>, vector<128x128xf32>, vector<256x128xf32> -> vector<256x128xf32>
    %181 = arith.subf %178, %180 : vector<256x128xf32>
    %182 = arith.mulf %181, %181 : vector<256x128xf32>
    %cst_96 = arith.constant dense<0.000000e+00> : vector<256x128xf32>
    %183 = tpu.matmul %182, %179, %cst_96 {dimension_numbers = #tpu.dot_dimension_numbers<[1], [0], [0], [1], [0, 0, 1, 1], [], []>} : vector<256x128xf32>, vector<128x128xf32>, vector<256x128xf32> -> vector<256x128xf32>
    %cst_97 = arith.constant 9.99999974E-6 : f32
    %184 = vector.broadcast %cst_97 : f32 to vector<256x128xf32>
    %185 = arith.addf %183, %184 : vector<256x128xf32>
    %186 = math.rsqrt %185 : vector<256x128xf32>
    %187 = arith.mulf %181, %186 : vector<256x128xf32>
    %c1424 = arith.constant 1424 : index
    %c0_98 = arith.constant 0 : index
    %188 = vector.load %arg1[%c1424, %c0_98] : memref<4840x128xf32, #tpu.memory_space<vmem>>, vector<1x128xf32>
    %189 = vector.broadcast %188 : vector<1x128xf32> to vector<256x128xf32>
    %190 = arith.mulf %187, %189 : vector<256x128xf32>
    %c1432 = arith.constant 1432 : index
    %c0_99 = arith.constant 0 : index
    %191 = vector.load %arg1[%c1432, %c0_99] : memref<4840x128xf32, #tpu.memory_space<vmem>>, vector<1x128xf32>
    %192 = vector.broadcast %191 : vector<1x128xf32> to vector<256x128xf32>
    %193 = arith.addf %190, %192 : vector<256x128xf32>
    %c2512 = arith.constant 2512 : index
    %c0_100 = arith.constant 0 : index
    %194 = vector.load %arg1[%c2512, %c0_100] : memref<4840x128xf32, #tpu.memory_space<vmem>>, vector<128x128xf32>
    %cst_101 = arith.constant dense<0.000000e+00> : vector<16x128xf32>
    %195 = tpu.matmul %177, %194, %cst_101 {dimension_numbers = #tpu.dot_dimension_numbers<[1], [0], [0], [1], [0, 0, 1, 1], [], []>} : vector<16x128xf32>, vector<128x128xf32>, vector<16x128xf32> -> vector<16x128xf32>
    %c2640 = arith.constant 2640 : index
    %c0_102 = arith.constant 0 : index
    %196 = vector.load %arg1[%c2640, %c0_102] : memref<4840x128xf32, #tpu.memory_space<vmem>>, vector<128x128xf32>
    %cst_103 = arith.constant dense<0.000000e+00> : vector<16x128xf32>
    %197 = tpu.matmul %177, %196, %cst_103 {dimension_numbers = #tpu.dot_dimension_numbers<[1], [0], [0], [1], [0, 0, 1, 1], [], []>} : vector<16x128xf32>, vector<128x128xf32>, vector<16x128xf32> -> vector<16x128xf32>
    %c2768 = arith.constant 2768 : index
    %c0_104 = arith.constant 0 : index
    %198 = vector.load %arg1[%c2768, %c0_104] : memref<4840x128xf32, #tpu.memory_space<vmem>>, vector<128x128xf32>
    %cst_105 = arith.constant dense<0.000000e+00> : vector<16x128xf32>
    %199 = tpu.matmul %177, %198, %cst_105 {dimension_numbers = #tpu.dot_dimension_numbers<[1], [0], [0], [1], [0, 0, 1, 1], [], []>} : vector<16x128xf32>, vector<128x128xf32>, vector<16x128xf32> -> vector<16x128xf32>
    %c2896 = arith.constant 2896 : index
    %c0_106 = arith.constant 0 : index
    %200 = vector.load %arg1[%c2896, %c0_106] : memref<4840x128xf32, #tpu.memory_space<vmem>>, vector<128x128xf32>
    %cst_107 = arith.constant dense<0.000000e+00> : vector<256x128xf32>
    %201 = tpu.matmul %193, %200, %cst_107 {dimension_numbers = #tpu.dot_dimension_numbers<[1], [0], [0], [1], [0, 0, 1, 1], [], []>} : vector<256x128xf32>, vector<128x128xf32>, vector<256x128xf32> -> vector<256x128xf32>
    %202 = vector.shape_cast %197 : vector<16x128xf32> to vector<16x1x128xf32>
    %203 = vector.shape_cast %202 : vector<16x1x128xf32> to vector<16x1x128xf32>
    %204 = vector.broadcast %203 : vector<16x1x128xf32> to vector<16x16x128xf32>
    %205 = vector.shape_cast %204 : vector<16x16x128xf32> to vector<256x128xf32>
    %206 = vector.shape_cast %195 : vector<16x128xf32> to vector<1x16x128xf32>
    %207 = vector.shape_cast %206 : vector<1x16x128xf32> to vector<1x16x128xf32>
    %208 = vector.broadcast %207 : vector<1x16x128xf32> to vector<16x16x128xf32>
    %209 = vector.shape_cast %208 : vector<16x16x128xf32> to vector<256x128xf32>
    %210 = arith.mulf %205, %209 : vector<256x128xf32>
    %211 = arith.mulf %210, %201 : vector<256x128xf32>
    %c0_108 = arith.constant 0 : index
    %c0_109 = arith.constant 0 : index
    %212 = vector.load %arg1[%c0_108, %c0_109] : memref<4840x128xf32, #tpu.memory_space<vmem>>, vector<128x128xf32>
    %cst_110 = arith.constant dense<0.000000e+00> : vector<256x128xf32>
    %213 = tpu.matmul %211, %212, %cst_110 {dimension_numbers = #tpu.dot_dimension_numbers<[1], [0], [0], [1], [0, 0, 1, 1], [], []>} : vector<256x128xf32>, vector<128x128xf32>, vector<256x128xf32> -> vector<256x128xf32>
    %cst_111 = arith.constant -5.000000e+00 : f32
    %cst_112 = arith.constant 5.000000e+00 : f32
    %214 = vector.broadcast %cst_111 : f32 to vector<256x128xf32>
    %215 = arith.maximumf %214, %213 : vector<256x128xf32>
    %216 = vector.broadcast %cst_112 : f32 to vector<256x128xf32>
    %217 = arith.minimumf %216, %215 : vector<256x128xf32>
    %218 = math.exp %217 : vector<256x128xf32>
    %219 = arith.mulf %218, %36 : vector<256x128xf32>
    %220 = vector.shape_cast %199 : vector<16x128xf32> to vector<16x1x128xf32>
    %221 = vector.shape_cast %220 : vector<16x1x128xf32> to vector<16x1x128xf32>
    %222 = vector.broadcast %221 : vector<16x1x128xf32> to vector<16x16x128xf32>
    %223 = vector.shape_cast %222 : vector<16x16x128xf32> to vector<256x128xf32>
    %224 = arith.mulf %219, %223 : vector<256x128xf32>
    %225 = vector.shape_cast %224 : vector<256x128xf32> to vector<16x16x128xf32>
    %cst_113 = arith.constant dense<0.000000e+00> : vector<16x128xf32>
    %226 = vector.multi_reduction <add>, %225, %cst_113 [0] : vector<16x16x128xf32> to vector<16x128xf32>
    %227 = vector.shape_cast %219 : vector<256x128xf32> to vector<16x16x128xf32>
    %cst_114 = arith.constant dense<0.000000e+00> : vector<16x128xf32>
    %228 = vector.multi_reduction <add>, %227, %cst_114 [0] : vector<16x16x128xf32> to vector<16x128xf32>
    %cst_115 = arith.constant 9.99999997E-7 : f32
    %229 = vector.broadcast %cst_115 : f32 to vector<16x128xf32>
    %230 = arith.addf %228, %229 : vector<16x128xf32>
    %231 = tpu.reciprocal %230 {approx = true} : vector<16x128xf32> -> vector<16x128xf32>
    %232 = arith.mulf %226, %231 : vector<16x128xf32>
    %c3024 = arith.constant 3024 : index
    %c0_116 = arith.constant 0 : index
    %233 = vector.load %arg1[%c3024, %c0_116] : memref<4840x128xf32, #tpu.memory_space<vmem>>, vector<128x128xf32>
    %cst_117 = arith.constant dense<0.000000e+00> : vector<16x128xf32>
    %234 = tpu.matmul %232, %233, %cst_117 {dimension_numbers = #tpu.dot_dimension_numbers<[1], [0], [0], [1], [0, 0, 1, 1], [], []>} : vector<16x128xf32>, vector<128x128xf32>, vector<16x128xf32> -> vector<16x128xf32>
    %c3152 = arith.constant 3152 : index
    %c0_118 = arith.constant 0 : index
    %235 = vector.load %arg1[%c3152, %c0_118] : memref<4840x128xf32, #tpu.memory_space<vmem>>, vector<1x128xf32>
    %236 = vector.broadcast %235 : vector<1x128xf32> to vector<16x128xf32>
    %237 = arith.addf %234, %236 : vector<16x128xf32>
    %238 = arith.addf %237, %177 : vector<16x128xf32>
    %c128_119 = arith.constant 128 : index
    %c0_120 = arith.constant 0 : index
    %239 = vector.load %arg1[%c128_119, %c0_120] : memref<4840x128xf32, #tpu.memory_space<vmem>>, vector<128x128xf32>
    %cst_121 = arith.constant dense<0.000000e+00> : vector<16x128xf32>
    %240 = tpu.matmul %238, %239, %cst_121 {dimension_numbers = #tpu.dot_dimension_numbers<[1], [0], [0], [1], [0, 0, 1, 1], [], []>} : vector<16x128xf32>, vector<128x128xf32>, vector<16x128xf32> -> vector<16x128xf32>
    %241 = arith.subf %238, %240 : vector<16x128xf32>
    %242 = arith.mulf %241, %241 : vector<16x128xf32>
    %cst_122 = arith.constant dense<0.000000e+00> : vector<16x128xf32>
    %243 = tpu.matmul %242, %239, %cst_122 {dimension_numbers = #tpu.dot_dimension_numbers<[1], [0], [0], [1], [0, 0, 1, 1], [], []>} : vector<16x128xf32>, vector<128x128xf32>, vector<16x128xf32> -> vector<16x128xf32>
    %cst_123 = arith.constant 9.99999974E-6 : f32
    %244 = vector.broadcast %cst_123 : f32 to vector<16x128xf32>
    %245 = arith.addf %243, %244 : vector<16x128xf32>
    %246 = math.rsqrt %245 : vector<16x128xf32>
    %247 = arith.mulf %241, %246 : vector<16x128xf32>
    %c3296 = arith.constant 3296 : index
    %c0_124 = arith.constant 0 : index
    %248 = vector.load %arg1[%c3296, %c0_124] : memref<4840x128xf32, #tpu.memory_space<vmem>>, vector<1x128xf32>
    %249 = vector.broadcast %248 : vector<1x128xf32> to vector<16x128xf32>
    %250 = arith.mulf %247, %249 : vector<16x128xf32>
    %c3304 = arith.constant 3304 : index
    %c0_125 = arith.constant 0 : index
    %251 = vector.load %arg1[%c3304, %c0_125] : memref<4840x128xf32, #tpu.memory_space<vmem>>, vector<1x128xf32>
    %252 = vector.broadcast %251 : vector<1x128xf32> to vector<16x128xf32>
    %253 = arith.addf %250, %252 : vector<16x128xf32>
    %c3360 = arith.constant 3360 : index
    %c0_126 = arith.constant 0 : index
    %254 = vector.load %arg1[%c3360, %c0_126] : memref<4840x128xf32, #tpu.memory_space<vmem>>, vector<128x128xf32>
    %cst_127 = arith.constant dense<0.000000e+00> : vector<16x128xf32>
    %255 = tpu.matmul %253, %254, %cst_127 {dimension_numbers = #tpu.dot_dimension_numbers<[1], [0], [0], [1], [0, 0, 1, 1], [], []>} : vector<16x128xf32>, vector<128x128xf32>, vector<16x128xf32> -> vector<16x128xf32>
    %c3616 = arith.constant 3616 : index
    %c0_128 = arith.constant 0 : index
    %256 = vector.load %arg1[%c3616, %c0_128] : memref<4840x128xf32, #tpu.memory_space<vmem>>, vector<1x128xf32>
    %257 = vector.broadcast %256 : vector<1x128xf32> to vector<16x128xf32>
    %258 = arith.addf %255, %257 : vector<16x128xf32>
    %cst_129 = arith.constant 0.000000e+00 : f32
    %259 = vector.broadcast %cst_129 : f32 to vector<16x128xf32>
    %260 = arith.maximumf %258, %259 : vector<16x128xf32>
    %c3488 = arith.constant 3488 : index
    %c0_130 = arith.constant 0 : index
    %261 = vector.load %arg1[%c3488, %c0_130] : memref<4840x128xf32, #tpu.memory_space<vmem>>, vector<128x128xf32>
    %cst_131 = arith.constant dense<0.000000e+00> : vector<16x128xf32>
    %262 = tpu.matmul %253, %261, %cst_131 {dimension_numbers = #tpu.dot_dimension_numbers<[1], [0], [0], [1], [0, 0, 1, 1], [], []>} : vector<16x128xf32>, vector<128x128xf32>, vector<16x128xf32> -> vector<16x128xf32>
    %c3624 = arith.constant 3624 : index
    %c0_132 = arith.constant 0 : index
    %263 = vector.load %arg1[%c3624, %c0_132] : memref<4840x128xf32, #tpu.memory_space<vmem>>, vector<1x128xf32>
    %264 = vector.broadcast %263 : vector<1x128xf32> to vector<16x128xf32>
    %265 = arith.addf %262, %264 : vector<16x128xf32>
    %cst_133 = arith.constant 0.000000e+00 : f32
    %266 = vector.broadcast %cst_133 : f32 to vector<16x128xf32>
    %267 = arith.maximumf %265, %266 : vector<16x128xf32>
    %c3632 = arith.constant 3632 : index
    %c0_134 = arith.constant 0 : index
    %268 = vector.load %arg1[%c3632, %c0_134] : memref<4840x128xf32, #tpu.memory_space<vmem>>, vector<128x128xf32>
    %cst_135 = arith.constant dense<0.000000e+00> : vector<16x128xf32>
    %269 = tpu.matmul %260, %268, %cst_135 {dimension_numbers = #tpu.dot_dimension_numbers<[1], [0], [0], [1], [0, 0, 1, 1], [], []>} : vector<16x128xf32>, vector<128x128xf32>, vector<16x128xf32> -> vector<16x128xf32>
    %c3760 = arith.constant 3760 : index
    %c0_136 = arith.constant 0 : index
    %270 = vector.load %arg1[%c3760, %c0_136] : memref<4840x128xf32, #tpu.memory_space<vmem>>, vector<128x128xf32>
    %cst_137 = arith.constant dense<0.000000e+00> : vector<16x128xf32>
    %271 = tpu.matmul %267, %270, %cst_137 {dimension_numbers = #tpu.dot_dimension_numbers<[1], [0], [0], [1], [0, 0, 1, 1], [], []>} : vector<16x128xf32>, vector<128x128xf32>, vector<16x128xf32> -> vector<16x128xf32>
    %272 = arith.addf %269, %271 : vector<16x128xf32>
    %c3888 = arith.constant 3888 : index
    %c0_138 = arith.constant 0 : index
    %273 = vector.load %arg1[%c3888, %c0_138] : memref<4840x128xf32, #tpu.memory_space<vmem>>, vector<1x128xf32>
    %274 = vector.broadcast %273 : vector<1x128xf32> to vector<16x128xf32>
    %275 = arith.addf %272, %274 : vector<16x128xf32>
    %276 = arith.addf %275, %253 : vector<16x128xf32>
    %c128_139 = arith.constant 128 : index
    %c0_140 = arith.constant 0 : index
    %277 = vector.load %arg1[%c128_139, %c0_140] : memref<4840x128xf32, #tpu.memory_space<vmem>>, vector<128x128xf32>
    %cst_141 = arith.constant dense<0.000000e+00> : vector<16x128xf32>
    %278 = tpu.matmul %276, %277, %cst_141 {dimension_numbers = #tpu.dot_dimension_numbers<[1], [0], [0], [1], [0, 0, 1, 1], [], []>} : vector<16x128xf32>, vector<128x128xf32>, vector<16x128xf32> -> vector<16x128xf32>
    %279 = arith.subf %276, %278 : vector<16x128xf32>
    %280 = arith.mulf %279, %279 : vector<16x128xf32>
    %cst_142 = arith.constant dense<0.000000e+00> : vector<16x128xf32>
    %281 = tpu.matmul %280, %277, %cst_142 {dimension_numbers = #tpu.dot_dimension_numbers<[1], [0], [0], [1], [0, 0, 1, 1], [], []>} : vector<16x128xf32>, vector<128x128xf32>, vector<16x128xf32> -> vector<16x128xf32>
    %cst_143 = arith.constant 9.99999974E-6 : f32
    %282 = vector.broadcast %cst_143 : f32 to vector<16x128xf32>
    %283 = arith.addf %281, %282 : vector<16x128xf32>
    %284 = math.rsqrt %283 : vector<16x128xf32>
    %285 = arith.mulf %279, %284 : vector<16x128xf32>
    %c3328 = arith.constant 3328 : index
    %c0_144 = arith.constant 0 : index
    %286 = vector.load %arg1[%c3328, %c0_144] : memref<4840x128xf32, #tpu.memory_space<vmem>>, vector<1x128xf32>
    %287 = vector.broadcast %286 : vector<1x128xf32> to vector<16x128xf32>
    %288 = arith.mulf %285, %287 : vector<16x128xf32>
    %c3336 = arith.constant 3336 : index
    %c0_145 = arith.constant 0 : index
    %289 = vector.load %arg1[%c3336, %c0_145] : memref<4840x128xf32, #tpu.memory_space<vmem>>, vector<1x128xf32>
    %290 = vector.broadcast %289 : vector<1x128xf32> to vector<16x128xf32>
    %291 = arith.addf %288, %290 : vector<16x128xf32>
    %cst_146 = arith.constant dense<0.000000e+00> : vector<128xf32>
    %292 = vector.multi_reduction <add>, %291, %cst_146 [0] : vector<16x128xf32> to vector<128xf32>
    %293 = vector.shape_cast %292 : vector<128xf32> to vector<1x128xf32>
    %cst_147 = arith.constant 1.600000e+01 : f32
    %294 = vector.broadcast %cst_147 : f32 to vector<1x128xf32>
    %295 = arith.divf %293, %294 : vector<1x128xf32>
    %c4432 = arith.constant 4432 : index
    %c0_148 = arith.constant 0 : index
    %296 = vector.load %arg1[%c4432, %c0_148] : memref<4840x128xf32, #tpu.memory_space<vmem>>, vector<128x128xf32>
    %cst_149 = arith.constant dense<0.000000e+00> : vector<1x128xf32>
    %297 = tpu.matmul %295, %296, %cst_149 {dimension_numbers = #tpu.dot_dimension_numbers<[1], [0], [0], [1], [0, 0, 1, 1], [], []>} : vector<1x128xf32>, vector<128x128xf32>, vector<1x128xf32> -> vector<1x128xf32>
    %c4560 = arith.constant 4560 : index
    %c0_150 = arith.constant 0 : index
    %298 = vector.load %arg1[%c4560, %c0_150] : memref<4840x128xf32, #tpu.memory_space<vmem>>, vector<1x128xf32>
    %299 = arith.addf %297, %298 : vector<1x128xf32>
    %cst_151 = arith.constant 0.000000e+00 : f32
    %300 = vector.broadcast %cst_151 : f32 to vector<1x128xf32>
    %301 = arith.maximumf %299, %300 : vector<1x128xf32>
    %c4568 = arith.constant 4568 : index
    %c0_152 = arith.constant 0 : index
    %302 = vector.load %arg1[%c4568, %c0_152] : memref<4840x128xf32, #tpu.memory_space<vmem>>, vector<128x128xf32>
    %cst_153 = arith.constant dense<0.000000e+00> : vector<1x128xf32>
    %303 = tpu.matmul %301, %302, %cst_153 {dimension_numbers = #tpu.dot_dimension_numbers<[1], [0], [0], [1], [0, 0, 1, 1], [], []>} : vector<1x128xf32>, vector<128x128xf32>, vector<1x128xf32> -> vector<1x128xf32>
    %c4696 = arith.constant 4696 : index
    %c0_154 = arith.constant 0 : index
    %304 = vector.load %arg1[%c4696, %c0_154] : memref<4840x128xf32, #tpu.memory_space<vmem>>, vector<1x128xf32>
    %305 = arith.addf %303, %304 : vector<1x128xf32>
    %cst_155 = arith.constant 0.000000e+00 : f32
    %306 = vector.broadcast %cst_155 : f32 to vector<1x128xf32>
    %307 = arith.maximumf %305, %306 : vector<1x128xf32>
    %c4704 = arith.constant 4704 : index
    %c0_156 = arith.constant 0 : index
    %308 = vector.load %arg1[%c4704, %c0_156] : memref<4840x128xf32, #tpu.memory_space<vmem>>, vector<128x128xf32>
    %cst_157 = arith.constant dense<0.000000e+00> : vector<1x128xf32>
    %309 = tpu.matmul %307, %308, %cst_157 {dimension_numbers = #tpu.dot_dimension_numbers<[1], [0], [0], [1], [0, 0, 1, 1], [], []>} : vector<1x128xf32>, vector<128x128xf32>, vector<1x128xf32> -> vector<1x128xf32>
    %c4832 = arith.constant 4832 : index
    %c0_158 = arith.constant 0 : index
    %310 = vector.load %arg1[%c4832, %c0_158] : memref<4840x128xf32, #tpu.memory_space<vmem>>, vector<1x128xf32>
    %311 = arith.addf %309, %310 : vector<1x128xf32>
    %c0_159 = arith.constant 0 : index
    %c0_160 = arith.constant 0 : index
    %c0_161 = arith.constant 0 : index
    %312 = vector.load %arg6[%c0_159, %c0_160, %c0_161] : memref<1x1x128xf32, #tpu.memory_space<vmem>>, vector<1x1x128xf32>
    %313 = vector.shape_cast %312 : vector<1x1x128xf32> to vector<1x128xf32>
    %314 = vector.shape_cast %311 : vector<1x128xf32> to vector<1x1x128xf32>
    tpu.vector_store %arg6[%c0_159, %c0_160, %c0_161], %314 {strides = array<i32>} : memref<1x1x128xf32, #tpu.memory_space<vmem>>, vector<1x1x128xf32>,
    return
  }
  func.func @transform_0(%arg0: i32) -> (i32, i32) {
    %c0_i32 = arith.constant 0 : i32
    %c0_i32_0 = arith.constant 0 : i32
    %c0_i32_1 = arith.constant 0 : i32
    return %c0_i32, %c0_i32_0 : i32, i32
  }
  func.func @transform_1(%arg0: i32) -> (i32, i32, i32) {
    %c0_i32 = arith.constant 0 : i32
    %c0_i32_0 = arith.constant 0 : i32
    %c0_i32_1 = arith.constant 0 : i32
    return %arg0, %c0_i32, %c0_i32_0 : i32, i32, i32
  }
  func.func @transform_2(%arg0: i32) -> (i32, i32, i32) {
    %c0_i32 = arith.constant 0 : i32
    %c0_i32_0 = arith.constant 0 : i32
    %c0_i32_1 = arith.constant 0 : i32
    return %arg0, %c0_i32, %c0_i32_0 : i32, i32, i32
  }
  func.func @transform_3(%arg0: i32) -> (i32, i32, i32) {
    %c0_i32 = arith.constant 0 : i32
    %c0_i32_0 = arith.constant 0 : i32
    %c0_i32_1 = arith.constant 0 : i32
    return %arg0, %c0_i32, %c0_i32_0 : i32, i32, i32
  }
  func.func @transform_4(%arg0: i32) -> (i32, i32, i32) {
    %c0_i32 = arith.constant 0 : i32
    %c0_i32_0 = arith.constant 0 : i32
    %c0_i32_1 = arith.constant 0 : i32
    return %arg0, %c0_i32, %c0_i32_0 : i32, i32, i32
  }
  func.func @transform_5(%arg0: i32) -> (i32, i32, i32) {
    %c0_i32 = arith.constant 0 : i32
    %c0_i32_0 = arith.constant 0 : i32
    %c0_i32_1 = arith.constant 0 : i32
    return %arg0, %c0_i32, %c0_i32_0 : i32, i32, i32
  }
}

</mosaic_0001>

<bundles_post_ra>
// kernel: squeeze.1
= control target key start
LH: loop header
LB: loop body
LE: loop exit
PB: predicated region body
PF: predicated region fallthrough
CT: control target
= control target key end

     0   :  { %s80_s0 = inlined_call_operand.vmem [shape: f32[2,4], index: 0, kind: input, shape index: {}]   ;;  %s81_s1 = inlined_call_operand.hbm [shape: f32[8,1], index: 1, kind: output, shape index: {}]  }
   0x1   :  { %v5_v0 = vld [vmem:[%s80_s0] sm:$0x3] }
   0x2   :  { %2 = vsyncpa [#allocation1], 0  ;;  %6 = vst [vmem:[#allocation3] sm:$0x3] %v5_v0  ;;  %vm8_vm0 = vcmask 31744   ;;  %s62_s0 = smov 4  }
   0x3   :  { %vm14_vm1 = vcmask 64544   ;;  %s63_s8 = smov [#allocation0]   ;;  %s27_s1 = sshll.u32 %s81_s1, 4  ;;  %s28_s1 = int_to_ptr.hbm [resolvable:$true] %s27_s1 }
   0x4   :  { %s25_s9 = sshll.u32 %s63_s8, 4  ;;  %s26_s9 = int_to_ptr.vmem [resolvable:$true] %s25_s9 }
   0x9   :  { %v11_v1 = vld [vmem:[#allocation3 + $0x1] sm:$0x1]   ;;  %v7_v2 = vld [vmem:[#allocation3] sm:$0x1]  }
   0xa   :  { %12 = vrot.lane.b32.xlu0 %v11_v1, %s62_s0  ;;  %9 = vst.msk [vmem:[#allocation2] sm:$0x1] %vm8_vm0, %v7_v2  }
  0x7c   :  { %v13_v3 = vpop.permute.xlu0 %12  }
  0x7d   :  { %15 = vst.msk [vmem:[#allocation2] sm:$0x1] %vm14_vm1, %v13_v3  }
  0x84   :  { %v18_v4 = vld [vmem:[#allocation2] sm:$0x1] }
  0x85   :  { %21 = vst [vmem:[#allocation0] sm:$0x1] %v18_v4 }
  0x86   :  { %30 = dma.vmem_to_hbm [thread:$0]  %s26_s9, 16, %s28_s1, [#allocation1]  }
  0x87   :  { %60 = dma.done.wait [#allocation1], 16  }
  0x88   :  { %61 = vsyncadd [#allocation1], 4294967280 }
  0x89   :  { %33 = vsyncpa [#allocation1], 1 }

// kernel: fwd.1
= control target key start
LH: loop header
LB: loop body
LE: loop exit
PB: predicated region body
PF: predicated region fallthrough
CT: control target
= control target key end

     0   :  { %10 = vsyncpa [#allocation3], 0  ;;  %s9238_s0 = inlined_call_operand.hbm [shape: f32[4840,128], index: 0, kind: input, shape index: {}]   ;;  %s9239_s1 = inlined_call_operand.vmem [shape: s32[2,16,4], index: 1, kind: input, shape index: {}]   ;;  %s9240_s2 = inlined_call_operand.vmem [shape: s32[2,256,4], index: 2, kind: input, shape index: {}]   ;;  %s9241_s3 = inlined_call_operand.vmem [shape: s32[2,256,4], index: 3, kind: input, shape index: {}]   ;;  %s9242_s4 = inlined_call_operand.hbm [shape: f32[2,16,32], index: 4, kind: input, shape index: {}]   ;;  %s9243_s5 = inlined_call_operand.vmem [shape: f32[2,1,128], index: 5, kind: output, shape index: {}]  }
   0x1   :  { %11 = vsyncpa [#allocation5], 0 }
   0x2   :  { %13 = vsyncpa [#allocation5 + $0x1], 0  ;;  %s6830_s18 = smov 0   ;;  %s6832_s19 = smov 0  }
   0x3   :  { %s6834_s20 = smov 0   ;;  %s6836_s21 = smov 0  }
   0x4 LB: > { %s6849_s22 = sadd.s32 4294967295, %s6793_s21   ;;  %p138_p0 = scmp.ne.s32.totalorder %s6785_s19, %s6781_s18  ;;  %s6793_s21 = sphi %s6836_s21, %s9485_s21   ;;  %s6789_s20 = sphi %s6834_s20, %s9484_s20   ;;  %s6785_s19 = sphi %s6832_s19, %s9483_s19   ;;  %s6781_s18 = sphi %s6830_s18, %s9482_s18  }
   0x5   : > { %p139_p1 = scmp.eq.s32.totalorder %s6849_s22, 0  ;;  %p6029_p2 = scmp.ge.s32.totalorder %s6793_s21, 1 }
   0x6   : > { %p175_p3 = scmp.lt.s32.totalorder %s6793_s21, 3  ;;  %s186_s26 = sshll.u32 %s9238_s0, 4  ;;  %s187_s26 = int_to_ptr.hbm [resolvable:$true] %s186_s26 }
   0x7   : > { %p6857_p4 = por %p139_p1, %p138_p0  ;;  %s6795_s28 = smov [#allocation2]  }
   0x8   : > { %p6864_p5 = pnand %p6029_p2, %p175_p3  ;;  %s188_s29 = sshll.u32 %s6795_s28, 4  ;;  %s189_s29 = int_to_ptr.vmem [resolvable:$true] %s188_s29 }
   0x9   : > { %s6873_s30 = sadd.s32 1, %s6793_s21   ;;  %s6796_s6 = smov 128  }
   0xa   : > { %p6259_p6 = pneg %p6864_p5  ;;  %s6797_s7 = smov 8  }
   0xb   : > { %s122_s8 = ssub.s32 %s6793_s21, %s6873_s30  ;;  %s125_s9 = sadd.s32 1, %s6789_s20 }
   0xc   : > { %p6260_p7 = pnand %p6259_p6, %p139_p1  ;;  %p123_p8 = scmp.eq.s32.totalorder %s122_s8, 0 }
   0xd   : > { %p132_p9 = scmp.ne.s32.totalorder %s6789_s20, %s6785_s19  ;;  %p133_p10 = scmp.eq.s32.totalorder %s6793_s21, 0 }
   0xe   : > { %6262 = dma.hbm_to_vmem [thread:$0]  (!%p6260_p7), %s187_s26, 77440, %s189_s29, [#allocation3], %s6796_s6, %s6796_s6, %s6797_s7  }
   0xf   : > { %p6268_p11 = scmp.lt.s32.totalorder %s6793_s21, 2  ;;  %p134_p12 = por %p133_p10, %p132_p9 }
  0x10   : > { %s6886_s10 = scalar_select %p123_p8, %s6789_s20, %s125_s9  }
  0x11   : > { %s226_s11 = sand.u32 1, %s6789_s20   ;;  %s6249_s13 = sshll.u32 %s6793_s21, 4 }
  0x12   : > { %s6032_s12 = sshll.u32 %s226_s11, 4  ;;  %s235_s16 = scalar_lea.hbm %s9242_s4, %s6249_s13 }
  0x13   : > { %s230_s17 = scalar_lea.vmem [#allocation4], %s6032_s12  ;;  %s236_s24 = sshll.u32 %s235_s16, 4  ;;  %s237_s24 = int_to_ptr.hbm [resolvable:$true] %s236_s24 }
  0x14   : > { %s238_s18 = sshll.u32 %s230_s17, 4  ;;  %p6893_p13 = pnand %p6268_p11, %p134_p12  ;;  %s239_s18 = int_to_ptr.vmem [resolvable:$true] %s238_s18 }
  0x15   : > { %s227_s26 = scalar_lea.sflag [#allocation5], %s226_s11  ;;  %s6725_s28 = sshra.s32 %s237_s24, 4  ;;  %s6726_s28 = int_to_ptr.hbm [resolvable:$true] %s6725_s28 }
  0x16   : > { %s6727_s29 = scalar_lea.hbm %s6726_s28, 16  ;;  %p6729_p2 = pneg %p6893_p13 }
  0x17   : > { %p6728_p0 = scmp.ne.s32.totalorder %s6726_s28, %s6727_s29  ;;  %s6732_s9 = scalar_lea.hbm %s9242_s4, 32 }
  0x18   : > { %p6733_p7 = scmp.lt.s32.totalorder %s6726_s28, %s9242_s4  ;;  %p6734_p8 = scmp.lt.s32.totalorder %s6732_s9, %s6727_s29 }
  0x19   : > { %p6730_p3 = pnand %p6729_p2, %p6728_p0 }
  0x1a   : > { %p6735_p9 = por %p6734_p8, %p6733_p7 }
  0x1b   : > { %p6731_p6 = pneg %p6730_p3 }
  0x1d   : > { %p6736_p10 = pnand %p6735_p9, %p6731_p6 }
  0x1f   : > { %6739 = shalt.err (!%p6736_p10)
}
  0x20   : > { %6266 = dma.hbm_to_vmem [thread:$0]  (!%p6893_p13), %s237_s24, 256, %s239_s18, %s227_s26, %s6796_s6, %s6796_s6, %s6797_s7  }
  0x21   : > { %250 = sbr.rel (%p6864_p5) target bundleno = 3968 (0xf80), region = 40 }
  0x26   : > { %6772 = dma.done.wait (%p139_p1), [#allocation3], 77440  }
  0x27   : > { %6774 = vsyncadd (%p139_p1), [#allocation3], 4294889856  ;;  %s257_s11 = sand.u32 1, %s6785_s19  }
  0x28   : > { %s6917_s14 = sshll.u32 %s257_s11, 4  ;;  %s258_s15 = scalar_lea.sflag [#allocation5], %s257_s11 }
  0x29   : > { %s261_s16 = scalar_lea.vmem [#allocation4], %s6917_s14 }
  0x2a   : > { %6776 = dma.done.wait (%p6857_p4), %s258_s15, 256  }
  0x2b   : > { %6778 = vsyncadd (%p6857_p4), %s258_s15, 4294967040  ;;  %p302_p5 = scmp.lt.s32.totalorder %s6849_s22, 1  ;;  %vm462_vm0 = vcmask 1043456   ;;  %v454_v0 = vld [vmem:[#allocation2 + $0x108] sm:$0xf]  ;;  %vm455_vm1 = vcmask 31744  }
  0x2c   : > { %6044 = vmatpush.msk.msra.mxu3 %vm462_vm0, %v454_v0  ;;  %v574_v3 = vld [vmem:[#allocation2 + $0x118] sm:$0xf]  ;;  %v512_v6 = vld [vmem:[#allocation2 + $0x1a0] sm:$0xff]  ;;  %v510_v10 = vld [vmem:[#allocation2 + $0x190] sm:$0xff]  ;;  %vm517_vm2 = vcmask 261120  }
  0x2d   : > { %s9487_s22 = smov (!%p302_p5, %s6849_s22), 1  ;;  %v511_v7 = vld [vmem:[#allocation2 + $0x198] sm:$0xff]  ;;  %547 = vmatpush.msra.mxu2 %v512_v6  ;;  %v509_v11 = vld [vmem:[#allocation2 + $0x188] sm:$0xff]  ;;  %v508_v13 = vld [vmem:[#allocation2 + $0x180] sm:$0xff] }
  0x2e   : > { %s6250_s27 = sshll.u32 %s9487_s22, 4  ;;  %6053 = vmatpush.msk.msrb.mxu3 %vm462_vm0, %v574_v3  ;;  %s6251_s23 = sshll.u32 %s9487_s22, 8  ;;  %v507_v15 = vld [vmem:[#allocation2 + $0x178] sm:$0xff]  ;;  %v506_v16 = vld [vmem:[#allocation2 + $0x170] sm:$0xff]  ;;  %v505_v17 = vld [vmem:[#allocation2 + $0x168] sm:$0xff] }
  0x2f   : > { %s306_s17 = scalar_lea.vmem %s9239_s1, %s6250_s27  ;;  %s6941_s25 = scalar_lea.vmem %s9240_s2, %s6251_s23  ;;  %548 = vmatpush.msra.mxu2 %v511_v7  ;;  %v504_v19 = vld [vmem:[#allocation2 + $0x160] sm:$0xff]  ;;  %v503_v21 = vld [vmem:[#allocation2 + $0x158] sm:$0xff]  ;;  %v502_v22 = vld [vmem:[#allocation2 + $0x150] sm:$0xff] }
  0x30   : > { %v320_v1 = vld [vmem:[%s306_s17] sm:$0xff]  ;;  %v321_v4 = vld [vmem:[%s306_s17 + $0x8] sm:$0xff]  ;;  %v326_v18 = vld [vmem:[%s6941_s25 + $0x10] sm:$0xff]  ;;  %s7155_s29 = scalar_lea.vmem %s9241_s3, %s6251_s23  ;;  %s319_s9 = scalar_lea.vmem %s9243_s5, %s9487_s22 }
  0x31   : > { %v322_v2 = vcvt.s32.f32 %v320_v1  ;;  %v323_v5 = vcvt.s32.f32 %v321_v4  ;;  %v324_v8 = vld [vmem:[%s6941_s25] sm:$0xff]  ;;  %v325_v12 = vld [vmem:[%s6941_s25 + $0x8] sm:$0xff]  ;;  %549 = vmatpush.msra.mxu2 %v510_v10  ;;  %v358_v20 = vcvt.s32.f32 %v326_v18  ;;  %v327_v24 = vld [vmem:[%s6941_s25 + $0x18] sm:$0xff] }
  0x32   : > { %v356_v9 = vcvt.s32.f32 %v324_v8  ;;  %v357_v14 = vcvt.s32.f32 %v325_v12  ;;  %v501_v23 = vld [vmem:[#allocation2 + $0x148] sm:$0xff]  ;;  %v500_v25 = vld [vmem:[#allocation2 + $0x140] sm:$0xff]  ;;  %v359_v26 = vcvt.s32.f32 %v327_v24  ;;  %v499_v27 = vld [vmem:[#allocation2 + $0x138] sm:$0xff] }
  0x33   : > { %6045 = vmatmul.msk.f32.vlgmr.msra.gmra.mxu3 %vm455_vm1, %v322_v2  ;;  %550 = vmatpush.msra.mxu2 %v509_v11  ;;  %v498_v28 = vld [vmem:[#allocation2 + $0x130] sm:$0xff]  ;;  %v328_v29 = vld [vmem:[%s6941_s25 + $0x20] sm:$0xff]  ;;  %v329_v31 = vld [vmem:[%s6941_s25 + $0x28] sm:$0xff] }
  0x34   : > { %v360_v30 = vcvt.s32.f32 %v328_v29  ;;  %v361_v32 = vcvt.s32.f32 %v329_v31  ;;  %v330_v33 = vld [vmem:[%s6941_s25 + $0x30] sm:$0xff]  ;;  %v331_v35 = vld [vmem:[%s6941_s25 + $0x38] sm:$0xff]  ;;  %v516_v37 = vld [vmem:[#allocation2 + $0x240] sm:$0xff] }
  0x35   : > { %551 = vmatpush.msra.mxu2 %v508_v13  ;;  %v362_v34 = vcvt.s32.f32 %v330_v33  ;;  %v363_v36 = vcvt.s32.f32 %v331_v35  ;;  %v497_v38 = vld [vmem:[#allocation2 + $0x128] sm:$0xff]  ;;  %536 = vmatpush.msra.mxu1 %v516_v37  ;;  %v515_v39 = vld [vmem:[#allocation2 + $0x238] sm:$0xff]  ;;  %v514_v40 = vld [vmem:[#allocation2 + $0x230] sm:$0xff] }
  0x36   : > { %v332_v41 = vld [vmem:[%s6941_s25 + $0x40] sm:$0xff]  ;;  %v513_v43 = vld [vmem:[#allocation2 + $0x228] sm:$0xff]  ;;  %v899_v49 = vld [vmem:[#allocation2 + $0x218] sm:$0xff] }
  0x37   : > { %552 = vmatpush.msra.mxu2 %v507_v15  ;;  %537 = vmatpush.msra.mxu1 %v515_v39  ;;  %v364_v42 = vcvt.s32.f32 %v332_v41  ;;  %v452_v44 = vld [vmem:[%s261_s16] sm:$0xff]  ;;  %v900_v47 = vld [vmem:[#allocation2 + $0x220] sm:$0xff]  ;;  %v898_v50 = vld [vmem:[#allocation2 + $0x210] sm:$0xff] }
  0x38   : > { %v333_v45 = vld [vmem:[%s6941_s25 + $0x48] sm:$0xff]  ;;  %901 = vmatpush.msra.mxu0 %v900_v47  ;;  %v453_v48 = vld [vmem:[%s261_s16 + $0x8] sm:$0xff]  ;;  %v895_v55 = vld [vmem:[#allocation2 + $0x1f8] sm:$0xff] }
  0x39   : > { %553 = vmatpush.msra.mxu2 %v506_v16  ;;  %538 = vmatpush.msra.mxu1 %v514_v40  ;;  %v365_v46 = vcvt.s32.f32 %v333_v45  ;;  %v334_v51 = vld [vmem:[%s6941_s25 + $0x50] sm:$0xff]  ;;  %v897_v52 = vld [vmem:[#allocation2 + $0x208] sm:$0xff]  ;;  %v896_v54 = vld [vmem:[#allocation2 + $0x200] sm:$0xff] }
  0x3a   : > { %902 = vmatpush.msra.mxu0 %v899_v49  ;;  %v366_v53 = vcvt.s32.f32 %v334_v51  ;;  %v894_v56 = vld [vmem:[#allocation2 + $0x1f0] sm:$0xff]  ;;  %v335_v57 = vld [vmem:[%s6941_s25 + $0x58] sm:$0xff]  ;;  %v893_v58 = vld [vmem:[#allocation2 + $0x1e8] sm:$0xff] }
  0x3b   : > { %6046 = vmatmul.msk.f32.gmra.mxu3 %vm455_vm1, %v323_v5  ;;  %554 = vmatpush.msra.mxu2 %v505_v17  ;;  %v367_v59 = vcvt.s32.f32 %v335_v57  ;;  %v892_v60 = vld [vmem:[#allocation2 + $0x1e0] sm:$0xff]  ;;  %v6307_v61 = vld [vmem:[#allocation2 + $0x110] ss:$0 sm:$0xff]  ;;  %v891_v62 = vld [vmem:[#allocation2 + $0x1d8] sm:$0xff]  ;;  %v6798_v5 = vmov 1.0  }
  0x3c   : > { %539 = vmatpush.msra.mxu1 %v513_v43  ;;  %903 = vmatpush.msra.mxu0 %v898_v50  ;;  %v890_v63 = vld [vmem:[#allocation2 + $0x1d0] sm:$0xff]  ;;  %v336_v0 = vld [vmem:[%s6941_s25 + $0x60] sm:$0xff]  ;;  %v889_v1 = vld [vmem:[#allocation2 + $0x1c8] sm:$0xff] }
  0x3d   : > { %555 = vmatpush.msra.mxu2 %v504_v19  ;;  %6049 = vmatmul.msk.f32.vlgmr.msra.gmra.mxu1 %vm517_vm2, %v452_v44  ;;  %v368_v3 = vcvt.s32.f32 %v336_v0  ;;  %v888_v4 = vld [vmem:[#allocation2 + $0x1c0] sm:$0xff]  ;;  %v887_v6 = vld [vmem:[#allocation2 + $0x1b8] sm:$0xff]  ;;  %v886_v7 = vld [vmem:[#allocation2 + $0x1b0] sm:$0xff] }
  0x3e   : > { %904 = vmatpush.msra.mxu0 %v897_v52  ;;  %v337_v8 = vld [vmem:[%s6941_s25 + $0x68] sm:$0xff]  ;;  %v6977_v13 = vld [vmem:[#allocation2 + $0x120] ss:$0 sm:$0xff]  ;;  %v1600_v15 = vld [vmem:[#allocation2 + $0x78] sm:$0xff] }
  0x3f   : > { %556 = vmatpush.msra.mxu2 %v503_v21  ;;  %v885_v10 = vld [vmem:[#allocation2 + $0x1a8] sm:$0xff]  ;;  %v369_v12 = vcvt.s32.f32 %v337_v8  ;;  %v1240_v16 = vld [vmem:[#allocation2 + $0x2b8] sm:$0xff]  ;;  %v338_v17 = vld [vmem:[%s6941_s25 + $0x70] sm:$0xff]  ;;  %1601 = vmatpush.msra.mxu3 %v1600_v15 }
  0x40   : > { %905 = vmatpush.msra.mxu0 %v896_v54  ;;  %v1239_v18 = vld [vmem:[#allocation2 + $0x2b0] sm:$0xff]  ;;  %v1238_v21 = vld [vmem:[#allocation2 + $0x2a8] sm:$0xff]  ;;  %v339_v24 = vld [vmem:[%s6941_s25 + $0x78] sm:$0xff] }
  0x41   : > { %557 = vmatpush.msra.mxu2 %v502_v22  ;;  %v1237_v22 = vld [vmem:[#allocation2 + $0x2a0] sm:$0xff]  ;;  %v1232_v31 = vld [vmem:[#allocation2 + $0x278] sm:$0xff]  ;;  %v1231_v33 = vld [vmem:[#allocation2 + $0x270] sm:$0xff] }
  0x42   : > { %906 = vmatpush.msra.mxu0 %v895_v55  ;;  %v1233_v29 = vld [vmem:[#allocation2 + $0x280] sm:$0xff]  ;;  %v341_v39 = vld [vmem:[%s6941_s25 + $0x88] sm:$0xff]  ;;  %v1227_v40 = vld [vmem:[#allocation2 + $0x250] sm:$0xff] }
  0x43   : > { %6054 = vmatmul.msk.f32.vlgmr.msrb.gmra.mxu3 %vm455_vm1, %v356_v9  ;;  %558 = vmatpush.msra.mxu2 %v501_v23  ;;  %v1242_v9 = vld [vmem:[#allocation2 + $0x2c8] sm:$0xff]  ;;  %v1236_v23 = vld [vmem:[#allocation2 + $0x298] sm:$0xff]  ;;  %v1229_v37 = vld [vmem:[#allocation2 + $0x260] sm:$0xff]  ;;  %v373_v43 = vcvt.s32.f32 %v341_v39 }
  0x44   : > { %907 = vmatpush.msra.mxu0 %v894_v56  ;;  %v1280_v44 = vld [vmem:[#allocation2 + $0x340] sm:$0xff]  ;;  %v1598_v45 = vld [vmem:[#allocation2 + $0x68] sm:$0xff]  ;;  %v342_v47 = vld [vmem:[%s6941_s25 + $0x90] sm:$0xff] }
  0x45   : > { %559 = vmatpush.msra.mxu2 %v500_v25  ;;  %6050 = vmatmul.msk.f32.gmra.mxu1 %vm517_vm2, %v453_v48  ;;  %v1235_v25 = vld [vmem:[#allocation2 + $0x290] sm:$0xff]  ;;  %v374_v50 = vcvt.s32.f32 %v342_v47  ;;  %v1277_v51 = vld [vmem:[#allocation2 + $0x328] sm:$0xff]  ;;  %v1276_v52 = vld [vmem:[#allocation2 + $0x320] sm:$0xff] }
  0x46   : > { %908 = vmatpush.msra.mxu0 %v893_v58  ;;  %v1278_v48 = vld [vmem:[#allocation2 + $0x330] sm:$0xff]  ;;  %v343_v54 = vld [vmem:[%s6941_s25 + $0x98] sm:$0xff]  ;;  %v1273_v58 = vld [vmem:[#allocation2 + $0x308] sm:$0xff] }
  0x47   : > { %560 = vmatpush.msra.mxu2 %v499_v27  ;;  %v371_v27 = vcvt.s32.f32 %v339_v24  ;;  %v1274_v55 = vld [vmem:[#allocation2 + $0x310] sm:$0xff]  ;;  %v375_v57 = vcvt.s32.f32 %v343_v54  ;;  %v1267_v15 = vld [vmem:[#allocation2 + $0x2d8] sm:$0xff] }
  0x48   : > { %909 = vmatpush.msra.mxu0 %v892_v60  ;;  %v1597_v60 = vld [vmem:[#allocation2 + $0x60] sm:$0xff]  ;;  %v1313_v54 = vld [vmem:[#allocation2 + $0x390] sm:$0xff] }
  0x49   : > { %561 = vmatpush.msra.mxu2 %v498_v28  ;;  %v1234_v28 = vld [vmem:[#allocation2 + $0x288] sm:$0xff] }
  0x4a   : > { %910 = vmatpush.msra.mxu0 %v891_v62  ;;  %v344_v62 = vld [vmem:[%s6941_s25 + $0xa0] sm:$0xff] }
  0x4b   : > { %6055 = vmatmul.msk.f32.gmra.mxu3 %vm455_vm1, %v357_v14  ;;  %562 = vmatpush.msra.mxu2 %v497_v38  ;;  %v1241_v14 = vld [vmem:[#allocation2 + $0x2c0] sm:$0xff]  ;;  %v1228_v38 = vld [vmem:[#allocation2 + $0x258] sm:$0xff] }
  0x4c   : > { %911 = vmatpush.msra.mxu0 %v890_v63  ;;  %v1270_v63 = vld [vmem:[#allocation2 + $0x2f0] sm:$0xff] }
  0x4d   : > { %1243 = vmatpush.msrb.mxu2 %v1242_v9  ;;  %v347_v9 = vld [vmem:[%s6941_s25 + $0xb8] sm:$0xff] }
  0x4e   : > { %912 = vmatpush.msra.mxu0 %v889_v1  ;;  %v376_v1 = vcvt.s32.f32 %v344_v62  ;;  %v1593_v62 = vld [vmem:[#allocation2 + $0x40] sm:$0xff] }
  0x4f   : > { %1244 = vmatpush.msrb.mxu2 %v1241_v14  ;;  %v1268_v14 = vld [vmem:[#allocation2 + $0x2e0] sm:$0xff] }
  0x50   : > { %913 = vmatpush.msra.mxu0 %v888_v4 }
  0x51   : > { %1245 = vmatpush.msrb.mxu2 %v1240_v16 }
  0x52   : > { %914 = vmatpush.msra.mxu0 %v887_v6 }
  0x53   : > { %6056 = vmatmul.msk.f32.gmra.mxu3 %vm455_vm1, %v358_v20  ;;  %v370_v20 = vcvt.s32.f32 %v338_v17  ;;  %1246 = vmatpush.msrb.mxu2 %v1239_v18  ;;  %v1266_v17 = vld [vmem:[#allocation2 + $0x2d0] sm:$0xff]  ;;  %v349_v18 = vld [vmem:[%s6941_s25 + $0xc8] sm:$0xff] }
  0x54   : > { %915 = vmatpush.msra.mxu0 %v886_v7  ;;  %v346_v7 = vld [vmem:[%s6941_s25 + $0xb0] sm:$0xff] }
  0x55   : > { %1247 = vmatpush.msrb.mxu2 %v1238_v21  ;;  %v378_v8 = vcvt.s32.f32 %v346_v7 }
  0x56   : > { %916 = vmatpush.msra.mxu0 %v885_v10  ;;  %v379_v10 = vcvt.s32.f32 %v347_v9  ;;  %v1592_v9 = vld [vmem:[#allocation2 + $0x38] sm:$0xff] }
  0x57   : > { %1248 = vmatpush.msrb.mxu2 %v1237_v22  ;;  %v350_v22 = vld [vmem:[%s6941_s25 + $0xd0] sm:$0xff] }
  0x59   : > { %1249 = vmatpush.msrb.mxu2 %v1236_v23  ;;  %v382_v23 = vcvt.s32.f32 %v350_v22  ;;  %v1350_v22 = vld [vmem:[#allocation2 + $0x400] sm:$0xff] }
  0x5b   : > { %6057 = vmatmul.msk.f32.gmra.mxu3 %vm455_vm1, %v359_v26  ;;  %1250 = vmatpush.msrb.mxu2 %v1235_v25  ;;  %v351_v25 = vld [vmem:[%s6941_s25 + $0xd8] sm:$0xff] }
  0x5d   : > { %1251 = vmatpush.msrb.mxu2 %v1234_v28 }
  0x5f   : > { %1252 = vmatpush.msrb.mxu2 %v1233_v29 }
  0x61   : > { %1253 = vmatpush.msrb.mxu2 %v1232_v31  ;;  %v6309_v31 = vld [vmem:[#allocation2 + $0x248] ss:$0 sm:$0xff] }
  0x63   : > { %6058 = vmatmul.msk.f32.gmra.mxu3 %vm455_vm1, %v360_v30  ;;  %v1599_v30 = vld [vmem:[#allocation2 + $0x70] sm:$0xff]  ;;  %1254 = vmatpush.msrb.mxu2 %v1231_v33 }
  0x64   : > { %1602 = vmatpush.msra.mxu3 %v1599_v30  ;;  %v352_v30 = vld [vmem:[%s6941_s25 + $0xe0] sm:$0xff] }
  0x66   : > { %1603 = vmatpush.msra.mxu3 %v1598_v45  ;;  %v1317_v45 = vld [vmem:[#allocation2 + $0x3b0] sm:$0xff] }
  0x68   : > { %1604 = vmatpush.msra.mxu3 %v1597_v60 }
  0x6b   : > { %6059 = vmatmul.msk.f32.gmra.mxu3 %vm455_vm1, %v361_v32  ;;  %v340_v32 = vld [vmem:[%s6941_s25 + $0x80] sm:$0xff] }
  0x6c   : > { %v372_v35 = vcvt.s32.f32 %v340_v32  ;;  %v384_v32 = vcvt.s32.f32 %v352_v30  ;;  %v1345_v30 = vld [vmem:[#allocation2 + $0x3d8] sm:$0xff] }
  0x73   : > { %6060 = vmatmul.msk.f32.gmra.mxu3 %vm455_vm1, %v362_v34 }
  0x7b   : > { %6061 = vmatmul.msk.f32.gmra.mxu3 %vm455_vm1, %v363_v36  ;;  %v1230_v36 = vld [vmem:[#allocation2 + $0x268] sm:$0xff] }
  0x7c   : > { %1255 = vmatpush.msrb.mxu2 %v1230_v36  ;;  %v1320_v36 = vld [vmem:[#allocation2 + $0x3c8] sm:$0xff] }
  0x7e   : > { %1256 = vmatpush.msrb.mxu2 %v1229_v37 }
  0x80   : > { %1257 = vmatpush.msrb.mxu2 %v1228_v38  ;;  %v1319_v38 = vld [vmem:[#allocation2 + $0x3c0] sm:$0xff] }
  0x82   : > { %1258 = vmatpush.msrb.mxu2 %v1227_v40  ;;  %v353_v40 = vld [vmem:[%s6941_s25 + $0xe8] sm:$0xff] }
  0x83   : > { %6062 = vmatmul.msk.f32.gmra.mxu3 %vm455_vm1, %v364_v42  ;;  %v1281_v42 = vld [vmem:[#allocation2 + $0x348] sm:$0xff] }
  0x8b   : > { %6063 = vmatmul.msk.f32.gmra.mxu3 %vm455_vm1, %v365_v46  ;;  %v1279_v46 = vld [vmem:[#allocation2 + $0x338] sm:$0xff] }
  0x93   : > { %6064 = vmatmul.msk.f32.gmra.mxu3 %vm455_vm1, %v366_v53  ;;  %v1275_v53 = vld [vmem:[#allocation2 + $0x318] sm:$0xff] }
  0x9b   : > { %6065 = vmatmul.msk.f32.gmra.mxu3 %vm455_vm1, %v367_v59  ;;  %v1272_v59 = vld [vmem:[#allocation2 + $0x300] sm:$0xff] }
  0xa3   : > { %6066 = vmatmul.msk.f32.gmra.mxu3 %vm455_vm1, %v368_v3  ;;  %v345_v3 = vld [vmem:[%s6941_s25 + $0xa8] sm:$0xff] }
  0xa4   : > { %v377_v6 = vcvt.s32.f32 %v345_v3  ;;  %v1305_v3 = vld [vmem:[#allocation2 + $0x350] sm:$0xff] }
  0xab   : > { %6067 = vmatmul.msk.f32.gmra.mxu3 %vm455_vm1, %v369_v12 }
  0xb3   : > { %6068 = vmatmul.msk.f32.gmra.mxu3 %vm455_vm1, %v370_v20  ;;  %v1596_v20 = vld [vmem:[#allocation2 + $0x58] sm:$0xff] }
  0xb4   : > { %1605 = vmatpush.msra.mxu3 %v1596_v20  ;;  %v1351_v20 = vld [vmem:[#allocation2 + $0x408] sm:$0xff] }
  0xb6   : > { %v483_v2 = vpop.f32.mrf.mxu3 }
  0xb7   : > { %vm491_vm3 = vcmp.eq.f32.partialorder %v483_v2, %v6307_v61  ;;  %v1269_v2 = vld [vmem:[#allocation2 + $0x2e8] sm:$0xff] }
  0xb8   : > { %6051 = vmatmul.msk.f32.vlgmr.msra.gmra.mxu2 %vm491_vm3, %v6798_v5 }
  0xb9   : > { %1282 = vmatpush.msra.mxu2 %v1281_v42  ;;  %v385_v42 = vcvt.s32.f32 %v353_v40  ;;  %v1589_v40 = vld [vmem:[#allocation2 + $0x20] sm:$0xff] }
  0xba   : > { %v541_v29 = vpop.f32.mrf.mxu1 }
  0xbb   : > { %6069 = vmatmul.msk.f32.gmra.mxu3 %vm455_vm1, %v371_v27  ;;  %1283 = vmatpush.msra.mxu2 %v1280_v44  ;;  %v1595_v27 = vld [vmem:[#allocation2 + $0x50] sm:$0xff] }
  0xbc   : > { %1606 = vmatpush.msra.mxu3 %v1595_v27  ;;  %v1347_v27 = vld [vmem:[#allocation2 + $0x3e8] sm:$0xff] }
  0xbd   : > { %1284 = vmatpush.msra.mxu2 %v1279_v46  ;;  %v1594_v46 = vld [vmem:[#allocation2 + $0x48] sm:$0xff] }
  0xbe   : > { %v486_v11 = vpop.f32.mrf.mxu3  ;;  %1607 = vmatpush.msra.mxu3 %v1594_v46 }
  0xbf   : > { %vm492_vm4 = vcmp.eq.f32.partialorder %v486_v11, %v6307_v61  ;;  %1285 = vmatpush.msra.mxu2 %v1278_v48  ;;  %v1271_v61 = vld [vmem:[#allocation2 + $0x2f8] sm:$0xff]  ;;  %v348_v11 = vld [vmem:[%s6941_s25 + $0xc0] sm:$0xff]  ;;  %v1316_v48 = vld [vmem:[#allocation2 + $0x3a8] sm:$0xff] }
  0xc0   : > { %6052 = vmatmul.msk.f32.gmra.mxu2 %vm492_vm4, %v6798_v5  ;;  %v380_v12 = vcvt.s32.f32 %v348_v11  ;;  %1608 = vmatpush.msra.mxu3 %v1593_v62  ;;  %v1356_v11 = vld [vmem:[#allocation2 + $0x430] sm:$0xff] }
  0xc1   : > { %1286 = vmatpush.msra.mxu2 %v1277_v51  ;;  %v354_v51 = vld [vmem:[%s6941_s25 + $0xf0] sm:$0xff] }
  0xc2   : > { %v544_v39 = vpop.f32.mrf.mxu1  ;;  %1609 = vmatpush.msra.mxu3 %v1592_v9 }
  0xc3   : > { %6070 = vmatmul.msk.f32.gmra.mxu3 %vm455_vm1, %v372_v35  ;;  %1287 = vmatpush.msra.mxu2 %v1276_v52  ;;  %v1314_v52 = vld [vmem:[#allocation2 + $0x398] sm:$0xff] }
  0xc5   : > { %1288 = vmatpush.msra.mxu2 %v1275_v53  ;;  %v386_v53 = vcvt.s32.f32 %v354_v51  ;;  %v1587_v51 = vld [vmem:[#allocation2 + $0x10] sm:$0xff] }
  0xc6   : > { %v691_v19 = vpop.f32.mrf.mxu3 }
  0xc7   : > { %vm789_vm5 = vcmp.eq.f32.partialorder %v691_v19, %v6977_v13  ;;  %1289 = vmatpush.msra.mxu2 %v1274_v55  ;;  %v381_v19 = vcvt.s32.f32 %v349_v18  ;;  %v1312_v55 = vld [vmem:[#allocation2 + $0x388] sm:$0xff]  ;;  %v1352_v18 = vld [vmem:[#allocation2 + $0x410] sm:$0xff] }
  0xc8   : > { %6118 = vmatmul.msk.f32.vlgmr.msra.gmra.mxu0 %vm789_vm5, %v6798_v5 }
  0xc9   : > { %1290 = vmatpush.msra.mxu2 %v1273_v58  ;;  %v355_v58 = vld [vmem:[%s6941_s25 + $0xf8] sm:$0xff] }
  0xca   : > { %v387_v60 = vcvt.s32.f32 %v355_v58 }
  0xcb   : > { %6071 = vmatmul.msk.f32.gmra.mxu3 %vm455_vm1, %v373_v43  ;;  %1291 = vmatpush.msra.mxu2 %v1272_v59  ;;  %v1310_v59 = vld [vmem:[#allocation2 + $0x378] sm:$0xff] }
  0xcd   : > { %1292 = vmatpush.msra.mxu2 %v1271_v61  ;;  %v1309_v61 = vld [vmem:[#allocation2 + $0x370] sm:$0xff] }
  0xce   : > { %v694_v26 = vpop.f32.mrf.mxu3 }
  0xcf   : > { %vm790_vm6 = vcmp.eq.f32.partialorder %v694_v26, %v6977_v13  ;;  %1293 = vmatpush.msra.mxu2 %v1270_v63  ;;  %v383_v26 = vcvt.s32.f32 %v351_v25  ;;  %v1308_v63 = vld [vmem:[#allocation2 + $0x368] sm:$0xff]  ;;  %v1348_v25 = vld [vmem:[#allocation2 + $0x3f0] sm:$0xff] }
  0xd0   : > { %6119 = vmatmul.msk.f32.gmra.mxu0 %vm790_vm6, %v6798_v5 }
  0xd1   : > { %1294 = vmatpush.msra.mxu2 %v1269_v2  ;;  %v1306_v2 = vld [vmem:[#allocation2 + $0x358] sm:$0xff] }
  0xd3   : > { %6072 = vmatmul.msk.f32.gmra.mxu3 %vm455_vm1, %v374_v50  ;;  %1295 = vmatpush.msra.mxu2 %v1268_v14  ;;  %v1315_v50 = vld [vmem:[#allocation2 + $0x3a0] sm:$0xff]  ;;  %v1355_v14 = vld [vmem:[#allocation2 + $0x428] sm:$0xff] }
  0xd5   : > { %1296 = vmatpush.msra.mxu2 %v1267_v15 }
  0xd6   : > { %v697_v34 = vpop.f32.mrf.mxu3 }
  0xd7   : > { %vm791_vm7 = vcmp.eq.f32.partialorder %v697_v34, %v6977_v13  ;;  %1297 = vmatpush.msra.mxu2 %v1266_v17  ;;  %v1353_v17 = vld [vmem:[#allocation2 + $0x418] sm:$0xff] }
  0xd8   : > { %6120 = vmatmul.msk.f32.gmra.mxu0 %vm791_vm7, %v6798_v5 }
  0xdb   : > { %6073 = vmatmul.msk.f32.gmra.mxu3 %vm455_vm1, %v375_v57  ;;  %v1311_v57 = vld [vmem:[#allocation2 + $0x380] sm:$0xff] }
  0xde   : > { %v700_v41 = vpop.f32.mrf.mxu3 }
  0xdf   : > { %vm792_vm8 = vcmp.eq.f32.partialorder %v700_v41, %v6977_v13  ;;  %v1318_v41 = vld [vmem:[#allocation2 + $0x3b8] sm:$0xff] }
  0xe0   : > { %6121 = vmatmul.msk.f32.gmra.mxu0 %vm792_vm8, %v6798_v5 }
  0xe3   : > { %6074 = vmatmul.msk.f32.gmra.mxu3 %vm455_vm1, %v376_v1  ;;  %v1307_v1 = vld [vmem:[#allocation2 + $0x360] sm:$0xff] }
  0xe6   : > { %v703_v49 = vpop.f32.mrf.mxu3 }
  0xe7   : > { %vm793_vm9 = vcmp.eq.f32.partialorder %v703_v49, %v6977_v13 }
  0xe8   : > { %6122 = vmatmul.msk.f32.gmra.mxu0 %vm793_vm9, %v6798_v5 }
  0xeb   : > { %6075 = vmatmul.msk.f32.gmra.mxu3 %vm455_vm1, %v377_v6  ;;  %v1359_v6 = vld [vmem:[#allocation2 + $0x448] sm:$0xff] }
  0xee   : > { %v706_v56 = vpop.f32.mrf.mxu3 }
  0xef   : > { %vm794_vm10 = vcmp.eq.f32.partialorder %v706_v56, %v6977_v13 }
  0xf0   : > { %6123 = vmatmul.msk.f32.gmra.mxu0 %vm794_vm10, %v6798_v5 }
  0xf3   : > { %6076 = vmatmul.msk.f32.gmra.mxu3 %vm455_vm1, %v378_v8  ;;  %v1358_v8 = vld [vmem:[#allocation2 + $0x440] sm:$0xff] }
  0xf6   : > { %v709_v0 = vpop.f32.mrf.mxu3 }
  0xf7   : > { %vm795_vm11 = vcmp.eq.f32.partialorder %v709_v0, %v6977_v13 }
  0xf8   : > { %6124 = vmatmul.msk.f32.gmra.mxu0 %vm795_vm11, %v6798_v5 }
  0xfb   : > { %6077 = vmatmul.msk.f32.gmra.mxu3 %vm455_vm1, %v379_v10  ;;  %v1357_v10 = vld [vmem:[#allocation2 + $0x438] sm:$0xff] }
  0xfe   : > { %v712_v4 = vpop.f32.mrf.mxu3 }
  0xff   : > { %vm796_vm12 = vcmp.eq.f32.partialorder %v712_v4, %v6977_v13 }
 0x100   : > { %6125 = vmatmul.msk.f32.gmra.mxu0 %vm796_vm12, %v6798_v5 }
 0x103   : > { %6078 = vmatmul.msk.f32.gmra.mxu3 %vm455_vm1, %v380_v12 }
 0x106   : > { %v715_v16 = vpop.f32.mrf.mxu3 }
 0x107   : > { %vm797_vm13 = vcmp.eq.f32.partialorder %v715_v16, %v6977_v13  ;;  %v1354_v16 = vld [vmem:[#allocation2 + $0x420] sm:$0xff] }
 0x108   : > { %6126 = vmatmul.msk.f32.gmra.mxu0 %vm797_vm13, %v6798_v5 }
 0x10b   : > { %6079 = vmatmul.msk.f32.gmra.mxu3 %vm455_vm1, %v381_v19 }
 0x10e   : > { %v718_v21 = vpop.f32.mrf.mxu3 }
 0x10f   : > { %vm798_vm14 = vcmp.eq.f32.partialorder %v718_v21, %v6977_v13 }
 0x110   : > { %6127 = vmatmul.msk.f32.gmra.mxu0 %vm798_vm14, %v6798_v5 }
 0x113   : > { %6080 = vmatmul.msk.f32.gmra.mxu3 %vm455_vm1, %v382_v23  ;;  %v1591_v23 = vld [vmem:[#allocation2 + $0x30] sm:$0xff] }
 0x114   : > { %1610 = vmatpush.msra.mxu3 %v1591_v23  ;;  %v2062_v23 = vld [vmem:[#allocation2 + $0x4e0] sm:$0xff] }
 0x116   : > { %v721_v24 = vpop.f32.mrf.mxu3 }
 0x117   : > { %vm799_vm15 = vcmp.eq.f32.partialorder %v721_v24, %v6977_v13  ;;  %v1349_v24 = vld [vmem:[#allocation2 + $0x3f8] sm:$0xff] }
 0x118   : > { %6128 = vmatmul.msk.f32.gmra.mxu0 %vm799_vm15, %v6798_v5 }
 0x11b   : > { %6081 = vmatmul.msk.f32.gmra.mxu3 %vm455_vm1, %v383_v26 }
 0x11e   : > { %v724_v28 = vpop.f32.mrf.mxu3 }
 0x11f   : > { %vm800_vm2 = vcmp.eq.f32.partialorder %v724_v28, %v6977_v13 }
 0x120   : > { %6129 = vmatmul.msk.f32.gmra.mxu0 %vm800_vm2, %v6798_v5 }
 0x123   : > { %6082 = vmatmul.msk.f32.gmra.mxu3 %vm455_vm1, %v384_v32 }
 0x126   : > { %v727_v37 = vpop.f32.mrf.mxu3 }
 0x127   : > { %vm801_vm3 = vcmp.eq.f32.partialorder %v727_v37, %v6977_v13 }
 0x128   : > { %6130 = vmatmul.msk.f32.gmra.mxu0 %vm801_vm3, %v6798_v5 }
 0x12b   : > { %6083 = vmatmul.msk.f32.gmra.mxu3 %vm455_vm1, %v385_v42 }
 0x12e   : > { %v730_v49 = vpop.f32.mrf.mxu3 }
 0x12f   : > { %vm802_vm4 = vcmp.eq.f32.partialorder %v730_v49, %v6977_v13 }
 0x130   : > { %6131 = vmatmul.msk.f32.gmra.mxu0 %vm802_vm4, %v6798_v5 }
 0x133   : > { %6084 = vmatmul.msk.f32.gmra.mxu3 %vm455_vm1, %v386_v53 }
 0x136   : > { %v733_v56 = vpop.f32.mrf.mxu3 }
 0x137   : > { %vm803_vm5 = vcmp.eq.f32.partialorder %v733_v56, %v6977_v13  ;;  %v1586_v56 = vld [vmem:[#allocation2 + $0x8] sm:$0xff] }
 0x138   : > { %6132 = vmatmul.msk.f32.gmra.mxu0 %vm803_vm5, %v6798_v5 }
 0x13b   : > { %v564_v33 = vpop.f32.mrf.mxu2  ;;  %6085 = vmatmul.msk.f32.gmra.mxu3 %vm455_vm1, %v387_v60  ;;  %v2075_v60 = vld [vmem:[#allocation2 + $0x548] sm:$0xff] }
 0x13c   : > { %v565_v34 = vadd.f32 %v564_v33, %v541_v29  ;;  %v1346_v29 = vld [vmem:[#allocation2 + $0x3e0] sm:$0xff] }
 0x13e   : > { %v7034_v35 = vadd.f32 %v6309_v31, %v565_v34  ;;  %v736_v0 = vpop.f32.mrf.mxu3  ;;  %v1590_v34 = vld [vmem:[#allocation2 + $0x28] sm:$0xff] }
 0x13f   : > { %vm804_vm6 = vcmp.eq.f32.partialorder %v736_v0, %v6977_v13  ;;  %1611 = vmatpush.msra.mxu3 %v1590_v34  ;;  %v2072_v0 = vld [vmem:[#allocation2 + $0x530] sm:$0xff] }
 0x140   : > { %1259 = vmatmul.f32.vlgmr.msrb.gmra.mxu2 %v7034_v35  ;;  %6133 = vmatmul.msk.f32.gmra.mxu0 %vm804_vm6, %v6798_v5 }
 0x141   : > { %1321 = vmatpush.msrb.mxu2 %v1320_v36  ;;  %1612 = vmatpush.msra.mxu3 %v1589_v40 }
 0x143   : > { %1322 = vmatpush.msrb.mxu2 %v1319_v38  ;;  %v567_v43 = vpop.f32.mrf.mxu2 }
 0x144   : > { %v568_v44 = vadd.f32 %v567_v43, %v544_v39 }
 0x145   : > { %1323 = vmatpush.msrb.mxu2 %v1318_v41  ;;  %v7056_v4 = vpop.f32.mrf.mxu0 }
 0x146   : > { %v7041_v47 = vadd.f32 %v6309_v31, %v568_v44  ;;  %v739_v7 = vpop.f32.mrf.mxu3  ;;  %v1344_v31 = vld [vmem:[#allocation2 + $0x3d0] sm:$0xff] }
 0x147   : > { %1324 = vmatpush.msrb.mxu2 %v1317_v45  ;;  %vm805_vm7 = vcmp.eq.f32.partialorder %v739_v7, %v6977_v13  ;;  %v1588_v45 = vld [vmem:[#allocation2 + $0x18] sm:$0xff]  ;;  %v1585_v7 = vld [vmem:[#allocation2] sm:$0xff] }
 0x148   : > { %1262 = vmatmul.f32.gmra.mxu2 %v7041_v47  ;;  %6134 = vmatmul.msk.f32.gmra.mxu0 %vm805_vm7, %v6798_v5 }
 0x149   : > { %1325 = vmatpush.msrb.mxu2 %v1316_v48  ;;  %1613 = vmatpush.msra.mxu3 %v1588_v45  ;;  %v390_v45 = vld [vmem:[%s7155_s29 + $0x10] sm:$0xff] }
 0x14b   : > { %1326 = vmatpush.msrb.mxu2 %v1315_v50  ;;  %1614 = vmatpush.msra.mxu3 %v1587_v51 }
 0x14d   : > { %1327 = vmatpush.msrb.mxu2 %v1314_v52  ;;  %v7061_v12 = vpop.f32.mrf.mxu0  ;;  %1615 = vmatpush.msra.mxu3 %v1586_v56 }
 0x14e   : > { %9318 = vst [vmem:[#allocation8_spill] sm:$0xff] %v7061_v12  ;;  %v742_v15 = vpop.f32.mrf.mxu3 }
 0x14f   : > { %1328 = vmatpush.msrb.mxu2 %v1313_v54  ;;  %vm806_vm8 = vcmp.eq.f32.partialorder %v742_v15, %v6977_v13  ;;  %1616 = vmatpush.msra.mxu3 %v1585_v7  ;;  %v2067_v15 = vld [vmem:[#allocation2 + $0x508] sm:$0xff] }
 0x150   : > { %1298 = vmatmul.f32.vlgmr.msra.gmra.mxu2 %v7034_v35  ;;  %6135 = vmatmul.msk.f32.gmra.mxu0 %vm806_vm8, %v6798_v5 }
 0x151   : > { %1329 = vmatpush.msrb.mxu2 %v1312_v55 }
 0x153   : > { %1330 = vmatpush.msrb.mxu2 %v1311_v57  ;;  %v2076_v57 = vld [vmem:[#allocation2 + $0x550] sm:$0xff] }
 0x154   : > { %2079 = vmatpush.msrb.mxu0 %v2076_v57  ;;  %v391_v57 = vld [vmem:[%s7155_s29 + $0x18] sm:$0xff] }
 0x155   : > { %1331 = vmatpush.msrb.mxu2 %v1310_v59  ;;  %v7066_v19 = vpop.f32.mrf.mxu0 }
 0x156   : > { %9319 = vst [vmem:[#allocation9_spill] sm:$0xff] %v7066_v19  ;;  %v745_v21 = vpop.f32.mrf.mxu3  ;;  %2080 = vmatpush.msrb.mxu0 %v2075_v60 }
 0x157   : > { %1332 = vmatpush.msrb.mxu2 %v1309_v61  ;;  %vm807_vm9 = vcmp.eq.f32.partialorder %v745_v21, %v6977_v13  ;;  %v2074_v61 = vld [vmem:[#allocation2 + $0x540] sm:$0xff] }
 0x158   : > { %1301 = vmatmul.f32.gmra.mxu2 %v7041_v47  ;;  %6136 = vmatmul.msk.f32.gmra.mxu0 %vm807_vm9, %v6798_v5 }
 0x159   : > { %1333 = vmatpush.msrb.mxu2 %v1308_v63  ;;  %2081 = vmatpush.msrb.mxu0 %v2074_v61  ;;  %v2073_v63 = vld [vmem:[#allocation2 + $0x538] sm:$0xff] }
 0x15b   : > { %1334 = vmatpush.msrb.mxu2 %v1307_v1  ;;  %2082 = vmatpush.msrb.mxu0 %v2073_v63 }
 0x15d   : > { %1335 = vmatpush.msrb.mxu2 %v1306_v2  ;;  %v7070_v26 = vpop.f32.mrf.mxu0  ;;  %2083 = vmatpush.msrb.mxu0 %v2072_v0 }
 0x15e   : > { %9320 = vst [vmem:[#allocation10_spill] sm:$0xff] %v7070_v26  ;;  %v748_v28 = vpop.f32.mrf.mxu3 }
 0x15f   : > { %1336 = vmatpush.msrb.mxu2 %v1305_v3  ;;  %vm808_vm10 = vcmp.eq.f32.partialorder %v748_v28, %v6977_v13  ;;  %v2071_v3 = vld [vmem:[#allocation2 + $0x528] sm:$0xff] }
 0x160   : > { %1337 = vmatmul.f32.vlgmr.msrb.gmra.mxu2 %v7034_v35  ;;  %6137 = vmatmul.msk.f32.gmra.mxu0 %vm808_vm10, %v6798_v5 }
 0x161   : > { %1360 = vmatpush.msra.mxu2 %v1359_v6  ;;  %v2070_v6 = vld [vmem:[#allocation2 + $0x520] sm:$0xff]  ;;  %2084 = vmatpush.msrb.mxu0 %v2071_v3 }
 0x162   : > { %v392_v3 = vld [vmem:[%s7155_s29 + $0x20] sm:$0xff] }
 0x163   : > { %1361 = vmatpush.msra.mxu2 %v1358_v8  ;;  %v2069_v8 = vld [vmem:[#allocation2 + $0x518] sm:$0xff]  ;;  %2085 = vmatpush.msrb.mxu0 %v2070_v6  ;;  %v424_v6 = vcvt.s32.f32 %v392_v3  ;;  %v397_v3 = vld [vmem:[%s7155_s29 + $0x48] sm:$0xff] }
 0x165   : > { %1362 = vmatpush.msra.mxu2 %v1357_v10  ;;  %v7074_v32 = vpop.f32.mrf.mxu0  ;;  %v2068_v10 = vld [vmem:[#allocation2 + $0x510] sm:$0xff]  ;;  %2086 = vmatpush.msrb.mxu0 %v2069_v8 }
 0x166   : > { %9321 = vst [vmem:[#allocation11_spill] sm:$0xff] %v7074_v32  ;;  %v751_v33 = vpop.f32.mrf.mxu3 }
 0x167   : > { %1363 = vmatpush.msra.mxu2 %v1356_v11  ;;  %vm809_vm11 = vcmp.eq.f32.partialorder %v751_v33, %v6977_v13  ;;  %2087 = vmatpush.msrb.mxu0 %v2068_v10  ;;  %v389_v33 = vld [vmem:[%s7155_s29 + $0x8] sm:$0xff] }
 0x168   : > { %1340 = vmatmul.f32.gmra.mxu2 %v7041_v47  ;;  %6138 = vmatmul.msk.f32.gmra.mxu0 %vm809_vm11, %v6798_v5 }
 0x169   : > { %1364 = vmatpush.msra.mxu2 %v1355_v14  ;;  %2088 = vmatpush.msrb.mxu0 %v2067_v15 }
 0x16b   : > { %1365 = vmatpush.msra.mxu2 %v1354_v16  ;;  %v2066_v16 = vld [vmem:[#allocation2 + $0x500] sm:$0xff] }
 0x16c   : > { %2089 = vmatpush.msrb.mxu0 %v2066_v16  ;;  %v393_v16 = vld [vmem:[%s7155_s29 + $0x28] sm:$0xff] }
 0x16d   : > { %1366 = vmatpush.msra.mxu2 %v1353_v17  ;;  %v7079_v36 = vpop.f32.mrf.mxu0  ;;  %v2065_v17 = vld [vmem:[#allocation2 + $0x4f8] sm:$0xff] }
 0x16e   : > { %9322 = vst [vmem:[#allocation12_spill] sm:$0xff] %v7079_v36  ;;  %v754_v37 = vpop.f32.mrf.mxu3  ;;  %2090 = vmatpush.msrb.mxu0 %v2065_v17  ;;  %v425_v17 = vcvt.s32.f32 %v393_v16 }
 0x16f   : > { %1367 = vmatpush.msra.mxu2 %v1352_v18  ;;  %vm810_vm12 = vcmp.eq.f32.partialorder %v754_v37, %v6977_v13  ;;  %v2064_v18 = vld [vmem:[#allocation2 + $0x4f0] sm:$0xff]  ;;  %v421_v37 = vcvt.s32.f32 %v389_v33 }
 0x170   : > { %6139 = vmatmul.msk.f32.gmra.mxu0 %vm810_vm12, %v6798_v5 }
 0x171   : > { %1368 = vmatpush.msra.mxu2 %v1351_v20  ;;  %2091 = vmatpush.msrb.mxu0 %v2064_v18 }
 0x173   : > { %1369 = vmatpush.msra.mxu2 %v1350_v22  ;;  %v2063_v22 = vld [vmem:[#allocation2 + $0x4e8] sm:$0xff] }
 0x174   : > { %2092 = vmatpush.msrb.mxu0 %v2063_v22 }
 0x175   : > { %1370 = vmatpush.msra.mxu2 %v1349_v24  ;;  %v7084_v38 = vpop.f32.mrf.mxu0  ;;  %v1014_v24 = vld [vmem:[#allocation2 + $0x100] sm:$0xf] }
 0x176   : > { %9323 = vst [vmem:[#allocation13_spill] sm:$0xff] %v7084_v38  ;;  %v757_v39 = vpop.f32.mrf.mxu3  ;;  %2093 = vmatpush.msrb.mxu0 %v2062_v23  ;;  %6150 = vmatpush.msk.msrb.mxu1 %vm462_vm0, %v1014_v24  ;;  %v394_v24 = vld [vmem:[%s7155_s29 + $0x30] sm:$0xff] }
 0x177   : > { %1371 = vmatpush.msra.mxu2 %v1348_v25  ;;  %vm811_vm13 = vcmp.eq.f32.partialorder %v757_v39, %v6977_v13 }
 0x178   : > { %6140 = vmatmul.msk.f32.gmra.mxu0 %vm811_vm13, %v6798_v5 }
 0x179   : > { %1372 = vmatpush.msra.mxu2 %v1347_v27 }
 0x17b   : > { %1373 = vmatpush.msra.mxu2 %v1346_v29  ;;  %v388_v29 = vld [vmem:[%s7155_s29] sm:$0xff] }
 0x17d   : > { %1374 = vmatpush.msra.mxu2 %v1345_v30  ;;  %v7089_v41 = vpop.f32.mrf.mxu0  ;;  %v420_v30 = vcvt.s32.f32 %v388_v29 }
 0x17e   : > { %9324 = vst [vmem:[#allocation14_spill] sm:$0xff] %v7089_v41  ;;  %v760_v42 = vpop.f32.mrf.mxu3 }
 0x17f   : > { %1375 = vmatpush.msra.mxu2 %v1344_v31  ;;  %vm812_vm14 = vcmp.eq.f32.partialorder %v760_v42, %v6977_v13  ;;  %6151 = vmatmul.msk.f32.vlgmr.msrb.gmra.mxu1 %vm455_vm1, %v420_v30  ;;  %v426_v30 = vcvt.s32.f32 %v394_v24 }
 0x180   : > { %1376 = vmatmul.f32.vlgmr.msra.gmra.mxu2 %v7056_v4  ;;  %6141 = vmatmul.msk.f32.gmra.mxu0 %vm812_vm14, %v6798_v5 }
 0x185   : > { %v7094_v43 = vpop.f32.mrf.mxu0 }
 0x186   : > { %9325 = vst [vmem:[#allocation15_spill] sm:$0xff] %v7094_v43  ;;  %v763_v44 = vpop.f32.mrf.mxu3 }
 0x187   : > { %vm813_vm15 = vcmp.eq.f32.partialorder %v763_v44, %v6977_v13  ;;  %6152 = vmatmul.msk.f32.gmra.mxu1 %vm455_vm1, %v421_v37 }
 0x188   : > { %1379 = vmatmul.f32.gmra.mxu2 %v7061_v12  ;;  %6142 = vmatmul.msk.f32.gmra.mxu0 %vm813_vm15, %v6798_v5 }
 0x18d   : > { %v7099_v46 = vpop.f32.mrf.mxu0 }
 0x18e   : > { %9326 = vst [vmem:[#allocation16_spill] sm:$0xff] %v7099_v46  ;;  %v766_v48 = vpop.f32.mrf.mxu3 }
 0x18f   : > { %vm814_vm2 = vcmp.eq.f32.partialorder %v766_v48, %v6977_v13  ;;  %v422_v48 = vcvt.s32.f32 %v390_v45 }
 0x190   : > { %1382 = vmatmul.f32.gmra.mxu2 %v7066_v19  ;;  %6143 = vmatmul.msk.f32.gmra.mxu0 %vm814_vm2, %v6798_v5 }
 0x191   : > { %6153 = vmatmul.msk.f32.gmra.mxu1 %vm455_vm1, %v422_v48 }
 0x195   : > { %v7104_v49 = vpop.f32.mrf.mxu0 }
 0x196   : > { %9327 = vst [vmem:[#allocation17_spill] sm:$0xff] %v7104_v49  ;;  %v769_v50 = vpop.f32.mrf.mxu3 }
 0x197   : > { %vm815_vm3 = vcmp.eq.f32.partialorder %v769_v50, %v6977_v13 }
 0x198   : > { %1385 = vmatmul.f32.gmra.mxu2 %v7070_v26  ;;  %6144 = vmatmul.msk.f32.gmra.mxu0 %vm815_vm3, %v6798_v5 }
 0x19d   : > { %v7109_v52 = vpop.f32.mrf.mxu0 }
 0x19e   : > { %9328 = vst [vmem:[#allocation18_spill] sm:$0xff] %v7109_v52  ;;  %v772_v53 = vpop.f32.mrf.mxu3 }
 0x19f   : > { %vm816_vm4 = vcmp.eq.f32.partialorder %v772_v53, %v6977_v13 }
 0x1a0   : > { %1388 = vmatmul.f32.gmra.mxu2 %v7074_v32  ;;  %6145 = vmatmul.msk.f32.gmra.mxu0 %vm816_vm4, %v6798_v5 }
 0x1a5   : > { %v7114_v54 = vpop.f32.mrf.mxu0 }
 0x1a6   : > { %9329 = vst [vmem:[#allocation19_spill] sm:$0xff] %v7114_v54  ;;  %v775_v55 = vpop.f32.mrf.mxu3 }
 0x1a7   : > { %vm817_vm5 = vcmp.eq.f32.partialorder %v775_v55, %v6977_v13 }
 0x1a8   : > { %1391 = vmatmul.f32.gmra.mxu2 %v7079_v36  ;;  %6146 = vmatmul.msk.f32.gmra.mxu0 %vm817_vm5, %v6798_v5 }
 0x1ad   : > { %v7119_v58 = vpop.f32.mrf.mxu0 }
 0x1ae   : > { %9330 = vst [vmem:[#allocation20_spill] sm:$0xff] %v7119_v58  ;;  %v778_v59 = vpop.f32.mrf.mxu3 }
 0x1af   : > { %vm818_vm6 = vcmp.eq.f32.partialorder %v778_v59, %v6977_v13  ;;  %v423_v59 = vcvt.s32.f32 %v391_v57 }
 0x1b0   : > { %1394 = vmatmul.f32.gmra.mxu2 %v7084_v38  ;;  %6147 = vmatmul.msk.f32.gmra.mxu0 %vm818_vm6, %v6798_v5 }
 0x1b1   : > { %6154 = vmatmul.msk.f32.gmra.mxu1 %vm455_vm1, %v423_v59 }
 0x1b5   : > { %v7126_v1 = vpop.f32.mrf.mxu0 }
 0x1b6   : > { %9331 = vst [vmem:[#allocation21_spill] sm:$0xff] %v7126_v1  ;;  %v781_v2 = vpop.f32.mrf.mxu3 }
 0x1b7   : > { %vm819_vm7 = vcmp.eq.f32.partialorder %v781_v2, %v6977_v13 }
 0x1b8   : > { %1397 = vmatmul.f32.gmra.mxu2 %v7089_v41  ;;  %6148 = vmatmul.msk.f32.gmra.mxu0 %vm819_vm7, %v6798_v5 }
 0x1b9   : > { %6155 = vmatmul.msk.f32.gmra.mxu1 %vm455_vm1, %v424_v6 }
 0x1bd   : > { %v7133_v11 = vpop.f32.mrf.mxu0 }
 0x1be   : > { %9332 = vst [vmem:[#allocation22_spill] sm:$0xff] %v7133_v11  ;;  %v784_v14 = vpop.f32.mrf.mxu3 }
 0x1bf   : > { %vm820_vm8 = vcmp.eq.f32.partialorder %v784_v14, %v6977_v13  ;;  %v2061_v13 = vld [vmem:[#allocation2 + $0x4d8] sm:$0xff] }
 0x1c0   : > { %1400 = vmatmul.f32.gmra.mxu2 %v7094_v43  ;;  %6149 = vmatmul.msk.f32.gmra.mxu0 %vm820_vm8, %v6798_v5 }
 0x1c1   : > { %2094 = vmatpush.msrb.mxu0 %v2061_v13  ;;  %6156 = vmatmul.msk.f32.gmra.mxu1 %vm455_vm1, %v425_v17  ;;  %v398_v17 = vld [vmem:[%s7155_s29 + $0x50] sm:$0xff] }
 0x1c3   : > { %v7122_v62 = vpop.f32.mrf.mxu2 }
 0x1c5   : > { %v7140_v21 = vpop.f32.mrf.mxu0 }
 0x1c6   : > { %9333 = vst [vmem:[#allocation23_spill] sm:$0xff] %v7140_v21 }
 0x1c8   : > { %1403 = vmatmul.f32.gmra.mxu2 %v7099_v46 }
 0x1c9   : > { %6157 = vmatmul.msk.f32.gmra.mxu1 %vm455_vm1, %v426_v30 }
 0x1cb   : > { %v7131_v9 = vpop.f32.mrf.mxu2 }
 0x1cd   : > { %v7147_v25 = vpop.f32.mrf.mxu0 }
 0x1ce   : > { %9334 = vst [vmem:[#allocation24_spill] sm:$0xff] %v7147_v25 }
 0x1d0   : > { %1406 = vmatmul.f32.gmra.mxu2 %v7104_v49 }
 0x1d3   : > { %v7138_v20 = vpop.f32.mrf.mxu2 }
 0x1d4   : > { %v1489_v39 = vperm.slane %v7138_v20, 0  ;;  %v1475_v53 = vrot.slane %v7138_v20, 1  ;;  %v1476_v8 = vrot.slane %v7138_v20, 2  ;;  %v1477_v37 = vrot.slane %v7138_v20, 3 }
 0x1d5   : > { %v7159_v28 = vpop.f32.mrf.mxu0 }
 0x1d6   : > { %9335 = vst [vmem:[#allocation25_spill] sm:$0xff] %v7159_v28  ;;  %v1521_v40 = vmul.f32 %v1489_v39, %v7122_v62  ;;  %v1522_v51 = vmul.f32 %v1489_v39, %v7131_v9  ;;  %v1490_v60 = vperm.slane %v1475_v53, 0  ;;  %v1491_v18 = vperm.slane %v1476_v8, 0 }
 0x1d8   : > { %1409 = vmatmul.f32.gmra.mxu2 %v7109_v52  ;;  %v1523_v63 = vmul.f32 %v1490_v60, %v7122_v62  ;;  %v1524_v7 = vmul.f32 %v1490_v60, %v7131_v9  ;;  %v1525_v22 = vmul.f32 %v1491_v18, %v7122_v62  ;;  %v1526_v33 = vmul.f32 %v1491_v18, %v7131_v9  ;;  %v2022_v52 = vld [vmem:[#allocation2 + $0x460] sm:$0xff] }
 0x1d9   : > { %v430_v18 = vcvt.s32.f32 %v398_v17 }
 0x1db   : > { %v7143_v5 = vpop.f32.mrf.mxu2 }
 0x1dd   : > { %v7167_v34 = vpop.f32.mrf.mxu0 }
 0x1de   : > { %9336 = vst [vmem:[#allocation26_spill] sm:$0xff] %v7167_v34 }
 0x1e0   : > { %1412 = vmatmul.f32.gmra.mxu2 %v7114_v54 }
 0x1e3   : > { %v7157_v27 = vpop.f32.mrf.mxu2 }
 0x1e4   : > { %v1882_v26 = vrot.slane %v7157_v27, 7 }
 0x1e5   : > { %v7174_v50 = vpop.f32.mrf.mxu0 }
 0x1e6   : > { %9337 = vst [vmem:[#allocation27_spill] sm:$0xff] %v7174_v50 }
 0x1e8   : > { %1415 = vmatmul.f32.gmra.mxu2 %v7119_v58 }
 0x1eb   : > { %v7164_v31 = vpop.f32.mrf.mxu2 }
 0x1ed   : > { %v7183_v61 = vpop.f32.mrf.mxu0 }
 0x1ee   : > { %9338 = vst [vmem:[#allocation28_spill] sm:$0xff] %v7183_v61 }
 0x1f0   : > { %1418 = vmatmul.f32.gmra.mxu2 %v7126_v1 }
 0x1f5   : > { %v7191_v14 = vpop.f32.mrf.mxu0 }
 0x1f6   : > { %9339 = vst [vmem:[#allocation29_spill] sm:$0xff] %v7191_v14 }
 0x1f8   : > { %1421 = vmatmul.f32.gmra.mxu2 %v7133_v11  ;;  %v2023_v11 = vld [vmem:[#allocation2 + $0x468] sm:$0xff] }
 0x1fd   : > { %v7198_v29 = vpop.f32.mrf.mxu0 }
 0x1fe   : > { %9340 = vst [vmem:[#allocation30_spill] sm:$0xff] %v7198_v29 }
 0x200   : > { %1424 = vmatmul.f32.gmra.mxu2 %v7140_v21 }
 0x203   : > { %v1377_v42 = vpop.f32.mrf.mxu2 }
 0x204   : > { %v1553_v44 = vmul.f32 %v1521_v40, %v1377_v42  ;;  %v395_v42 = vld [vmem:[%s7155_s29 + $0x38] sm:$0xff] }
 0x205   : > { %v427_v45 = vcvt.s32.f32 %v395_v42  ;;  %v7205_v48 = vpop.f32.mrf.mxu0 }
 0x206   : > { %1617 = vmatmul.f32.vlgmr.msra.gmra.mxu3 %v1553_v44  ;;  %2095 = vmatmul.f32.vlgmr.msrb.gmra.mxu0 %v1553_v44  ;;  %v1492_v44 = vperm.slane %v1477_v37, 0  ;;  %9341 = vst [vmem:[#allocation31_spill] sm:$0xff] %v7205_v48  ;;  %v399_v37 = vld [vmem:[%s7155_s29 + $0x58] sm:$0xff] }
 0x207   : > { %6158 = vmatmul.msk.f32.gmra.mxu1 %vm455_vm1, %v427_v45  ;;  %v400_v45 = vld [vmem:[%s7155_s29 + $0x60] sm:$0xff] }
 0x208   : > { %1427 = vmatmul.f32.gmra.mxu2 %v7147_v25  ;;  %v1528_v60 = vmul.f32 %v1492_v44, %v7131_v9 }
 0x20b   : > { %v1380_v55 = vpop.f32.mrf.mxu2 }
 0x20c   : > { %v1554_v56 = vmul.f32 %v1522_v51, %v1380_v55  ;;  %v1527_v51 = vmul.f32 %v1492_v44, %v7122_v62 }
 0x20d   : > { %v7213_v59 = vpop.f32.mrf.mxu0 }
 0x20e   : > { %1620 = vmatmul.f32.gmra.mxu3 %v1554_v56  ;;  %2098 = vmatmul.f32.gmra.mxu0 %v1554_v56  ;;  %v396_v56 = vld [vmem:[%s7155_s29 + $0x40] sm:$0xff]  ;;  %9342 = vst [vmem:[#allocation32_spill] sm:$0xff] %v7213_v59 }
 0x20f   : > { %v428_v57 = vcvt.s32.f32 %v396_v56  ;;  %v1480_v56 = vrot.slane %v7138_v20, 6 }
 0x210   : > { %1430 = vmatmul.f32.gmra.mxu2 %v7159_v28  ;;  %v2024_v28 = vld [vmem:[#allocation2 + $0x470] sm:$0xff] }
 0x211   : > { %6159 = vmatmul.msk.f32.gmra.mxu1 %vm455_vm1, %v428_v57 }
 0x213   : > { %v1383_v0 = vpop.f32.mrf.mxu2 }
 0x214   : > { %v1555_v2 = vmul.f32 %v1523_v63, %v1383_v0  ;;  %v1478_v63 = vrot.slane %v7138_v20, 4 }
 0x216   : > { %1623 = vmatmul.f32.gmra.mxu3 %v1555_v2  ;;  %2101 = vmatmul.f32.gmra.mxu0 %v1555_v2  ;;  %v1493_v6 = vperm.slane %v1478_v63, 0  ;;  %v1495_v63 = vperm.slane %v1480_v56, 0 }
 0x218   : > { %1433 = vmatmul.f32.gmra.mxu2 %v7167_v34  ;;  %v1529_v8 = vmul.f32 %v1493_v6, %v7122_v62  ;;  %v1534_v17 = vmul.f32 %v1495_v63, %v7131_v9 }
 0x21b   : > { %v1386_v10 = vpop.f32.mrf.mxu2 }
 0x21c   : > { %v1556_v15 = vmul.f32 %v1524_v7, %v1386_v10  ;;  %v429_v7 = vcvt.s32.f32 %v397_v3 }
 0x21e   : > { %1626 = vmatmul.f32.gmra.mxu3 %v1556_v15  ;;  %2104 = vmatmul.f32.gmra.mxu0 %v1556_v15  ;;  %v7221_v15 = vpop.f32.mrf.mxu0 }
 0x21f   : > { %6160 = vmatmul.msk.f32.gmra.mxu1 %vm455_vm1, %v429_v7  ;;  %9343 = vst [vmem:[#allocation33_spill] sm:$0xff] %v7221_v15 }
 0x220   : > { %1436 = vmatmul.f32.gmra.mxu2 %v7174_v50 }
 0x223   : > { %v1389_v23 = vpop.f32.mrf.mxu2 }
 0x224   : > { %v1557_v13 = vmul.f32 %v1525_v22, %v1389_v23  ;;  %v1530_v22 = vmul.f32 %v1493_v6, %v7131_v9  ;;  %v1479_v23 = vrot.slane %v7138_v20, 5  ;;  %v1533_v6 = vmul.f32 %v1495_v63, %v7122_v62 }
 0x225   : > { %v1497_v63 = vperm.slane %v7143_v5, 0 }
 0x226   : > { %1629 = vmatmul.f32.gmra.mxu3 %v1557_v13  ;;  %2107 = vmatmul.f32.gmra.mxu0 %v1557_v13  ;;  %v7228_v30 = vpop.f32.mrf.mxu0 }
 0x227   : > { %6161 = vmatmul.msk.f32.gmra.mxu1 %vm455_vm1, %v430_v18  ;;  %9344 = vst [vmem:[#allocation34_spill] sm:$0xff] %v7228_v30  ;;  %v1481_v18 = vrot.slane %v7138_v20, 7  ;;  %v7260_v20 = vpop.f32.mrf.mxu1 }
 0x228   : > { %1439 = vmatmul.f32.gmra.mxu2 %v7183_v61  ;;  %9349 = vst [vmem:[#allocation39_spill] sm:$0xff] %v7260_v20 }
 0x22b   : > { %v1392_v39 = vpop.f32.mrf.mxu2 }
 0x22c   : > { %v1558_v40 = vmul.f32 %v1526_v33, %v1392_v39  ;;  %v1494_v33 = vperm.slane %v1479_v23, 0  ;;  %v431_v39 = vcvt.s32.f32 %v399_v37 }
 0x22e   : > { %1632 = vmatmul.f32.gmra.mxu3 %v1558_v40  ;;  %2110 = vmatmul.f32.gmra.mxu0 %v1558_v40  ;;  %v1531_v40 = vmul.f32 %v1494_v33, %v7122_v62 }
 0x22f   : > { %6162 = vmatmul.msk.f32.gmra.mxu1 %vm455_vm1, %v431_v39 }
 0x230   : > { %1442 = vmatmul.f32.gmra.mxu2 %v7191_v14 }
 0x233   : > { %v1395_v53 = vpop.f32.mrf.mxu2 }
 0x234   : > { %v1559_v55 = vmul.f32 %v1527_v51, %v1395_v53  ;;  %v7235_v51 = vpop.f32.mrf.mxu0  ;;  %v432_v53 = vcvt.s32.f32 %v400_v45  ;;  %v2035_v45 = vld [vmem:[#allocation2 + $0x4c8] sm:$0xff] }
 0x235   : > { %9345 = vst [vmem:[#allocation35_spill] sm:$0xff] %v7235_v51  ;;  %2038 = vmatpush.msra.mxu1 %v2035_v45  ;;  %v407_v45 = vld [vmem:[%s7155_s29 + $0x98] sm:$0xff] }
 0x236   : > { %1635 = vmatmul.f32.gmra.mxu3 %v1559_v55  ;;  %2113 = vmatmul.f32.gmra.mxu0 %v1559_v55  ;;  %v1532_v55 = vmul.f32 %v1494_v33, %v7131_v9  ;;  %v403_v33 = vld [vmem:[%s7155_s29 + $0x78] sm:$0xff] }
 0x237   : > { %6163 = vmatmul.msk.f32.gmra.mxu1 %vm455_vm1, %v432_v53  ;;  %v435_v37 = vcvt.s32.f32 %v403_v33  ;;  %v404_v53 = vld [vmem:[%s7155_s29 + $0x80] sm:$0xff]  ;;  %v1482_v33 = vrot.slane %v7143_v5, 1 }
 0x238   : > { %1445 = vmatmul.f32.gmra.mxu2 %v7198_v29  ;;  %v419_v29 = vld [vmem:[%s7155_s29 + $0xf8] sm:$0xff] }
 0x239   : > { %v451_v61 = vcvt.s32.f32 %v419_v29 }
 0x23b   : > { %v1398_v0 = vpop.f32.mrf.mxu2 }
 0x23c   : > { %v1560_v2 = vmul.f32 %v1528_v60, %v1398_v0  ;;  %v401_v0 = vld [vmem:[%s7155_s29 + $0x68] sm:$0xff]  ;;  %v7243_v3 = vpop.f32.mrf.mxu0 }
 0x23d   : > { %9346 = vst [vmem:[#allocation36_spill] sm:$0xff] %v7243_v3 }
 0x23e   : > { %1638 = vmatmul.f32.gmra.mxu3 %v1560_v2  ;;  %2116 = vmatmul.f32.gmra.mxu0 %v1560_v2  ;;  %v433_v2 = vcvt.s32.f32 %v401_v0  ;;  %v7267_v0 = vpop.f32.mrf.mxu1 }
 0x23f   : > { %9350 = vst [vmem:[#allocation40_spill] sm:$0xff] %v7267_v0 }
 0x240   : > { %1448 = vmatmul.f32.gmra.mxu2 %v7205_v48  ;;  %6164 = vmatmul.msk.f32.gmra.mxu1 %vm455_vm1, %v433_v2  ;;  %v405_v2 = vld [vmem:[%s7155_s29 + $0x88] sm:$0xff] }
 0x243   : > { %v1401_v10 = vpop.f32.mrf.mxu2 }
 0x244   : > { %v1561_v16 = vmul.f32 %v1529_v8, %v1401_v10  ;;  %v402_v10 = vld [vmem:[%s7155_s29 + $0x70] sm:$0xff]  ;;  %v7252_v23 = vpop.f32.mrf.mxu0 }
 0x245   : > { %9347 = vst [vmem:[#allocation37_spill] sm:$0xff] %v7252_v23 }
 0x246   : > { %1641 = vmatmul.f32.gmra.mxu3 %v1561_v16  ;;  %2119 = vmatmul.f32.gmra.mxu0 %v1561_v16  ;;  %v434_v16 = vcvt.s32.f32 %v402_v10 }
 0x248   : > { %1451 = vmatmul.f32.gmra.mxu2 %v7213_v59  ;;  %6165 = vmatmul.msk.f32.gmra.mxu1 %vm455_vm1, %v434_v16  ;;  %v7272_v16 = vpop.f32.mrf.mxu1  ;;  %v1488_v59 = vrot.slane %v7143_v5, 7 }
 0x249   : > { %9351 = vst [vmem:[#allocation41_spill] sm:$0xff] %v7272_v16 }
 0x24b   : > { %v1404_v13 = vpop.f32.mrf.mxu2 }
 0x24c   : > { %v1562_v24 = vmul.f32 %v1530_v22, %v1404_v13 }
 0x24e   : > { %1644 = vmatmul.f32.gmra.mxu3 %v1562_v24  ;;  %2122 = vmatmul.f32.gmra.mxu0 %v1562_v24  ;;  %v1496_v24 = vperm.slane %v1481_v18, 0 }
 0x250   : > { %1454 = vmatmul.f32.gmra.mxu2 %v7221_v15  ;;  %6166 = vmatmul.msk.f32.gmra.mxu1 %vm455_vm1, %v435_v37  ;;  %v1535_v39 = vmul.f32 %v1496_v24, %v7122_v62  ;;  %v1536_v56 = vmul.f32 %v1496_v24, %v7131_v9  ;;  %v1538_v24 = vmul.f32 %v1497_v63, %v7131_v9 }
 0x253   : > { %v1407_v42 = vpop.f32.mrf.mxu2 }
 0x254   : > { %v1563_v44 = vmul.f32 %v1531_v40, %v1407_v42 }
 0x256   : > { %1647 = vmatmul.f32.gmra.mxu3 %v1563_v44  ;;  %2125 = vmatmul.f32.gmra.mxu0 %v1563_v44  ;;  %v7258_v44 = vpop.f32.mrf.mxu0 }
 0x257   : > { %9348 = vst [vmem:[#allocation38_spill] sm:$0xff] %v7258_v44 }
 0x258   : > { %1457 = vmatmul.f32.gmra.mxu2 %v7228_v30 }
 0x25b   : > { %v1410_v57 = vpop.f32.mrf.mxu2 }
 0x25c   : > { %v1564_v60 = vmul.f32 %v1532_v55, %v1410_v57  ;;  %v436_v55 = vcvt.s32.f32 %v404_v53 }
 0x25e   : > { %1650 = vmatmul.f32.gmra.mxu3 %v1564_v60  ;;  %2128 = vmatmul.f32.gmra.mxu0 %v1564_v60 }
 0x25f   : > { %6167 = vmatmul.msk.f32.gmra.mxu1 %vm455_vm1, %v436_v55  ;;  %v439_v55 = vcvt.s32.f32 %v407_v45 }
 0x260   : > { %1460 = vmatmul.f32.gmra.mxu2 %v7235_v51  ;;  %v417_v51 = vld [vmem:[%s7155_s29 + $0xe8] sm:$0xff] }
 0x261   : > { %v449_v30 = vcvt.s32.f32 %v417_v51 }
 0x263   : > { %v1413_v7 = vpop.f32.mrf.mxu2 }
 0x264   : > { %v1565_v8 = vmul.f32 %v1533_v6, %v1413_v7  ;;  %v437_v6 = vcvt.s32.f32 %v405_v2  ;;  %v1537_v7 = vmul.f32 %v1497_v63, %v7122_v62 }
 0x266   : > { %1653 = vmatmul.f32.gmra.mxu3 %v1565_v8  ;;  %2131 = vmatmul.f32.gmra.mxu0 %v1565_v8 }
 0x267   : > { %6168 = vmatmul.msk.f32.gmra.mxu1 %vm455_vm1, %v437_v6 }
 0x268   : > { %1463 = vmatmul.f32.gmra.mxu2 %v7243_v3 }
 0x26b   : > { %v1416_v22 = vpop.f32.mrf.mxu2 }
 0x26c   : > { %v1566_v13 = vmul.f32 %v1534_v17, %v1416_v22  ;;  %v406_v17 = vld [vmem:[%s7155_s29 + $0x90] sm:$0xff]  ;;  %v2034_v22 = vld [vmem:[#allocation2 + $0x4c0] sm:$0xff] }
 0x26d   : > { %2039 = vmatpush.msra.mxu1 %v2034_v22 }
 0x26e   : > { %1656 = vmatmul.f32.gmra.mxu3 %v1566_v13  ;;  %2134 = vmatmul.f32.gmra.mxu0 %v1566_v13  ;;  %v438_v13 = vcvt.s32.f32 %v406_v17  ;;  %v2033_v17 = vld [vmem:[#allocation2 + $0x4b8] sm:$0xff] }
 0x26f   : > { %2040 = vmatpush.msra.mxu1 %v2033_v17 }
 0x270   : > { %1466 = vmatmul.f32.gmra.mxu2 %v7252_v23  ;;  %6169 = vmatmul.msk.f32.gmra.mxu1 %vm455_vm1, %v438_v13 }
 0x273   : > { %v1419_v40 = vpop.f32.mrf.mxu2 }
 0x274   : > { %v1567_v42 = vmul.f32 %v1535_v39, %v1419_v40  ;;  %v1498_v40 = vperm.slane %v1482_v33, 0 }
 0x276   : > { %1659 = vmatmul.f32.gmra.mxu3 %v1567_v42  ;;  %2137 = vmatmul.f32.gmra.mxu0 %v1567_v42  ;;  %v7278_v42 = vpop.f32.mrf.mxu1 }
 0x277   : > { %9352 = vst [vmem:[#allocation42_spill] sm:$0xff] %v7278_v42 }
 0x278   : > { %1469 = vmatmul.f32.gmra.mxu2 %v7258_v44  ;;  %6170 = vmatmul.msk.f32.gmra.mxu1 %vm455_vm1, %v439_v55  ;;  %v2032_v44 = vld [vmem:[#allocation2 + $0x4b0] sm:$0xff] }
 0x279   : > { %2041 = vmatpush.msra.mxu1 %v2032_v44 }
 0x27b   : > { %v1422_v57 = vpop.f32.mrf.mxu2 }
 0x27c   : > { %v1568_v60 = vmul.f32 %v1536_v56, %v1422_v57  ;;  %v1539_v57 = vmul.f32 %v1498_v40, %v7122_v62 }
 0x27e   : > { %1662 = vmatmul.f32.gmra.mxu3 %v1568_v60  ;;  %2140 = vmatmul.f32.gmra.mxu0 %v1568_v60  ;;  %v7283_v6 = vpop.f32.mrf.mxu1 }
 0x27f   : > { %9353 = vst [vmem:[#allocation43_spill] sm:$0xff] %v7283_v6 }
 0x283   : > { %v1425_v8 = vpop.f32.mrf.mxu2 }
 0x284   : > { %v1569_v10 = vmul.f32 %v1537_v7, %v1425_v8  ;;  %v408_v7 = vld [vmem:[%s7155_s29 + $0xa0] sm:$0xff] }
 0x285   : > { %v440_v22 = vcvt.s32.f32 %v408_v7 }
 0x286   : > { %1665 = vmatmul.f32.gmra.mxu3 %v1569_v10  ;;  %2143 = vmatmul.f32.gmra.mxu0 %v1569_v10  ;;  %v1483_v10 = vrot.slane %v7143_v5, 2 }
 0x287   : > { %6171 = vmatmul.msk.f32.gmra.mxu1 %vm455_vm1, %v440_v22 }
 0x288   : > { %v1499_v55 = vperm.slane %v1483_v10, 0 }
 0x289   : > { %v1618_v18 = vpop.f32.mrf.mxu3 }
 0x28a   : > { %v6183_v56 = vclamps-f32 %v1618_v18, 5.0  ;;  %v1541_v7 = vmul.f32 %v1499_v55, %v7122_v62 }
 0x28b   : > { %v1428_v37 = vpop.f32.mrf.mxu2 }
 0x28c   : > { %v1570_v39 = vmul.f32 %v1538_v24, %v1428_v37  ;;  %v1778_v2 = vmul.f32 1.442695, %v6183_v56  ;;  %v1540_v24 = vmul.f32 %v1498_v40, %v7131_v9  ;;  %v7289_v56 = vpop.f32.mrf.mxu1 }
 0x28d   : > { %9354 = vst [vmem:[#allocation44_spill] sm:$0xff] %v7289_v56 }
 0x28e   : > { %1668 = vmatmul.f32.gmra.mxu3 %v1570_v39  ;;  %2146 = vmatmul.f32.gmra.mxu0 %v1570_v39  ;;  %6334 = vpow2.f32 %v1778_v2 }
 0x291   : > { %v1621_v53 = vpop.f32.mrf.mxu3 }
 0x292   : > { %v6184_v18 = vclamps-f32 %v1621_v53, 5.0  ;;  %v1876_v53 = vrot.slane %v7157_v27, 1 }
 0x293   : > { %v1431_v60 = vpop.f32.mrf.mxu2 }
 0x294   : > { %v1571_v63 = vmul.f32 %v1539_v57, %v1431_v60  ;;  %v1780_v45 = vmul.f32 1.442695, %v6184_v18  ;;  %v6335_v57 = vpop.eup %6334  ;;  %v409_v60 = vld [vmem:[%s7155_s29 + $0xa8] sm:$0xff] }
 0x295   : > { %v441_v2 = vcvt.s32.f32 %v409_v60 }
 0x296   : > { %1671 = vmatmul.f32.gmra.mxu3 %v1571_v63  ;;  %2149 = vmatmul.f32.gmra.mxu0 %v1571_v63 }
 0x297   : > { %6172 = vmatmul.msk.f32.gmra.mxu1 %vm455_vm1, %v441_v2 }
 0x299   : > { %v1624_v8 = vpop.f32.mrf.mxu3 }
 0x29a   : > { %v6185_v13 = vclamps-f32 %v1624_v8, 5.0  ;;  %v1842_v8 = vmul.f32 %v6335_v57, %v7260_v20 }
 0x29b   : > { %v1434_v33 = vpop.f32.mrf.mxu2 }
 0x29c   : > { %v1782_v37 = vmul.f32 1.442695, %v6185_v13  ;;  %v1572_v39 = vmul.f32 %v1540_v24, %v1434_v33  ;;  %v1890_v13 = vperm.slane %v7157_v27, 0  ;;  %v1891_v33 = vperm.slane %v1876_v53, 0 }
 0x29e   : > { %6336 = vpow2.f32 %v1782_v37  ;;  %1674 = vmatmul.f32.gmra.mxu3 %v1572_v39  ;;  %2152 = vmatmul.f32.gmra.mxu0 %v1572_v39  ;;  %v7298_v37 = vpop.f32.mrf.mxu1  ;;  %v1922_v39 = vmul.f32 %v1890_v13, %v1842_v8 }
 0x29f   : > { %6338 = vpow2.f32 %v1780_v45  ;;  %9355 = vst [vmem:[#allocation45_spill] sm:$0xff] %v7298_v37 }
 0x2a1   : > { %v1627_v63 = vpop.f32.mrf.mxu3 }
 0x2a2   : > { %v6186_v40 = vclamps-f32 %v1627_v63, 5.0  ;;  %v410_v63 = vld [vmem:[%s7155_s29 + $0xb0] sm:$0xff] }
 0x2a3   : > { %v1437_v17 = vpop.f32.mrf.mxu2 }
 0x2a4   : > { %v6337_v22 = vpop.eup %6336  ;;  %v1784_v10 = vmul.f32 1.442695, %v6186_v40  ;;  %v1573_v18 = vmul.f32 %v1541_v7, %v1437_v17  ;;  %v442_v40 = vcvt.s32.f32 %v410_v63  ;;  %v1542_v17 = vmul.f32 %v1499_v55, %v7131_v9 }
 0x2a5   : > { %v1844_v24 = vmul.f32 %v6337_v22, %v7272_v16  ;;  %v6339_v60 = vpop.eup %6338  ;;  %v1484_v22 = vrot.slane %v7143_v5, 3  ;;  %v411_v16 = vld [vmem:[%s7155_s29 + $0xb8] sm:$0xff] }
 0x2a6   : > { %6340 = vpow2.f32 %v1784_v10  ;;  %1677 = vmatmul.f32.gmra.mxu3 %v1573_v18  ;;  %2155 = vmatmul.f32.gmra.mxu0 %v1573_v18  ;;  %v1843_v53 = vmul.f32 %v6339_v60, %v7267_v0  ;;  %v7306_v63 = vpop.f32.mrf.mxu1  ;;  %v1877_v0 = vrot.slane %v7157_v27, 2 }
 0x2a7   : > { %v1924_v45 = vmul.f32 %v1891_v33, %v1844_v24  ;;  %v1984_v57 = vadd.f32 %v1844_v24, %v1842_v8  ;;  %6173 = vmatmul.msk.f32.gmra.mxu1 %vm455_vm1, %v442_v40  ;;  %9356 = vst [vmem:[#allocation46_spill] sm:$0xff] %v7306_v63  ;;  %v443_v40 = vcvt.s32.f32 %v411_v16 }
 0x2a8   : > { %v1923_v55 = vmul.f32 %v1890_v13, %v1843_v53 }
 0x2a9   : > { %v1954_v20 = vadd.f32 %v1924_v45, %v1922_v39  ;;  %v1630_v2 = vpop.f32.mrf.mxu3  ;;  %v1500_v45 = vperm.slane %v1484_v22, 0 }
 0x2aa   : > { %v6187_v7 = vclamps-f32 %v1630_v2, 5.0 }
 0x2ab   : > { %v1440_v10 = vpop.f32.mrf.mxu2 }
 0x2ac   : > { %v6341_v18 = vpop.eup %6340  ;;  %v1786_v8 = vmul.f32 1.442695, %v6187_v7  ;;  %v1574_v24 = vmul.f32 %v1542_v17, %v1440_v10  ;;  %v1543_v7 = vmul.f32 %v1500_v45, %v7122_v62 }
 0x2ad   : > { %v1845_v39 = vmul.f32 %v6341_v18, %v7278_v42 }
 0x2ae   : > { %6342 = vpow2.f32 %v1786_v8  ;;  %1680 = vmatmul.f32.gmra.mxu3 %v1574_v24  ;;  %2158 = vmatmul.f32.gmra.mxu0 %v1574_v24  ;;  %v7315_v24 = vpop.f32.mrf.mxu0 }
 0x2af   : > { %v1925_v2 = vmul.f32 %v1891_v33, %v1845_v39  ;;  %v1999_v44 = vadd.f32 %v1845_v39, %v1843_v53  ;;  %6174 = vmatmul.msk.f32.gmra.mxu1 %vm455_vm1, %v443_v40  ;;  %v1892_v33 = vperm.slane %v1877_v0, 0  ;;  %v7313_v53 = vpop.f32.mrf.mxu1  ;;  %v412_v39 = vld [vmem:[%s7155_s29 + $0xc0] sm:$0xff]  ;;  %v1485_v0 = vrot.slane %v7143_v5, 4 }
 0x2b0   : > { %9357 = vst [vmem:[#allocation47_spill] sm:$0xff] %v7313_v53  ;;  %v444_v40 = vcvt.s32.f32 %v412_v39 }
 0x2b1   : > { %v1969_v23 = vadd.f32 %v1925_v2, %v1923_v55  ;;  %v1633_v60 = vpop.f32.mrf.mxu3 }
 0x2b2   : > { %v6188_v3 = vclamps-f32 %v1633_v60, 5.0  ;;  %v2031_v60 = vld [vmem:[#allocation2 + $0x4a8] sm:$0xff] }
 0x2b3   : > { %v1443_v17 = vpop.f32.mrf.mxu2  ;;  %2042 = vmatpush.msra.mxu1 %v2031_v60  ;;  %v1878_v60 = vrot.slane %v7157_v27, 3 }
 0x2b4   : > { %v6343_v10 = vpop.eup %6342  ;;  %v1788_v22 = vmul.f32 1.442695, %v6188_v3  ;;  %v1575_v18 = vmul.f32 %v1543_v7, %v1443_v17  ;;  %v1544_v3 = vmul.f32 %v1500_v45, %v7131_v9 }
 0x2b5   : > { %v1846_v13 = vmul.f32 %v6343_v10, %v7283_v6 }
 0x2b6   : > { %6344 = vpow2.f32 %v1788_v22  ;;  %1683 = vmatmul.f32.gmra.mxu3 %v1575_v18  ;;  %2161 = vmatmul.f32.gmra.mxu0 %v1575_v18 }
 0x2b7   : > { %v1926_v8 = vmul.f32 %v1892_v33, %v1846_v13  ;;  %v1985_v16 = vadd.f32 %v1984_v57, %v1846_v13  ;;  %6175 = vmatmul.msk.f32.gmra.mxu1 %vm455_vm1, %v444_v40  ;;  %v7322_v18 = vpop.f32.mrf.mxu1  ;;  %v7326_v40 = vpop.f32.mrf.mxu0 }
 0x2b8   : > { %9358 = vst [vmem:[#allocation48_spill] sm:$0xff] %v7322_v18 }
 0x2b9   : > { %v1955_v55 = vadd.f32 %v1954_v20, %v1926_v8  ;;  %v1636_v2 = vpop.f32.mrf.mxu3  ;;  %v1501_v20 = vperm.slane %v1485_v0, 0  ;;  %v413_v8 = vld [vmem:[%s7155_s29 + $0xc8] sm:$0xff]  ;;  %9359 = vst [vmem:[#allocation49_spill] sm:$0xff] %v7326_v40 }
 0x2ba   : > { %v6189_v42 = vclamps-f32 %v1636_v2, 5.0  ;;  %v445_v6 = vcvt.s32.f32 %v413_v8 }
 0x2bb   : > { %v1446_v7 = vpop.f32.mrf.mxu2 }
 0x2bc   : > { %v6345_v17 = vpop.eup %6344  ;;  %v1790_v10 = vmul.f32 1.442695, %v6189_v42  ;;  %v1576_v57 = vmul.f32 %v1544_v3, %v1446_v7  ;;  %v1545_v3 = vmul.f32 %v1501_v20, %v7122_v62 }
 0x2bd   : > { %v1847_v22 = vmul.f32 %v6345_v17, %v7289_v56 }
 0x2be   : > { %6346 = vpow2.f32 %v1790_v10  ;;  %1686 = vmatmul.f32.gmra.mxu3 %v1576_v57  ;;  %2164 = vmatmul.f32.gmra.mxu0 %v1576_v57 }
 0x2bf   : > { %v1927_v13 = vmul.f32 %v1892_v33, %v1847_v22  ;;  %v2000_v45 = vadd.f32 %v1999_v44, %v1847_v22  ;;  %6176 = vmatmul.msk.f32.gmra.mxu1 %vm455_vm1, %v445_v6  ;;  %v1893_v33 = vperm.slane %v1878_v60, 0  ;;  %v2030_v6 = vld [vmem:[#allocation2 + $0x4a0] sm:$0xff]  ;;  %v1486_v60 = vrot.slane %v7143_v5, 5 }
 0x2c0   : > { %2043 = vmatpush.msra.mxu1 %v2030_v6 }
 0x2c1   : > { %v1970_v39 = vadd.f32 %v1969_v23, %v1927_v13  ;;  %v1639_v2 = vpop.f32.mrf.mxu3  ;;  %v7331_v23 = vpop.f32.mrf.mxu1  ;;  %v414_v13 = vld [vmem:[%s7155_s29 + $0xd0] sm:$0xff] }
 0x2c2   : > { %v6190_v42 = vclamps-f32 %v1639_v2, 5.0  ;;  %9360 = vst [vmem:[#allocation50_spill] sm:$0xff] %v7331_v23  ;;  %v446_v56 = vcvt.s32.f32 %v414_v13 }
 0x2c3   : > { %v1449_v7 = vpop.f32.mrf.mxu2 }
 0x2c4   : > { %v6347_v0 = vpop.eup %6346  ;;  %v1792_v17 = vmul.f32 1.442695, %v6190_v42  ;;  %v1577_v10 = vmul.f32 %v1545_v3, %v1449_v7  ;;  %v1546_v42 = vmul.f32 %v1501_v20, %v7131_v9 }
 0x2c5   : > { %v1848_v44 = vmul.f32 %v6347_v0, %v7298_v37  ;;  %v7343_v0 = vpop.f32.mrf.mxu0 }
 0x2c6   : > { %6348 = vpow2.f32 %v1792_v17  ;;  %1689 = vmatmul.f32.gmra.mxu3 %v1577_v10  ;;  %2167 = vmatmul.f32.gmra.mxu0 %v1577_v10  ;;  %9361 = vst [vmem:[#allocation51_spill] sm:$0xff] %v7343_v0  ;;  %v1502_v17 = vperm.slane %v1486_v60, 0  ;;  %v416_v60 = vld [vmem:[%s7155_s29 + $0xe0] sm:$0xff] }
 0x2c7   : > { %v1928_v57 = vmul.f32 %v1893_v33, %v1848_v44  ;;  %v7333_v22 = vadd.f32 %v1985_v16, %v1848_v44  ;;  %6177 = vmatmul.msk.f32.gmra.mxu1 %vm455_vm1, %v446_v56 }
 0x2c8   : > { %v1547_v37 = vmul.f32 %v1502_v17, %v7122_v62 }
 0x2c9   : > { %v7336_v8 = vadd.f32 %v1955_v55, %v1928_v57  ;;  %v7338_v2 = vpop.f32.mrf.mxu3  ;;  %v7346_v10 = vpop.f32.mrf.mxu1  ;;  %v415_v57 = vld [vmem:[%s7155_s29 + $0xd8] sm:$0xff] }
 0x2ca   : > { %9362 = vst [vmem:[#allocation52_spill] sm:$0xff] %v7346_v10  ;;  %v447_v56 = vcvt.s32.f32 %v415_v57  ;;  %v6191_v46 = vclamps-f32 %v7338_v2, 5.0  ;;  %v1880_v2 = vrot.slane %v7157_v27, 5 }
 0x2cb   : > { %v1452_v3 = vpop.f32.mrf.mxu2 }
 0x2cc   : > { %v6349_v7 = vpop.eup %6348  ;;  %v1578_v16 = vmul.f32 %v1546_v42, %v1452_v3  ;;  %v1794_v38 = vmul.f32 1.442695, %v6191_v46 }
 0x2cd   : > { %v1849_v55 = vmul.f32 %v6349_v7, %v7306_v63  ;;  %v7357_v7 = vpop.f32.mrf.mxu0 }
 0x2ce   : > { %1692 = vmatmul.f32.gmra.mxu3 %v1578_v16  ;;  %2170 = vmatmul.f32.gmra.mxu0 %v1578_v16  ;;  %9363 = vst [vmem:[#allocation53_spill] sm:$0xff] %v7357_v7  ;;  %v1548_v16 = vmul.f32 %v1502_v17, %v7131_v9  ;;  %6350 = vpow2.f32 %v1794_v38 }
 0x2cf   : > { %v1929_v44 = vmul.f32 %v1893_v33, %v1849_v55  ;;  %v7348_v20 = vadd.f32 %v2000_v45, %v1849_v55  ;;  %6178 = vmatmul.msk.f32.gmra.mxu1 %vm455_vm1, %v447_v56  ;;  %v1487_v55 = vrot.slane %v7143_v5, 6 }
 0x2d1   : > { %v7351_v13 = vadd.f32 %v1970_v39, %v1929_v44  ;;  %v7353_v6 = vpop.f32.mrf.mxu3  ;;  %v7359_v33 = vpop.f32.mrf.mxu1  ;;  %v2029_v39 = vld [vmem:[#allocation2 + $0x498] sm:$0xff]  ;;  %v448_v44 = vcvt.s32.f32 %v416_v60 }
 0x2d2   : > { %9364 = vst [vmem:[#allocation54_spill] sm:$0xff] %v7359_v33  ;;  %2044 = vmatpush.msra.mxu1 %v2029_v39  ;;  %v6192_v43 = vclamps-f32 %v7353_v6, 5.0 }
 0x2d3   : > { %v1455_v42 = vpop.f32.mrf.mxu2 }
 0x2d4   : > { %v1579_v3 = vmul.f32 %v1547_v37, %v1455_v42  ;;  %v1503_v37 = vperm.slane %v1487_v55, 0  ;;  %v2028_v55 = vld [vmem:[#allocation2 + $0x490] sm:$0xff] }
 0x2d5   : > { %2045 = vmatpush.msra.mxu1 %v2028_v55 }
 0x2d6   : > { %1695 = vmatmul.f32.gmra.mxu3 %v1579_v3  ;;  %2173 = vmatmul.f32.gmra.mxu0 %v1579_v3  ;;  %v7369_v3 = vpop.f32.mrf.mxu0  ;;  %v1549_v17 = vmul.f32 %v1503_v37, %v7122_v62  ;;  %v1550_v15 = vmul.f32 %v1503_v37, %v7131_v9 }
 0x2d7   : > { %6179 = vmatmul.msk.f32.gmra.mxu1 %vm455_vm1, %v448_v44  ;;  %9366 = vst [vmem:[#allocation56_spill] sm:$0xff] %v7369_v3  ;;  %v1881_v3 = vrot.slane %v7157_v27, 6 }
 0x2d9   : > { %v7361_v45 = vpop.f32.mrf.mxu3  ;;  %v7367_v42 = vpop.f32.mrf.mxu1 }
 0x2da   : > { %9365 = vst [vmem:[#allocation55_spill] sm:$0xff] %v7367_v42  ;;  %v6193_v36 = vclamps-f32 %v7361_v45, 5.0 }
 0x2db   : > { %v1458_v57 = vpop.f32.mrf.mxu2 }
 0x2dc   : > { %v1580_v56 = vmul.f32 %v1548_v16, %v1458_v57  ;;  %v418_v57 = vld [vmem:[%s7155_s29 + $0xf0] sm:$0xff]  ;;  %v1798_v32 = vmul.f32 1.442695, %v6193_v36 }
 0x2dd   : > { %v450_v51 = vcvt.s32.f32 %v418_v57 }
 0x2de   : > { %1698 = vmatmul.f32.gmra.mxu3 %v1580_v56  ;;  %2176 = vmatmul.f32.gmra.mxu0 %v1580_v56  ;;  %v7381_v56 = vpop.f32.mrf.mxu0 }
 0x2df   : > { %6180 = vmatmul.msk.f32.gmra.mxu1 %vm455_vm1, %v449_v30  ;;  %9368 = vst [vmem:[#allocation58_spill] sm:$0xff] %v7381_v56  ;;  %v1504_v30 = vperm.slane %v1488_v59, 0  ;;  %v2027_v59 = vld [vmem:[#allocation2 + $0x488] sm:$0xff]  ;;  %v1879_v56 = vrot.slane %v7157_v27, 4  ;;  %v7466_v27 = vperm.slane %v1882_v26, 0 }
 0x2e0   : > { %2046 = vmatpush.msra.mxu1 %v2027_v59  ;;  %v2025_v59 = vld [vmem:[#allocation2 + $0x478] sm:$0xff] }
 0x2e1   : > { %v7371_v63 = vpop.f32.mrf.mxu3  ;;  %v7376_v16 = vpop.f32.mrf.mxu1  ;;  %v1551_v14 = vmul.f32 %v1504_v30, %v7122_v62  ;;  %v1552_v57 = vmul.f32 %v1504_v30, %v7131_v9 }
 0x2e2   : > { %9367 = vst [vmem:[#allocation57_spill] sm:$0xff] %v7376_v16 }
 0x2e3   : > { %v1461_v39 = vpop.f32.mrf.mxu2 }
 0x2e4   : > { %v1581_v60 = vmul.f32 %v1549_v17, %v1461_v39 }
 0x2e6   : > { %1701 = vmatmul.f32.gmra.mxu3 %v1581_v60  ;;  %2179 = vmatmul.f32.gmra.mxu0 %v1581_v60  ;;  %v7392_v50 = vpop.f32.mrf.mxu0 }
 0x2e7   : > { %6181 = vmatmul.msk.f32.gmra.mxu1 %vm455_vm1, %v450_v51  ;;  %9370 = vst [vmem:[#allocation60_spill] sm:$0xff] %v7392_v50  ;;  %v1796_v50 = vmul.f32 1.442695, %v6192_v43 }
 0x2e9   : > { %v7378_v44 = vpop.f32.mrf.mxu3  ;;  %v7386_v60 = vpop.f32.mrf.mxu1  ;;  %6352 = vpow2.f32 %v1796_v50  ;;  %v1894_v50 = vperm.slane %v1879_v56, 0  ;;  %v1883_v56 = vrot.slane %v7164_v31, 1 }
 0x2ea   : > { %9369 = vst [vmem:[#allocation59_spill] sm:$0xff] %v7386_v60  ;;  %v6195_v6 = vclamps-f32 %v7378_v44, 5.0  ;;  %6354 = vpow2.f32 %v1798_v32  ;;  %v7464_v44 = vperm.slane %v1881_v3, 0 }
 0x2eb   : > { %v1464_v17 = vpop.f32.mrf.mxu2 }
 0x2ec   : > { %v1582_v39 = vmul.f32 %v1550_v15, %v1464_v17  ;;  %v1802_v7 = vmul.f32 1.442695, %v6195_v6 }
 0x2ee   : > { %1704 = vmatmul.f32.gmra.mxu3 %v1582_v39  ;;  %2182 = vmatmul.f32.gmra.mxu0 %v1582_v39  ;;  %v7400_v62 = vpop.f32.mrf.mxu0 }
 0x2ef   : > { %6182 = vmatmul.msk.f32.gmra.mxu1 %vm455_vm1, %v451_v61  ;;  %9372 = vst [vmem:[#allocation62_spill] sm:$0xff] %v7400_v62 }
 0x2f1   : > { %v7388_v48 = vpop.f32.mrf.mxu3  ;;  %v7395_v15 = vpop.f32.mrf.mxu1 }
 0x2f2   : > { %9371 = vst [vmem:[#allocation61_spill] sm:$0xff] %v7395_v15  ;;  %v6196_v36 = vclamps-f32 %v7388_v48, 5.0 }
 0x2f3   : > { %v1467_v37 = vpop.f32.mrf.mxu2 }
 0x2f4   : > { %v1583_v5 = vmul.f32 %v1551_v14, %v1467_v37  ;;  %v2026_v37 = vld [vmem:[#allocation2 + $0x480] sm:$0xff] }
 0x2f5   : > { %2047 = vmatpush.msra.mxu1 %v2026_v37 }
 0x2f6   : > { %1707 = vmatmul.f32.gmra.mxu3 %v1583_v5  ;;  %2185 = vmatmul.f32.gmra.mxu0 %v1583_v5 }
 0x2f7   : > { %2048 = vmatpush.msra.mxu1 %v2025_v59 }
 0x2f9   : > { %v7397_v55 = vpop.f32.mrf.mxu3  ;;  %v7402_v29 = vpop.f32.mrf.mxu1  ;;  %2049 = vmatpush.msra.mxu1 %v2024_v28 }
 0x2fa   : > { %9373 = vst [vmem:[#allocation63_spill] sm:$0xff] %v7402_v29  ;;  %v6197_v43 = vclamps-f32 %v7397_v55, 5.0 }
 0x2fb   : > { %v1470_v51 = vpop.f32.mrf.mxu2  ;;  %2050 = vmatpush.msra.mxu1 %v2023_v11  ;;  %v2021_v11 = vld [vmem:[#allocation2 + $0x458] sm:$0xff] }
 0x2fc   : > { %v1584_v17 = vmul.f32 %v1552_v57, %v1470_v51  ;;  %v1806_v12 = vmul.f32 1.442695, %v6197_v43  ;;  %v1804_v43 = vmul.f32 1.442695, %v6196_v36 }
 0x2fd   : > { %2051 = vmatpush.msra.mxu1 %v2022_v52  ;;  %v6194_v52 = vclamps-f32 %v7371_v63, 5.0  ;;  %v6351_v63 = vpop.eup %6350 }
 0x2fe   : > { %1710 = vmatmul.f32.gmra.mxu3 %v1584_v17  ;;  %2188 = vmatmul.f32.gmra.mxu0 %v1584_v17  ;;  %v6353_v0 = vpop.eup %6352 }
 0x2ff   : > { %2052 = vmatpush.msra.mxu1 %v2021_v11  ;;  %v1800_v38 = vmul.f32 1.442695, %v6194_v52  ;;  %v7460_v11 = vperm.slane %v1880_v2, 0  ;;  %v1850_v2 = vmul.f32 %v6351_v63, %v7313_v53  ;;  %v1851_v6 = vmul.f32 %v6353_v0, %v7322_v18 }
 0x301   : > { %v7404_v14 = vpop.f32.mrf.mxu3  ;;  %v7406_v61 = vpop.f32.mrf.mxu1  ;;  %6356 = vpow2.f32 %v1800_v38  ;;  %v1987_v36 = vadd.f32 %v7333_v22, %v1850_v2 }
 0x302   : > { %9374 = vst [vmem:[#allocation64_spill] sm:$0xff] %v7406_v61  ;;  %6358 = vpow2.f32 %v1802_v7  ;;  %v6355_v7 = vpop.eup %6354 }
 0x303   : > { %6360 = vpow2.f32 %v1806_v12 }
 0x309   : > { %v7408_v39 = vpop.f32.mrf.mxu3  ;;  %v7412_v9 = vpop.f32.mrf.mxu1 }
 0x30a   : > { %9375 = vst [vmem:[#allocation65_spill] sm:$0xff] %v7412_v9  ;;  %v6199_v19 = vclamps-f32 %v7408_v39, 5.0  ;;  %v7482_v39 = vperm.slane %v1883_v56, 0 }
 0x30c   : > { %v1810_v48 = vmul.f32 1.442695, %v6199_v19  ;;  %v1930_v19 = vmul.f32 %v1894_v50, %v1850_v2  ;;  %v2002_v2 = vadd.f32 %v7348_v20, %v1851_v6 }
 0x30e   : > { %6362 = vpow2.f32 %v1810_v48  ;;  %v1957_v22 = vadd.f32 %v7336_v8, %v1930_v19 }
 0x30f   : > { %6364 = vpow2.f32 %v1804_v43 }
 0x311   : > { %v7410_v5 = vpop.f32.mrf.mxu3  ;;  %v7416_v57 = vpop.f32.mrf.mxu1 }
 0x312   : > { %9376 = vst [vmem:[#allocation66_spill] sm:$0xff] %v7416_v57 }
 0x319   : > { %v7414_v30 = vpop.f32.mrf.mxu3  ;;  %v7420_v17 = vpop.f32.mrf.mxu1 }
 0x31a   : > { %9377 = vst [vmem:[#allocation67_spill] sm:$0xff] %v7420_v17  ;;  %v6201_v52 = vclamps-f32 %v7414_v30, 5.0  ;;  %v6198_v30 = vclamps-f32 %v7404_v14, 5.0 }
 0x31c   : > { %v1814_v38 = vmul.f32 1.442695, %v6201_v52  ;;  %v6357_v52 = vpop.eup %6356  ;;  %v1808_v32 = vmul.f32 1.442695, %v6198_v30 }
 0x31d   : > { %v6359_v53 = vpop.eup %6358 }
 0x31e   : > { %6366 = vpow2.f32 %v1814_v38  ;;  %v1854_v38 = vmul.f32 %v6359_v53, %v7359_v33 }
 0x321   : > { %v7418_v51 = vpop.f32.mrf.mxu3 }
 0x322   : > { %v6202_v3 = vclamps-f32 %v7418_v51, 5.0 }
 0x324   : > { %v7424_v25 = vpop.f32.mrf.mxu1 }
 0x325   : > { %9378 = vst [vmem:[#allocation68_spill] sm:$0xff] %v7424_v25 }
 0x329   : > { %v7422_v34 = vpop.f32.mrf.mxu3 }
 0x32a   : > { %v6203_v26 = vclamps-f32 %v7422_v34, 5.0  ;;  %v6200_v34 = vclamps-f32 %v7410_v5, 5.0  ;;  %v1852_v5 = vmul.f32 %v6355_v7, %v7331_v23  ;;  %v8037_v23 = vld [vmem:[#allocation2 + $0x98] sm:$0xff] }
 0x32c   : > { %v7430_v1 = vpop.f32.mrf.mxu1  ;;  %v1818_v14 = vmul.f32 1.442695, %v6203_v26  ;;  %v6361_v26 = vpop.eup %6360  ;;  %v1932_v8 = vmul.f32 %v7460_v11, %v1852_v5 }
 0x32d   : > { %9379 = vst [vmem:[#allocation69_spill] sm:$0xff] %v7430_v1  ;;  %v6363_v7 = vpop.eup %6362 }
 0x32e   : > { %6368 = vpow2.f32 %v1818_v14  ;;  %v6365_v19 = vpop.eup %6364 }
 0x32f   : > { %6370 = vpow2.f32 %v1808_v32 }
 0x331   : > { %v7426_v37 = vpop.f32.mrf.mxu3 }
 0x332   : > { %v6204_v48 = vclamps-f32 %v7426_v37, 5.0 }
 0x334   : > { %v7434_v58 = vpop.f32.mrf.mxu1 }
 0x335   : > { %9380 = vst [vmem:[#allocation70_spill] sm:$0xff] %v7434_v58 }
 0x339   : > { %v7428_v21 = vpop.f32.mrf.mxu3 }
 0x33a   : > { %v6205_v63 = vclamps-f32 %v7428_v21, 5.0  ;;  %v1931_v21 = vmul.f32 %v1894_v50, %v1851_v6  ;;  %v1853_v50 = vmul.f32 %v6357_v52, %v7346_v10  ;;  %v2020_v6 = vld [vmem:[#allocation2 + $0x450] sm:$0xff]  ;;  %v1858_v52 = vmul.f32 %v6363_v7, %v7395_v15  ;;  %v3549_v15 = vld [vmem:[#allocation2 + $0x980] sm:$0xff]  ;;  %v8051_v10 = vld [vmem:[#allocation2 + $0x88] sm:$0xff] }
 0x33b   : > { %2053 = vmatpush.msra.mxu1 %v2020_v6 }
 0x33c   : > { %v7438_v49 = vpop.f32.mrf.mxu1  ;;  %v1822_v56 = vmul.f32 1.442695, %v6205_v63  ;;  %v1972_v30 = vadd.f32 %v7351_v13, %v1931_v21  ;;  %v1816_v63 = vmul.f32 1.442695, %v6202_v3  ;;  %v6367_v13 = vpop.eup %6366  ;;  %v1933_v53 = vmul.f32 %v7460_v11, %v1853_v50 }
 0x33d   : > { %9381 = vst [vmem:[#allocation71_spill] sm:$0xff] %v7438_v49  ;;  %v1934_v21 = vmul.f32 %v7464_v44, %v1854_v38  ;;  %v1855_v11 = vmul.f32 %v6365_v19, %v7367_v42  ;;  %v3532_v42 = vld [vmem:[#allocation2 + $0x8f8] sm:$0xff] }
 0x33e   : > { %6372 = vpow2.f32 %v1822_v56 }
 0x341   : > { %v7432_v59 = vpop.f32.mrf.mxu3 }
 0x342   : > { %v6206_v20 = vclamps-f32 %v7432_v59, 5.0 }
 0x344   : > { %v7444_v41 = vpop.f32.mrf.mxu1 }
 0x345   : > { %9382 = vst [vmem:[#allocation72_spill] sm:$0xff] %v7444_v41 }
 0x349   : > { %v7436_v54 = vpop.f32.mrf.mxu3 }
 0x34a   : > { %v6207_v55 = vclamps-f32 %v7436_v54, 5.0  ;;  %v1812_v54 = vmul.f32 1.442695, %v6200_v34  ;;  %v1988_v34 = vadd.f32 %v1987_v36, %v1852_v5  ;;  %v1958_v36 = vadd.f32 %v1957_v22, %v1932_v8 }
 0x34b   : > { %v1824_v5 = vmul.f32 1.442695, %v6206_v20  ;;  %v1973_v22 = vadd.f32 %v1972_v30, %v1933_v53 }
 0x34c   : > { %v7458_v45 = vpop.f32.mrf.mxu1  ;;  %v1826_v43 = vmul.f32 1.442695, %v6207_v55  ;;  %v1856_v55 = vmul.f32 %v6361_v26, %v7376_v16  ;;  %6374 = vpow2.f32 %v1812_v54  ;;  %v1989_v14 = vadd.f32 %v1988_v34, %v1854_v38  ;;  %v8018_v16 = vld [vmem:[#allocation2 + $0xa8] sm:$0xff] }
 0x34d   : > { %9383 = vst [vmem:[#allocation73_spill] sm:$0xff] %v7458_v45  ;;  %v1959_v6 = vadd.f32 %v1958_v36, %v1934_v21  ;;  %v1935_v36 = vmul.f32 %v7464_v44, %v1855_v11  ;;  %v9387_v44 = vrot.slane %v7164_v31, 2 }
 0x34e   : > { %6376 = vpow2.f32 %v1826_v43  ;;  %v2003_v43 = vadd.f32 %v2002_v2, %v1853_v50  ;;  %v1936_v2 = vmul.f32 %v7466_v27, %v1856_v55 }
 0x34f   : > { %6378 = vpow2.f32 %v1816_v63 }
 0x351   : > { %v7440_v28 = vpop.f32.mrf.mxu3 }
 0x352   : > { %v6208_v32 = vclamps-f32 %v7440_v28, 5.0  ;;  %v1860_v28 = vmul.f32 %v6367_v13, %v7406_v61 }
 0x354   : > { %v7487_v12 = vpop.f32.mrf.mxu1 }
 0x355   : > { %9384 = vst [vmem:[#allocation74_spill] sm:$0xff] %v7487_v12 }
 0x359   : > { %v7446_v62 = vpop.f32.mrf.mxu3 }
 0x35a   : > { %v6209_v0 = vclamps-f32 %v7446_v62, 5.0 }
 0x35c   : > { %v1830_v37 = vmul.f32 1.442695, %v6209_v0  ;;  %v6369_v0 = vpop.eup %6368  ;;  %v7506_v56 = vpop.f32.mrf.mxu1 }
 0x35d   : > { %9385 = vst [vmem:[#allocation75_spill] sm:$0xff] %v7506_v56  ;;  %v6371_v54 = vpop.eup %6370  ;;  %v1862_v38 = vmul.f32 %v6369_v0, %v7416_v57 }
 0x35e   : > { %6380 = vpow2.f32 %v1830_v37  ;;  %v6373_v26 = vpop.eup %6372  ;;  %v1857_v19 = vmul.f32 %v6371_v54, %v7386_v60  ;;  %v8003_v60 = vld [vmem:[#allocation2 + $0xb8] sm:$0xff] }
 0x35f   : > { %v6375_v63 = vpop.eup %6374 }
 0x360   : > { %v6377_v37 = vpop.eup %6376  ;;  %v7515_v30 = vmul.f32 %v6375_v63, %v7402_v29  ;;  %v7984_v29 = vld [vmem:[#allocation2 + $0xc8] sm:$0xff] }
 0x361   : > { %v7455_v46 = vpop.f32.mrf.mxu3  ;;  %v6379_v13 = vpop.eup %6378 }
 0x362   : > { %v6210_v59 = vclamps-f32 %v7455_v46, 5.0 }
 0x364   : > { %v1832_v8 = vmul.f32 1.442695, %v6210_v59  ;;  %v7519_v59 = vld [vmem:[#allocation2 + $0xf0] sm:$0xff] }
 0x369   : > { %v1702_v40 = vpop.f32.mrf.mxu3 }
 0x36a   : > { %v6211_v51 = vclamps-f32 %v1702_v40, 5.0  ;;  %v1820_v40 = vmul.f32 1.442695, %v6204_v48  ;;  %v1990_v48 = vadd.f32 %v1989_v14, %v1856_v55  ;;  %v7517_v14 = vld [vmem:[#allocation2 + $0xf8] sm:$0xff]  ;;  %v1866_v55 = vmul.f32 %v6377_v37, %v7434_v58 }
 0x36b   : > { %2210 = vmatpush.msrb.mxu1 %v7517_v14  ;;  %2499 = vmatpush.msrb.mxu2 %v7517_v14 }
 0x36c   : > { %v1834_v3 = vmul.f32 1.442695, %v6211_v51  ;;  %6382 = vpow2.f32 %v1820_v40  ;;  %v1828_v51 = vmul.f32 1.442695, %v6208_v32  ;;  %v1991_v7 = vadd.f32 %v1990_v48, %v1858_v52  ;;  %v6381_v32 = vpop.eup %6380 }
 0x36d   : > { %v2004_v40 = vadd.f32 %v2003_v43, %v1855_v11  ;;  %v9386_v48 = vperm.slane %v7164_v31, 0  ;;  %v1861_v43 = vmul.f32 %v6379_v13, %v7412_v9  ;;  %v7532_v11 = vperm.slane %v9387_v44, 0  ;;  %2211 = vmatpush.msrb.mxu1 %v7519_v59  ;;  %2500 = vmatpush.msrb.mxu2 %v7519_v59  ;;  %v7972_v9 = vld [vmem:[#allocation2 + $0x570] ss:$0 sm:$0xff] }
 0x36e   : > { %6384 = vpow2.f32 %v1834_v3  ;;  %v1992_v50 = vadd.f32 %v1991_v7, %v1860_v28  ;;  %v1868_v7 = vmul.f32 %v6381_v32, %v7444_v41  ;;  %v1974_v13 = vadd.f32 %v1973_v22, %v1935_v36 }
 0x36f   : > { %6386 = vpow2.f32 %v1824_v5  ;;  %v2005_v54 = vadd.f32 %v2004_v40, %v1857_v19  ;;  %v9389_v40 = vrot.slane %v7164_v31, 3  ;;  %v1937_v36 = vmul.f32 %v7466_v27, %v1857_v19 }
 0x370   : > { %6388 = vpow2.f32 %v1828_v51  ;;  %v1993_v21 = vadd.f32 %v1992_v50, %v1862_v38  ;;  %v7528_v51 = vld [vmem:[#allocation2 + $0xe8] sm:$0xff]  ;;  %v9391_v19 = vrot.slane %v7164_v31, 5  ;;  %v1941_v41 = vmul.f32 %v7482_v39, %v1861_v43 }
 0x371   : > { %v1705_v62 = vpop.f32.mrf.mxu3  ;;  %6390 = vpow2.f32 %v1832_v8  ;;  %2212 = vmatpush.msrb.mxu1 %v7528_v51  ;;  %2501 = vmatpush.msrb.mxu2 %v7528_v51 }
 0x372   : > { %v6212_v46 = vclamps-f32 %v1705_v62, 5.0  ;;  %v1864_v62 = vmul.f32 %v6373_v26, %v7424_v25  ;;  %v6383_v0 = vpop.eup %6382  ;;  %v1938_v26 = vmul.f32 %v9386_v48, %v1858_v52  ;;  %v2006_v52 = vadd.f32 %v2005_v54, %v7515_v30  ;;  %v7552_v48 = vld [vmem:[#allocation2 + $0xd8] sm:$0xff] }
 0x373   : > { %v1863_v37 = vmul.f32 %v6383_v0, %v7420_v17  ;;  %v7957_v17 = vld [vmem:[#allocation2 + $0xe0] sm:$0xff] }
 0x374   : > { %v1836_v53 = vmul.f32 1.442695, %v6212_v46  ;;  %v6385_v5 = vpop.eup %6384  ;;  %v1960_v46 = vadd.f32 %v1959_v6, %v1936_v2  ;;  %v1994_v63 = vadd.f32 %v1993_v21, %v1864_v62  ;;  %v7540_v6 = vpop.f32.mrf.mxu1  ;;  %v7546_v2 = vperm.slane %v9389_v40, 0 }
 0x375   : > { %v6387_v8 = vpop.eup %6386  ;;  %9388 = vst [vmem:[#allocation76_spill] sm:$0xff] %v7540_v6  ;;  %v1870_v32 = vmul.f32 %v6385_v5, %v7487_v12  ;;  %v1942_v21 = vmul.f32 %v7532_v11, %v1862_v38  ;;  %v9390_v5 = vrot.slane %v7164_v31, 4  ;;  %v7561_v12 = vld [vmem:[#allocation2 + $0xd0] sm:$0xff] }
 0x376   : > { %v1995_v50 = vadd.f32 %v1994_v63, %v1866_v55  ;;  %v1961_v0 = vadd.f32 %v1960_v46, %v1938_v26  ;;  %v1865_v44 = vmul.f32 %v6387_v8, %v7430_v1  ;;  %v1944_v38 = vmul.f32 %v7546_v2, %v1864_v62 }
 0x377   : > { %v1902_v63 = vperm.slane %v9390_v5, 0  ;;  %v1903_v8 = vperm.slane %v9391_v19, 0 }
 0x378   : > { %v1996_v40 = vadd.f32 %v1995_v50, %v1868_v7 }
 0x379   : > { %v1708_v20 = vpop.f32.mrf.mxu3 }
 0x37a   : > { %v6213_v34 = vclamps-f32 %v1708_v20, 5.0  ;;  %v1940_v20 = vmul.f32 %v7482_v39, %v1860_v28  ;;  %v6389_v28 = vpop.eup %6388  ;;  %v1997_v1 = vadd.f32 %v1996_v40, %v1870_v32  ;;  %v9393_v40 = vrot.slane %v7164_v31, 6 }
 0x37b   : > { %v6391_v22 = vpop.eup %6390  ;;  %v1867_v27 = vmul.f32 %v6389_v28, %v7438_v49  ;;  %v1975_v49 = vadd.f32 %v1974_v13, %v1937_v36  ;;  %v1943_v13 = vmul.f32 %v7532_v11, %v1863_v37 }
 0x37c   : > { %v1838_v3 = vmul.f32 1.442695, %v6213_v34  ;;  %v7542_v34 = vld [vmem:[#allocation2 + $0xe0] sm:$0xff]  ;;  %v1962_v46 = vadd.f32 %v1961_v0, %v1940_v20  ;;  %v9392_v20 = vperm.slane %v7164_v31, 0  ;;  %v1869_v19 = vmul.f32 %v6391_v22, %v7458_v45 }
 0x37d   : > { %2213 = vmatpush.msrb.mxu1 %v7542_v34  ;;  %2502 = vmatpush.msrb.mxu2 %v7542_v34  ;;  %v9394_v22 = vrot.slane %v7164_v31, 7 }
 0x37e   : > { %6392 = vpow2.f32 %v1838_v3  ;;  %v1939_v62 = vmul.f32 %v9392_v20, %v7515_v30  ;;  %v1963_v0 = vadd.f32 %v1962_v46, %v1942_v21  ;;  %v1948_v21 = vmul.f32 %v1903_v8, %v1868_v7  ;;  %v7590_v7 = vld [vmem:[#allocation2 + $0xb8] sm:$0xff] }
 0x37f   : > { %6394 = vpow2.f32 %v1836_v53  ;;  %v2007_v53 = vadd.f32 %v2006_v52, %v1861_v43  ;;  %2214 = vmatpush.msrb.mxu1 %v7552_v48  ;;  %2503 = vmatpush.msrb.mxu2 %v7552_v48  ;;  %v7588_v43 = vpop.f32.mrf.mxu1 }
 0x380   : > { %v1964_v30 = vadd.f32 %v1963_v0, %v1944_v38  ;;  %9395 = vst [vmem:[#allocation77_spill] sm:$0xff] %v7588_v43 }
 0x381   : > { %v1711_v3 = vpop.f32.mrf.mxu3  ;;  %v2008_v52 = vadd.f32 %v2007_v53, %v1863_v37  ;;  %v1946_v53 = vmul.f32 %v1902_v63, %v1866_v55  ;;  %2215 = vmatpush.msrb.mxu1 %v7561_v12  ;;  %2504 = vmatpush.msrb.mxu2 %v7561_v12  ;;  %v7580_v55 = vld [vmem:[#allocation2 + $0xc0] sm:$0xff] }
 0x382   : > { %v6214_v54 = vclamps-f32 %v1711_v3, 5.0 }
 0x383   : > { %v2009_v28 = vadd.f32 %v2008_v52, %v1865_v44  ;;  %v1965_v36 = vadd.f32 %v1964_v30, %v1946_v53  ;;  %v1947_v53 = vmul.f32 %v1902_v63, %v1867_v27 }
 0x384   : > { %v6393_v26 = vpop.eup %6392  ;;  %v1840_v3 = vmul.f32 1.442695, %v6214_v54  ;;  %v7572_v54 = vld [vmem:[#allocation2 + $0xc8] sm:$0xff] }
 0x385   : > { %v1872_v50 = vmul.f32 %v6393_v26, %v7540_v6  ;;  %v6395_v5 = vpop.eup %6394  ;;  %v1904_v26 = vperm.slane %v9393_v40, 0  ;;  %v2010_v46 = vadd.f32 %v2009_v28, %v1867_v27  ;;  %2216 = vmatpush.msrb.mxu1 %v7572_v54  ;;  %2505 = vmatpush.msrb.mxu2 %v7572_v54  ;;  %v1966_v0 = vadd.f32 %v1965_v36, %v1948_v21  ;;  %v7600_v40 = vld [vmem:[#allocation2 + $0xa8] sm:$0xff] }
 0x386   : > { %6396 = vpow2.f32 %v1840_v3  ;;  %v1871_v52 = vmul.f32 %v6395_v5, %v7506_v56  ;;  %v1905_v3 = vperm.slane %v9394_v22, 0  ;;  %v1945_v5 = vmul.f32 %v7546_v2, %v1865_v44 }
 0x387   : > { %v1998_v6 = vadd.f32 %v1997_v1, %v1872_v50  ;;  %v1976_v1 = vadd.f32 %v1975_v49, %v1939_v62  ;;  %v1950_v39 = vmul.f32 %v1904_v26, %v1870_v32  ;;  %v2011_v38 = vadd.f32 %v2010_v46, %v1869_v19  ;;  %2217 = vmatpush.msrb.mxu1 %v7580_v55  ;;  %v7595_v62 = vld [vmem:[#allocation2 + $0xb0] sm:$0xff] }
 0x388   : > { %2506 = vmatpush.msrb.mxu2 %v7580_v55  ;;  %v1952_v49 = vmul.f32 %v1905_v3, %v1872_v50  ;;  %v1949_v2 = vmul.f32 %v1903_v8, %v1869_v19  ;;  %v7604_v50 = vld [vmem:[#allocation2 + $0xa0] sm:$0xff]  ;;  %v1951_v27 = vmul.f32 %v1904_v26, %v1871_v52  ;;  %v7614_v26 = vld [vmem:[#allocation2 + $0x90] sm:$0xff] }
 0x389   : > { %v2014_v20 = vadd.f32 1e-06, %v1998_v6  ;;  %v1977_v6 = vadd.f32 %v1976_v1, %v1941_v41  ;;  %v2012_v11 = vadd.f32 %v2011_v38, %v1871_v52  ;;  %2218 = vmatpush.msrb.mxu1 %v7590_v7  ;;  %v1967_v28 = vadd.f32 %v1966_v0, %v1950_v39  ;;  %v7616_v52 = vld [vmem:[#allocation2 + $0x88] sm:$0xff]  ;;  %v7620_v38 = vld [vmem:[#allocation2 + $0x80] sm:$0xff] }
 0x38a   : > { %2507 = vmatpush.msrb.mxu2 %v7590_v7  ;;  %v3088_v0 = vld [vmem:[#allocation2 + $0x688] sm:$0xff] }
 0x38b   : > { %6398 = vrcp.f32 %v2014_v20  ;;  %v1978_v32 = vadd.f32 %v1977_v6, %v1943_v13  ;;  %2219 = vmatpush.msrb.mxu1 %v7595_v62  ;;  %v1968_v44 = vadd.f32 %v1967_v28, %v1952_v49  ;;  %v7608_v20 = vld [vmem:[#allocation2 + $0x98] sm:$0xff]  ;;  %v3089_v6 = vld [vmem:[#allocation2 + $0x690] sm:$0xff]  ;;  %v3045_v49 = vld [vmem:[#allocation2 + $0x608] sm:$0xff] }
 0x38c   : > { %v6397_v31 = vpop.eup %6396  ;;  %2508 = vmatpush.msrb.mxu2 %v7595_v62  ;;  %v3085_v28 = vld [vmem:[#allocation2 + $0x670] sm:$0xff] }
 0x38d   : > { %v1873_v37 = vmul.f32 %v6397_v31, %v7588_v43  ;;  %v1979_v41 = vadd.f32 %v1978_v32, %v1945_v5  ;;  %2220 = vmatpush.msrb.mxu1 %v7600_v40  ;;  %v3047_v31 = vld [vmem:[#allocation2 + $0x618] sm:$0xff]  ;;  %v3046_v5 = vld [vmem:[#allocation2 + $0x610] sm:$0xff] }
 0x38e   : > { %2509 = vmatpush.msrb.mxu2 %v7600_v40  ;;  %3050 = vmatpush.msrb.mxu3 %v3047_v31  ;;  %v3086_v32 = vld [vmem:[#allocation2 + $0x678] sm:$0xff]  ;;  %v9400_v31 = vld [vmem:[#allocation53_spill] sm:$0xff] }
 0x38f   : > { %v2013_v30 = vadd.f32 %v2012_v11, %v1873_v37  ;;  %v1980_v63 = vadd.f32 %v1979_v41, %v1947_v53  ;;  %2221 = vmatpush.msrb.mxu1 %v7604_v50  ;;  %v1953_v19 = vmul.f32 %v1905_v3, %v1873_v37  ;;  %v3090_v3 = vld [vmem:[#allocation2 + $0x698] sm:$0xff]  ;;  %v3087_v11 = vld [vmem:[#allocation2 + $0x680] sm:$0xff]  ;;  %v6311_v41 = vld [vmem:[#allocation2 + $0x4d0] ss:$0 sm:$0xff] }
 0x390   : > { %2510 = vmatpush.msrb.mxu2 %v7604_v50  ;;  %3093 = vmatpush.msra.mxu0 %v3090_v3  ;;  %v3044_v37 = vld [vmem:[#allocation2 + $0x600] sm:$0xff]  ;;  %v3043_v53 = vld [vmem:[#allocation2 + $0x5f8] sm:$0xff]  ;;  %v3037_v3 = vld [vmem:[#allocation2 + $0x5c8] sm:$0xff] }
 0x391   : > { %v6399_v21 = vpop.eup %6398  ;;  %v2015_v46 = vadd.f32 1e-06, %v2013_v30  ;;  %v1981_v8 = vadd.f32 %v1980_v63, %v1949_v2  ;;  %2222 = vmatpush.msrb.mxu1 %v7608_v20  ;;  %3051 = vmatpush.msrb.mxu3 %v3046_v5  ;;  %v3042_v30 = vld [vmem:[#allocation2 + $0x5f0] sm:$0xff] }
 0x392   : > { %v2018_v22 = vmul.f32 %v6399_v21, %v1968_v44  ;;  %2511 = vmatpush.msrb.mxu2 %v7608_v20  ;;  %3094 = vmatpush.msra.mxu0 %v3089_v6 }
 0x393   : > { %6400 = vrcp.f32 %v2015_v46  ;;  %v1982_v1 = vadd.f32 %v1981_v8, %v1951_v27  ;;  %2223 = vmatpush.msrb.mxu1 %v7614_v26  ;;  %3052 = vmatpush.msrb.mxu3 %v3045_v49  ;;  %v3038_v8 = vld [vmem:[#allocation2 + $0x5d0] sm:$0xff] }
 0x394   : > { %2054 = vmatmul.f32.vlgmr.msra.gmra.mxu1 %v2018_v22  ;;  %2512 = vmatpush.msrb.mxu2 %v7614_v26 }
 0x395   : > { %v1983_v13 = vadd.f32 %v1982_v1, %v1953_v19  ;;  %2224 = vmatpush.msrb.mxu1 %v7616_v52  ;;  %3095 = vmatpush.msra.mxu0 %v3088_v0  ;;  %v9396_v19 = vld [vmem:[#allocation49_spill] sm:$0xff]  ;;  %v9401_v0 = vld [vmem:[#allocation10_spill] sm:$0xff] }
 0x396   : > { %2513 = vmatpush.msrb.mxu2 %v7616_v52  ;;  %3053 = vmatpush.msrb.mxu3 %v3044_v37  ;;  %v9402_v37 = vld [vmem:[#allocation56_spill] sm:$0xff] }
 0x397   : > { %2225 = vmatpush.msrb.mxu1 %v7620_v38  ;;  %3096 = vmatpush.msra.mxu0 %v3087_v11  ;;  %v3079_v11 = vld [vmem:[#allocation2 + $0x640] sm:$0xff] }
 0x398   : > { %2514 = vmatpush.msrb.mxu2 %v7620_v38  ;;  %3054 = vmatpush.msrb.mxu3 %v3043_v53 }
 0x399   : > { %v6401_v36 = vpop.eup %6400  ;;  %2237 = vmatpush.msra.mxu1 %v7517_v14  ;;  %3097 = vmatpush.msra.mxu0 %v3086_v32 }
 0x39a   : > { %v2019_v39 = vmul.f32 %v6401_v36, %v1983_v13  ;;  %3055 = vmatpush.msrb.mxu3 %v3042_v30  ;;  %v9397_v13 = vld [vmem:[#allocation8_spill] sm:$0xff] }
 0x39b   : > { %2238 = vmatpush.msra.mxu1 %v7519_v59  ;;  %3098 = vmatpush.msra.mxu0 %v3085_v28  ;;  %v9403_v28 = vld [vmem:[#allocation11_spill] sm:$0xff] }
 0x39c   : > { %2057 = vmatmul.f32.gmra.mxu1 %v2019_v39  ;;  %v3080_v39 = vld [vmem:[#allocation2 + $0x648] sm:$0xff] }
 0x39d   : > { %2239 = vmatpush.msra.mxu1 %v7528_v51 }
 0x39f   : > { %2240 = vmatpush.msra.mxu1 %v7542_v34 }
 0x3a1   : > { %2241 = vmatpush.msra.mxu1 %v7552_v48 }
 0x3a3   : > { %2242 = vmatpush.msra.mxu1 %v7561_v12 }
 0x3a5   : > { %2243 = vmatpush.msra.mxu1 %v7572_v54 }
 0x3a7   : > { %2244 = vmatpush.msra.mxu1 %v7580_v55 }
 0x3a9   : > { %2245 = vmatpush.msra.mxu1 %v7590_v7 }
 0x3ab   : > { %2246 = vmatpush.msra.mxu1 %v7595_v62 }
 0x3ad   : > { %2247 = vmatpush.msra.mxu1 %v7600_v40 }
 0x3af   : > { %2248 = vmatpush.msra.mxu1 %v7604_v50 }
 0x3b1   : > { %2249 = vmatpush.msra.mxu1 %v7608_v20 }
 0x3b3   : > { %2250 = vmatpush.msra.mxu1 %v7614_v26 }
 0x3b5   : > { %2251 = vmatpush.msra.mxu1 %v7616_v52 }
 0x3b7   : > { %2252 = vmatpush.msra.mxu1 %v7620_v38 }
 0x411   : > { %v2055_v2 = vpop.f32.mrf.mxu1 }
 0x412   : > { %v2056_v44 = vadd.f32 %v6311_v41, %v2055_v2  ;;  %v9404_v2 = vld [vmem:[#allocation58_spill] sm:$0xff] }
 0x414   : > { %v2192_v21 = vadd.f32 %v2056_v44, %v7034_v35  ;;  %v3084_v35 = vld [vmem:[#allocation2 + $0x668] sm:$0xff] }
 0x415   : > { %3099 = vmatpush.msra.mxu0 %v3084_v35  ;;  %v9406_v35 = vld [vmem:[#allocation60_spill] sm:$0xff] }
 0x416   : > { %2226 = vmatmul.f32.vlgmr.msrb.gmra.mxu1 %v2192_v21 }
 0x417   : > { %2322 = vmatpush.msrb.mxu1 %v7517_v14  ;;  %v3040_v14 = vld [vmem:[#allocation2 + $0x5e0] sm:$0xff] }
 0x419   : > { %v2058_v46 = vpop.f32.mrf.mxu1  ;;  %2323 = vmatpush.msrb.mxu1 %v7519_v59  ;;  %v3082_v59 = vld [vmem:[#allocation2 + $0x658] sm:$0xff] }
 0x41a   : > { %v2059_v63 = vadd.f32 %v6311_v41, %v2058_v46  ;;  %v3036_v41 = vld [vmem:[#allocation2 + $0x5c0] sm:$0xff] }
 0x41b   : > { %2324 = vmatpush.msrb.mxu1 %v7528_v51 }
 0x41c   : > { %v2193_v27 = vadd.f32 %v2059_v63, %v7041_v47  ;;  %v3041_v47 = vld [vmem:[#allocation2 + $0x5e8] sm:$0xff] }
 0x41d   : > { %2325 = vmatpush.msrb.mxu1 %v7542_v34  ;;  %3056 = vmatpush.msrb.mxu3 %v3041_v47 }
 0x41e   : > { %2229 = vmatmul.f32.gmra.mxu1 %v2193_v27 }
 0x41f   : > { %2326 = vmatpush.msrb.mxu1 %v7552_v48  ;;  %3057 = vmatpush.msrb.mxu3 %v3040_v14 }
 0x421   : > { %2327 = vmatpush.msrb.mxu1 %v7561_v12  ;;  %v3083_v12 = vld [vmem:[#allocation2 + $0x660] sm:$0xff] }
 0x422   : > { %3100 = vmatpush.msra.mxu0 %v3083_v12  ;;  %v9407_v12 = vld [vmem:[#allocation13_spill] sm:$0xff] }
 0x423   : > { %2328 = vmatpush.msrb.mxu1 %v7572_v54  ;;  %v3039_v54 = vld [vmem:[#allocation2 + $0x5d8] sm:$0xff] }
 0x424   : > { %3101 = vmatpush.msra.mxu0 %v3082_v59  ;;  %3058 = vmatpush.msrb.mxu3 %v3039_v54  ;;  %v3035_v59 = vld [vmem:[#allocation2 + $0x5b8] sm:$0xff] }
 0x425   : > { %2329 = vmatpush.msrb.mxu1 %v7580_v55 }
 0x426   : > { %3059 = vmatpush.msrb.mxu3 %v3038_v8 }
 0x427   : > { %2330 = vmatpush.msrb.mxu1 %v7590_v7 }
 0x428   : > { %3060 = vmatpush.msrb.mxu3 %v3037_v3 }
 0x429   : > { %2331 = vmatpush.msrb.mxu1 %v7595_v62  ;;  %v7666_v62 = vld [vmem:[#allocation2 + $0x558] ss:$0 sm:$0xff] }
 0x42a   : > { %v2097_v22 = vadd.f32 %v7666_v62, %v7315_v24  ;;  %v2100_v1 = vadd.f32 %v7666_v62, %v9396_v19  ;;  %v2106_v6 = vadd.f32 %v7666_v62, %v9400_v31  ;;  %v2109_v32 = vadd.f32 %v7666_v62, %v9402_v37  ;;  %3061 = vmatpush.msrb.mxu3 %v3036_v41  ;;  %v9410_v19 = vld [vmem:[#allocation15_spill] sm:$0xff]  ;;  %v9412_v31 = vld [vmem:[#allocation17_spill] sm:$0xff] }
 0x42b   : > { %2332 = vmatpush.msrb.mxu1 %v7600_v40  ;;  %v2112_v44 = vadd.f32 %v7666_v62, %v9404_v2  ;;  %v2115_v47 = vadd.f32 %v7666_v62, %v9406_v35  ;;  %v3075_v35 = vld [vmem:[#allocation2 + $0x620] sm:$0xff] }
 0x42c   : > { %v7679_v36 = vadd.f32 %v2100_v1, %v9397_v13  ;;  %v7691_v49 = vadd.f32 %v2106_v6, %v9401_v0  ;;  %v7697_v30 = vadd.f32 %v2109_v32, %v9403_v28  ;;  %3062 = vmatpush.msrb.mxu3 %v3035_v59  ;;  %v3034_v13 = vld [vmem:[#allocation2 + $0x5b0] sm:$0xff]  ;;  %v9414_v28 = vld [vmem:[#allocation19_spill] sm:$0xff] }
 0x42d   : > { %2333 = vmatpush.msrb.mxu1 %v7604_v50  ;;  %v3081_v50 = vld [vmem:[#allocation2 + $0x650] sm:$0xff]  ;;  %v7709_v14 = vadd.f32 %v2115_v47, %v9407_v12  ;;  %v3032_v47 = vld [vmem:[#allocation2 + $0x5a0] sm:$0xff] }
 0x42e   : > { %3102 = vmatpush.msra.mxu0 %v3081_v50  ;;  %v3077_v50 = vld [vmem:[#allocation2 + $0x630] sm:$0xff]  ;;  %3063 = vmatpush.msrb.mxu3 %v3034_v13 }
 0x42f   : > { %2334 = vmatpush.msrb.mxu1 %v7608_v20  ;;  %v7673_v20 = vadd.f32 %v2097_v22, %v7056_v4  ;;  %v9399_v4 = vld [vmem:[#allocation9_spill] sm:$0xff] }
 0x430   : > { %3103 = vmatpush.msra.mxu0 %v3080_v39 }
 0x431   : > { %2335 = vmatpush.msrb.mxu1 %v7614_v26  ;;  %v2120_v26 = vpop.f32.mrf.mxu0 }
 0x432   : > { %3104 = vmatpush.msra.mxu0 %v3079_v11  ;;  %v2121_v22 = vadd.f32 %v7666_v62, %v2120_v26  ;;  %v9413_v11 = vld [vmem:[#allocation18_spill] sm:$0xff] }
 0x433   : > { %2336 = vmatpush.msrb.mxu1 %v7616_v52  ;;  %v9398_v52 = vld [vmem:[#allocation51_spill] sm:$0xff] }
 0x434   : > { %v2103_v24 = vadd.f32 %v7666_v62, %v9398_v52  ;;  %v7720_v1 = vadd.f32 %v2121_v22, %v9410_v19  ;;  %v9417_v19 = vld [vmem:[#allocation22_spill] sm:$0xff] }
 0x435   : > { %2337 = vmatpush.msrb.mxu1 %v7620_v38 }
 0x436   : > { %v7685_v38 = vadd.f32 %v2103_v24, %v9399_v4  ;;  %v9411_v24 = vld [vmem:[#allocation16_spill] sm:$0xff] }
 0x439   : > { %v2123_v5 = vpop.f32.mrf.mxu0 }
 0x43a   : > { %v2124_v39 = vadd.f32 %v7666_v62, %v2123_v5 }
 0x43c   : > { %v7725_v4 = vadd.f32 %v2124_v39, %v9411_v24 }
 0x441   : > { %v2126_v53 = vpop.f32.mrf.mxu0 }
 0x442   : > { %v2127_v3 = vadd.f32 %v7666_v62, %v2126_v53 }
 0x444   : > { %v7730_v26 = vadd.f32 %v2127_v3, %v9412_v31 }
 0x449   : > { %v2129_v63 = vpop.f32.mrf.mxu0 }
 0x44a   : > { %v2130_v0 = vadd.f32 %v7666_v62, %v2129_v63  ;;  %v9415_v63 = vld [vmem:[#allocation20_spill] sm:$0xff] }
 0x44c   : > { %v7735_v37 = vadd.f32 %v2130_v0, %v9413_v11 }
 0x493   : > { %v2227_v51 = vpop.f32.mrf.mxu1 }
 0x494   : > { %v7660_v34 = vsub.f32 %v2192_v21, %v2227_v51  ;;  %v9405_v21 = vld [vmem:[#allocation12_spill] sm:$0xff]  ;;  %v2132_v51 = vpop.f32.mrf.mxu0 }
 0x495   : > { %v7703_v46 = vadd.f32 %v2112_v44, %v9405_v21  ;;  %v2133_v32 = vadd.f32 %v7666_v62, %v2132_v51  ;;  %v3076_v44 = vld [vmem:[#allocation2 + $0x628] sm:$0xff] }
 0x496   : > { %v2235_v48 = vmul.f32 %v7660_v34, %v7660_v34  ;;  %v3033_v21 = vld [vmem:[#allocation2 + $0x5a8] sm:$0xff] }
 0x497   : > { %v7740_v41 = vadd.f32 %v2133_v32, %v9414_v28  ;;  %3064 = vmatpush.msrb.mxu3 %v3033_v21 }
 0x498   : > { %2253 = vmatmul.f32.vlgmr.msra.gmra.mxu1 %v2235_v48  ;;  %v9408_v48 = vld [vmem:[#allocation62_spill] sm:$0xff] }
 0x499   : > { %v2118_v54 = vadd.f32 %v7666_v62, %v9408_v48  ;;  %3065 = vmatpush.msrb.mxu3 %v3032_v47  ;;  %v9416_v48 = vld [vmem:[#allocation21_spill] sm:$0xff] }
 0x49b   : > { %v2230_v55 = vpop.f32.mrf.mxu1 }
 0x49c   : > { %v7664_v7 = vsub.f32 %v2193_v27, %v2230_v55  ;;  %v3078_v27 = vld [vmem:[#allocation2 + $0x638] sm:$0xff]  ;;  %v2135_v8 = vpop.f32.mrf.mxu0 }
 0x49d   : > { %3105 = vmatpush.msra.mxu0 %v3078_v27  ;;  %v9409_v55 = vld [vmem:[#allocation14_spill] sm:$0xff]  ;;  %v2136_v53 = vadd.f32 %v7666_v62, %v2135_v8 }
 0x49e   : > { %v2236_v40 = vmul.f32 %v7664_v7, %v7664_v7 }
 0x49f   : > { %3106 = vmatpush.msra.mxu0 %v3077_v50  ;;  %v7745_v27 = vadd.f32 %v2136_v53, %v9415_v63 }
 0x4a0   : > { %2256 = vmatmul.f32.gmra.mxu1 %v2236_v40  ;;  %v7715_v40 = vadd.f32 %v2118_v54, %v9409_v55 }
 0x4a1   : > { %3107 = vmatpush.msra.mxu0 %v3076_v44 }
 0x4a3   : > { %3108 = vmatpush.msra.mxu0 %v3075_v35  ;;  %v6312_v35 = vld [vmem:[#allocation2 + $0x560] ss:$0 sm:$0xff] }
 0x4a4   : > { %v2138_v52 = vpop.f32.mrf.mxu0 }
 0x4a5   : > { %v2139_v12 = vadd.f32 %v7666_v62, %v2138_v52 }
 0x4a7   : > { %v7750_v54 = vadd.f32 %v2139_v12, %v9416_v48 }
 0x4a8   : > { %2338 = vmatmul.f32.vlgmr.msrb.gmra.mxu1 %v7673_v20 }
 0x4ac   : > { %v2141_v6 = vpop.f32.mrf.mxu0 }
 0x4ad   : > { %v2142_v50 = vadd.f32 %v7666_v62, %v2141_v6  ;;  %v9418_v6 = vld [vmem:[#allocation23_spill] sm:$0xff] }
 0x4af   : > { %v7755_v13 = vadd.f32 %v2142_v50, %v9417_v19 }
 0x4b0   : > { %2341 = vmatmul.f32.gmra.mxu1 %v7679_v36 }
 0x4b4   : > { %v2144_v5 = vpop.f32.mrf.mxu0 }
 0x4b5   : > { %v2145_v31 = vadd.f32 %v7666_v62, %v2144_v5 }
 0x4b7   : > { %v7760_v53 = vadd.f32 %v2145_v31, %v9418_v6 }
 0x4b8   : > { %2344 = vmatmul.f32.gmra.mxu1 %v7685_v38 }
 0x4bc   : > { %v2147_v2 = vpop.f32.mrf.mxu0 }
 0x4bd   : > { %v2148_v48 = vadd.f32 %v7666_v62, %v2147_v2  ;;  %v3541_v2 = vld [vmem:[#allocation2 + $0x940] sm:$0xff] }
 0x4be   : > { %3671 = vmatpush.msra.mxu2 %v3541_v2 }
 0x4c0   : > { %2347 = vmatmul.f32.gmra.mxu1 %v7691_v49 }
 0x4c4   : > { %v2150_v59 = vpop.f32.mrf.mxu0 }
 0x4c8   : > { %2350 = vmatmul.f32.gmra.mxu1 %v7697_v30 }
 0x4cc   : > { %v2153_v24 = vpop.f32.mrf.mxu0 }
 0x4d0   : > { %2353 = vmatmul.f32.gmra.mxu1 %v7703_v46 }
 0x4d4   : > { %v2156_v5 = vpop.f32.mrf.mxu0 }
 0x4d8   : > { %2356 = vmatmul.f32.gmra.mxu1 %v7709_v14 }
 0x4e0   : > { %2359 = vmatmul.f32.gmra.mxu1 %v7715_v40 }
 0x4e8   : > { %2362 = vmatmul.f32.gmra.mxu1 %v7720_v1 }
 0x4f0   : > { %2365 = vmatmul.f32.gmra.mxu1 %v7725_v4 }
 0x4f8   : > { %2368 = vmatmul.f32.gmra.mxu1 %v7730_v26 }
 0x500   : > { %2371 = vmatmul.f32.gmra.mxu1 %v7735_v37 }
 0x508   : > { %2374 = vmatmul.f32.gmra.mxu1 %v7740_v41 }
 0x510   : > { %2377 = vmatmul.f32.gmra.mxu1 %v7745_v27 }
 0x515   : > { %v2254_v51 = vpop.f32.mrf.mxu1 }
 0x516   : > { %v2255_v55 = vadd.f32 1e-05, %v2254_v51 }
 0x518   : > { %6402 = vrsqrt.f32 %v2255_v55  ;;  %2380 = vmatmul.f32.gmra.mxu1 %v7750_v54  ;;  %vm2266_vm1 = vweird.f32 %v2255_v55 }
 0x51d   : > { %v2257_v22 = vpop.f32.mrf.mxu1 }
 0x51e   : > { %v6403_v8 = vpop.eup %6402  ;;  %v2258_v39 = vadd.f32 1e-05, %v2257_v22 }
 0x51f   : > { %v2261_v3 = vmul.f32 %v6403_v8, %v2255_v55  ;;  %vm2267_vm0 = vweird.f32 %v6403_v8 }
 0x520   : > { %6404 = vrsqrt.f32 %v2258_v39  ;;  %2383 = vmatmul.f32.gmra.mxu1 %v7755_v13  ;;  %vm2268_vm9 = vmor %vm2266_vm1, %vm2267_vm0  ;;  %vm2276_vm11 = vweird.f32 %v2258_v39 }
 0x521   : > { %v2262_v52 = vmul.f32 %v6403_v8, %v2261_v3 }
 0x523   : > { %v2263_v0 = vmul.f32 0.5, %v2262_v52  ;;  %v9419_v52 = vld [vmem:[#allocation24_spill] sm:$0xff] }
 0x524   : > { %v7771_v31 = vadd.f32 %v2148_v48, %v9419_v52  ;;  %v9423_v52 = vld [vmem:[#allocation27_spill] sm:$0xff] }
 0x525   : > { %v2264_v11 = vsub.f32 1.5, %v2263_v0  ;;  %v2339_v32 = vpop.f32.mrf.mxu1 }
 0x526   : > { %v6405_v28 = vpop.eup %6404  ;;  %v7763_v44 = vsub.f32 %v7673_v20, %v2339_v32  ;;  %v6313_v20 = vld [vmem:[#allocation2 + $0x568] ss:$0 sm:$0xff] }
 0x527   : > { %v2265_v21 = vmul.f32 %v6403_v8, %v2264_v11  ;;  %v2271_v63 = vmul.f32 %v6405_v28, %v2258_v39  ;;  %vm2277_vm10 = vweird.f32 %v6405_v28 }
 0x528   : > { %v2467_v47 = vmul.f32 %v7763_v44, %v7763_v44  ;;  %2386 = vmatmul.f32.gmra.mxu1 %v7760_v53  ;;  %vm2278_vm12 = vmor %vm2276_vm11, %vm2277_vm10 }
 0x529   : > { %v2269_v12 = vsel %vm2268_vm9, %v6403_v8, %v2265_v21  ;;  %v2272_v51 = vmul.f32 %v6405_v28, %v2271_v63  ;;  %v2159_v21 = vpop.f32.mrf.mxu0 }
 0x52a   : > { %v2280_v50 = vmul.f32 %v2269_v12, %v7660_v34  ;;  %2515 = vmatmul.f32.vlgmr.msrb.gmra.mxu2 %v2467_v47  ;;  %v9420_v47 = vld [vmem:[#allocation25_spill] sm:$0xff] }
 0x52b   : > { %v2273_v22 = vmul.f32 0.5, %v2272_v51 }
 0x52c   : > { %v2284_v19 = vmul.f32 %v6312_v35, %v2280_v50 }
 0x52d   : > { %v2274_v55 = vsub.f32 1.5, %v2273_v22  ;;  %v2342_v3 = vpop.f32.mrf.mxu1 }
 0x52e   : > { %v7774_v0 = vsub.f32 %v7679_v36, %v2342_v3  ;;  %v7776_v11 = vadd.f32 %v6313_v20, %v2284_v19  ;;  %v2151_v36 = vadd.f32 %v7666_v62, %v2150_v59  ;;  %v3557_v59 = vld [vmem:[#allocation2 + $0x9c0] sm:$0xff]  ;;  %v2157_v3 = vadd.f32 %v7666_v62, %v2156_v5 }
 0x52f   : > { %v2275_v8 = vmul.f32 %v6405_v28, %v2274_v55  ;;  %3558 = vmatpush.msra.mxu1 %v3557_v59  ;;  %v3540_v55 = vld [vmem:[#allocation2 + $0x938] sm:$0xff] }
 0x530   : > { %v2468_v34 = vmul.f32 %v7774_v0, %v7774_v0  ;;  %2389 = vmatmul.f32.gmra.mxu1 %v7771_v31  ;;  %3066 = vmatmul.f32.vlgmr.msrb.gmra.mxu3 %v7776_v11  ;;  %v7786_v12 = vadd.f32 %v2151_v36, %v9420_v47  ;;  %v2160_v36 = vadd.f32 %v7666_v62, %v2159_v21  ;;  %v3539_v47 = vld [vmem:[#allocation2 + $0x930] sm:$0xff] }
 0x531   : > { %3109 = vmatmul.f32.vlgmr.msra.gmra.mxu0 %v7776_v11  ;;  %v2279_v32 = vsel %vm2278_vm12, %v6405_v28, %v2275_v8  ;;  %3672 = vmatpush.msra.mxu2 %v3540_v55  ;;  %v7810_v8 = vadd.f32 %v2157_v3, %v9423_v52 }
 0x532   : > { %2518 = vmatmul.f32.gmra.mxu2 %v2468_v34  ;;  %v2281_v6 = vmul.f32 %v2279_v32, %v7664_v7  ;;  %v2154_v7 = vadd.f32 %v7666_v62, %v2153_v24  ;;  %v3556_v32 = vld [vmem:[#allocation2 + $0x9b8] sm:$0xff] }
 0x533   : > { %3559 = vmatpush.msra.mxu1 %v3556_v32  ;;  %3673 = vmatpush.msra.mxu2 %v3539_v47  ;;  %v3538_v32 = vld [vmem:[#allocation2 + $0x928] sm:$0xff] }
 0x534   : > { %v2285_v39 = vmul.f32 %v6312_v35, %v2281_v6  ;;  %v2162_v35 = vpop.f32.mrf.mxu0  ;;  %v9424_v6 = vld [vmem:[#allocation28_spill] sm:$0xff] }
 0x535   : > { %v2345_v63 = vpop.f32.mrf.mxu1  ;;  %v2163_v59 = vadd.f32 %v7666_v62, %v2162_v35  ;;  %3674 = vmatpush.msra.mxu2 %v3538_v32  ;;  %v3147_v32 = vld [vmem:[#allocation2 + $0x798] sm:$0xff] }
 0x536   : > { %v7789_v51 = vsub.f32 %v7685_v38, %v2345_v63  ;;  %v7791_v48 = vadd.f32 %v6313_v20, %v2285_v39  ;;  %v9422_v38 = vld [vmem:[#allocation26_spill] sm:$0xff]  ;;  %v7820_v39 = vadd.f32 %v2160_v36, %v9424_v6  ;;  %v9427_v6 = vld [vmem:[#allocation31_spill] sm:$0xff] }
 0x537   : > { %v7800_v22 = vadd.f32 %v2154_v7, %v9422_v38  ;;  %v9425_v7 = vld [vmem:[#allocation29_spill] sm:$0xff] }
 0x538   : > { %9421 = vst [vmem:[#allocation49_spill] sm:$0xff] %v7791_v48  ;;  %v2469_v28 = vmul.f32 %v7789_v51, %v7789_v51  ;;  %2392 = vmatmul.f32.gmra.mxu1 %v7786_v12  ;;  %3069 = vmatmul.f32.gmra.mxu3 %v7791_v48 }
 0x539   : > { %3112 = vmatmul.f32.gmra.mxu0 %v7791_v48 }
 0x53a   : > { %2521 = vmatmul.f32.gmra.mxu2 %v2469_v28 }
 0x53c   : > { %v2165_v2 = vpop.f32.mrf.mxu0 }
 0x53d   : > { %v2348_v50 = vpop.f32.mrf.mxu1  ;;  %v2166_v55 = vadd.f32 %v7666_v62, %v2165_v2 }
 0x53e   : > { %v7803_v20 = vsub.f32 %v7691_v49, %v2348_v50  ;;  %v7830_v50 = vadd.f32 %v2163_v59, %v9425_v7  ;;  %v3554_v59 = vld [vmem:[#allocation2 + $0x9a8] sm:$0xff] }
 0x53f   : > { %v3133_v7 = vld [vmem:[#allocation2 + $0x728] sm:$0xff] }
 0x540   : > { %v2470_v19 = vmul.f32 %v7803_v20, %v7803_v20  ;;  %2395 = vmatmul.f32.gmra.mxu1 %v7800_v22  ;;  %3173 = vmatpush.msrb.mxu0 %v3133_v7  ;;  %v3128_v7 = vld [vmem:[#allocation2 + $0x700] sm:$0xff] }
 0x542   : > { %2524 = vmatmul.f32.gmra.mxu2 %v2470_v19  ;;  %v3555_v19 = vld [vmem:[#allocation2 + $0x9b0] sm:$0xff] }
 0x543   : > { %3560 = vmatpush.msra.mxu1 %v3555_v19  ;;  %v3132_v19 = vld [vmem:[#allocation2 + $0x720] sm:$0xff] }
 0x544   : > { %v2168_v28 = vpop.f32.mrf.mxu0  ;;  %3174 = vmatpush.msrb.mxu0 %v3132_v19  ;;  %v9429_v19 = vld [vmem:[#allocation33_spill] sm:$0xff] }
 0x545   : > { %v2351_v24 = vpop.f32.mrf.mxu1  ;;  %v2169_v36 = vadd.f32 %v7666_v62, %v2168_v28  ;;  %3561 = vmatpush.msra.mxu1 %v3554_v59  ;;  %v3149_v28 = vld [vmem:[#allocation2 + $0x7a8] sm:$0xff] }
 0x546   : > { %v7813_v34 = vsub.f32 %v7697_v30, %v2351_v24  ;;  %v9426_v24 = vld [vmem:[#allocation30_spill] sm:$0xff]  ;;  %3150 = vmatpush.msra.mxu3 %v3149_v28  ;;  %v3129_v28 = vld [vmem:[#allocation2 + $0x708] sm:$0xff] }
 0x547   : > { %v7840_v52 = vadd.f32 %v2166_v55, %v9426_v24 }
 0x548   : > { %v2471_v49 = vmul.f32 %v7813_v34, %v7813_v34  ;;  %2398 = vmatmul.f32.gmra.mxu1 %v7810_v8 }
 0x54a   : > { %2527 = vmatmul.f32.gmra.mxu2 %v2471_v49 }
 0x54c   : > { %v2171_v3 = vpop.f32.mrf.mxu0 }
 0x54d   : > { %v2354_v5 = vpop.f32.mrf.mxu1 }
 0x54e   : > { %v7823_v63 = vsub.f32 %v7703_v46, %v2354_v5 }
 0x550   : > { %v2472_v30 = vmul.f32 %v7823_v63, %v7823_v63  ;;  %2401 = vmatmul.f32.gmra.mxu1 %v7820_v39 }
 0x552   : > { %2530 = vmatmul.f32.gmra.mxu2 %v2472_v30  ;;  %v7850_v30 = vadd.f32 %v2169_v36, %v9427_v6  ;;  %v3131_v36 = vld [vmem:[#allocation2 + $0x718] sm:$0xff]  ;;  %v3130_v6 = vld [vmem:[#allocation2 + $0x710] sm:$0xff] }
 0x553   : > { %3175 = vmatpush.msrb.mxu0 %v3131_v36  ;;  %v3553_v36 = vld [vmem:[#allocation2 + $0x9a0] sm:$0xff] }
 0x554   : > { %v2174_v2 = vpop.f32.mrf.mxu0  ;;  %3562 = vmatpush.msra.mxu1 %v3553_v36  ;;  %v3138_v36 = vld [vmem:[#allocation2 + $0x750] sm:$0xff] }
 0x555   : > { %v2357_v21 = vpop.f32.mrf.mxu1  ;;  %v2175_v59 = vadd.f32 %v7666_v62, %v2174_v2  ;;  %3176 = vmatpush.msrb.mxu0 %v3130_v6  ;;  %v3142_v6 = vld [vmem:[#allocation2 + $0x770] sm:$0xff] }
 0x556   : > { %v7833_v38 = vsub.f32 %v7709_v14, %v2357_v21  ;;  %v2172_v21 = vadd.f32 %v7666_v62, %v2171_v3 }
 0x557   : > { %3177 = vmatpush.msrb.mxu0 %v3129_v28  ;;  %v3140_v28 = vld [vmem:[#allocation2 + $0x760] sm:$0xff] }
 0x558   : > { %v2473_v46 = vmul.f32 %v7833_v38, %v7833_v38  ;;  %2404 = vmatmul.f32.gmra.mxu1 %v7830_v50 }
 0x559   : > { %3178 = vmatpush.msrb.mxu0 %v3128_v7 }
 0x55a   : > { %2533 = vmatmul.f32.gmra.mxu2 %v2473_v46  ;;  %v3148_v46 = vld [vmem:[#allocation2 + $0x7a0] sm:$0xff] }
 0x55b   : > { %3151 = vmatpush.msra.mxu3 %v3148_v46 }
 0x55d   : > { %v2360_v35 = vpop.f32.mrf.mxu1  ;;  %3152 = vmatpush.msra.mxu3 %v3147_v32  ;;  %v3127_v32 = vld [vmem:[#allocation2 + $0x6f8] sm:$0xff] }
 0x55e   : > { %v7843_v49 = vsub.f32 %v7715_v40, %v2360_v35  ;;  %3179 = vmatpush.msrb.mxu0 %v3127_v32  ;;  %v3123_v32 = vld [vmem:[#allocation2 + $0x6d8] sm:$0xff] }
 0x560   : > { %v2474_v14 = vmul.f32 %v7843_v49, %v7843_v49  ;;  %2407 = vmatmul.f32.gmra.mxu1 %v7840_v52 }
 0x562   : > { %2536 = vmatmul.f32.gmra.mxu2 %v2474_v14  ;;  %v2177_v14 = vpop.f32.mrf.mxu0 }
 0x565   : > { %v2363_v5 = vpop.f32.mrf.mxu1 }
 0x566   : > { %v7853_v47 = vsub.f32 %v7720_v1, %v2363_v5  ;;  %v9428_v1 = vld [vmem:[#allocation32_spill] sm:$0xff]  ;;  %v3146_v5 = vld [vmem:[#allocation2 + $0x790] sm:$0xff] }
 0x567   : > { %v7860_v35 = vadd.f32 %v2172_v21, %v9428_v1  ;;  %v3145_v21 = vld [vmem:[#allocation2 + $0x788] sm:$0xff]  ;;  %3153 = vmatpush.msra.mxu3 %v3146_v5 }
 0x568   : > { %v2475_v40 = vmul.f32 %v7853_v47, %v7853_v47  ;;  %2410 = vmatmul.f32.gmra.mxu1 %v7850_v30 }
 0x569   : > { %3154 = vmatpush.msra.mxu3 %v3145_v21  ;;  %v3125_v21 = vld [vmem:[#allocation2 + $0x6e8] sm:$0xff] }
 0x56a   : > { %2539 = vmatmul.f32.gmra.mxu2 %v2475_v40  ;;  %v3537_v40 = vld [vmem:[#allocation2 + $0x920] sm:$0xff]  ;;  %v2180_v5 = vpop.f32.mrf.mxu0 }
 0x56b   : > { %3675 = vmatpush.msra.mxu2 %v3537_v40  ;;  %v3126_v40 = vld [vmem:[#allocation2 + $0x6f0] sm:$0xff] }
 0x56c   : > { %3180 = vmatpush.msrb.mxu0 %v3126_v40  ;;  %v3536_v40 = vld [vmem:[#allocation2 + $0x918] sm:$0xff] }
 0x56d   : > { %v2366_v55 = vpop.f32.mrf.mxu1  ;;  %3676 = vmatpush.msra.mxu2 %v3536_v40  ;;  %v3118_v40 = vld [vmem:[#allocation2 + $0x6b0] sm:$0xff] }
 0x56e   : > { %v7863_v24 = vsub.f32 %v7725_v4, %v2366_v55  ;;  %v3144_v4 = vld [vmem:[#allocation2 + $0x780] sm:$0xff]  ;;  %v7870_v55 = vadd.f32 %v2175_v59, %v9429_v19  ;;  %v2178_v59 = vadd.f32 %v7666_v62, %v2177_v14  ;;  %3181 = vmatpush.msrb.mxu0 %v3125_v21 }
 0x56f   : > { %3155 = vmatpush.msra.mxu3 %v3144_v4  ;;  %v3124_v4 = vld [vmem:[#allocation2 + $0x6e0] sm:$0xff] }
 0x570   : > { %v2476_v3 = vmul.f32 %v7863_v24, %v7863_v24  ;;  %2413 = vmatmul.f32.gmra.mxu1 %v7860_v35  ;;  %3182 = vmatpush.msrb.mxu0 %v3124_v4  ;;  %v3120_v4 = vld [vmem:[#allocation2 + $0x6c0] sm:$0xff] }
 0x572   : > { %2542 = vmatmul.f32.gmra.mxu2 %v2476_v3  ;;  %v3143_v3 = vld [vmem:[#allocation2 + $0x778] sm:$0xff]  ;;  %3183 = vmatpush.msrb.mxu0 %v3123_v32  ;;  %v2183_v21 = vpop.f32.mrf.mxu0 }
 0x573   : > { %3156 = vmatpush.msra.mxu3 %v3143_v3  ;;  %v3119_v32 = vld [vmem:[#allocation2 + $0x6b8] sm:$0xff] }
 0x575   : > { %v2369_v46 = vpop.f32.mrf.mxu1  ;;  %3157 = vmatpush.msra.mxu3 %v3142_v6  ;;  %v3122_v6 = vld [vmem:[#allocation2 + $0x6d0] sm:$0xff] }
 0x576   : > { %v7873_v1 = vsub.f32 %v7730_v26, %v2369_v46  ;;  %v3141_v26 = vld [vmem:[#allocation2 + $0x768] sm:$0xff]  ;;  %v9430_v46 = vld [vmem:[#allocation34_spill] sm:$0xff]  ;;  %3184 = vmatpush.msrb.mxu0 %v3122_v6  ;;  %v3134_v6 = vld [vmem:[#allocation2 + $0x730] sm:$0xff] }
 0x577   : > { %3158 = vmatpush.msra.mxu3 %v3141_v26  ;;  %v7880_v19 = vadd.f32 %v2178_v59, %v9430_v46  ;;  %v2181_v59 = vadd.f32 %v7666_v62, %v2180_v5  ;;  %v3137_v26 = vld [vmem:[#allocation2 + $0x748] sm:$0xff]  ;;  %v9431_v46 = vld [vmem:[#allocation35_spill] sm:$0xff] }
 0x578   : > { %v2477_v2 = vmul.f32 %v7873_v1, %v7873_v1  ;;  %2416 = vmatmul.f32.gmra.mxu1 %v7870_v55 }
 0x579   : > { %3159 = vmatpush.msra.mxu3 %v3140_v28  ;;  %v3136_v28 = vld [vmem:[#allocation2 + $0x740] sm:$0xff]  ;;  %v7890_v43 = vadd.f32 %v2181_v59, %v9431_v46  ;;  %v2184_v59 = vadd.f32 %v7666_v62, %v2183_v21  ;;  %v9432_v46 = vld [vmem:[#allocation36_spill] sm:$0xff] }
 0x57a   : > { %2545 = vmatmul.f32.gmra.mxu2 %v2477_v2  ;;  %v3139_v2 = vld [vmem:[#allocation2 + $0x758] sm:$0xff] }
 0x57b   : > { %3160 = vmatpush.msra.mxu3 %v3139_v2  ;;  %v7900_v56 = vadd.f32 %v2184_v59, %v9432_v46  ;;  %v3210_v46 = vld [vmem:[#allocation2 + $0x808] sm:$0xff] }
 0x57d   : > { %v2372_v7 = vpop.f32.mrf.mxu1  ;;  %3161 = vmatpush.msra.mxu3 %v3138_v36  ;;  %v3552_v36 = vld [vmem:[#allocation2 + $0x998] sm:$0xff] }
 0x57e   : > { %v7883_v3 = vsub.f32 %v7735_v37, %v2372_v7  ;;  %v3121_v37 = vld [vmem:[#allocation2 + $0x6c8] sm:$0xff]  ;;  %3563 = vmatpush.msra.mxu1 %v3552_v36  ;;  %v3376_v36 = vld [vmem:[#allocation2 + $0x8a0] sm:$0xff] }
 0x57f   : > { %3162 = vmatpush.msra.mxu3 %v3137_v26  ;;  %3185 = vmatpush.msrb.mxu0 %v3121_v37  ;;  %v3215_v26 = vld [vmem:[#allocation2 + $0x830] sm:$0xff]  ;;  %v3214_v37 = vld [vmem:[#allocation2 + $0x828] sm:$0xff] }
 0x580   : > { %v2478_v14 = vmul.f32 %v7883_v3, %v7883_v3  ;;  %2419 = vmatmul.f32.gmra.mxu1 %v7880_v19 }
 0x581   : > { %3163 = vmatpush.msra.mxu3 %v3136_v28  ;;  %3186 = vmatpush.msrb.mxu0 %v3120_v4  ;;  %v3377_v28 = vld [vmem:[#allocation2 + $0x8a8] sm:$0xff]  ;;  %v2186_v4 = vpop.f32.mrf.mxu0 }
 0x582   : > { %2548 = vmatmul.f32.gmra.mxu2 %v2478_v14  ;;  %v3135_v14 = vld [vmem:[#allocation2 + $0x738] sm:$0xff] }
 0x583   : > { %3164 = vmatpush.msra.mxu3 %v3135_v14  ;;  %3187 = vmatpush.msrb.mxu0 %v3119_v32  ;;  %v3213_v32 = vld [vmem:[#allocation2 + $0x820] sm:$0xff] }
 0x585   : > { %v2375_v7 = vpop.f32.mrf.mxu1  ;;  %3165 = vmatpush.msra.mxu3 %v3134_v6  ;;  %3188 = vmatpush.msrb.mxu0 %v3118_v40  ;;  %v3212_v6 = vld [vmem:[#allocation2 + $0x818] sm:$0xff] }
 0x586   : > { %v7893_v2 = vsub.f32 %v7740_v41, %v2375_v7  ;;  %v3378_v41 = vld [vmem:[#allocation2 + $0x8b0] sm:$0xff]  ;;  %v3375_v40 = vld [vmem:[#allocation2 + $0x898] sm:$0xff] }
 0x587   : > { %3218 = vmatpush.msrb.mxu3 %v3215_v26  ;;  %3381 = vmatpush.msra.mxu0 %v3378_v41 }
 0x588   : > { %v2479_v5 = vmul.f32 %v7893_v2, %v7893_v2  ;;  %2422 = vmatmul.f32.gmra.mxu1 %v7890_v43 }
 0x589   : > { %3219 = vmatpush.msrb.mxu3 %v3214_v37  ;;  %3382 = vmatpush.msra.mxu0 %v3377_v28  ;;  %v3211_v37 = vld [vmem:[#allocation2 + $0x810] sm:$0xff] }
 0x58a   : > { %2551 = vmatmul.f32.gmra.mxu2 %v2479_v5  ;;  %v2187_v5 = vadd.f32 %v7666_v62, %v2186_v4  ;;  %v3374_v28 = vld [vmem:[#allocation2 + $0x890] sm:$0xff] }
 0x58b   : > { %3220 = vmatpush.msrb.mxu3 %v3213_v32  ;;  %3383 = vmatpush.msra.mxu0 %v3376_v36  ;;  %v3209_v32 = vld [vmem:[#allocation2 + $0x800] sm:$0xff]  ;;  %v3208_v36 = vld [vmem:[#allocation2 + $0x7f8] sm:$0xff] }
 0x58d   : > { %v2378_v7 = vpop.f32.mrf.mxu1  ;;  %3221 = vmatpush.msrb.mxu3 %v3212_v6  ;;  %3384 = vmatpush.msra.mxu0 %v3375_v40  ;;  %v3371_v6 = vld [vmem:[#allocation2 + $0x878] sm:$0xff] }
 0x58e   : > { %v7903_v14 = vsub.f32 %v7745_v27, %v2378_v7  ;;  %v9433_v27 = vld [vmem:[#allocation37_spill] sm:$0xff]  ;;  %v2189_v7 = vpop.f32.mrf.mxu0 }
 0x58f   : > { %v7910_v59 = vadd.f32 %v2187_v5, %v9433_v27  ;;  %3222 = vmatpush.msrb.mxu3 %v3211_v37  ;;  %3385 = vmatpush.msra.mxu0 %v3374_v28  ;;  %v2190_v5 = vadd.f32 %v7666_v62, %v2189_v7  ;;  %v3207_v28 = vld [vmem:[#allocation2 + $0x7f0] sm:$0xff]  ;;  %v3206_v7 = vld [vmem:[#allocation2 + $0x7e8] sm:$0xff] }
 0x590   : > { %v2480_v21 = vmul.f32 %v7903_v14, %v7903_v14  ;;  %2425 = vmatmul.f32.gmra.mxu1 %v7900_v56 }
 0x591   : > { %3223 = vmatpush.msrb.mxu3 %v3210_v46  ;;  %v3370_v46 = vld [vmem:[#allocation2 + $0x870] sm:$0xff] }
 0x592   : > { %2554 = vmatmul.f32.gmra.mxu2 %v2480_v21  ;;  %v3373_v21 = vld [vmem:[#allocation2 + $0x888] sm:$0xff] }
 0x593   : > { %3386 = vmatpush.msra.mxu0 %v3373_v21  ;;  %3224 = vmatpush.msrb.mxu3 %v3209_v32  ;;  %v3205_v21 = vld [vmem:[#allocation2 + $0x7e0] sm:$0xff]  ;;  %v3204_v32 = vld [vmem:[#allocation2 + $0x7d8] sm:$0xff] }
 0x595   : > { %v2381_v26 = vpop.f32.mrf.mxu1  ;;  %3225 = vmatpush.msrb.mxu3 %v3208_v36 }
 0x596   : > { %v7913_v41 = vsub.f32 %v7750_v54, %v2381_v26  ;;  %v3372_v54 = vld [vmem:[#allocation2 + $0x880] sm:$0xff]  ;;  %v9434_v26 = vld [vmem:[#allocation38_spill] sm:$0xff] }
 0x597   : > { %3387 = vmatpush.msra.mxu0 %v3372_v54  ;;  %v7920_v27 = vadd.f32 %v2190_v5, %v9434_v26  ;;  %3226 = vmatpush.msrb.mxu3 %v3207_v28  ;;  %v3368_v5 = vld [vmem:[#allocation2 + $0x860] sm:$0xff]  ;;  %v3367_v54 = vld [vmem:[#allocation2 + $0x858] sm:$0xff]  ;;  %v3366_v26 = vld [vmem:[#allocation2 + $0x850] sm:$0xff] }
 0x598   : > { %v2481_v4 = vmul.f32 %v7913_v41, %v7913_v41  ;;  %2428 = vmatmul.f32.gmra.mxu1 %v7910_v59  ;;  %v3551_v28 = vld [vmem:[#allocation2 + $0x990] sm:$0xff] }
 0x599   : > { %3388 = vmatpush.msra.mxu0 %v3371_v6  ;;  %3227 = vmatpush.msrb.mxu3 %v3206_v7  ;;  %v3365_v7 = vld [vmem:[#allocation2 + $0x848] sm:$0xff] }
 0x59a   : > { %2557 = vmatmul.f32.gmra.mxu2 %v2481_v4  ;;  %v3369_v4 = vld [vmem:[#allocation2 + $0x868] sm:$0xff]  ;;  %3564 = vmatpush.msra.mxu1 %v3551_v28 }
 0x59b   : > { %3389 = vmatpush.msra.mxu0 %v3370_v46  ;;  %3228 = vmatpush.msrb.mxu3 %v3205_v21  ;;  %v3364_v21 = vld [vmem:[#allocation2 + $0x840] sm:$0xff] }
 0x59d   : > { %v2384_v40 = vpop.f32.mrf.mxu1  ;;  %3390 = vmatpush.msra.mxu0 %v3369_v4  ;;  %3229 = vmatpush.msrb.mxu3 %v3204_v32  ;;  %v3201_v4 = vld [vmem:[#allocation2 + $0x7c0] sm:$0xff] }
 0x59e   : > { %v7923_v37 = vsub.f32 %v7755_v13, %v2384_v40  ;;  %v3535_v13 = vld [vmem:[#allocation2 + $0x910] sm:$0xff] }
 0x59f   : > { %3391 = vmatpush.msra.mxu0 %v3368_v5  ;;  %3677 = vmatpush.msra.mxu2 %v3535_v13  ;;  %v3203_v40 = vld [vmem:[#allocation2 + $0x7d0] sm:$0xff]  ;;  %v6315_v5 = vld [vmem:[#allocation2 + $0x6a8] ss:$0 sm:$0xff]  ;;  %v3363_v13 = vld [vmem:[#allocation2 + $0x838] sm:$0xff] }
 0x5a0   : > { %v2482_v62 = vmul.f32 %v7923_v37, %v7923_v37  ;;  %2431 = vmatmul.f32.gmra.mxu1 %v7920_v27  ;;  %3230 = vmatpush.msrb.mxu3 %v3203_v40 }
 0x5a1   : > { %3392 = vmatpush.msra.mxu0 %v3367_v54 }
 0x5a2   : > { %2560 = vmatmul.f32.gmra.mxu2 %v2482_v62  ;;  %v3202_v62 = vld [vmem:[#allocation2 + $0x7c8] sm:$0xff] }
 0x5a3   : > { %3393 = vmatpush.msra.mxu0 %v3366_v26  ;;  %3231 = vmatpush.msrb.mxu3 %v3202_v62  ;;  %v3534_v62 = vld [vmem:[#allocation2 + $0x908] sm:$0xff] }
 0x5a4   : > { %3678 = vmatpush.msra.mxu2 %v3534_v62  ;;  %v7946_v62 = vld [vmem:[#allocation2 + $0xf0] sm:$0xff] }
 0x5a5   : > { %v2387_v36 = vpop.f32.mrf.mxu1  ;;  %3394 = vmatpush.msra.mxu0 %v3365_v7  ;;  %3232 = vmatpush.msrb.mxu3 %v3201_v4  ;;  %v6316_v7 = vld [vmem:[#allocation2 + $0x6a0] ss:$0 sm:$0xff] }
 0x5a6   : > { %v7929_v6 = vsub.f32 %v7760_v53, %v2387_v36  ;;  %v3200_v53 = vld [vmem:[#allocation2 + $0x7b8] sm:$0xff] }
 0x5a7   : > { %3395 = vmatpush.msra.mxu0 %v3364_v21  ;;  %3233 = vmatpush.msrb.mxu3 %v3200_v53  ;;  %v7938_v53 = vld [vmem:[#allocation2 + $0xf8] sm:$0xff] }
 0x5a8   : > { %v2483_v46 = vmul.f32 %v7929_v6, %v7929_v6 }
 0x5a9   : > { %3396 = vmatpush.msra.mxu0 %v3363_v13 }
 0x5aa   : > { %2563 = vmatmul.f32.gmra.mxu2 %v2483_v46 }
 0x5ad   : > { %v2390_v32 = vpop.f32.mrf.mxu1  ;;  %v2516_v54 = vpop.f32.mrf.mxu2 }
 0x5ae   : > { %v7934_v36 = vsub.f32 %v7771_v31, %v2390_v32  ;;  %v2517_v40 = vadd.f32 1e-05, %v2516_v54  ;;  %v3110_v26 = vpop.f32.mrf.mxu0 }
 0x5af   : > { %v3111_v28 = vadd.f32 %v6315_v5, %v3110_v26 }
 0x5b0   : > { %v2484_v46 = vmul.f32 %v7934_v36, %v7934_v36  ;;  %6406 = vrsqrt.f32 %v2517_v40  ;;  %vm2618_vm14 = vweird.f32 %v2517_v40 }
 0x5b1   : > { %v3116_v4 = vmax.f32 %v3111_v28, 0.0 }
 0x5b2   : > { %2566 = vmatmul.f32.gmra.mxu2 %v2484_v46 }
 0x5b3   : > { %3166 = vmatmul.f32.vlgmr.msra.gmra.mxu3 %v3116_v4  ;;  %v3067_v21 = vpop.f32.mrf.mxu3  ;;  %v3550_v4 = vld [vmem:[#allocation2 + $0x988] sm:$0xff] }
 0x5b4   : > { %v3068_v45 = vadd.f32 %v6316_v7, %v3067_v21  ;;  %3820 = vmatpush.msra.mxu3 %v7938_v53  ;;  %3565 = vmatpush.msra.mxu1 %v3550_v4 }
 0x5b5   : > { %v2393_v31 = vpop.f32.mrf.mxu1  ;;  %v2519_v32 = vpop.f32.mrf.mxu2 }
 0x5b6   : > { %v6407_v13 = vpop.eup %6406  ;;  %v3073_v54 = vmax.f32 %v3068_v45, 0.0  ;;  %v7942_v26 = vsub.f32 %v7786_v12, %v2393_v31  ;;  %v7944_v58 = vadd.f32 1e-05, %v2519_v32  ;;  %v3113_v25 = vpop.f32.mrf.mxu0  ;;  %3821 = vmatpush.msra.mxu3 %v7946_v62  ;;  %v7952_v31 = vld [vmem:[#allocation2 + $0xe8] sm:$0xff]  ;;  %3566 = vmatpush.msra.mxu1 %v3549_v15 }
 0x5b7   : > { %v2613_v28 = vmul.f32 %v6407_v13, %v2517_v40  ;;  %v3114_v46 = vadd.f32 %v6315_v5, %v3113_v25  ;;  %vm2619_vm13 = vweird.f32 %v6407_v13 }
 0x5b8   : > { %v2485_v21 = vmul.f32 %v7942_v26, %v7942_v26  ;;  %6408 = vrsqrt.f32 %v7944_v58  ;;  %3189 = vmatmul.f32.vlgmr.msrb.gmra.mxu0 %v3073_v54  ;;  %3822 = vmatpush.msra.mxu3 %v7952_v31  ;;  %vm2620_vm15 = vmor %vm2618_vm14, %vm2619_vm13  ;;  %vm2628_vm3 = vweird.f32 %v7944_v58 }
 0x5b9   : > { %v2614_v45 = vmul.f32 %v6407_v13, %v2613_v28  ;;  %v3117_v12 = vmax.f32 %v3114_v46, 0.0  ;;  %3847 = vmatpush.msrb.mxu0 %v7938_v53 }
 0x5ba   : > { %2569 = vmatmul.f32.gmra.mxu2 %v2485_v21  ;;  %3823 = vmatpush.msra.mxu3 %v7957_v17 }
 0x5bb   : > { %v2615_v32 = vmul.f32 0.5, %v2614_v45  ;;  %3169 = vmatmul.f32.gmra.mxu3 %v3117_v12  ;;  %v3070_v25 = vpop.f32.mrf.mxu3  ;;  %3848 = vmatpush.msrb.mxu0 %v7946_v62  ;;  %v7966_v12 = vld [vmem:[#allocation2 + $0xd8] sm:$0xff] }
 0x5bc   : > { %v3071_v5 = vadd.f32 %v6316_v7, %v3070_v25  ;;  %3824 = vmatpush.msra.mxu3 %v7966_v12  ;;  %v3533_v25 = vld [vmem:[#allocation2 + $0x900] sm:$0xff] }
 0x5bd   : > { %v2616_v54 = vsub.f32 1.5, %v2615_v32  ;;  %v2396_v28 = vpop.f32.mrf.mxu1  ;;  %v2522_v46 = vpop.f32.mrf.mxu2  ;;  %3849 = vmatpush.msrb.mxu0 %v7952_v31  ;;  %3679 = vmatpush.msra.mxu2 %v3533_v25  ;;  %v7989_v25 = vld [vmem:[#allocation2 + $0xc0] sm:$0xff] }
 0x5be   : > { %v6409_v4 = vpop.eup %6408  ;;  %v3074_v57 = vmax.f32 %v3071_v5, 0.0  ;;  %v7962_v21 = vsub.f32 %v7800_v22, %v2396_v28  ;;  %v7964_v45 = vadd.f32 1e-05, %v2522_v46  ;;  %v7982_v46 = vld [vmem:[#allocation2 + $0x578] ss:$0 sm:$0xff] }
 0x5bf   : > { %v2617_v7 = vmul.f32 %v6407_v13, %v2616_v54  ;;  %v2623_v32 = vmul.f32 %v6409_v4, %v7944_v58  ;;  %3850 = vmatpush.msrb.mxu0 %v7957_v17  ;;  %v7977_v54 = vld [vmem:[#allocation2 + $0xd0] sm:$0xff]  ;;  %vm2629_vm2 = vweird.f32 %v6409_v4  ;;  %3680 = vmatpush.msra.mxu2 %v3532_v42 }
 0x5c0   : > { %v2486_v22 = vmul.f32 %v7962_v21, %v7962_v21  ;;  %6410 = vrsqrt.f32 %v7964_v45  ;;  %3192 = vmatmul.f32.gmra.mxu0 %v3074_v57  ;;  %3825 = vmatpush.msra.mxu3 %v7977_v54  ;;  %vm2630_vm4 = vmor %vm2628_vm3, %vm2629_vm2  ;;  %vm2638_vm6 = vweird.f32 %v7964_v45 }
 0x5c1   : > { %v2621_v5 = vsel %vm2620_vm15, %v6407_v13, %v2617_v7  ;;  %v2624_v28 = vmul.f32 %v6409_v4, %v2623_v32  ;;  %3851 = vmatpush.msrb.mxu0 %v7966_v12 }
 0x5c2   : > { %v2932_v40 = vmul.f32 %v2621_v5, %v7763_v44  ;;  %2572 = vmatmul.f32.gmra.mxu2 %v2486_v22  ;;  %3826 = vmatpush.msra.mxu3 %v7984_v29 }
 0x5c3   : > { %v2625_v61 = vmul.f32 0.5, %v2624_v28  ;;  %3852 = vmatpush.msrb.mxu0 %v7977_v54 }
 0x5c4   : > { %v2966_v57 = vmul.f32 %v7972_v9, %v2932_v40  ;;  %3827 = vmatpush.msra.mxu3 %v7989_v25 }
 0x5c5   : > { %v2626_v13 = vsub.f32 1.5, %v2625_v61  ;;  %v2399_v7 = vpop.f32.mrf.mxu1  ;;  %v2525_v32 = vpop.f32.mrf.mxu2  ;;  %3853 = vmatpush.msrb.mxu0 %v7984_v29 }
 0x5c6   : > { %v6411_v44 = vpop.eup %6410  ;;  %v7994_v22 = vsub.f32 %v7810_v8, %v2399_v7  ;;  %v7996_v5 = vadd.f32 1e-05, %v2525_v32  ;;  %v7999_v28 = vadd.f32 %v7982_v46, %v2966_v57  ;;  %3828 = vmatpush.msra.mxu3 %v8003_v60 }
 0x5c7   : > { %v2627_v40 = vmul.f32 %v6409_v4, %v2626_v13  ;;  %v2633_v61 = vmul.f32 %v6411_v44, %v7964_v45  ;;  %3854 = vmatpush.msrb.mxu0 %v7989_v25  ;;  %v8013_v13 = vld [vmem:[#allocation2 + $0xb0] sm:$0xff]  ;;  %vm2639_vm5 = vweird.f32 %v6411_v44 }
 0x5c8   : > { %9435 = vst [vmem:[#allocation8_spill] sm:$0xff] %v7999_v28  ;;  %v2487_v8 = vmul.f32 %v7994_v22, %v7994_v22  ;;  %6412 = vrsqrt.f32 %v7996_v5  ;;  %3234 = vmatmul.f32.vlgmr.msrb.gmra.mxu3 %v7999_v28  ;;  %3397 = vmatmul.f32.vlgmr.msra.gmra.mxu0 %v7999_v28  ;;  %vm2640_vm7 = vmor %vm2638_vm6, %vm2639_vm5  ;;  %vm2648_vm0 = vweird.f32 %v7996_v5 }
 0x5c9   : > { %v2634_v58 = vmul.f32 %v6411_v44, %v2633_v61  ;;  %v2631_v57 = vsel %vm2630_vm4, %v6409_v4, %v2627_v40  ;;  %3829 = vmatpush.msra.mxu3 %v8013_v13  ;;  %3855 = vmatpush.msrb.mxu0 %v8003_v60  ;;  %v8023_v61 = vld [vmem:[#allocation2 + $0xa0] sm:$0xff] }
 0x5ca   : > { %2575 = vmatmul.f32.gmra.mxu2 %v2487_v8  ;;  %v2933_v7 = vmul.f32 %v2631_v57, %v7774_v0 }
 0x5cb   : > { %v2635_v32 = vmul.f32 0.5, %v2634_v58  ;;  %3830 = vmatpush.msra.mxu3 %v8018_v16  ;;  %3856 = vmatpush.msrb.mxu0 %v8013_v13 }
 0x5cc   : > { %v2967_v33 = vmul.f32 %v7972_v9, %v2933_v7 }
 0x5cd   : > { %v2636_v4 = vsub.f32 1.5, %v2635_v32  ;;  %v2402_v15 = vpop.f32.mrf.mxu1  ;;  %v2528_v40 = vpop.f32.mrf.mxu2  ;;  %3831 = vmatpush.msra.mxu3 %v8023_v61  ;;  %3857 = vmatpush.msrb.mxu0 %v8018_v16 }
 0x5ce   : > { %v6413_v0 = vpop.eup %6412  ;;  %v8027_v8 = vsub.f32 %v7820_v39, %v2402_v15  ;;  %v8029_v58 = vadd.f32 1e-05, %v2528_v40  ;;  %v8032_v57 = vadd.f32 %v7982_v46, %v2967_v33 }
 0x5cf   : > { %v2637_v7 = vmul.f32 %v6411_v44, %v2636_v4  ;;  %v2643_v32 = vmul.f32 %v6413_v0, %v7996_v5  ;;  %3832 = vmatpush.msra.mxu3 %v8037_v23  ;;  %v8046_v4 = vld [vmem:[#allocation2 + $0x90] sm:$0xff]  ;;  %3858 = vmatpush.msrb.mxu0 %v8023_v61  ;;  %vm2649_vm8 = vweird.f32 %v6413_v0 }
 0x5d0   : > { %9436 = vst [vmem:[#allocation51_spill] sm:$0xff] %v8032_v57  ;;  %v2488_v39 = vmul.f32 %v8027_v8, %v8027_v8  ;;  %6414 = vrsqrt.f32 %v8029_v58  ;;  %3237 = vmatmul.f32.gmra.mxu3 %v8032_v57  ;;  %3400 = vmatmul.f32.gmra.mxu0 %v8032_v57  ;;  %v3548_v57 = vld [vmem:[#allocation2 + $0x978] sm:$0xff]  ;;  %vm2650_vm1 = vmor %vm2648_vm0, %vm2649_vm8  ;;  %vm2658_vm10 = vweird.f32 %v8029_v58 }
 0x5d1   : > { %v2644_v33 = vmul.f32 %v6413_v0, %v2643_v32  ;;  %v2641_v45 = vsel %vm2640_vm7, %v6411_v44, %v2637_v7  ;;  %3833 = vmatpush.msra.mxu3 %v8046_v4  ;;  %3859 = vmatpush.msrb.mxu0 %v8037_v23  ;;  %v8056_v32 = vld [vmem:[#allocation2 + $0x80] sm:$0xff] }
 0x5d2   : > { %2578 = vmatmul.f32.gmra.mxu2 %v2488_v39  ;;  %v2934_v15 = vmul.f32 %v2641_v45, %v7789_v51  ;;  %3567 = vmatpush.msra.mxu1 %v3548_v57 }
 0x5d3   : > { %v2645_v40 = vmul.f32 0.5, %v2644_v33  ;;  %3834 = vmatpush.msra.mxu3 %v8051_v10  ;;  %3860 = vmatpush.msrb.mxu0 %v8046_v4 }
 0x5d4   : > { %v2968_v18 = vmul.f32 %v7972_v9, %v2934_v15 }
 0x5d5   : > { %v2646_v44 = vsub.f32 1.5, %v2645_v40  ;;  %v2405_v42 = vpop.f32.mrf.mxu1  ;;  %v2531_v7 = vpop.f32.mrf.mxu2  ;;  %3835 = vmatpush.msra.mxu3 %v8056_v32  ;;  %3861 = vmatpush.msrb.mxu0 %v8051_v10 }
 0x5d6   : > { %v6415_v51 = vpop.eup %6414  ;;  %v8060_v39 = vsub.f32 %v7830_v50, %v2405_v42  ;;  %v8062_v33 = vadd.f32 1e-05, %v2531_v7  ;;  %v8065_v45 = vadd.f32 %v7982_v46, %v2968_v18 }
 0x5d7   : > { %3932 = vmatpush.msrb.mxu3 %v7938_v53  ;;  %v2647_v15 = vmul.f32 %v6413_v0, %v2646_v44  ;;  %v2653_v40 = vmul.f32 %v6415_v51, %v8029_v58  ;;  %3862 = vmatpush.msrb.mxu0 %v8056_v32  ;;  %vm2659_vm9 = vweird.f32 %v6415_v51 }
 0x5d8   : > { %9437 = vst [vmem:[#allocation9_spill] sm:$0xff] %v8065_v45  ;;  %v2489_v50 = vmul.f32 %v8060_v39, %v8060_v39  ;;  %6416 = vrsqrt.f32 %v8062_v33  ;;  %3240 = vmatmul.f32.gmra.mxu3 %v8065_v45  ;;  %3403 = vmatmul.f32.gmra.mxu0 %v8065_v45  ;;  %vm2660_vm11 = vmor %vm2658_vm10, %vm2659_vm9  ;;  %vm2668_vm13 = vweird.f32 %v8062_v33 }
 0x5d9   : > { %v2654_v18 = vmul.f32 %v6415_v51, %v2653_v40  ;;  %v2651_v42 = vsel %vm2650_vm1, %v6413_v0, %v2647_v15  ;;  %3933 = vmatpush.msrb.mxu3 %v7946_v62 }
 0x5da   : > { %2581 = vmatmul.f32.gmra.mxu2 %v2489_v50  ;;  %v2935_v5 = vmul.f32 %v2651_v42, %v7803_v20  ;;  %v3531_v42 = vld [vmem:[#allocation2 + $0x8f0] sm:$0xff] }
 0x5db   : > { %v2655_v44 = vmul.f32 0.5, %v2654_v18  ;;  %3934 = vmatpush.msrb.mxu3 %v7952_v31  ;;  %3681 = vmatpush.msra.mxu2 %v3531_v42 }
 0x5dc   : > { %v2969_v7 = vmul.f32 %v7972_v9, %v2935_v5 }
 0x5dd   : > { %v2656_v28 = vsub.f32 1.5, %v2655_v44  ;;  %v2408_v45 = vpop.f32.mrf.mxu1  ;;  %v2534_v40 = vpop.f32.mrf.mxu2  ;;  %3935 = vmatpush.msrb.mxu3 %v7957_v17 }
 0x5de   : > { %v6417_v0 = vpop.eup %6416  ;;  %v8085_v57 = vsub.f32 %v7840_v52, %v2408_v45  ;;  %v8087_v20 = vadd.f32 1e-05, %v2534_v40  ;;  %v8090_v15 = vadd.f32 %v7982_v46, %v2969_v7 }
 0x5df   : > { %v2657_v50 = vmul.f32 %v6415_v51, %v2656_v28  ;;  %v2663_v18 = vmul.f32 %v6417_v0, %v8062_v33  ;;  %3936 = vmatpush.msrb.mxu3 %v7966_v12  ;;  %vm2669_vm12 = vweird.f32 %v6417_v0 }
 0x5e0   : > { %9438 = vst [vmem:[#allocation53_spill] sm:$0xff] %v8090_v15  ;;  %v2490_v5 = vmul.f32 %v8085_v57, %v8085_v57  ;;  %6418 = vrsqrt.f32 %v8087_v20  ;;  %3243 = vmatmul.f32.gmra.mxu3 %v8090_v15  ;;  %3406 = vmatmul.f32.gmra.mxu0 %v8090_v15  ;;  %vm2670_vm14 = vmor %vm2668_vm13, %vm2669_vm12  ;;  %vm2678_vm2 = vweird.f32 %v8087_v20 }
 0x5e1   : > { %v2664_v52 = vmul.f32 %v6417_v0, %v2663_v18  ;;  %v2661_v45 = vsel %vm2660_vm11, %v6415_v51, %v2657_v50  ;;  %3937 = vmatpush.msrb.mxu3 %v7977_v54 }
 0x5e2   : > { %2584 = vmatmul.f32.gmra.mxu2 %v2490_v5  ;;  %v2936_v28 = vmul.f32 %v2661_v45, %v7813_v34  ;;  %v3547_v5 = vld [vmem:[#allocation2 + $0x970] sm:$0xff] }
 0x5e3   : > { %v2665_v58 = vmul.f32 0.5, %v2664_v52  ;;  %3938 = vmatpush.msrb.mxu3 %v7984_v29  ;;  %3568 = vmatpush.msra.mxu1 %v3547_v5 }
 0x5e4   : > { %v2970_v44 = vmul.f32 %v7972_v9, %v2936_v28 }
 0x5e5   : > { %v2666_v7 = vsub.f32 1.5, %v2665_v58  ;;  %v2411_v40 = vpop.f32.mrf.mxu1  ;;  %v2537_v48 = vpop.f32.mrf.mxu2  ;;  %3939 = vmatpush.msrb.mxu3 %v7989_v25 }
 0x5e6   : > { %v6419_v15 = vpop.eup %6418  ;;  %v8106_v51 = vsub.f32 %v7850_v30, %v2411_v40  ;;  %v2538_v50 = vadd.f32 1e-05, %v2537_v48  ;;  %v8109_v18 = vadd.f32 %v7982_v46, %v2970_v44 }
 0x5e7   : > { %v2667_v34 = vmul.f32 %v6417_v0, %v2666_v7  ;;  %v2673_v42 = vmul.f32 %v6419_v15, %v8087_v20  ;;  %3940 = vmatpush.msrb.mxu3 %v8003_v60  ;;  %vm2679_vm15 = vweird.f32 %v6419_v15 }
 0x5e8   : > { %9439 = vst [vmem:[#allocation10_spill] sm:$0xff] %v8109_v18  ;;  %v2491_v52 = vmul.f32 %v8106_v51, %v8106_v51  ;;  %6420 = vrsqrt.f32 %v2538_v50  ;;  %3246 = vmatmul.f32.gmra.mxu3 %v8109_v18  ;;  %3409 = vmatmul.f32.gmra.mxu0 %v8109_v18  ;;  %vm2680_vm3 = vmor %vm2678_vm2, %vm2679_vm15  ;;  %vm2688_vm5 = vweird.f32 %v2538_v50 }
 0x5e9   : > { %v2674_v48 = vmul.f32 %v6419_v15, %v2673_v42  ;;  %v2671_v30 = vsel %vm2670_vm14, %v6417_v0, %v2667_v34  ;;  %3941 = vmatpush.msrb.mxu3 %v8013_v13 }
 0x5ea   : > { %2587 = vmatmul.f32.gmra.mxu2 %v2491_v52  ;;  %v2937_v33 = vmul.f32 %v2671_v30, %v7823_v63  ;;  %v3530_v52 = vld [vmem:[#allocation2 + $0x8e8] sm:$0xff] }
 0x5eb   : > { %v2675_v45 = vmul.f32 0.5, %v2674_v48  ;;  %3942 = vmatpush.msrb.mxu3 %v8018_v16  ;;  %3682 = vmatpush.msra.mxu2 %v3530_v52 }
 0x5ec   : > { %v2971_v28 = vmul.f32 %v7972_v9, %v2937_v33 }
 0x5ed   : > { %v2676_v58 = vsub.f32 1.5, %v2675_v45  ;;  %v2414_v44 = vpop.f32.mrf.mxu1  ;;  %v2540_v7 = vpop.f32.mrf.mxu2  ;;  %3943 = vmatpush.msrb.mxu3 %v8023_v61 }
 0x5ee   : > { %v6421_v40 = vpop.eup %6420  ;;  %v8124_v0 = vsub.f32 %v7860_v35, %v2414_v44  ;;  %v2541_v34 = vadd.f32 1e-05, %v2540_v7  ;;  %v8127_v42 = vadd.f32 %v7982_v46, %v2971_v28 }
 0x5ef   : > { %v2677_v63 = vmul.f32 %v6419_v15, %v2676_v58  ;;  %v2683_v5 = vmul.f32 %v6421_v40, %v2538_v50  ;;  %3944 = vmatpush.msrb.mxu3 %v8037_v23  ;;  %vm2689_vm4 = vweird.f32 %v6421_v40 }
 0x5f0   : > { %9440 = vst [vmem:[#allocation56_spill] sm:$0xff] %v8127_v42  ;;  %v2492_v48 = vmul.f32 %v8124_v0, %v8124_v0  ;;  %6422 = vrsqrt.f32 %v2541_v34  ;;  %3249 = vmatmul.f32.gmra.mxu3 %v8127_v42  ;;  %3412 = vmatmul.f32.gmra.mxu0 %v8127_v42  ;;  %vm2690_vm6 = vmor %vm2688_vm5, %vm2689_vm4  ;;  %vm2698_vm8 = vweird.f32 %v2541_v34 }
 0x5f1   : > { %v2684_v35 = vmul.f32 %v6421_v40, %v2683_v5  ;;  %v2681_v30 = vsel %vm2680_vm3, %v6419_v15, %v2677_v63  ;;  %3945 = vmatpush.msrb.mxu3 %v8046_v4 }
 0x5f2   : > { %2590 = vmatmul.f32.gmra.mxu2 %v2492_v48  ;;  %v2938_v20 = vmul.f32 %v2681_v30, %v7833_v38  ;;  %v3546_v48 = vld [vmem:[#allocation2 + $0x968] sm:$0xff] }
 0x5f3   : > { %v2685_v33 = vmul.f32 0.5, %v2684_v35  ;;  %3946 = vmatpush.msrb.mxu3 %v8051_v10  ;;  %3569 = vmatpush.msra.mxu1 %v3546_v48 }
 0x5f4   : > { %v2972_v45 = vmul.f32 %v7972_v9, %v2938_v20 }
 0x5f5   : > { %v2686_v28 = vsub.f32 1.5, %v2685_v33  ;;  %v2417_v58 = vpop.f32.mrf.mxu1  ;;  %v2543_v44 = vpop.f32.mrf.mxu2  ;;  %3947 = vmatpush.msrb.mxu3 %v8056_v32 }
 0x5f6   : > { %v6423_v7 = vpop.eup %6422  ;;  %v8141_v15 = vsub.f32 %v7870_v55, %v2417_v58  ;;  %v2544_v63 = vadd.f32 1e-05, %v2543_v44  ;;  %v8144_v5 = vadd.f32 %v7982_v46, %v2972_v45 }
 0x5f7   : > { %v2687_v38 = vmul.f32 %v6421_v40, %v2686_v28  ;;  %v2693_v52 = vmul.f32 %v6423_v7, %v2541_v34  ;;  %vm2699_vm7 = vweird.f32 %v6423_v7 }
 0x5f8   : > { %9441 = vst [vmem:[#allocation11_spill] sm:$0xff] %v8144_v5  ;;  %v2493_v35 = vmul.f32 %v8141_v15, %v8141_v15  ;;  %6424 = vrsqrt.f32 %v2544_v63  ;;  %3252 = vmatmul.f32.gmra.mxu3 %v8144_v5  ;;  %3415 = vmatmul.f32.gmra.mxu0 %v8144_v5  ;;  %vm2700_vm0 = vmor %vm2698_vm8, %vm2699_vm7  ;;  %vm2708_vm9 = vweird.f32 %v2544_v63 }
 0x5f9   : > { %v2694_v30 = vmul.f32 %v6423_v7, %v2693_v52  ;;  %v2691_v55 = vsel %vm2690_vm6, %v6421_v40, %v2687_v38  ;;  %v3529_v52 = vld [vmem:[#allocation2 + $0x8e0] sm:$0xff] }
 0x5fa   : > { %2593 = vmatmul.f32.gmra.mxu2 %v2493_v35  ;;  %v2939_v20 = vmul.f32 %v2691_v55, %v7843_v49 }
 0x5fb   : > { %v2695_v33 = vmul.f32 0.5, %v2694_v30  ;;  %3683 = vmatpush.msra.mxu2 %v3529_v52 }
 0x5fc   : > { %v2973_v50 = vmul.f32 %v7972_v9, %v2939_v20 }
 0x5fd   : > { %v2696_v45 = vsub.f32 1.5, %v2695_v33  ;;  %v2420_v28 = vpop.f32.mrf.mxu1  ;;  %v2546_v58 = vpop.f32.mrf.mxu2 }
 0x5fe   : > { %v6425_v44 = vpop.eup %6424  ;;  %v8153_v42 = vsub.f32 %v7880_v19, %v2420_v28  ;;  %v2547_v18 = vadd.f32 1e-05, %v2546_v58  ;;  %v8156_v5 = vadd.f32 %v7982_v46, %v2973_v50 }
 0x5ff   : > { %v2697_v40 = vmul.f32 %v6423_v7, %v2696_v45  ;;  %v2703_v38 = vmul.f32 %v6425_v44, %v2544_v63  ;;  %vm2709_vm1 = vweird.f32 %v6425_v44 }
 0x600   : > { %v2494_v49 = vmul.f32 %v8153_v42, %v8153_v42  ;;  %6426 = vrsqrt.f32 %v2547_v18  ;;  %3255 = vmatmul.f32.gmra.mxu3 %v8156_v5  ;;  %3418 = vmatmul.f32.gmra.mxu0 %v8156_v5  ;;  %vm2710_vm10 = vmor %vm2708_vm9, %vm2709_vm1  ;;  %vm2718_vm12 = vweird.f32 %v2547_v18 }
 0x601   : > { %v2704_v48 = vmul.f32 %v6425_v44, %v2703_v38  ;;  %v2701_v19 = vsel %vm2700_vm0, %v6423_v7, %v2697_v40  ;;  %v3545_v38 = vld [vmem:[#allocation2 + $0x960] sm:$0xff] }
 0x602   : > { %2596 = vmatmul.f32.gmra.mxu2 %v2494_v49  ;;  %v2940_v35 = vmul.f32 %v2701_v19, %v7853_v47  ;;  %3570 = vmatpush.msra.mxu1 %v3545_v38 }
 0x603   : > { %v2705_v30 = vmul.f32 0.5, %v2704_v48 }
 0x604   : > { %v2974_v34 = vmul.f32 %v7972_v9, %v2940_v35 }
 0x605   : > { %v2706_v55 = vsub.f32 1.5, %v2705_v30  ;;  %v2423_v20 = vpop.f32.mrf.mxu1  ;;  %v2549_v33 = vpop.f32.mrf.mxu2 }
 0x606   : > { %v6427_v50 = vpop.eup %6426  ;;  %v8165_v45 = vsub.f32 %v7890_v43, %v2423_v20  ;;  %v2550_v28 = vadd.f32 1e-05, %v2549_v33  ;;  %v8168_v58 = vadd.f32 %v7982_v46, %v2974_v34 }
 0x607   : > { %v2707_v7 = vmul.f32 %v6425_v44, %v2706_v55  ;;  %v2713_v40 = vmul.f32 %v6427_v50, %v2547_v18  ;;  %vm2719_vm11 = vweird.f32 %v6427_v50 }
 0x608   : > { %v2495_v47 = vmul.f32 %v8165_v45, %v8165_v45  ;;  %6428 = vrsqrt.f32 %v2550_v28  ;;  %3258 = vmatmul.f32.gmra.mxu3 %v8168_v58  ;;  %3421 = vmatmul.f32.gmra.mxu0 %v8168_v58  ;;  %vm2720_vm13 = vmor %vm2718_vm12, %vm2719_vm11  ;;  %vm2728_vm15 = vweird.f32 %v2550_v28 }
 0x609   : > { %v2714_v52 = vmul.f32 %v6427_v50, %v2713_v40  ;;  %v2711_v43 = vsel %vm2710_vm10, %v6425_v44, %v2707_v7  ;;  %v3528_v40 = vld [vmem:[#allocation2 + $0x8d8] sm:$0xff] }
 0x60a   : > { %2599 = vmatmul.f32.gmra.mxu2 %v2495_v47  ;;  %v2941_v49 = vmul.f32 %v2711_v43, %v7863_v24 }
 0x60b   : > { %v2715_v48 = vmul.f32 0.5, %v2714_v52  ;;  %3684 = vmatpush.msra.mxu2 %v3528_v40 }
 0x60c   : > { %v2975_v63 = vmul.f32 %v7972_v9, %v2941_v49 }
 0x60d   : > { %v2716_v19 = vsub.f32 1.5, %v2715_v48  ;;  %v2426_v35 = vpop.f32.mrf.mxu1  ;;  %v2552_v30 = vpop.f32.mrf.mxu2 }
 0x60e   : > { %v6429_v34 = vpop.eup %6428  ;;  %v8177_v55 = vsub.f32 %v7900_v56, %v2426_v35  ;;  %v2553_v20 = vadd.f32 1e-05, %v2552_v30  ;;  %v8180_v33 = vadd.f32 %v7982_v46, %v2975_v63 }
 0x60f   : > { %v2717_v44 = vmul.f32 %v6427_v50, %v2716_v19  ;;  %v2723_v7 = vmul.f32 %v6429_v34, %v2550_v28  ;;  %vm2729_vm14 = vweird.f32 %v6429_v34 }
 0x610   : > { %v2496_v24 = vmul.f32 %v8177_v55, %v8177_v55  ;;  %6430 = vrsqrt.f32 %v2553_v20  ;;  %3261 = vmatmul.f32.gmra.mxu3 %v8180_v33  ;;  %3424 = vmatmul.f32.gmra.mxu0 %v8180_v33  ;;  %vm2730_vm2 = vmor %vm2728_vm15, %vm2729_vm14  ;;  %vm2738_vm4 = vweird.f32 %v2553_v20 }
 0x611   : > { %v2724_v38 = vmul.f32 %v6429_v34, %v2723_v7  ;;  %v2721_v56 = vsel %vm2720_vm13, %v6427_v50, %v2717_v44  ;;  %v3544_v7 = vld [vmem:[#allocation2 + $0x958] sm:$0xff] }
 0x612   : > { %2602 = vmatmul.f32.gmra.mxu2 %v2496_v24  ;;  %v2942_v47 = vmul.f32 %v2721_v56, %v7873_v1  ;;  %3571 = vmatpush.msra.mxu1 %v3544_v7 }
 0x613   : > { %v2725_v52 = vmul.f32 0.5, %v2724_v38 }
 0x614   : > { %v2976_v18 = vmul.f32 %v7972_v9, %v2942_v47 }
 0x615   : > { %v2726_v43 = vsub.f32 1.5, %v2725_v52  ;;  %v2429_v49 = vpop.f32.mrf.mxu1  ;;  %v2555_v48 = vpop.f32.mrf.mxu2 }
 0x616   : > { %v6431_v63 = vpop.eup %6430  ;;  %v8189_v19 = vsub.f32 %v7910_v59, %v2429_v49  ;;  %v2556_v35 = vadd.f32 1e-05, %v2555_v48  ;;  %v8192_v30 = vadd.f32 %v7982_v46, %v2976_v18 }
 0x617   : > { %v2727_v50 = vmul.f32 %v6429_v34, %v2726_v43  ;;  %v2733_v44 = vmul.f32 %v6431_v63, %v2553_v20  ;;  %vm2739_vm3 = vweird.f32 %v6431_v63 }
 0x618   : > { %v2497_v1 = vmul.f32 %v8189_v19, %v8189_v19  ;;  %6432 = vrsqrt.f32 %v2556_v35  ;;  %3264 = vmatmul.f32.gmra.mxu3 %v8192_v30  ;;  %3427 = vmatmul.f32.gmra.mxu0 %v8192_v30  ;;  %vm2740_vm5 = vmor %vm2738_vm4, %vm2739_vm3  ;;  %vm2748_vm7 = vweird.f32 %v2556_v35 }
 0x619   : > { %v2734_v40 = vmul.f32 %v6431_v63, %v2733_v44  ;;  %v2731_v59 = vsel %vm2730_vm2, %v6429_v34, %v2727_v50  ;;  %v3527_v44 = vld [vmem:[#allocation2 + $0x8d0] sm:$0xff] }
 0x61a   : > { %2605 = vmatmul.f32.gmra.mxu2 %v2497_v1  ;;  %v2943_v24 = vmul.f32 %v2731_v59, %v7883_v3 }
 0x61b   : > { %v2735_v38 = vmul.f32 0.5, %v2734_v40  ;;  %3685 = vmatpush.msra.mxu2 %v3527_v44 }
 0x61c   : > { %v2977_v28 = vmul.f32 %v7972_v9, %v2943_v24 }
 0x61d   : > { %v2736_v56 = vsub.f32 1.5, %v2735_v38  ;;  %v2432_v47 = vpop.f32.mrf.mxu1  ;;  %v2558_v52 = vpop.f32.mrf.mxu2 }
 0x61e   : > { %v6433_v18 = vpop.eup %6432  ;;  %v8201_v43 = vsub.f32 %v7920_v27, %v2432_v47  ;;  %v2559_v49 = vadd.f32 1e-05, %v2558_v52  ;;  %v8204_v48 = vadd.f32 %v7982_v46, %v2977_v28 }
 0x61f   : > { %v2737_v34 = vmul.f32 %v6431_v63, %v2736_v56  ;;  %v2743_v50 = vmul.f32 %v6433_v18, %v2556_v35  ;;  %vm2749_vm6 = vweird.f32 %v6433_v18 }
 0x620   : > { %v2498_v3 = vmul.f32 %v8201_v43, %v8201_v43  ;;  %6434 = vrsqrt.f32 %v2559_v49  ;;  %3267 = vmatmul.f32.gmra.mxu3 %v8204_v48  ;;  %3430 = vmatmul.f32.gmra.mxu0 %v8204_v48  ;;  %vm2750_vm8 = vmor %vm2748_vm7, %vm2749_vm6  ;;  %vm2758_vm1 = vweird.f32 %v2559_v49 }
 0x621   : > { %v2744_v7 = vmul.f32 %v6433_v18, %v2743_v50  ;;  %v2741_v27 = vsel %vm2740_vm5, %v6431_v63, %v2737_v34  ;;  %v3543_v50 = vld [vmem:[#allocation2 + $0x950] sm:$0xff] }
 0x622   : > { %2608 = vmatmul.f32.gmra.mxu2 %v2498_v3  ;;  %v2944_v1 = vmul.f32 %v2741_v27, %v7893_v2  ;;  %3572 = vmatpush.msra.mxu1 %v3543_v50 }
 0x623   : > { %v2745_v40 = vmul.f32 0.5, %v2744_v7 }
 0x624   : > { %v2978_v20 = vmul.f32 %v7972_v9, %v2944_v1 }
 0x625   : > { %v2746_v59 = vsub.f32 1.5, %v2745_v40  ;;  %v2561_v24 = vpop.f32.mrf.mxu2 }
 0x626   : > { %v6435_v38 = vpop.eup %6434  ;;  %v2562_v28 = vadd.f32 1e-05, %v2561_v24  ;;  %v8213_v56 = vadd.f32 %v7982_v46, %v2978_v20  ;;  %v3542_v20 = vld [vmem:[#allocation2 + $0x948] sm:$0xff] }
 0x627   : > { %v2747_v47 = vmul.f32 %v6433_v18, %v2746_v59  ;;  %v2753_v52 = vmul.f32 %v6435_v38, %v2559_v49  ;;  %vm2759_vm0 = vweird.f32 %v6435_v38  ;;  %3573 = vmatpush.msra.mxu1 %v3542_v20 }
 0x628   : > { %6436 = vrsqrt.f32 %v2562_v28  ;;  %3270 = vmatmul.f32.gmra.mxu3 %v8213_v56  ;;  %3433 = vmatmul.f32.gmra.mxu0 %v8213_v56  ;;  %vm2760_vm9 = vmor %vm2758_vm1, %vm2759_vm0  ;;  %vm2768_vm11 = vweird.f32 %v2562_v28 }
 0x629   : > { %v2754_v2 = vmul.f32 %v6435_v38, %v2753_v52  ;;  %v2751_v63 = vsel %vm2750_vm8, %v6433_v18, %v2747_v47  ;;  %v3526_v52 = vld [vmem:[#allocation2 + $0x8c8] sm:$0xff]  ;;  %4109 = vmatpush.msrb.mxu1 %v7938_v53 }
 0x62a   : > { %v2945_v34 = vmul.f32 %v2751_v63, %v7903_v14  ;;  %3686 = vmatpush.msra.mxu2 %v3526_v52 }
 0x62b   : > { %v2755_v44 = vmul.f32 0.5, %v2754_v2  ;;  %4110 = vmatpush.msrb.mxu1 %v7946_v62 }
 0x62c   : > { %v2979_v3 = vmul.f32 %v7972_v9, %v2945_v34 }
 0x62d   : > { %v2756_v7 = vsub.f32 1.5, %v2755_v44  ;;  %v2564_v27 = vpop.f32.mrf.mxu2  ;;  %4111 = vmatpush.msrb.mxu1 %v7952_v31 }
 0x62e   : > { %v6437_v35 = vpop.eup %6436  ;;  %v2565_v1 = vadd.f32 1e-05, %v2564_v27  ;;  %v8220_v40 = vadd.f32 %v7982_v46, %v2979_v3 }
 0x62f   : > { %v2757_v59 = vmul.f32 %v6435_v38, %v2756_v7  ;;  %v2763_v24 = vmul.f32 %v6437_v35, %v2562_v28  ;;  %vm2769_vm10 = vweird.f32 %v6437_v35  ;;  %4112 = vmatpush.msrb.mxu1 %v7957_v17 }
 0x630   : > { %6438 = vrsqrt.f32 %v2565_v1  ;;  %3273 = vmatmul.f32.gmra.mxu3 %v8220_v40  ;;  %3436 = vmatmul.f32.gmra.mxu0 %v8220_v40  ;;  %vm2770_vm12 = vmor %vm2768_vm11, %vm2769_vm10  ;;  %vm2778_vm14 = vweird.f32 %v2565_v1 }
 0x631   : > { %v2764_v14 = vmul.f32 %v6437_v35, %v2763_v24  ;;  %v2761_v18 = vsel %vm2760_vm9, %v6435_v38, %v2757_v59  ;;  %4113 = vmatpush.msrb.mxu1 %v7966_v12 }
 0x632   : > { %v2946_v47 = vmul.f32 %v2761_v18, %v7913_v41 }
 0x633   : > { %v2765_v50 = vmul.f32 0.5, %v2764_v14  ;;  %4114 = vmatpush.msrb.mxu1 %v7977_v54 }
 0x634   : > { %v2980_v49 = vmul.f32 %v7972_v9, %v2946_v47 }
 0x635   : > { %v2766_v2 = vsub.f32 1.5, %v2765_v50  ;;  %v2567_v63 = vpop.f32.mrf.mxu2  ;;  %v8228_v34 = vpop.f32.mrf.mxu0  ;;  %4115 = vmatpush.msrb.mxu1 %v7984_v29  ;;  %v8253_v29 = vld [vmem:[#allocation2 + $0x8c0] ss:$0 sm:$0xff] }
 0x636   : > { %v6439_v44 = vpop.eup %6438  ;;  %v2568_v3 = vadd.f32 1e-05, %v2567_v63  ;;  %v8232_v38 = vadd.f32 %v7982_v46, %v2980_v49  ;;  %v8237_v7 = vpop.f32.mrf.mxu3 }
 0x637   : > { %v2767_v53 = vmul.f32 %v6437_v35, %v2766_v2  ;;  %v2773_v41 = vmul.f32 %v6439_v44, %v2565_v1  ;;  %vm2779_vm13 = vweird.f32 %v6439_v44  ;;  %4116 = vmatpush.msrb.mxu1 %v7989_v25 }
 0x638   : > { %6440 = vrsqrt.f32 %v2568_v3  ;;  %3276 = vmatmul.f32.gmra.mxu3 %v8232_v38  ;;  %3439 = vmatmul.f32.gmra.mxu0 %v8232_v38  ;;  %vm2780_vm15 = vmor %vm2778_vm14, %vm2779_vm13  ;;  %vm2788_vm3 = vweird.f32 %v2568_v3 }
 0x639   : > { %v2774_v62 = vmul.f32 %v6439_v44, %v2773_v41  ;;  %v2771_v31 = vsel %vm2770_vm12, %v6437_v35, %v2767_v53  ;;  %4117 = vmatpush.msrb.mxu1 %v8003_v60 }
 0x63a   : > { %v2947_v27 = vmul.f32 %v2771_v31, %v7923_v37 }
 0x63b   : > { %v2775_v20 = vmul.f32 0.5, %v2774_v62  ;;  %4118 = vmatpush.msrb.mxu1 %v8013_v13 }
 0x63c   : > { %v2981_v28 = vmul.f32 %v7972_v9, %v2947_v27 }
 0x63d   : > { %v2776_v17 = vsub.f32 1.5, %v2775_v20  ;;  %v2570_v59 = vpop.f32.mrf.mxu2  ;;  %v8243_v24 = vpop.f32.mrf.mxu0  ;;  %4119 = vmatpush.msrb.mxu1 %v8018_v16  ;;  %v8271_v20 = vld [vmem:[#allocation2 + $0x8b8] ss:$0 sm:$0xff] }
 0x63e   : > { %v6441_v52 = vpop.eup %6440  ;;  %v2571_v14 = vadd.f32 1e-05, %v2570_v59  ;;  %v8247_v35 = vadd.f32 %v7982_v46, %v2981_v28  ;;  %v8256_v2 = vpop.f32.mrf.mxu3 }
 0x63f   : > { %v2777_v12 = vmul.f32 %v6439_v44, %v2776_v17  ;;  %v2783_v37 = vmul.f32 %v6441_v52, %v2568_v3  ;;  %vm2789_vm2 = vweird.f32 %v6441_v52  ;;  %4120 = vmatpush.msrb.mxu1 %v8023_v61 }
 0x640   : > { %6442 = vrsqrt.f32 %v2571_v14  ;;  %3279 = vmatmul.f32.gmra.mxu3 %v8247_v35  ;;  %3442 = vmatmul.f32.gmra.mxu0 %v8247_v35  ;;  %vm2790_vm4 = vmor %vm2788_vm3, %vm2789_vm2  ;;  %vm2798_vm6 = vweird.f32 %v2571_v14 }
 0x641   : > { %v2784_v18 = vmul.f32 %v6441_v52, %v2783_v37  ;;  %v2781_v47 = vsel %vm2780_vm15, %v6439_v44, %v2777_v12  ;;  %4121 = vmatpush.msrb.mxu1 %v8037_v23 }
 0x642   : > { %v2948_v50 = vmul.f32 %v2781_v47, %v7929_v6 }
 0x643   : > { %v2785_v49 = vmul.f32 0.5, %v2784_v18  ;;  %4122 = vmatpush.msrb.mxu1 %v8046_v4 }
 0x644   : > { %v2982_v25 = vmul.f32 %v7972_v9, %v2948_v50 }
 0x645   : > { %v2786_v1 = vsub.f32 1.5, %v2785_v49  ;;  %v2573_v63 = vpop.f32.mrf.mxu2  ;;  %v3398_v53 = vpop.f32.mrf.mxu0  ;;  %4123 = vmatpush.msrb.mxu1 %v8051_v10 }
 0x646   : > { %v6443_v44 = vpop.eup %6442  ;;  %v8261_v41 = vadd.f32 1e-05, %v2573_v63  ;;  %v3399_v60 = vadd.f32 %v8253_v29, %v3398_v53  ;;  %v8265_v6 = vadd.f32 %v7982_v46, %v2982_v25 }
 0x647   : > { %v2787_v62 = vmul.f32 %v6441_v52, %v2786_v1  ;;  %v2793_v31 = vmul.f32 %v6443_v44, %v2571_v14  ;;  %vm2799_vm5 = vweird.f32 %v6443_v44  ;;  %4124 = vmatpush.msrb.mxu1 %v8056_v32 }
 0x648   : > { %6444 = vrsqrt.f32 %v8261_v41  ;;  %v3494_v27 = vmax.f32 %v3399_v60, 0.0  ;;  %3282 = vmatmul.f32.gmra.mxu3 %v8265_v6  ;;  %3445 = vmatmul.f32.gmra.mxu0 %v8265_v6  ;;  %vm2800_vm7 = vmor %vm2798_vm6, %vm2799_vm5  ;;  %vm2808_vm0 = vweird.f32 %v8261_v41 }
 0x649   : > { %v2794_v28 = vmul.f32 %v6443_v44, %v2793_v31  ;;  %v2791_v17 = vsel %vm2790_vm4, %v6441_v52, %v2787_v62 }
 0x64a   : > { %3574 = vmatmul.f32.vlgmr.msra.gmra.mxu1 %v3494_v27  ;;  %v2949_v3 = vmul.f32 %v2791_v17, %v7934_v36  ;;  %v6632_v27 = vld [vmem:[#allocation2 + $0xf8] sm:$0xff] }
 0x64b   : > { %v2795_v59 = vmul.f32 0.5, %v2794_v28  ;;  %v3235_v12 = vpop.f32.mrf.mxu3  ;;  %5462 = vmatpush.msra.mxu1 %v6632_v27 }
 0x64c   : > { %v3236_v61 = vadd.f32 %v8271_v20, %v3235_v12  ;;  %v2983_v37 = vmul.f32 %v7972_v9, %v2949_v3  ;;  %v6633_v3 = vld [vmem:[#allocation2 + $0xf0] sm:$0xff] }
 0x64d   : > { %v2796_v18 = vsub.f32 1.5, %v2795_v59  ;;  %v2576_v47 = vpop.f32.mrf.mxu2  ;;  %v3401_v50 = vpop.f32.mrf.mxu0  ;;  %5463 = vmatpush.msra.mxu1 %v6633_v3 }
 0x64e   : > { %v6445_v52 = vpop.eup %6444  ;;  %v3331_v49 = vmax.f32 %v3236_v61, 0.0  ;;  %v8279_v25 = vadd.f32 1e-05, %v2576_v47  ;;  %v3402_v36 = vadd.f32 %v8253_v29, %v3401_v50  ;;  %v8283_v1 = vadd.f32 %v7982_v46, %v2983_v37  ;;  %v6634_v47 = vld [vmem:[#allocation2 + $0xe8] sm:$0xff] }
 0x64f   : > { %v2797_v63 = vmul.f32 %v6443_v44, %v2796_v18  ;;  %v2803_v53 = vmul.f32 %v6445_v52, %v8261_v41  ;;  %vm2809_vm8 = vweird.f32 %v6445_v52  ;;  %5464 = vmatpush.msra.mxu1 %v6634_v47 }
 0x650   : > { %6446 = vrsqrt.f32 %v8279_v25  ;;  %v3495_v60 = vmax.f32 %v3402_v36, 0.0  ;;  %3285 = vmatmul.f32.gmra.mxu3 %v8283_v1  ;;  %3448 = vmatmul.f32.gmra.mxu0 %v8283_v1  ;;  %vm2810_vm1 = vmor %vm2808_vm0, %vm2809_vm8  ;;  %vm2818_vm10 = vweird.f32 %v8279_v25 }
 0x651   : > { %v2804_v62 = vmul.f32 %v6445_v52, %v2803_v53  ;;  %3687 = vmatmul.f32.vlgmr.msra.gmra.mxu2 %v3331_v49  ;;  %v2801_v31 = vsel %vm2800_vm7, %v6443_v44, %v2797_v63  ;;  %v6635_v53 = vld [vmem:[#allocation2 + $0xe0] sm:$0xff] }
 0x652   : > { %3577 = vmatmul.f32.gmra.mxu1 %v3495_v60  ;;  %v2950_v14 = vmul.f32 %v2801_v31, %v7942_v26  ;;  %v6636_v31 = vld [vmem:[#allocation2 + $0xd8] sm:$0xff] }
 0x653   : > { %v2805_v28 = vmul.f32 0.5, %v2804_v62  ;;  %v3238_v17 = vpop.f32.mrf.mxu3  ;;  %5465 = vmatpush.msra.mxu1 %v6635_v53 }
 0x654   : > { %v3239_v59 = vadd.f32 %v8271_v20, %v3238_v17  ;;  %v2984_v12 = vmul.f32 %v7972_v9, %v2950_v14  ;;  %v8308_v17 = vld [vmem:[#allocation2 + $0x570] ss:$0 sm:$0xff] }
 0x655   : > { %v2806_v61 = vsub.f32 1.5, %v2805_v28  ;;  %v2579_v37 = vpop.f32.mrf.mxu2  ;;  %v3404_v18 = vpop.f32.mrf.mxu0  ;;  %5466 = vmatpush.msra.mxu1 %v6636_v31 }
 0x656   : > { %v6447_v44 = vpop.eup %6446  ;;  %v3332_v50 = vmax.f32 %v3239_v59, 0.0  ;;  %v8293_v49 = vadd.f32 1e-05, %v2579_v37  ;;  %v3405_v26 = vadd.f32 %v8253_v29, %v3404_v18  ;;  %v8297_v36 = vadd.f32 %v7982_v46, %v2984_v12 }
 0x657   : > { %v2807_v63 = vmul.f32 %v6445_v52, %v2806_v61  ;;  %v2813_v9 = vmul.f32 %v6447_v44, %v8279_v25  ;;  %5467 = vmatpush.msra.mxu1 %v7977_v54  ;;  %vm2819_vm9 = vweird.f32 %v6447_v44 }
 0x658   : > { %6448 = vrsqrt.f32 %v8293_v49  ;;  %v3496_v60 = vmax.f32 %v3405_v26, 0.0  ;;  %3288 = vmatmul.f32.gmra.mxu3 %v8297_v36  ;;  %3451 = vmatmul.f32.gmra.mxu0 %v8297_v36  ;;  %vm2820_vm11 = vmor %vm2818_vm10, %vm2819_vm9  ;;  %vm2828_vm13 = vweird.f32 %v8293_v49 }
 0x659   : > { %v2814_v62 = vmul.f32 %v6447_v44, %v2813_v9  ;;  %3690 = vmatmul.f32.gmra.mxu2 %v3332_v50  ;;  %v2811_v46 = vsel %vm2810_vm1, %v6445_v52, %v2807_v63  ;;  %v6638_v52 = vld [vmem:[#allocation2 + $0xc8] sm:$0xff]  ;;  %v8314_v50 = vld [vmem:[#allocation2 + $0x578] ss:$0 sm:$0xff]  ;;  %v6640_v9 = vld [vmem:[#allocation2 + $0xc0] sm:$0xff] }
 0x65a   : > { %3580 = vmatmul.f32.gmra.mxu1 %v3496_v60  ;;  %v2951_v41 = vmul.f32 %v2811_v46, %v7962_v21  ;;  %v6641_v46 = vld [vmem:[#allocation2 + $0xb8] sm:$0xff] }
 0x65b   : > { %v2815_v27 = vmul.f32 0.5, %v2814_v62  ;;  %v3241_v14 = vpop.f32.mrf.mxu3  ;;  %5468 = vmatpush.msra.mxu1 %v6638_v52 }
 0x65c   : > { %v3242_v28 = vadd.f32 %v8271_v20, %v3241_v14  ;;  %v2985_v3 = vmul.f32 %v8308_v17, %v2951_v41 }
 0x65d   : > { %v2816_v59 = vsub.f32 1.5, %v2815_v27  ;;  %v2582_v12 = vpop.f32.mrf.mxu2  ;;  %v3407_v61 = vpop.f32.mrf.mxu0  ;;  %5469 = vmatpush.msra.mxu1 %v6640_v9 }
 0x65e   : > { %v6449_v37 = vpop.eup %6448  ;;  %v3333_v18 = vmax.f32 %v3242_v28, 0.0  ;;  %v8311_v47 = vadd.f32 1e-05, %v2582_v12  ;;  %v3408_v21 = vadd.f32 %v8253_v29, %v3407_v61  ;;  %v8317_v54 = vadd.f32 %v8314_v50, %v2985_v3 }
 0x65f   : > { %v2817_v26 = vmul.f32 %v6447_v44, %v2816_v59  ;;  %v2823_v63 = vmul.f32 %v6449_v37, %v8293_v49  ;;  %5470 = vmatpush.msra.mxu1 %v6641_v46  ;;  %vm2829_vm12 = vweird.f32 %v6449_v37 }
 0x660   : > { %6450 = vrsqrt.f32 %v8311_v47  ;;  %v3497_v53 = vmax.f32 %v3408_v21, 0.0  ;;  %3291 = vmatmul.f32.gmra.mxu3 %v8317_v54  ;;  %3454 = vmatmul.f32.gmra.mxu0 %v8317_v54  ;;  %v6642_v21 = vld [vmem:[#allocation2 + $0xa0] sm:$0xff]  ;;  %vm2830_vm14 = vmor %vm2828_vm13, %vm2829_vm12  ;;  %vm2838_vm2 = vweird.f32 %v8311_v47 }
 0x661   : > { %v2824_v60 = vmul.f32 %v6449_v37, %v2823_v63  ;;  %3693 = vmatmul.f32.gmra.mxu2 %v3333_v18  ;;  %v2821_v62 = vsel %vm2820_vm11, %v6447_v44, %v2817_v26  ;;  %5471 = vmatpush.msra.mxu1 %v8013_v13 }
 0x662   : > { %3583 = vmatmul.f32.gmra.mxu1 %v3497_v53  ;;  %v2952_v25 = vmul.f32 %v2821_v62, %v7994_v22 }
 0x663   : > { %v2825_v31 = vmul.f32 0.5, %v2824_v60  ;;  %v3244_v41 = vpop.f32.mrf.mxu3  ;;  %5472 = vmatpush.msra.mxu1 %v8018_v16 }
 0x664   : > { %v3245_v27 = vadd.f32 %v8271_v20, %v3244_v41  ;;  %v2986_v14 = vmul.f32 %v8308_v17, %v2952_v25 }
 0x665   : > { %v2826_v28 = vsub.f32 1.5, %v2825_v31  ;;  %v2585_v3 = vpop.f32.mrf.mxu2  ;;  %v3410_v59 = vpop.f32.mrf.mxu0  ;;  %5473 = vmatpush.msra.mxu1 %v6642_v21 }
 0x666   : > { %v6451_v44 = vpop.eup %6450  ;;  %v3334_v12 = vmax.f32 %v3245_v27, 0.0  ;;  %v8330_v61 = vadd.f32 1e-05, %v2585_v3  ;;  %v3411_v22 = vadd.f32 %v8253_v29, %v3410_v59  ;;  %v8334_v52 = vadd.f32 %v8314_v50, %v2986_v14 }
 0x667   : > { %v2827_v13 = vmul.f32 %v6449_v37, %v2826_v28  ;;  %v2833_v18 = vmul.f32 %v6451_v44, %v8311_v47  ;;  %5474 = vmatpush.msra.mxu1 %v8037_v23  ;;  %vm2839_vm15 = vweird.f32 %v6451_v44 }
 0x668   : > { %6452 = vrsqrt.f32 %v8330_v61  ;;  %v3498_v16 = vmax.f32 %v3411_v22, 0.0  ;;  %3294 = vmatmul.f32.gmra.mxu3 %v8334_v52  ;;  %3457 = vmatmul.f32.gmra.mxu0 %v8334_v52  ;;  %vm2840_vm3 = vmor %vm2838_vm2, %vm2839_vm15  ;;  %vm2848_vm5 = vweird.f32 %v8330_v61 }
 0x669   : > { %v2834_v26 = vmul.f32 %v6451_v44, %v2833_v18  ;;  %3696 = vmatmul.f32.gmra.mxu2 %v3334_v12  ;;  %v2831_v63 = vsel %vm2830_vm14, %v6449_v37, %v2827_v13  ;;  %5475 = vmatpush.msra.mxu1 %v8046_v4 }
 0x66a   : > { %3586 = vmatmul.f32.gmra.mxu1 %v3498_v16  ;;  %v2953_v49 = vmul.f32 %v2831_v63, %v8027_v8 }
 0x66b   : > { %v2835_v9 = vmul.f32 0.5, %v2834_v26  ;;  %v3247_v53 = vpop.f32.mrf.mxu3  ;;  %5476 = vmatpush.msra.mxu1 %v8051_v10 }
 0x66c   : > { %v3248_v60 = vadd.f32 %v8271_v20, %v3247_v53  ;;  %v2987_v62 = vmul.f32 %v8308_v17, %v2953_v49 }
 0x66d   : > { %v2836_v46 = vsub.f32 1.5, %v2835_v9  ;;  %v2588_v25 = vpop.f32.mrf.mxu2  ;;  %v3413_v31 = vpop.f32.mrf.mxu0  ;;  %5477 = vmatpush.msra.mxu1 %v8056_v32 }
 0x66e   : > { %v6453_v37 = vpop.eup %6452  ;;  %v3335_v41 = vmax.f32 %v3248_v60, 0.0  ;;  %v2589_v23 = vadd.f32 1e-05, %v2588_v25  ;;  %v3414_v27 = vadd.f32 %v8253_v29, %v3413_v31  ;;  %v8349_v8 = vadd.f32 %v8314_v50, %v2987_v62 }
 0x66f   : > { %v2837_v14 = vmul.f32 %v6451_v44, %v2836_v46  ;;  %v2843_v4 = vmul.f32 %v6453_v37, %v8330_v61  ;;  %vm2849_vm4 = vweird.f32 %v6453_v37 }
 0x670   : > { %6454 = vrsqrt.f32 %v2589_v23  ;;  %v3499_v28 = vmax.f32 %v3414_v27, 0.0  ;;  %3297 = vmatmul.f32.gmra.mxu3 %v8349_v8  ;;  %3460 = vmatmul.f32.gmra.mxu0 %v8349_v8  ;;  %vm2850_vm6 = vmor %vm2848_vm5, %vm2849_vm4  ;;  %vm2858_vm8 = vweird.f32 %v2589_v23 }
 0x671   : > { %v2844_v10 = vmul.f32 %v6453_v37, %v2843_v4  ;;  %3699 = vmatmul.f32.gmra.mxu2 %v3335_v41  ;;  %v2841_v3 = vsel %vm2840_vm3, %v6451_v44, %v2837_v14 }
 0x672   : > { %3589 = vmatmul.f32.gmra.mxu1 %v3499_v28  ;;  %v2954_v59 = vmul.f32 %v2841_v3, %v8060_v39 }
 0x673   : > { %v2845_v12 = vmul.f32 0.5, %v2844_v10  ;;  %v3250_v22 = vpop.f32.mrf.mxu3 }
 0x674   : > { %v3251_v47 = vadd.f32 %v8271_v20, %v3250_v22  ;;  %v2988_v13 = vmul.f32 %v8308_v17, %v2954_v59 }
 0x675   : > { %v2846_v32 = vsub.f32 1.5, %v2845_v12  ;;  %v2591_v18 = vpop.f32.mrf.mxu2  ;;  %v3416_v21 = vpop.f32.mrf.mxu0 }
 0x676   : > { %v6455_v16 = vpop.eup %6454  ;;  %v3336_v26 = vmax.f32 %v3251_v47, 0.0  ;;  %v2592_v63 = vadd.f32 1e-05, %v2591_v18  ;;  %v3417_v49 = vadd.f32 %v8253_v29, %v3416_v21  ;;  %v8361_v44 = vadd.f32 %v8314_v50, %v2988_v13 }
 0x677   : > { %v2847_v9 = vmul.f32 %v6453_v37, %v2846_v32  ;;  %v2853_v39 = vmul.f32 %v6455_v16, %v2589_v23  ;;  %vm2859_vm7 = vweird.f32 %v6455_v16 }
 0x678   : > { %6456 = vrsqrt.f32 %v2592_v63  ;;  %v3500_v53 = vmax.f32 %v3417_v49, 0.0  ;;  %3300 = vmatmul.f32.gmra.mxu3 %v8361_v44  ;;  %3463 = vmatmul.f32.gmra.mxu0 %v8361_v44  ;;  %vm2860_vm0 = vmor %vm2858_vm8, %vm2859_vm7  ;;  %vm2868_vm9 = vweird.f32 %v2592_v63 }
 0x679   : > { %v2854_v60 = vmul.f32 %v6455_v16, %v2853_v39  ;;  %3702 = vmatmul.f32.gmra.mxu2 %v3336_v26  ;;  %v2851_v62 = vsel %vm2850_vm6, %v6453_v37, %v2847_v9 }
 0x67a   : > { %3592 = vmatmul.f32.gmra.mxu1 %v3500_v53  ;;  %v2955_v46 = vmul.f32 %v2851_v62, %v8085_v57 }
 0x67b   : > { %v2855_v25 = vmul.f32 0.5, %v2854_v60  ;;  %v3253_v31 = vpop.f32.mrf.mxu3 }
 0x67c   : > { %v3254_v41 = vadd.f32 %v8271_v20, %v3253_v31  ;;  %v2989_v61 = vmul.f32 %v8308_v17, %v2955_v46 }
 0x67d   : > { %v2856_v27 = vsub.f32 1.5, %v2855_v25  ;;  %v2594_v14 = vpop.f32.mrf.mxu2  ;;  %v3419_v4 = vpop.f32.mrf.mxu0 }
 0x67e   : > { %v6457_v28 = vpop.eup %6456  ;;  %v3337_v10 = vmax.f32 %v3254_v41, 0.0  ;;  %v2595_v3 = vadd.f32 1e-05, %v2594_v14  ;;  %v3420_v59 = vadd.f32 %v8253_v29, %v3419_v4  ;;  %v8371_v37 = vadd.f32 %v8314_v50, %v2989_v61 }
 0x67f   : > { %v2857_v12 = vmul.f32 %v6455_v16, %v2856_v27  ;;  %v2863_v57 = vmul.f32 %v6457_v28, %v2592_v63  ;;  %vm2869_vm1 = vweird.f32 %v6457_v28 }
 0x680   : > { %6458 = vrsqrt.f32 %v2595_v3  ;;  %v3501_v22 = vmax.f32 %v3420_v59, 0.0  ;;  %3303 = vmatmul.f32.gmra.mxu3 %v8371_v37  ;;  %3466 = vmatmul.f32.gmra.mxu0 %v8371_v37  ;;  %vm2870_vm10 = vmor %vm2868_vm9, %vm2869_vm1  ;;  %vm2878_vm12 = vweird.f32 %v2595_v3 }
 0x681   : > { %v2864_v47 = vmul.f32 %v6457_v28, %v2863_v57  ;;  %3705 = vmatmul.f32.gmra.mxu2 %v3337_v10  ;;  %v2861_v13 = vsel %vm2860_vm0, %v6455_v16, %v2857_v12 }
 0x682   : > { %3595 = vmatmul.f32.gmra.mxu1 %v3501_v22  ;;  %v2956_v32 = vmul.f32 %v2861_v13, %v8106_v51 }
 0x683   : > { %v2865_v18 = vmul.f32 0.5, %v2864_v47  ;;  %v3256_v21 = vpop.f32.mrf.mxu3 }
 0x684   : > { %v3257_v26 = vadd.f32 %v8271_v20, %v3256_v21  ;;  %v2990_v23 = vmul.f32 %v8308_v17, %v2956_v32 }
 0x685   : > { %v2866_v49 = vsub.f32 1.5, %v2865_v18  ;;  %v2597_v9 = vpop.f32.mrf.mxu2  ;;  %v3422_v39 = vpop.f32.mrf.mxu0 }
 0x686   : > { %v6459_v53 = vpop.eup %6458  ;;  %v3338_v60 = vmax.f32 %v3257_v26, 0.0  ;;  %v2598_v62 = vadd.f32 1e-05, %v2597_v9  ;;  %v3423_v46 = vadd.f32 %v8253_v29, %v3422_v39  ;;  %v8380_v16 = vadd.f32 %v8314_v50, %v2990_v23 }
 0x687   : > { %v2867_v25 = vmul.f32 %v6457_v28, %v2866_v49  ;;  %v2873_v51 = vmul.f32 %v6459_v53, %v2595_v3  ;;  %vm2879_vm11 = vweird.f32 %v6459_v53 }
 0x688   : > { %6460 = vrsqrt.f32 %v2598_v62  ;;  %v3502_v31 = vmax.f32 %v3423_v46, 0.0  ;;  %3306 = vmatmul.f32.gmra.mxu3 %v8380_v16  ;;  %3469 = vmatmul.f32.gmra.mxu0 %v8380_v16  ;;  %vm2880_vm13 = vmor %vm2878_vm12, %vm2879_vm11  ;;  %vm2888_vm15 = vweird.f32 %v2598_v62 }
 0x689   : > { %v2874_v41 = vmul.f32 %v6459_v53, %v2873_v51  ;;  %3708 = vmatmul.f32.gmra.mxu2 %v3338_v60  ;;  %v2871_v61 = vsel %vm2870_vm10, %v6457_v28, %v2867_v25 }
 0x68a   : > { %3598 = vmatmul.f32.gmra.mxu1 %v3502_v31  ;;  %v2957_v27 = vmul.f32 %v2871_v61, %v8124_v0 }
 0x68b   : > { %v2875_v14 = vmul.f32 0.5, %v2874_v41  ;;  %v3259_v4 = vpop.f32.mrf.mxu3 }
 0x68c   : > { %v3260_v10 = vadd.f32 %v8271_v20, %v3259_v4  ;;  %v2991_v63 = vmul.f32 %v8308_v17, %v2957_v27 }
 0x68d   : > { %v2876_v59 = vsub.f32 1.5, %v2875_v14  ;;  %v2600_v12 = vpop.f32.mrf.mxu2  ;;  %v3425_v57 = vpop.f32.mrf.mxu0 }
 0x68e   : > { %v6461_v22 = vpop.eup %6460  ;;  %v3339_v47 = vmax.f32 %v3260_v10, 0.0  ;;  %v2601_v13 = vadd.f32 1e-05, %v2600_v12  ;;  %v3426_v32 = vadd.f32 %v8253_v29, %v3425_v57  ;;  %v8389_v28 = vadd.f32 %v8314_v50, %v2991_v63 }
 0x68f   : > { %v2877_v18 = vmul.f32 %v6459_v53, %v2876_v59  ;;  %v2883_v0 = vmul.f32 %v6461_v22, %v2598_v62  ;;  %vm2889_vm14 = vweird.f32 %v6461_v22 }
 0x690   : > { %6462 = vrsqrt.f32 %v2601_v13  ;;  %v3503_v21 = vmax.f32 %v3426_v32, 0.0  ;;  %3309 = vmatmul.f32.gmra.mxu3 %v8389_v28  ;;  %3472 = vmatmul.f32.gmra.mxu0 %v8389_v28  ;;  %vm2890_vm2 = vmor %vm2888_vm15, %vm2889_vm14  ;;  %vm2898_vm4 = vweird.f32 %v2601_v13 }
 0x691   : > { %v2884_v26 = vmul.f32 %v6461_v22, %v2883_v0  ;;  %3711 = vmatmul.f32.gmra.mxu2 %v3339_v47  ;;  %v2881_v23 = vsel %vm2880_vm13, %v6459_v53, %v2877_v18 }
 0x692   : > { %3601 = vmatmul.f32.gmra.mxu1 %v3503_v21  ;;  %v2958_v49 = vmul.f32 %v2881_v23, %v8141_v15 }
 0x693   : > { %v2885_v9 = vmul.f32 0.5, %v2884_v26  ;;  %v3262_v39 = vpop.f32.mrf.mxu3 }
 0x694   : > { %v3263_v60 = vadd.f32 %v8271_v20, %v3262_v39  ;;  %v2992_v3 = vmul.f32 %v8308_v17, %v2958_v49 }
 0x695   : > { %v2886_v46 = vsub.f32 1.5, %v2885_v9  ;;  %v2603_v25 = vpop.f32.mrf.mxu2  ;;  %v3428_v51 = vpop.f32.mrf.mxu0 }
 0x696   : > { %v6463_v31 = vpop.eup %6462  ;;  %v3340_v41 = vmax.f32 %v3263_v60, 0.0  ;;  %v2604_v61 = vadd.f32 1e-05, %v2603_v25  ;;  %v3429_v27 = vadd.f32 %v8253_v29, %v3428_v51  ;;  %v8398_v53 = vadd.f32 %v8314_v50, %v2992_v3 }
 0x697   : > { %v2887_v14 = vmul.f32 %v6461_v22, %v2886_v46  ;;  %v2893_v15 = vmul.f32 %v6463_v31, %v2601_v13  ;;  %vm2899_vm3 = vweird.f32 %v6463_v31 }
 0x698   : > { %6464 = vrsqrt.f32 %v2604_v61  ;;  %v3504_v4 = vmax.f32 %v3429_v27, 0.0  ;;  %3312 = vmatmul.f32.gmra.mxu3 %v8398_v53  ;;  %3475 = vmatmul.f32.gmra.mxu0 %v8398_v53  ;;  %vm2900_vm5 = vmor %vm2898_vm4, %vm2899_vm3  ;;  %vm2908_vm7 = vweird.f32 %v2604_v61 }
 0x699   : > { %v2894_v10 = vmul.f32 %v6463_v31, %v2893_v15  ;;  %3714 = vmatmul.f32.gmra.mxu2 %v3340_v41  ;;  %v2891_v63 = vsel %vm2890_vm2, %v6461_v22, %v2887_v14 }
 0x69a   : > { %3604 = vmatmul.f32.gmra.mxu1 %v3504_v4  ;;  %v2959_v59 = vmul.f32 %v2891_v63, %v8153_v42 }
 0x69b   : > { %v2895_v12 = vmul.f32 0.5, %v2894_v10  ;;  %v3265_v57 = vpop.f32.mrf.mxu3 }
 0x69c   : > { %v3266_v47 = vadd.f32 %v8271_v20, %v3265_v57  ;;  %v2993_v62 = vmul.f32 %v8308_v17, %v2959_v59 }
 0x69d   : > { %v2896_v32 = vsub.f32 1.5, %v2895_v12  ;;  %v2606_v18 = vpop.f32.mrf.mxu2  ;;  %v3431_v0 = vpop.f32.mrf.mxu0 }
 0x69e   : > { %v6465_v21 = vpop.eup %6464  ;;  %v3341_v26 = vmax.f32 %v3266_v47, 0.0  ;;  %v2607_v23 = vadd.f32 1e-05, %v2606_v18  ;;  %v3432_v49 = vadd.f32 %v8253_v29, %v3431_v0  ;;  %v8407_v22 = vadd.f32 %v8314_v50, %v2993_v62 }
 0x69f   : > { %v2897_v9 = vmul.f32 %v6463_v31, %v2896_v32  ;;  %v2903_v42 = vmul.f32 %v6465_v21, %v2604_v61  ;;  %vm2909_vm6 = vweird.f32 %v6465_v21 }
 0x6a0   : > { %6466 = vrsqrt.f32 %v2607_v23  ;;  %v3505_v39 = vmax.f32 %v3432_v49, 0.0  ;;  %3315 = vmatmul.f32.gmra.mxu3 %v8407_v22  ;;  %3478 = vmatmul.f32.gmra.mxu0 %v8407_v22  ;;  %vm2910_vm8 = vmor %vm2908_vm7, %vm2909_vm6  ;;  %vm2918_vm1 = vweird.f32 %v2607_v23 }
 0x6a1   : > { %v2904_v60 = vmul.f32 %v6465_v21, %v2903_v42  ;;  %3717 = vmatmul.f32.gmra.mxu2 %v3341_v26  ;;  %v2901_v3 = vsel %vm2900_vm5, %v6463_v31, %v2897_v9 }
 0x6a2   : > { %3607 = vmatmul.f32.gmra.mxu1 %v3505_v39  ;;  %v2960_v46 = vmul.f32 %v2901_v3, %v8165_v45 }
 0x6a3   : > { %v2905_v25 = vmul.f32 0.5, %v2904_v60  ;;  %v3268_v51 = vpop.f32.mrf.mxu3 }
 0x6a4   : > { %v3269_v41 = vadd.f32 %v8271_v20, %v3268_v51  ;;  %v2994_v13 = vmul.f32 %v8308_v17, %v2960_v46 }
 0x6a5   : > { %v2906_v27 = vsub.f32 1.5, %v2905_v25  ;;  %v2609_v14 = vpop.f32.mrf.mxu2  ;;  %v3434_v15 = vpop.f32.mrf.mxu0 }
 0x6a6   : > { %v6467_v4 = vpop.eup %6466  ;;  %v3342_v10 = vmax.f32 %v3269_v41, 0.0  ;;  %v2610_v63 = vadd.f32 1e-05, %v2609_v14  ;;  %v3435_v59 = vadd.f32 %v8253_v29, %v3434_v15  ;;  %v8416_v31 = vadd.f32 %v8314_v50, %v2994_v13 }
 0x6a7   : > { %v2907_v12 = vmul.f32 %v6465_v21, %v2906_v27  ;;  %v2913_v45 = vmul.f32 %v6467_v4, %v2607_v23  ;;  %vm2919_vm0 = vweird.f32 %v6467_v4 }
 0x6a8   : > { %6468 = vrsqrt.f32 %v2610_v63  ;;  %v3506_v57 = vmax.f32 %v3435_v59, 0.0  ;;  %3318 = vmatmul.f32.gmra.mxu3 %v8416_v31  ;;  %3481 = vmatmul.f32.gmra.mxu0 %v8416_v31  ;;  %vm2920_vm9 = vmor %vm2918_vm1, %vm2919_vm0  ;;  %vm2928_vm11 = vweird.f32 %v2610_v63 }
 0x6a9   : > { %v2914_v47 = vmul.f32 %v6467_v4, %v2913_v45  ;;  %3720 = vmatmul.f32.gmra.mxu2 %v3342_v10  ;;  %v2911_v62 = vsel %vm2910_vm8, %v6465_v21, %v2907_v12 }
 0x6aa   : > { %3610 = vmatmul.f32.gmra.mxu1 %v3506_v57  ;;  %v2961_v32 = vmul.f32 %v2911_v62, %v8177_v55 }
 0x6ab   : > { %v2915_v18 = vmul.f32 0.5, %v2914_v47  ;;  %v3271_v0 = vpop.f32.mrf.mxu3 }
 0x6ac   : > { %v3272_v26 = vadd.f32 %v8271_v20, %v3271_v0  ;;  %v2995_v61 = vmul.f32 %v8308_v17, %v2961_v32 }
 0x6ad   : > { %v2916_v49 = vsub.f32 1.5, %v2915_v18  ;;  %v3437_v9 = vpop.f32.mrf.mxu0 }
 0x6ae   : > { %v6469_v42 = vpop.eup %6468  ;;  %v3343_v39 = vmax.f32 %v3272_v26, 0.0  ;;  %v3438_v60 = vadd.f32 %v8253_v29, %v3437_v9  ;;  %v8425_v3 = vadd.f32 %v8314_v50, %v2995_v61  ;;  %v6318_v26 = vld [vmem:[#allocation2 + $0x7b0] ss:$0 sm:$0xff] }
 0x6af   : > { %v2917_v21 = vmul.f32 %v6467_v4, %v2916_v49  ;;  %v2923_v46 = vmul.f32 %v6469_v42, %v2610_v63  ;;  %vm2929_vm10 = vweird.f32 %v6469_v42  ;;  %v3191_v63 = vadd.f32 %v8228_v34, %v8237_v7 }
 0x6b0   : > { %v3507_v55 = vmax.f32 %v3438_v60, 0.0  ;;  %3321 = vmatmul.f32.gmra.mxu3 %v8425_v3  ;;  %3484 = vmatmul.f32.gmra.mxu0 %v8425_v3  ;;  %vm2930_vm12 = vmor %vm2928_vm11, %vm2929_vm10  ;;  %v3194_v7 = vadd.f32 %v8243_v24, %v8256_v2  ;;  %v9442_v24 = vld [vmem:[#allocation49_spill] sm:$0xff] }
 0x6b1   : > { %v2924_v25 = vmul.f32 %v6469_v42, %v2923_v46  ;;  %3723 = vmatmul.f32.gmra.mxu2 %v3343_v39  ;;  %v2921_v51 = vsel %vm2920_vm9, %v6467_v4, %v2917_v21 }
 0x6b2   : > { %3613 = vmatmul.f32.gmra.mxu1 %v3507_v55  ;;  %v2962_v41 = vmul.f32 %v2921_v51, %v8189_v19 }
 0x6b3   : > { %v2925_v13 = vmul.f32 0.5, %v2924_v25  ;;  %v3274_v27 = vpop.f32.mrf.mxu3  ;;  %v3199_v25 = vadd.f32 %v6318_v26, %v3194_v7 }
 0x6b4   : > { %v3275_v14 = vadd.f32 %v8271_v20, %v3274_v27  ;;  %v2996_v15 = vmul.f32 %v8308_v17, %v2962_v41  ;;  %v4696_v41 = vld [vmem:[#allocation2 + $0xac8] sm:$0xff] }
 0x6b5   : > { %v2926_v23 = vsub.f32 1.5, %v2925_v13  ;;  %v3440_v10 = vpop.f32.mrf.mxu0  ;;  %4697 = vmatpush.msrb.mxu2 %v4696_v41  ;;  %v8460_v2 = vadd.f32 %v3199_v25, %v9442_v24 }
 0x6b6   : > { %v3344_v59 = vmax.f32 %v3275_v14, 0.0  ;;  %v3441_v12 = vadd.f32 %v8253_v29, %v3440_v10  ;;  %v8434_v45 = vadd.f32 %v8314_v50, %v2996_v15 }
 0x6b7   : > { %v2927_v57 = vmul.f32 %v6469_v42, %v2926_v23 }
 0x6b8   : > { %v3508_v4 = vmax.f32 %v3441_v12, 0.0  ;;  %3324 = vmatmul.f32.gmra.mxu3 %v8434_v45  ;;  %3487 = vmatmul.f32.gmra.mxu0 %v8434_v45 }
 0x6b9   : > { %3726 = vmatmul.f32.gmra.mxu2 %v3344_v59  ;;  %v2931_v19 = vsel %vm2930_vm12, %v6469_v42, %v2927_v57  ;;  %v8463_v59 = vld [vmem:[#allocation2 + $0x9c8] ss:$0 sm:$0xff] }
 0x6ba   : > { %3616 = vmatmul.f32.gmra.mxu1 %v3508_v4  ;;  %v2963_v47 = vmul.f32 %v2931_v19, %v8201_v43  ;;  %v3198_v43 = vadd.f32 %v6318_v26, %v3191_v63  ;;  %v9443_v63 = vld [vmem:[#allocation8_spill] sm:$0xff] }
 0x6bb   : > { %v3277_v62 = vpop.f32.mrf.mxu3 }
 0x6bc   : > { %v3278_v32 = vadd.f32 %v8271_v20, %v3277_v62  ;;  %v2997_v18 = vmul.f32 %v8308_v17, %v2963_v47  ;;  %v8451_v34 = vadd.f32 %v3198_v43, %v7776_v11 }
 0x6bd   : > { %v3443_v0 = vpop.f32.mrf.mxu0 }
 0x6be   : > { %v3345_v61 = vmax.f32 %v3278_v32, 0.0  ;;  %v3444_v49 = vadd.f32 %v8253_v29, %v3443_v0  ;;  %v8445_v9 = vadd.f32 %v8314_v50, %v2997_v18 }
 0x6c0   : > { %v3509_v42 = vmax.f32 %v3444_v49, 0.0  ;;  %3327 = vmatmul.f32.gmra.mxu3 %v8445_v9  ;;  %3490 = vmatmul.f32.gmra.mxu0 %v8445_v9  ;;  %v4695_v49 = vld [vmem:[#allocation2 + $0xac0] sm:$0xff] }
 0x6c1   : > { %3729 = vmatmul.f32.gmra.mxu2 %v3345_v61 }
 0x6c2   : > { %3619 = vmatmul.f32.gmra.mxu1 %v3509_v42  ;;  %4698 = vmatpush.msrb.mxu2 %v4695_v49 }
 0x6c3   : > { %v3280_v17 = vpop.f32.mrf.mxu3 }
 0x6c4   : > { %v3281_v39 = vadd.f32 %v8271_v20, %v3280_v17 }
 0x6c5   : > { %v3446_v60 = vpop.f32.mrf.mxu0 }
 0x6c6   : > { %v3346_v50 = vmax.f32 %v3281_v39, 0.0  ;;  %v3447_v21 = vadd.f32 %v8253_v29, %v3446_v60 }
 0x6c7   : > { %v3575_v46 = vpop.f32.mrf.mxu1 }
 0x6c8   : > { %v3510_v55 = vmax.f32 %v3447_v21, 0.0  ;;  %3836 = vmatmul.f32.vlgmr.msra.gmra.mxu3 %v8451_v34 }
 0x6c9   : > { %3732 = vmatmul.f32.gmra.mxu2 %v3346_v50 }
 0x6ca   : > { %3622 = vmatmul.f32.gmra.mxu1 %v3510_v55  ;;  %v9444_v55 = vld [vmem:[#allocation51_spill] sm:$0xff] }
 0x6cb   : > { %v3283_v51 = vpop.f32.mrf.mxu3 }
 0x6cc   : > { %v3284_v13 = vadd.f32 %v8271_v20, %v3283_v51 }
 0x6cd   : > { %v3449_v11 = vpop.f32.mrf.mxu0 }
 0x6ce   : > { %v3347_v27 = vmax.f32 %v3284_v13, 0.0  ;;  %v3450_v14 = vadd.f32 %v8253_v29, %v3449_v11 }
 0x6cf   : > { %v3578_v15 = vpop.f32.mrf.mxu1 }
 0x6d0   : > { %v3511_v23 = vmax.f32 %v3450_v14, 0.0  ;;  %3839 = vmatmul.f32.gmra.mxu3 %v8460_v2 }
 0x6d1   : > { %3735 = vmatmul.f32.gmra.mxu2 %v3347_v27 }
 0x6d2   : > { %3625 = vmatmul.f32.gmra.mxu1 %v3511_v23 }
 0x6d3   : > { %v3286_v10 = vpop.f32.mrf.mxu3 }
 0x6d4   : > { %v3287_v12 = vadd.f32 %v8271_v20, %v3286_v10  ;;  %v3688_v57 = vpop.f32.mrf.mxu2 }
 0x6d5   : > { %v3689_v4 = vadd.f32 %v3688_v57, %v3575_v46  ;;  %v3452_v19 = vpop.f32.mrf.mxu0 }
 0x6d6   : > { %v3348_v47 = vmax.f32 %v3287_v12, 0.0  ;;  %v3453_v62 = vadd.f32 %v8253_v29, %v3452_v19  ;;  %v9445_v12 = vld [vmem:[#allocation9_spill] sm:$0xff]  ;;  %v4694_v19 = vld [vmem:[#allocation2 + $0xab8] sm:$0xff] }
 0x6d7   : > { %v3786_v32 = vadd.f32 %v8463_v59, %v3689_v4  ;;  %v3581_v18 = vpop.f32.mrf.mxu1  ;;  %4699 = vmatpush.msrb.mxu2 %v4694_v19 }
 0x6d8   : > { %v3512_v0 = vmax.f32 %v3453_v62, 0.0 }
 0x6d9   : > { %v8469_v26 = vadd.f32 %v3786_v32, %v9443_v63  ;;  %3738 = vmatmul.f32.gmra.mxu2 %v3348_v47 }
 0x6da   : > { %3628 = vmatmul.f32.gmra.mxu1 %v3512_v0 }
 0x6db   : > { %3948 = vmatmul.f32.vlgmr.msrb.gmra.mxu3 %v8469_v26  ;;  %v3289_v61 = vpop.f32.mrf.mxu3 }
 0x6dc   : > { %v3290_v42 = vadd.f32 %v8271_v20, %v3289_v61  ;;  %v3691_v43 = vpop.f32.mrf.mxu2 }
 0x6dd   : > { %v3692_v17 = vadd.f32 %v3691_v43, %v3578_v15  ;;  %v3455_v39 = vpop.f32.mrf.mxu0  ;;  %v9446_v43 = vld [vmem:[#allocation53_spill] sm:$0xff] }
 0x6de   : > { %v3349_v60 = vmax.f32 %v3290_v42, 0.0  ;;  %v3456_v7 = vadd.f32 %v8253_v29, %v3455_v39 }
 0x6df   : > { %v3787_v50 = vadd.f32 %v8463_v59, %v3692_v17  ;;  %v3584_v21 = vpop.f32.mrf.mxu1 }
 0x6e0   : > { %v3513_v46 = vmax.f32 %v3456_v7, 0.0 }
 0x6e1   : > { %3741 = vmatmul.f32.gmra.mxu2 %v3349_v60  ;;  %v8476_v25 = vadd.f32 %v3787_v50, %v9444_v55  ;;  %v8494_v55 = vld [vmem:[#allocation2 + $0x8c0] ss:$0 sm:$0xff] }
 0x6e2   : > { %3631 = vmatmul.f32.gmra.mxu1 %v3513_v46 }
 0x6e3   : > { %3951 = vmatmul.f32.gmra.mxu3 %v8476_v25  ;;  %v3292_v51 = vpop.f32.mrf.mxu3 }
 0x6e4   : > { %v3293_v41 = vadd.f32 %v8271_v20, %v3292_v51  ;;  %v3694_v13 = vpop.f32.mrf.mxu2 }
 0x6e5   : > { %v3695_v11 = vadd.f32 %v3694_v13, %v3581_v18  ;;  %v3458_v27 = vpop.f32.mrf.mxu0 }
 0x6e6   : > { %v3350_v14 = vmax.f32 %v3293_v41, 0.0  ;;  %v3459_v24 = vadd.f32 %v8253_v29, %v3458_v27 }
 0x6e7   : > { %v3788_v15 = vadd.f32 %v8463_v59, %v3695_v11  ;;  %v3587_v23 = vpop.f32.mrf.mxu1  ;;  %v9447_v11 = vld [vmem:[#allocation10_spill] sm:$0xff] }
 0x6e8   : > { %v3514_v10 = vmax.f32 %v3459_v24, 0.0  ;;  %v4693_v24 = vld [vmem:[#allocation2 + $0xab0] sm:$0xff] }
 0x6e9   : > { %3744 = vmatmul.f32.gmra.mxu2 %v3350_v14  ;;  %v8483_v57 = vadd.f32 %v3788_v15, %v9445_v12 }
 0x6ea   : > { %3634 = vmatmul.f32.gmra.mxu1 %v3514_v10  ;;  %4700 = vmatpush.msrb.mxu2 %v4693_v24 }
 0x6eb   : > { %3954 = vmatmul.f32.gmra.mxu3 %v8483_v57  ;;  %v3295_v4 = vpop.f32.mrf.mxu3 }
 0x6ec   : > { %v3296_v47 = vadd.f32 %v8271_v20, %v3295_v4  ;;  %v3697_v62 = vpop.f32.mrf.mxu2 }
 0x6ed   : > { %v3698_v32 = vadd.f32 %v3697_v62, %v3584_v21  ;;  %v3461_v18 = vpop.f32.mrf.mxu0 }
 0x6ee   : > { %v3351_v0 = vmax.f32 %v3296_v47, 0.0  ;;  %v3462_v63 = vadd.f32 %v8253_v29, %v3461_v18  ;;  %v9448_v18 = vld [vmem:[#allocation56_spill] sm:$0xff] }
 0x6ef   : > { %v3789_v61 = vadd.f32 %v8463_v59, %v3698_v32  ;;  %v3590_v49 = vpop.f32.mrf.mxu1 }
 0x6f0   : > { %v3515_v42 = vmax.f32 %v3462_v63, 0.0 }
 0x6f1   : > { %3747 = vmatmul.f32.gmra.mxu2 %v3351_v0  ;;  %v8490_v17 = vadd.f32 %v3789_v61, %v9446_v43 }
 0x6f2   : > { %3637 = vmatmul.f32.gmra.mxu1 %v3515_v42 }
 0x6f3   : > { %3957 = vmatmul.f32.gmra.mxu3 %v8490_v17  ;;  %v3298_v39 = vpop.f32.mrf.mxu3 }
 0x6f4   : > { %v3299_v60 = vadd.f32 %v8271_v20, %v3298_v39  ;;  %v3700_v7 = vpop.f32.mrf.mxu2 }
 0x6f5   : > { %v3701_v50 = vadd.f32 %v3700_v7, %v3587_v23  ;;  %v3464_v21 = vpop.f32.mrf.mxu0 }
 0x6f6   : > { %v3352_v46 = vmax.f32 %v3299_v60, 0.0  ;;  %v3465_v29 = vadd.f32 %v8494_v55, %v3464_v21 }
 0x6f7   : > { %v3790_v51 = vadd.f32 %v8463_v59, %v3701_v50  ;;  %v3593_v41 = vpop.f32.mrf.mxu1 }
 0x6f8   : > { %v3516_v13 = vmax.f32 %v3465_v29, 0.0 }
 0x6f9   : > { %3750 = vmatmul.f32.gmra.mxu2 %v3352_v46  ;;  %v8499_v27 = vadd.f32 %v3790_v51, %v9447_v11  ;;  %v9449_v46 = vld [vmem:[#allocation11_spill] sm:$0xff] }
 0x6fa   : > { %3640 = vmatmul.f32.gmra.mxu1 %v3516_v13  ;;  %v4692_v13 = vld [vmem:[#allocation2 + $0xaa8] sm:$0xff] }
 0x6fb   : > { %3960 = vmatmul.f32.gmra.mxu3 %v8499_v27  ;;  %v3301_v14 = vpop.f32.mrf.mxu3  ;;  %4701 = vmatpush.msrb.mxu2 %v4692_v13 }
 0x6fc   : > { %v3302_v15 = vadd.f32 %v8271_v20, %v3301_v14  ;;  %v3703_v23 = vpop.f32.mrf.mxu2  ;;  %v8509_v20 = vld [vmem:[#allocation2 + $0x8b8] ss:$0 sm:$0xff] }
 0x6fd   : > { %v3704_v10 = vadd.f32 %v3703_v23, %v3590_v49  ;;  %v3467_v12 = vpop.f32.mrf.mxu0 }
 0x6fe   : > { %v3353_v4 = vmax.f32 %v3302_v15, 0.0  ;;  %v3468_v19 = vadd.f32 %v8494_v55, %v3467_v12 }
 0x6ff   : > { %v3791_v47 = vadd.f32 %v8463_v59, %v3704_v10  ;;  %v3596_v62 = vpop.f32.mrf.mxu1 }
 0x700   : > { %v3517_v32 = vmax.f32 %v3468_v19, 0.0 }
 0x701   : > { %3753 = vmatmul.f32.gmra.mxu2 %v3353_v4  ;;  %v8506_v0 = vadd.f32 %v3791_v47, %v9448_v18 }
 0x702   : > { %3643 = vmatmul.f32.gmra.mxu1 %v3517_v32 }
 0x703   : > { %3963 = vmatmul.f32.gmra.mxu3 %v8506_v0  ;;  %v3304_v63 = vpop.f32.mrf.mxu3 }
 0x704   : > { %v3305_v61 = vadd.f32 %v8509_v20, %v3304_v63  ;;  %v3706_v49 = vpop.f32.mrf.mxu2 }
 0x705   : > { %v3707_v42 = vadd.f32 %v3706_v49, %v3593_v41  ;;  %v3470_v43 = vpop.f32.mrf.mxu0 }
 0x706   : > { %v3354_v39 = vmax.f32 %v3305_v61, 0.0  ;;  %v3471_v60 = vadd.f32 %v8494_v55, %v3470_v43 }
 0x707   : > { %v3792_v7 = vadd.f32 %v8463_v59, %v3707_v42  ;;  %v3599_v50 = vpop.f32.mrf.mxu1 }
 0x708   : > { %v3518_v21 = vmax.f32 %v3471_v60, 0.0 }
 0x709   : > { %3756 = vmatmul.f32.gmra.mxu2 %v3354_v39  ;;  %v8515_v29 = vadd.f32 %v3792_v7, %v9449_v46  ;;  %v4691_v7 = vld [vmem:[#allocation2 + $0xaa0] sm:$0xff] }
 0x70a   : > { %3646 = vmatmul.f32.gmra.mxu1 %v3518_v21  ;;  %4702 = vmatpush.msrb.mxu2 %v4691_v7 }
 0x70b   : > { %3966 = vmatmul.f32.gmra.mxu3 %v8515_v29  ;;  %v3307_v51 = vpop.f32.mrf.mxu3 }
 0x70c   : > { %v3308_v11 = vadd.f32 %v8509_v20, %v3307_v51  ;;  %v3709_v41 = vpop.f32.mrf.mxu2 }
 0x70d   : > { %v3710_v14 = vadd.f32 %v3709_v41, %v3596_v62  ;;  %v3473_v24 = vpop.f32.mrf.mxu0 }
 0x70e   : > { %v3355_v15 = vmax.f32 %v3308_v11, 0.0  ;;  %v3474_v23 = vadd.f32 %v8494_v55, %v3473_v24 }
 0x70f   : > { %v3793_v10 = vadd.f32 %v8463_v59, %v3710_v14  ;;  %v3602_v12 = vpop.f32.mrf.mxu1 }
 0x710   : > { %v3519_v4 = vmax.f32 %v3474_v23, 0.0 }
 0x711   : > { %3759 = vmatmul.f32.gmra.mxu2 %v3355_v15  ;;  %v8522_v19 = vadd.f32 %v3793_v10, %v8156_v5 }
 0x712   : > { %3649 = vmatmul.f32.gmra.mxu1 %v3519_v4 }
 0x713   : > { %3969 = vmatmul.f32.gmra.mxu3 %v8522_v19  ;;  %v3310_v47 = vpop.f32.mrf.mxu3 }
 0x714   : > { %v3311_v32 = vadd.f32 %v8509_v20, %v3310_v47  ;;  %v3712_v18 = vpop.f32.mrf.mxu2 }
 0x715   : > { %v3713_v62 = vadd.f32 %v3712_v18, %v3599_v50  ;;  %v3476_v63 = vpop.f32.mrf.mxu0 }
 0x716   : > { %v3356_v61 = vmax.f32 %v3311_v32, 0.0  ;;  %v3477_v49 = vadd.f32 %v8494_v55, %v3476_v63 }
 0x717   : > { %v3794_v42 = vadd.f32 %v8463_v59, %v3713_v62  ;;  %v3605_v43 = vpop.f32.mrf.mxu1 }
 0x718   : > { %v3520_v39 = vmax.f32 %v3477_v49, 0.0  ;;  %v4690_v49 = vld [vmem:[#allocation2 + $0xa98] sm:$0xff] }
 0x719   : > { %3762 = vmatmul.f32.gmra.mxu2 %v3356_v61  ;;  %v8529_v5 = vadd.f32 %v3794_v42, %v8168_v58 }
 0x71a   : > { %3652 = vmatmul.f32.gmra.mxu1 %v3520_v39  ;;  %4703 = vmatpush.msrb.mxu2 %v4690_v49 }
 0x71b   : > { %3972 = vmatmul.f32.gmra.mxu3 %v8529_v5  ;;  %v3313_v60 = vpop.f32.mrf.mxu3 }
 0x71c   : > { %v3314_v21 = vadd.f32 %v8509_v20, %v3313_v60  ;;  %v3715_v50 = vpop.f32.mrf.mxu2 }
 0x71d   : > { %v3716_v46 = vadd.f32 %v3715_v50, %v3602_v12  ;;  %v3479_v51 = vpop.f32.mrf.mxu0 }
 0x71e   : > { %v3357_v13 = vmax.f32 %v3314_v21, 0.0  ;;  %v3480_v11 = vadd.f32 %v8494_v55, %v3479_v51 }
 0x71f   : > { %v3795_v41 = vadd.f32 %v8463_v59, %v3716_v46  ;;  %v3608_v14 = vpop.f32.mrf.mxu1 }
 0x720   : > { %v3521_v24 = vmax.f32 %v3480_v11, 0.0 }
 0x721   : > { %3765 = vmatmul.f32.gmra.mxu2 %v3357_v13  ;;  %v8536_v58 = vadd.f32 %v3795_v41, %v8180_v33 }
 0x722   : > { %3655 = vmatmul.f32.gmra.mxu1 %v3521_v24 }
 0x723   : > { %3975 = vmatmul.f32.gmra.mxu3 %v8536_v58  ;;  %v3316_v15 = vpop.f32.mrf.mxu3 }
 0x724   : > { %v3317_v23 = vadd.f32 %v8509_v20, %v3316_v15  ;;  %v3718_v10 = vpop.f32.mrf.mxu2 }
 0x725   : > { %v3719_v12 = vadd.f32 %v3718_v10, %v3605_v43  ;;  %v3482_v4 = vpop.f32.mrf.mxu0 }
 0x726   : > { %v3358_v47 = vmax.f32 %v3317_v23, 0.0  ;;  %v3483_v32 = vadd.f32 %v8494_v55, %v3482_v4 }
 0x727   : > { %v3796_v18 = vadd.f32 %v8463_v59, %v3719_v12  ;;  %v3611_v62 = vpop.f32.mrf.mxu1 }
 0x728   : > { %v3522_v63 = vmax.f32 %v3483_v32, 0.0  ;;  %v4689_v32 = vld [vmem:[#allocation2 + $0xa90] sm:$0xff] }
 0x729   : > { %3768 = vmatmul.f32.gmra.mxu2 %v3358_v47  ;;  %v8543_v33 = vadd.f32 %v3796_v18, %v8192_v30 }
 0x72a   : > { %3658 = vmatmul.f32.gmra.mxu1 %v3522_v63  ;;  %4704 = vmatpush.msrb.mxu2 %v4689_v32 }
 0x72b   : > { %3978 = vmatmul.f32.gmra.mxu3 %v8543_v33  ;;  %v3319_v61 = vpop.f32.mrf.mxu3 }
 0x72c   : > { %v3320_v42 = vadd.f32 %v8509_v20, %v3319_v61  ;;  %v3721_v43 = vpop.f32.mrf.mxu2 }
 0x72d   : > { %v3722_v39 = vadd.f32 %v3721_v43, %v3608_v14  ;;  %v3485_v60 = vpop.f32.mrf.mxu0 }
 0x72e   : > { %v3359_v7 = vmax.f32 %v3320_v42, 0.0  ;;  %v3486_v21 = vadd.f32 %v8494_v55, %v3485_v60 }
 0x72f   : > { %v3797_v50 = vadd.f32 %v8463_v59, %v3722_v39  ;;  %v3614_v46 = vpop.f32.mrf.mxu1 }
 0x730   : > { %v3523_v51 = vmax.f32 %v3486_v21, 0.0 }
 0x731   : > { %3771 = vmatmul.f32.gmra.mxu2 %v3359_v7  ;;  %v8550_v30 = vadd.f32 %v3797_v50, %v8204_v48 }
 0x732   : > { %3661 = vmatmul.f32.gmra.mxu1 %v3523_v51 }
 0x733   : > { %3981 = vmatmul.f32.gmra.mxu3 %v8550_v30  ;;  %v3322_v13 = vpop.f32.mrf.mxu3 }
 0x734   : > { %v3323_v11 = vadd.f32 %v8509_v20, %v3322_v13  ;;  %v3724_v41 = vpop.f32.mrf.mxu2 }
 0x735   : > { %v3725_v14 = vadd.f32 %v3724_v41, %v3611_v62  ;;  %v3488_v24 = vpop.f32.mrf.mxu0  ;;  %v4688_v41 = vld [vmem:[#allocation2 + $0xa88] sm:$0xff] }
 0x736   : > { %v3360_v15 = vmax.f32 %v3323_v11, 0.0  ;;  %v3489_v23 = vadd.f32 %v8494_v55, %v3488_v24  ;;  %4705 = vmatpush.msrb.mxu2 %v4688_v41 }
 0x737   : > { %v3798_v10 = vadd.f32 %v8463_v59, %v3725_v14  ;;  %v3617_v12 = vpop.f32.mrf.mxu1 }
 0x738   : > { %v3524_v4 = vmax.f32 %v3489_v23, 0.0 }
 0x739   : > { %3774 = vmatmul.f32.gmra.mxu2 %v3360_v15  ;;  %v8557_v48 = vadd.f32 %v3798_v10, %v8213_v56 }
 0x73a   : > { %3664 = vmatmul.f32.gmra.mxu1 %v3524_v4 }
 0x73b   : > { %3984 = vmatmul.f32.gmra.mxu3 %v8557_v48  ;;  %v3325_v47 = vpop.f32.mrf.mxu3 }
 0x73c   : > { %v3326_v18 = vadd.f32 %v8509_v20, %v3325_v47  ;;  %v3727_v62 = vpop.f32.mrf.mxu2 }
 0x73d   : > { %v3728_v63 = vadd.f32 %v3727_v62, %v3614_v46  ;;  %v3491_v61 = vpop.f32.mrf.mxu0 }
 0x73e   : > { %v3361_v49 = vmax.f32 %v3326_v18, 0.0  ;;  %v3492_v42 = vadd.f32 %v8494_v55, %v3491_v61 }
 0x73f   : > { %v3799_v43 = vadd.f32 %v8463_v59, %v3728_v63  ;;  %v3620_v39 = vpop.f32.mrf.mxu1 }
 0x740   : > { %v3525_v60 = vmax.f32 %v3492_v42, 0.0 }
 0x741   : > { %3777 = vmatmul.f32.gmra.mxu2 %v3361_v49  ;;  %v8564_v56 = vadd.f32 %v3799_v43, %v8220_v40 }
 0x742   : > { %3667 = vmatmul.f32.gmra.mxu1 %v3525_v60 }
 0x743   : > { %3987 = vmatmul.f32.gmra.mxu3 %v8564_v56  ;;  %v3328_v7 = vpop.f32.mrf.mxu3 }
 0x744   : > { %v3329_v21 = vadd.f32 %v8509_v20, %v3328_v7  ;;  %v3730_v50 = vpop.f32.mrf.mxu2 }
 0x745   : > { %v3731_v46 = vadd.f32 %v3730_v50, %v3617_v12 }
 0x746   : > { %v3362_v51 = vmax.f32 %v3329_v21, 0.0 }
 0x747   : > { %v3800_v13 = vadd.f32 %v8463_v59, %v3731_v46  ;;  %v3623_v55 = vpop.f32.mrf.mxu1 }
 0x749   : > { %3780 = vmatmul.f32.gmra.mxu2 %v3362_v51  ;;  %v8570_v11 = vadd.f32 %v3800_v13, %v8232_v38 }
 0x74b   : > { %3990 = vmatmul.f32.gmra.mxu3 %v8570_v11  ;;  %v3837_v40 = vpop.f32.mrf.mxu3 }
 0x74c   : > { %v3733_v14 = vpop.f32.mrf.mxu2  ;;  %v8574_v24 = vsub.f32 %v8451_v34, %v3837_v40 }
 0x74d   : > { %v3734_v20 = vadd.f32 %v3733_v14, %v3620_v39 }
 0x74e   : > { %v3845_v15 = vmul.f32 %v8574_v24, %v8574_v24 }
 0x74f   : > { %v3801_v23 = vadd.f32 %v8463_v59, %v3734_v20  ;;  %v3626_v10 = vpop.f32.mrf.mxu1 }
 0x750   : > { %3863 = vmatmul.f32.vlgmr.msrb.gmra.mxu0 %v3845_v15 }
 0x751   : > { %v8580_v38 = vadd.f32 %v3801_v23, %v8247_v35  ;;  %v4687_v35 = vld [vmem:[#allocation2 + $0xa80] sm:$0xff] }
 0x752   : > { %4706 = vmatpush.msrb.mxu2 %v4687_v35 }
 0x753   : > { %3993 = vmatmul.f32.gmra.mxu3 %v8580_v38  ;;  %v3840_v12 = vpop.f32.mrf.mxu3 }
 0x754   : > { %v3736_v4 = vpop.f32.mrf.mxu2  ;;  %v8584_v47 = vsub.f32 %v8460_v2, %v3840_v12 }
 0x755   : > { %v3737_v34 = vadd.f32 %v3736_v4, %v3623_v55 }
 0x756   : > { %v3846_v32 = vmul.f32 %v8584_v47, %v8584_v47 }
 0x757   : > { %v3802_v18 = vadd.f32 %v8463_v59, %v3737_v34  ;;  %v3629_v62 = vpop.f32.mrf.mxu1 }
 0x758   : > { %3866 = vmatmul.f32.gmra.mxu0 %v3846_v32 }
 0x759   : > { %v8590_v63 = vadd.f32 %v3802_v18, %v8265_v6 }
 0x75b   : > { %3996 = vmatmul.f32.gmra.mxu3 %v8590_v63 }
 0x75c   : > { %v3739_v61 = vpop.f32.mrf.mxu2 }
 0x75d   : > { %v3740_v49 = vadd.f32 %v3739_v61, %v3626_v10 }
 0x75e   : > { %v3949_v42 = vpop.f32.mrf.mxu3 }
 0x75f   : > { %v3803_v2 = vadd.f32 %v8463_v59, %v3740_v49  ;;  %v8595_v43 = vsub.f32 %v8469_v26, %v3949_v42  ;;  %v3632_v39 = vpop.f32.mrf.mxu1 }
 0x761   : > { %v4077_v60 = vmul.f32 %v8595_v43, %v8595_v43  ;;  %v8600_v7 = vadd.f32 %v3803_v2, %v8283_v1  ;;  %v4686_v1 = vld [vmem:[#allocation2 + $0xa78] sm:$0xff] }
 0x762   : > { %4707 = vmatpush.msrb.mxu2 %v4686_v1 }
 0x763   : > { %3999 = vmatmul.f32.gmra.mxu3 %v8600_v7  ;;  %4125 = vmatmul.f32.vlgmr.msrb.gmra.mxu1 %v4077_v60 }
 0x764   : > { %v3742_v6 = vpop.f32.mrf.mxu2 }
 0x765   : > { %v3743_v21 = vadd.f32 %v3742_v6, %v3629_v62 }
 0x766   : > { %v3952_v50 = vpop.f32.mrf.mxu3 }
 0x767   : > { %v3804_v46 = vadd.f32 %v8463_v59, %v3743_v21  ;;  %v8605_v51 = vsub.f32 %v8476_v25, %v3952_v50  ;;  %v3635_v26 = vpop.f32.mrf.mxu1 }
 0x769   : > { %v4078_v13 = vmul.f32 %v8605_v51, %v8605_v51  ;;  %v8610_v55 = vadd.f32 %v3804_v46, %v8297_v36 }
 0x76b   : > { %4002 = vmatmul.f32.gmra.mxu3 %v8610_v55  ;;  %4128 = vmatmul.f32.gmra.mxu1 %v4078_v13 }
 0x76c   : > { %v3745_v40 = vpop.f32.mrf.mxu2 }
 0x76d   : > { %v3746_v41 = vadd.f32 %v3745_v40, %v3632_v39 }
 0x76e   : > { %v3955_v14 = vpop.f32.mrf.mxu3 }
 0x76f   : > { %v3805_v20 = vadd.f32 %v8463_v59, %v3746_v41  ;;  %v8615_v25 = vsub.f32 %v8483_v57, %v3955_v14  ;;  %v3638_v15 = vpop.f32.mrf.mxu1 }
 0x771   : > { %v4079_v23 = vmul.f32 %v8615_v25, %v8615_v25  ;;  %v8620_v36 = vadd.f32 %v3805_v20, %v8317_v54  ;;  %v4685_v54 = vld [vmem:[#allocation2 + $0xa70] sm:$0xff] }
 0x772   : > { %4708 = vmatpush.msrb.mxu2 %v4685_v54  ;;  %v4683_v54 = vld [vmem:[#allocation2 + $0xa60] sm:$0xff] }
 0x773   : > { %4005 = vmatmul.f32.gmra.mxu3 %v8620_v36  ;;  %4131 = vmatmul.f32.gmra.mxu1 %v4079_v23 }
 0x774   : > { %v3748_v10 = vpop.f32.mrf.mxu2 }
 0x775   : > { %v3749_v12 = vadd.f32 %v3748_v10, %v3635_v26 }
 0x776   : > { %v3958_v4 = vpop.f32.mrf.mxu3 }
 0x777   : > { %v3806_v34 = vadd.f32 %v8463_v59, %v3749_v12  ;;  %v8625_v32 = vsub.f32 %v8490_v17, %v3958_v4  ;;  %v3641_v57 = vpop.f32.mrf.mxu1 }
 0x779   : > { %v4080_v18 = vmul.f32 %v8625_v32, %v8625_v32  ;;  %v8630_v62 = vadd.f32 %v3806_v34, %v8334_v52 }
 0x77b   : > { %4008 = vmatmul.f32.gmra.mxu3 %v8630_v62  ;;  %4134 = vmatmul.f32.gmra.mxu1 %v4080_v18 }
 0x77c   : > { %v3751_v35 = vpop.f32.mrf.mxu2 }
 0x77d   : > { %v3752_v61 = vadd.f32 %v3751_v35, %v3638_v15 }
 0x77e   : > { %v3961_v49 = vpop.f32.mrf.mxu3 }
 0x77f   : > { %v3807_v42 = vadd.f32 %v8463_v59, %v3752_v61  ;;  %v8635_v17 = vsub.f32 %v8499_v27, %v3961_v49  ;;  %v3644_v2 = vpop.f32.mrf.mxu1 }
 0x781   : > { %v4081_v39 = vmul.f32 %v8635_v17, %v8635_v17  ;;  %v8640_v52 = vadd.f32 %v3807_v42, %v8349_v8  ;;  %v4684_v8 = vld [vmem:[#allocation2 + $0xa68] sm:$0xff] }
 0x782   : > { %4709 = vmatpush.msrb.mxu2 %v4684_v8 }
 0x783   : > { %4011 = vmatmul.f32.gmra.mxu3 %v8640_v52  ;;  %4137 = vmatmul.f32.gmra.mxu1 %v4081_v39 }
 0x784   : > { %v3754_v60 = vpop.f32.mrf.mxu2  ;;  %4710 = vmatpush.msrb.mxu2 %v4683_v54 }
 0x785   : > { %v3755_v6 = vadd.f32 %v3754_v60, %v3641_v57  ;;  %v4655_v60 = vld [vmem:[#allocation2 + $0xa38] sm:$0xff] }
 0x786   : > { %v3964_v21 = vpop.f32.mrf.mxu3 }
 0x787   : > { %v3808_v50 = vadd.f32 %v8463_v59, %v3755_v6  ;;  %v8645_v46 = vsub.f32 %v8506_v0, %v3964_v21  ;;  %v3647_v27 = vpop.f32.mrf.mxu1  ;;  %v4654_v6 = vld [vmem:[#allocation2 + $0xa30] sm:$0xff]  ;;  %v4653_v21 = vld [vmem:[#allocation2 + $0xa28] sm:$0xff] }
 0x789   : > { %v4082_v26 = vmul.f32 %v8645_v46, %v8645_v46  ;;  %v8650_v13 = vadd.f32 %v3808_v50, %v8361_v44 }
 0x78b   : > { %4014 = vmatmul.f32.gmra.mxu3 %v8650_v13  ;;  %4140 = vmatmul.f32.gmra.mxu1 %v4082_v26 }
 0x78c   : > { %v3757_v1 = vpop.f32.mrf.mxu2 }
 0x78d   : > { %v3758_v40 = vadd.f32 %v3757_v1, %v3644_v2  ;;  %v4656_v2 = vld [vmem:[#allocation2 + $0xa40] sm:$0xff] }
 0x78e   : > { %v3967_v41 = vpop.f32.mrf.mxu3 }
 0x78f   : > { %v3809_v14 = vadd.f32 %v8463_v59, %v3758_v40  ;;  %v8655_v0 = vsub.f32 %v8515_v29, %v3967_v41  ;;  %v3650_v20 = vpop.f32.mrf.mxu1 }
 0x791   : > { %v4083_v15 = vmul.f32 %v8655_v0, %v8655_v0  ;;  %v8660_v44 = vadd.f32 %v3809_v14, %v8371_v37  ;;  %v4657_v37 = vld [vmem:[#allocation2 + $0xa48] sm:$0xff]  ;;  %v4651_v14 = vld [vmem:[#allocation2 + $0xa18] sm:$0xff] }
 0x792   : > { %4658 = vmatpush.msra.mxu0 %v4657_v37 }
 0x793   : > { %4017 = vmatmul.f32.gmra.mxu3 %v8660_v44  ;;  %4143 = vmatmul.f32.gmra.mxu1 %v4083_v15  ;;  %v4649_v15 = vld [vmem:[#allocation2 + $0xa08] sm:$0xff] }
 0x794   : > { %v3760_v23 = vpop.f32.mrf.mxu2  ;;  %4659 = vmatpush.msra.mxu0 %v4656_v2 }
 0x795   : > { %v3761_v10 = vadd.f32 %v3760_v23, %v3647_v27  ;;  %v4682_v23 = vld [vmem:[#allocation2 + $0xa58] sm:$0xff] }
 0x796   : > { %v3970_v12 = vpop.f32.mrf.mxu3  ;;  %4660 = vmatpush.msra.mxu0 %v4655_v60  ;;  %4711 = vmatpush.msrb.mxu2 %v4682_v23  ;;  %v4645_v60 = vld [vmem:[#allocation2 + $0x9e8] sm:$0xff] }
 0x797   : > { %v3810_v4 = vadd.f32 %v8463_v59, %v3761_v10  ;;  %v8665_v34 = vsub.f32 %v8522_v19, %v3970_v12  ;;  %v3653_v18 = vpop.f32.mrf.mxu1 }
 0x798   : > { %4661 = vmatpush.msra.mxu0 %v4654_v6 }
 0x799   : > { %v4084_v29 = vmul.f32 %v8665_v34, %v8665_v34  ;;  %v8670_v57 = vadd.f32 %v3810_v4, %v8380_v16 }
 0x79a   : > { %4662 = vmatpush.msra.mxu0 %v4653_v21 }
 0x79b   : > { %4020 = vmatmul.f32.gmra.mxu3 %v8670_v57  ;;  %4146 = vmatmul.f32.gmra.mxu1 %v4084_v29 }
 0x79c   : > { %v3763_v35 = vpop.f32.mrf.mxu2 }
 0x79d   : > { %v3764_v61 = vadd.f32 %v3763_v35, %v3650_v20  ;;  %v4650_v20 = vld [vmem:[#allocation2 + $0xa10] sm:$0xff]  ;;  %v4647_v35 = vld [vmem:[#allocation2 + $0x9f8] sm:$0xff] }
 0x79e   : > { %v3973_v49 = vpop.f32.mrf.mxu3 }
 0x79f   : > { %v3811_v19 = vadd.f32 %v8463_v59, %v3764_v61  ;;  %v8675_v42 = vsub.f32 %v8529_v5, %v3973_v49  ;;  %v3656_v50 = vpop.f32.mrf.mxu1 }
 0x7a1   : > { %v4085_v16 = vmul.f32 %v8675_v42, %v8675_v42  ;;  %v8680_v39 = vadd.f32 %v3811_v19, %v8389_v28  ;;  %v4652_v28 = vld [vmem:[#allocation2 + $0xa20] sm:$0xff]  ;;  %v4646_v19 = vld [vmem:[#allocation2 + $0x9f0] sm:$0xff] }
 0x7a2   : > { %4663 = vmatpush.msra.mxu0 %v4652_v28  ;;  %v4735_v28 = vld [vmem:[#allocation2 + $0xb48] sm:$0xff] }
 0x7a3   : > { %4023 = vmatmul.f32.gmra.mxu3 %v8680_v39  ;;  %4149 = vmatmul.f32.gmra.mxu1 %v4085_v16 }
 0x7a4   : > { %v3766_v27 = vpop.f32.mrf.mxu2  ;;  %4664 = vmatpush.msra.mxu0 %v4651_v14 }
 0x7a5   : > { %v3767_v5 = vadd.f32 %v3766_v27, %v3653_v18  ;;  %v4648_v18 = vld [vmem:[#allocation2 + $0xa00] sm:$0xff]  ;;  %v4643_v27 = vld [vmem:[#allocation2 + $0x9d8] sm:$0xff] }
 0x7a6   : > { %v3976_v26 = vpop.f32.mrf.mxu3  ;;  %4665 = vmatpush.msra.mxu0 %v4650_v20  ;;  %v4734_v20 = vld [vmem:[#allocation2 + $0xb40] sm:$0xff] }
 0x7a7   : > { %v3812_v8 = vadd.f32 %v8463_v59, %v3767_v5  ;;  %v8685_v1 = vsub.f32 %v8536_v58, %v3976_v26  ;;  %v3659_v12 = vpop.f32.mrf.mxu1 }
 0x7a8   : > { %4666 = vmatpush.msra.mxu0 %v4649_v15  ;;  %v4774_v15 = vld [vmem:[#allocation2 + $0xbc8] sm:$0xff] }
 0x7a9   : > { %v4086_v40 = vmul.f32 %v8685_v1, %v8685_v1  ;;  %v8690_v41 = vadd.f32 %v3812_v8, %v8398_v53 }
 0x7aa   : > { %4667 = vmatpush.msra.mxu0 %v4648_v18  ;;  %v4772_v18 = vld [vmem:[#allocation2 + $0xbb8] sm:$0xff] }
 0x7ab   : > { %4026 = vmatmul.f32.gmra.mxu3 %v8690_v41  ;;  %4152 = vmatmul.f32.gmra.mxu1 %v4086_v40 }
 0x7ac   : > { %v3769_v10 = vpop.f32.mrf.mxu2  ;;  %4668 = vmatpush.msra.mxu0 %v4647_v35 }
 0x7ad   : > { %v3770_v58 = vadd.f32 %v3769_v10, %v3656_v50  ;;  %v4644_v50 = vld [vmem:[#allocation2 + $0x9e0] sm:$0xff] }
 0x7ae   : > { %v3979_v4 = vpop.f32.mrf.mxu3  ;;  %4669 = vmatpush.msra.mxu0 %v4646_v19 }
 0x7af   : > { %v3813_v29 = vadd.f32 %v8463_v59, %v3770_v58  ;;  %v8695_v53 = vsub.f32 %v8543_v33, %v3979_v4  ;;  %v3662_v6 = vpop.f32.mrf.mxu1  ;;  %v4773_v4 = vld [vmem:[#allocation2 + $0xbc0] sm:$0xff] }
 0x7b0   : > { %4670 = vmatpush.msra.mxu0 %v4645_v60 }
 0x7b1   : > { %v4087_v37 = vmul.f32 %v8695_v53, %v8695_v53  ;;  %v8700_v54 = vadd.f32 %v3813_v29, %v8407_v22  ;;  %v4732_v29 = vld [vmem:[#allocation2 + $0xb30] sm:$0xff] }
 0x7b2   : > { %4671 = vmatpush.msra.mxu0 %v4644_v50  ;;  %v4769_v50 = vld [vmem:[#allocation2 + $0xba0] sm:$0xff] }
 0x7b3   : > { %4029 = vmatmul.f32.gmra.mxu3 %v8700_v54  ;;  %4155 = vmatmul.f32.gmra.mxu1 %v4087_v37 }
 0x7b4   : > { %v3772_v61 = vpop.f32.mrf.mxu2  ;;  %4672 = vmatpush.msra.mxu0 %v4643_v27 }
 0x7b5   : > { %v3773_v49 = vadd.f32 %v3772_v61, %v3659_v12  ;;  %v4733_v12 = vld [vmem:[#allocation2 + $0xb38] sm:$0xff]  ;;  %v4731_v61 = vld [vmem:[#allocation2 + $0xb28] sm:$0xff] }
 0x7b6   : > { %v3982_v2 = vpop.f32.mrf.mxu3 }
 0x7b7   : > { %v3814_v33 = vadd.f32 %v8463_v59, %v3773_v49  ;;  %v8705_v16 = vsub.f32 %v8550_v30, %v3982_v2  ;;  %v4642_v30 = vld [vmem:[#allocation2 + $0x9d0] sm:$0xff]  ;;  %v3665_v58 = vpop.f32.mrf.mxu1  ;;  %v4730_v2 = vld [vmem:[#allocation2 + $0xb20] sm:$0xff] }
 0x7b8   : > { %4673 = vmatpush.msra.mxu0 %v4642_v30 }
 0x7b9   : > { %v4088_v22 = vmul.f32 %v8705_v16, %v8705_v16  ;;  %v8710_v21 = vadd.f32 %v3814_v33, %v8416_v31  ;;  %v4681_v31 = vld [vmem:[#allocation2 + $0xa50] sm:$0xff]  ;;  %v4770_v33 = vld [vmem:[#allocation2 + $0xba8] sm:$0xff] }
 0x7ba   : > { %4736 = vmatpush.msrb.mxu0 %v4735_v28  ;;  %4712 = vmatpush.msrb.mxu2 %v4681_v31  ;;  %v4767_v31 = vld [vmem:[#allocation2 + $0xb90] sm:$0xff] }
 0x7bb   : > { %4032 = vmatmul.f32.gmra.mxu3 %v8710_v21  ;;  %4158 = vmatmul.f32.gmra.mxu1 %v4088_v22  ;;  %v4729_v22 = vld [vmem:[#allocation2 + $0xb18] sm:$0xff] }
 0x7bc   : > { %v3775_v5 = vpop.f32.mrf.mxu2  ;;  %4737 = vmatpush.msrb.mxu0 %v4734_v20  ;;  %4775 = vmatpush.msra.mxu2 %v4774_v15 }
 0x7bd   : > { %v3776_v26 = vadd.f32 %v3775_v5, %v3662_v6  ;;  %v4728_v5 = vld [vmem:[#allocation2 + $0xb10] sm:$0xff] }
 0x7be   : > { %v3985_v8 = vpop.f32.mrf.mxu3  ;;  %4738 = vmatpush.msrb.mxu0 %v4733_v12  ;;  %4776 = vmatpush.msra.mxu2 %v4773_v4 }
 0x7bf   : > { %v3815_v40 = vadd.f32 %v8463_v59, %v3776_v26  ;;  %v8715_v14 = vsub.f32 %v8557_v48, %v3985_v8  ;;  %v3668_v27 = vpop.f32.mrf.mxu1  ;;  %v4768_v26 = vld [vmem:[#allocation2 + $0xb98] sm:$0xff] }
 0x7c0   : > { %4739 = vmatpush.msrb.mxu0 %v4732_v29  ;;  %4777 = vmatpush.msra.mxu2 %v4772_v18  ;;  %v4765_v29 = vld [vmem:[#allocation2 + $0xb80] sm:$0xff] }
 0x7c1   : > { %v4089_v23 = vmul.f32 %v8715_v14, %v8715_v14  ;;  %v8720_v10 = vadd.f32 %v3815_v40, %v8425_v3  ;;  %v4771_v3 = vld [vmem:[#allocation2 + $0xbb0] sm:$0xff] }
 0x7c2   : > { %4740 = vmatpush.msrb.mxu0 %v4731_v61  ;;  %4778 = vmatpush.msra.mxu2 %v4771_v3  ;;  %v4723_v3 = vld [vmem:[#allocation2 + $0xae8] sm:$0xff] }
 0x7c3   : > { %4035 = vmatmul.f32.gmra.mxu3 %v8720_v10  ;;  %4161 = vmatmul.f32.gmra.mxu1 %v4089_v23  ;;  %v4726_v23 = vld [vmem:[#allocation2 + $0xb00] sm:$0xff] }
 0x7c4   : > { %v3778_v48 = vpop.f32.mrf.mxu2  ;;  %4741 = vmatpush.msrb.mxu0 %v4730_v2  ;;  %4779 = vmatpush.msra.mxu2 %v4770_v33  ;;  %v4722_v33 = vld [vmem:[#allocation2 + $0xae0] sm:$0xff] }
 0x7c5   : > { %v3779_v37 = vadd.f32 %v3778_v48, %v3665_v58  ;;  %v4766_v58 = vld [vmem:[#allocation2 + $0xb88] sm:$0xff]  ;;  %v4725_v48 = vld [vmem:[#allocation2 + $0xaf8] sm:$0xff] }
 0x7c6   : > { %v3988_v35 = vpop.f32.mrf.mxu3  ;;  %4742 = vmatpush.msrb.mxu0 %v4729_v22  ;;  %4780 = vmatpush.msra.mxu2 %v4769_v50 }
 0x7c7   : > { %v3816_v49 = vadd.f32 %v8463_v59, %v3779_v37  ;;  %v8725_v19 = vsub.f32 %v8564_v56, %v3988_v35 }
 0x7c8   : > { %4743 = vmatpush.msrb.mxu0 %v4728_v5  ;;  %4781 = vmatpush.msra.mxu2 %v4768_v26  ;;  %v4720_v26 = vld [vmem:[#allocation2 + $0xad0] sm:$0xff] }
 0x7c9   : > { %v4090_v60 = vmul.f32 %v8725_v19, %v8725_v19  ;;  %v8730_v6 = vadd.f32 %v3816_v49, %v8434_v45  ;;  %v4727_v45 = vld [vmem:[#allocation2 + $0xb08] sm:$0xff] }
 0x7ca   : > { %4744 = vmatpush.msrb.mxu0 %v4727_v45  ;;  %4782 = vmatpush.msra.mxu2 %v4767_v31  ;;  %v4759_v45 = vld [vmem:[#allocation2 + $0xb50] sm:$0xff] }
 0x7cb   : > { %4038 = vmatmul.f32.gmra.mxu3 %v8730_v6  ;;  %4164 = vmatmul.f32.gmra.mxu1 %v4090_v60  ;;  %v4762_v60 = vld [vmem:[#allocation2 + $0xb68] sm:$0xff] }
 0x7cc   : > { %v3781_v56 = vpop.f32.mrf.mxu2  ;;  %4745 = vmatpush.msrb.mxu0 %v4726_v23  ;;  %4783 = vmatpush.msra.mxu2 %v4766_v58  ;;  %v6322_v58 = vld [vmem:[#allocation2 + $0x580] ss:$0 sm:$0xff] }
 0x7cd   : > { %v3782_v30 = vadd.f32 %v3781_v56, %v3668_v27  ;;  %v3864_v8 = vpop.f32.mrf.mxu0  ;;  %v4721_v27 = vld [vmem:[#allocation2 + $0xad8] sm:$0xff]  ;;  %v4761_v56 = vld [vmem:[#allocation2 + $0xb60] sm:$0xff] }
 0x7ce   : > { %v8733_v28 = vadd.f32 1e-05, %v3864_v8  ;;  %v3991_v40 = vpop.f32.mrf.mxu3  ;;  %4746 = vmatpush.msrb.mxu0 %v4725_v48  ;;  %4784 = vmatpush.msra.mxu2 %v4765_v29 }
 0x7cf   : > { %v3817_v20 = vadd.f32 %v8463_v59, %v3782_v30  ;;  %v8737_v15 = vsub.f32 %v8570_v11, %v3991_v40  ;;  %v4724_v59 = vld [vmem:[#allocation2 + $0xaf0] sm:$0xff]  ;;  %v4764_v11 = vld [vmem:[#allocation2 + $0xb78] sm:$0xff] }
 0x7d0   : > { %6470 = vrsqrt.f32 %v8733_v28  ;;  %4747 = vmatpush.msrb.mxu0 %v4724_v59  ;;  %4785 = vmatpush.msra.mxu2 %v4764_v11  ;;  %vm3876_vm14 = vweird.f32 %v8733_v28 }
 0x7d1   : > { %v4091_v12 = vmul.f32 %v8737_v15, %v8737_v15  ;;  %v8743_v4 = vadd.f32 %v3817_v20, %v8445_v9  ;;  %v4763_v9 = vld [vmem:[#allocation2 + $0xb70] sm:$0xff] }
 0x7d2   : > { %4748 = vmatpush.msrb.mxu0 %v4723_v3  ;;  %4786 = vmatpush.msra.mxu2 %v4763_v9 }
 0x7d3   : > { %4041 = vmatmul.f32.gmra.mxu3 %v8743_v4  ;;  %4167 = vmatmul.f32.gmra.mxu1 %v4091_v12 }
 0x7d4   : > { %4749 = vmatpush.msrb.mxu0 %v4722_v33  ;;  %4787 = vmatpush.msra.mxu2 %v4762_v60 }
 0x7d5   : > { %v3867_v18 = vpop.f32.mrf.mxu0 }
 0x7d6   : > { %v6471_v37 = vpop.eup %6470  ;;  %v3868_v35 = vadd.f32 1e-05, %v3867_v18  ;;  %v3994_v61 = vpop.f32.mrf.mxu3  ;;  %4750 = vmatpush.msrb.mxu0 %v4721_v27  ;;  %4788 = vmatpush.msra.mxu2 %v4761_v56  ;;  %v6645_v56 = vld [vmem:[#allocation2 + $0x78] sm:$0xff] }
 0x7d7   : > { %v3871_v49 = vmul.f32 %v6471_v37, %v8733_v28  ;;  %v8748_v2 = vsub.f32 %v8580_v38, %v3994_v61  ;;  %v4760_v38 = vld [vmem:[#allocation2 + $0xb58] sm:$0xff]  ;;  %vm3877_vm13 = vweird.f32 %v6471_v37  ;;  %v6324_v61 = vld [vmem:[#allocation2 + $0x588] ss:$0 sm:$0xff] }
 0x7d8   : > { %6472 = vrsqrt.f32 %v3868_v35  ;;  %4751 = vmatpush.msrb.mxu0 %v4720_v26  ;;  %4789 = vmatpush.msra.mxu2 %v4760_v38  ;;  %vm3878_vm15 = vmor %vm3876_vm14, %vm3877_vm13  ;;  %vm3886_vm3 = vweird.f32 %v3868_v35 }
 0x7d9   : > { %v3872_v22 = vmul.f32 %v6471_v37, %v3871_v49  ;;  %v4092_v50 = vmul.f32 %v8748_v2, %v8748_v2 }
 0x7da   : > { %4790 = vmatpush.msra.mxu2 %v4759_v45 }
 0x7db   : > { %v3873_v5 = vmul.f32 0.5, %v3872_v22  ;;  %4170 = vmatmul.f32.gmra.mxu1 %v4092_v50 }
 0x7dd   : > { %v3874_v30 = vsub.f32 1.5, %v3873_v5 }
 0x7de   : > { %v6473_v8 = vpop.eup %6472  ;;  %v3997_v40 = vpop.f32.mrf.mxu3 }
 0x7df   : > { %v3875_v31 = vmul.f32 %v6471_v37, %v3874_v30  ;;  %v3881_v20 = vmul.f32 %v6473_v8, %v3868_v35  ;;  %v8754_v23 = vsub.f32 %v8590_v63, %v3997_v40  ;;  %vm3887_vm2 = vweird.f32 %v6473_v8  ;;  %v6647_v30 = vld [vmem:[#allocation2 + $0x68] sm:$0xff] }
 0x7e0   : > { %v4126_v12 = vpop.f32.mrf.mxu1  ;;  %vm3888_vm4 = vmor %vm3886_vm3, %vm3887_vm2 }
 0x7e1   : > { %v3879_v48 = vsel %vm3878_vm15, %v6471_v37, %v3875_v31  ;;  %v3882_v29 = vmul.f32 %v6473_v8, %v3881_v20  ;;  %v4093_v59 = vmul.f32 %v8754_v23, %v8754_v23  ;;  %v4127_v11 = vadd.f32 1e-05, %v4126_v12  ;;  %v6648_v20 = vld [vmem:[#allocation2 + $0x60] sm:$0xff] }
 0x7e2   : > { %v3890_v18 = vmul.f32 %v3879_v48, %v8574_v24 }
 0x7e3   : > { %v3883_v3 = vmul.f32 0.5, %v3882_v29  ;;  %6474 = vrsqrt.f32 %v4127_v11  ;;  %4173 = vmatmul.f32.gmra.mxu1 %v4093_v59  ;;  %v6649_v59 = vld [vmem:[#allocation2 + $0x58] sm:$0xff]  ;;  %vm4228_vm6 = vweird.f32 %v4127_v11 }
 0x7e4   : > { %v3894_v28 = vmul.f32 %v6322_v58, %v3890_v18 }
 0x7e5   : > { %v3884_v9 = vsub.f32 1.5, %v3883_v3  ;;  %v6650_v3 = vld [vmem:[#allocation2 + $0x50] sm:$0xff] }
 0x7e6   : > { %v4000_v63 = vpop.f32.mrf.mxu3  ;;  %v8759_v49 = vadd.f32 %v6324_v61, %v3894_v28 }
 0x7e7   : > { %v3885_v33 = vmul.f32 %v6473_v8, %v3884_v9  ;;  %v8762_v37 = vsub.f32 %v8600_v7, %v4000_v63  ;;  %v6646_v7 = vld [vmem:[#allocation2 + $0x70] sm:$0xff] }
 0x7e8   : > { %v4129_v60 = vpop.f32.mrf.mxu1  ;;  %4674 = vmatmul.f32.vlgmr.msra.gmra.mxu0 %v8759_v49  ;;  %4713 = vmatmul.f32.vlgmr.msrb.gmra.mxu2 %v8759_v49 }
 0x7e9   : > { %v6475_v24 = vpop.eup %6474  ;;  %v3889_v22 = vsel %vm3888_vm4, %v6473_v8, %v3885_v33  ;;  %v4094_v50 = vmul.f32 %v8762_v37, %v8762_v37  ;;  %v8768_v27 = vadd.f32 1e-05, %v4129_v60  ;;  %5000 = vmatpush.msra.mxu0 %v6645_v56  ;;  %v8788_v33 = vld [vmem:[#allocation2 + $0x598] ss:$0 sm:$0xff]  ;;  %v6651_v60 = vld [vmem:[#allocation2 + $0x48] sm:$0xff] }
 0x7ea   : > { %v3891_v35 = vmul.f32 %v3889_v22, %v8584_v47  ;;  %v4223_v5 = vmul.f32 %v6475_v24, %v4127_v11  ;;  %vm4229_vm5 = vweird.f32 %v6475_v24 }
 0x7eb   : > { %6476 = vrsqrt.f32 %v8768_v27  ;;  %4176 = vmatmul.f32.gmra.mxu1 %v4094_v50  ;;  %5001 = vmatpush.msra.mxu0 %v6646_v7  ;;  %vm4230_vm7 = vmor %vm4228_vm6, %vm4229_vm5  ;;  %vm4238_vm0 = vweird.f32 %v8768_v27 }
 0x7ec   : > { %v4224_v26 = vmul.f32 %v6475_v24, %v4223_v5  ;;  %v3895_v38 = vmul.f32 %v6322_v58, %v3891_v35  ;;  %v6652_v35 = vld [vmem:[#allocation2 + $0x40] sm:$0xff] }
 0x7ed   : > { %5002 = vmatpush.msra.mxu0 %v6647_v30  ;;  %v6653_v30 = vld [vmem:[#allocation2 + $0x38] sm:$0xff] }
 0x7ee   : > { %v4225_v8 = vmul.f32 0.5, %v4224_v26  ;;  %v4003_v40 = vpop.f32.mrf.mxu3  ;;  %v8772_v45 = vadd.f32 %v6324_v61, %v3895_v38  ;;  %v8784_v61 = vld [vmem:[#allocation2 + $0x590] ss:$0 sm:$0xff] }
 0x7ef   : > { %v8775_v31 = vsub.f32 %v8610_v55, %v4003_v40  ;;  %5003 = vmatpush.msra.mxu0 %v6648_v20 }
 0x7f0   : > { %v4226_v47 = vsub.f32 1.5, %v4225_v8  ;;  %v4132_v12 = vpop.f32.mrf.mxu1  ;;  %4677 = vmatmul.f32.gmra.mxu0 %v8772_v45  ;;  %4716 = vmatmul.f32.gmra.mxu2 %v8772_v45 }
 0x7f1   : > { %v6477_v48 = vpop.eup %6476  ;;  %v4095_v58 = vmul.f32 %v8775_v31, %v8775_v31  ;;  %v8781_v29 = vadd.f32 1e-05, %v4132_v12  ;;  %5004 = vmatpush.msra.mxu0 %v6649_v59 }
 0x7f2   : > { %v4227_v18 = vmul.f32 %v6475_v24, %v4226_v47  ;;  %v4233_v55 = vmul.f32 %v6477_v48, %v8768_v27  ;;  %vm4239_vm8 = vweird.f32 %v6477_v48  ;;  %v6654_v47 = vld [vmem:[#allocation2 + $0x30] sm:$0xff] }
 0x7f3   : > { %6478 = vrsqrt.f32 %v8781_v29  ;;  %4179 = vmatmul.f32.gmra.mxu1 %v4095_v58  ;;  %5005 = vmatpush.msra.mxu0 %v6650_v3  ;;  %vm4240_vm1 = vmor %vm4238_vm0, %vm4239_vm8  ;;  %vm4248_vm10 = vweird.f32 %v8781_v29 }
 0x7f4   : > { %v4231_v28 = vsel %vm4230_vm7, %v6475_v24, %v4227_v18  ;;  %v4234_v9 = vmul.f32 %v6477_v48, %v4233_v55  ;;  %v6655_v18 = vld [vmem:[#allocation2 + $0x28] sm:$0xff] }
 0x7f5   : > { %v4542_v63 = vmul.f32 %v4231_v28, %v8595_v43  ;;  %5006 = vmatpush.msra.mxu0 %v6651_v60  ;;  %v6656_v60 = vld [vmem:[#allocation2 + $0x20] sm:$0xff] }
 0x7f6   : > { %v4235_v22 = vmul.f32 0.5, %v4234_v9  ;;  %v4006_v11 = vpop.f32.mrf.mxu3 }
 0x7f7   : > { %v4576_v50 = vmul.f32 %v8784_v61, %v4542_v63  ;;  %v8792_v56 = vsub.f32 %v8620_v36, %v4006_v11  ;;  %5007 = vmatpush.msra.mxu0 %v6652_v35  ;;  %v6657_v35 = vld [vmem:[#allocation2 + $0x18] sm:$0xff] }
 0x7f8   : > { %v4236_v5 = vsub.f32 1.5, %v4235_v22  ;;  %v4135_v7 = vpop.f32.mrf.mxu1  ;;  %4752 = vmatmul.f32.vlgmr.msrb.gmra.mxu0 %v8759_v49 }
 0x7f9   : > { %v6479_v24 = vpop.eup %6478  ;;  %v4096_v43 = vmul.f32 %v8792_v56, %v8792_v56  ;;  %v8797_v26 = vadd.f32 1e-05, %v4135_v7  ;;  %v4610_v38 = vadd.f32 %v8788_v33, %v4576_v50  ;;  %5008 = vmatpush.msra.mxu0 %v6653_v30 }
 0x7fa   : > { %v4237_v8 = vmul.f32 %v6477_v48, %v4236_v5  ;;  %v4243_v36 = vmul.f32 %v6479_v24, %v8781_v29  ;;  %vm4249_vm9 = vweird.f32 %v6479_v24 }
 0x7fb   : > { %6480 = vrsqrt.f32 %v8797_v26  ;;  %4182 = vmatmul.f32.gmra.mxu1 %v4096_v43  ;;  %4791 = vmatmul.f32.vlgmr.msra.gmra.mxu2 %v4610_v38  ;;  %vm4250_vm11 = vmor %vm4248_vm10, %vm4249_vm9  ;;  %v6658_v38 = vld [vmem:[#allocation2 + $0x10] sm:$0xff]  ;;  %vm4258_vm13 = vweird.f32 %v8797_v26 }
 0x7fc   : > { %v4244_v40 = vmul.f32 %v6479_v24, %v4243_v36  ;;  %v4241_v20 = vsel %vm4240_vm1, %v6477_v48, %v4237_v8  ;;  %5009 = vmatpush.msra.mxu0 %v6654_v47 }
 0x7fd   : > { %v4543_v12 = vmul.f32 %v4241_v20, %v8605_v51 }
 0x7fe   : > { %v4245_v58 = vmul.f32 0.5, %v4244_v40  ;;  %v4009_v59 = vpop.f32.mrf.mxu3  ;;  %5010 = vmatpush.msra.mxu0 %v6655_v18  ;;  %v6659_v40 = vld [vmem:[#allocation2 + $0x8] sm:$0xff] }
 0x7ff   : > { %v8805_v55 = vsub.f32 %v8630_v62, %v4009_v59  ;;  %v4577_v27 = vmul.f32 %v8784_v61, %v4543_v12 }
 0x800   : > { %v4246_v3 = vsub.f32 1.5, %v4245_v58  ;;  %v4138_v28 = vpop.f32.mrf.mxu1  ;;  %4755 = vmatmul.f32.gmra.mxu0 %v8772_v45  ;;  %v6660_v58 = vld [vmem:[#allocation2] sm:$0xff] }
 0x801   : > { %v6481_v9 = vpop.eup %6480  ;;  %v4097_v48 = vmul.f32 %v8805_v55, %v8805_v55  ;;  %v8811_v63 = vadd.f32 1e-05, %v4138_v28  ;;  %v4611_v51 = vadd.f32 %v8788_v33, %v4577_v27  ;;  %5011 = vmatpush.msra.mxu0 %v6656_v60  ;;  %v6661_v27 = vld [vmem:[#allocation2 + $0xf8] sm:$0xff] }
 0x802   : > { %v4247_v22 = vmul.f32 %v6479_v24, %v4246_v3  ;;  %v4253_v62 = vmul.f32 %v6481_v9, %v8797_v26  ;;  %vm4259_vm12 = vweird.f32 %v6481_v9 }
 0x803   : > { %6482 = vrsqrt.f32 %v8811_v63  ;;  %4185 = vmatmul.f32.gmra.mxu1 %v4097_v48  ;;  %4794 = vmatmul.f32.gmra.mxu2 %v4611_v51  ;;  %vm4260_vm14 = vmor %vm4258_vm13, %vm4259_vm12  ;;  %v6662_v51 = vld [vmem:[#allocation2 + $0xf0] sm:$0xff]  ;;  %vm4268_vm2 = vweird.f32 %v8811_v63 }
 0x804   : > { %v4254_v11 = vmul.f32 %v6481_v9, %v4253_v62  ;;  %v4251_v50 = vsel %vm4250_vm11, %v6479_v24, %v4247_v22  ;;  %5012 = vmatpush.msra.mxu0 %v6657_v35 }
 0x805   : > { %v4544_v5 = vmul.f32 %v4251_v50, %v8615_v25 }
 0x806   : > { %v4255_v7 = vmul.f32 0.5, %v4254_v11  ;;  %v4012_v43 = vpop.f32.mrf.mxu3  ;;  %5013 = vmatpush.msra.mxu0 %v6658_v38  ;;  %v6663_v11 = vld [vmem:[#allocation2 + $0xe8] sm:$0xff] }
 0x807   : > { %v8819_v30 = vsub.f32 %v8640_v52, %v4012_v43  ;;  %v4578_v29 = vmul.f32 %v8784_v61, %v4544_v5 }
 0x808   : > { %v4256_v8 = vsub.f32 1.5, %v4255_v7  ;;  %v4141_v36 = vpop.f32.mrf.mxu1  ;;  %5014 = vmatpush.msra.mxu0 %v6659_v40  ;;  %v6664_v7 = vld [vmem:[#allocation2 + $0xe0] sm:$0xff] }
 0x809   : > { %v6483_v20 = vpop.eup %6482  ;;  %v4098_v24 = vmul.f32 %v8819_v30, %v8819_v30  ;;  %v8824_v47 = vadd.f32 1e-05, %v4141_v36  ;;  %v4612_v25 = vadd.f32 %v8788_v33, %v4578_v29  ;;  %v6665_v29 = vld [vmem:[#allocation2 + $0xd8] sm:$0xff] }
 0x80a   : > { %v4257_v12 = vmul.f32 %v6481_v9, %v4256_v8  ;;  %v4263_v52 = vmul.f32 %v6483_v20, %v8811_v63  ;;  %5015 = vmatpush.msra.mxu0 %v6660_v58  ;;  %vm4269_vm15 = vweird.f32 %v6483_v20  ;;  %v6667_v58 = vld [vmem:[#allocation2 + $0xc8] sm:$0xff] }
 0x80b   : > { %6484 = vrsqrt.f32 %v8824_v47  ;;  %4188 = vmatmul.f32.gmra.mxu1 %v4098_v24  ;;  %4797 = vmatmul.f32.gmra.mxu2 %v4612_v25  ;;  %vm4270_vm3 = vmor %vm4268_vm2, %vm4269_vm15  ;;  %v6666_v24 = vld [vmem:[#allocation2 + $0xd0] sm:$0xff]  ;;  %vm4278_vm5 = vweird.f32 %v8824_v47 }
 0x80c   : > { %v4264_v59 = vmul.f32 %v6483_v20, %v4263_v52  ;;  %v4261_v18 = vsel %vm4260_vm14, %v6481_v9, %v4257_v12  ;;  %5712 = vmatpush.msrb.mxu0 %v6661_v27 }
 0x80d   : > { %v4545_v3 = vmul.f32 %v4261_v18, %v8625_v32 }
 0x80e   : > { %v4265_v28 = vmul.f32 0.5, %v4264_v59  ;;  %v4015_v48 = vpop.f32.mrf.mxu3  ;;  %5713 = vmatpush.msrb.mxu0 %v6662_v51  ;;  %v6669_v51 = vld [vmem:[#allocation2 + $0xb8] sm:$0xff] }
 0x80f   : > { %v8832_v26 = vsub.f32 %v8650_v13, %v4015_v48  ;;  %v4579_v60 = vmul.f32 %v8784_v61, %v4545_v3  ;;  %v6668_v3 = vld [vmem:[#allocation2 + $0xc0] sm:$0xff] }
 0x810   : > { %v4266_v22 = vsub.f32 1.5, %v4265_v28  ;;  %v4144_v62 = vpop.f32.mrf.mxu1  ;;  %5714 = vmatpush.msrb.mxu0 %v6663_v11  ;;  %v6670_v11 = vld [vmem:[#allocation2 + $0xb0] sm:$0xff] }
 0x811   : > { %v6485_v50 = vpop.eup %6484  ;;  %v4099_v9 = vmul.f32 %v8832_v26, %v8832_v26  ;;  %v8837_v35 = vadd.f32 1e-05, %v4144_v62  ;;  %v4613_v32 = vadd.f32 %v8788_v33, %v4579_v60 }
 0x812   : > { %v4267_v5 = vmul.f32 %v6483_v20, %v4266_v22  ;;  %v4273_v13 = vmul.f32 %v6485_v50, %v8824_v47  ;;  %5715 = vmatpush.msrb.mxu0 %v6664_v7  ;;  %vm4279_vm4 = vweird.f32 %v6485_v50 }
 0x813   : > { %6486 = vrsqrt.f32 %v8837_v35  ;;  %4191 = vmatmul.f32.gmra.mxu1 %v4099_v9  ;;  %4800 = vmatmul.f32.gmra.mxu2 %v4613_v32  ;;  %vm4280_vm6 = vmor %vm4278_vm5, %vm4279_vm4  ;;  %vm4288_vm8 = vweird.f32 %v8837_v35 }
 0x814   : > { %v4274_v43 = vmul.f32 %v6485_v50, %v4273_v13  ;;  %v4271_v38 = vsel %vm4270_vm3, %v6483_v20, %v4267_v5  ;;  %5716 = vmatpush.msrb.mxu0 %v6665_v29  ;;  %v6671_v13 = vld [vmem:[#allocation2 + $0xa8] sm:$0xff]  ;;  %v6672_v29 = vld [vmem:[#allocation2 + $0xa0] sm:$0xff] }
 0x815   : > { %v4546_v8 = vmul.f32 %v4271_v38, %v8635_v17 }
 0x816   : > { %v4275_v36 = vmul.f32 0.5, %v4274_v43  ;;  %v4018_v40 = vpop.f32.mrf.mxu3  ;;  %5717 = vmatpush.msrb.mxu0 %v6666_v24 }
 0x817   : > { %v8845_v63 = vsub.f32 %v8660_v44, %v4018_v40  ;;  %v4580_v25 = vmul.f32 %v8784_v61, %v4546_v8  ;;  %v6673_v40 = vld [vmem:[#allocation2 + $0x98] sm:$0xff] }
 0x818   : > { %v4276_v12 = vsub.f32 1.5, %v4275_v36  ;;  %v4147_v52 = vpop.f32.mrf.mxu1  ;;  %5718 = vmatpush.msrb.mxu0 %v6667_v58 }
 0x819   : > { %v6487_v59 = vpop.eup %6486  ;;  %v4100_v20 = vmul.f32 %v8845_v63, %v8845_v63  ;;  %v8850_v18 = vadd.f32 1e-05, %v4147_v52  ;;  %v4614_v17 = vadd.f32 %v8788_v33, %v4580_v25  ;;  %v6674_v52 = vld [vmem:[#allocation2 + $0x90] sm:$0xff] }
 0x81a   : > { %v4277_v27 = vmul.f32 %v6485_v50, %v4276_v12  ;;  %v4283_v44 = vmul.f32 %v6487_v59, %v8837_v35  ;;  %5719 = vmatpush.msrb.mxu0 %v6668_v3  ;;  %vm4289_vm7 = vweird.f32 %v6487_v59 }
 0x81b   : > { %6488 = vrsqrt.f32 %v8850_v18  ;;  %4194 = vmatmul.f32.gmra.mxu1 %v4100_v20  ;;  %4803 = vmatmul.f32.gmra.mxu2 %v4614_v17  ;;  %vm4290_vm0 = vmor %vm4288_vm8, %vm4289_vm7  ;;  %vm4298_vm9 = vweird.f32 %v8850_v18 }
 0x81c   : > { %v4284_v28 = vmul.f32 %v6487_v59, %v4283_v44  ;;  %v4281_v48 = vsel %vm4280_vm6, %v6485_v50, %v4277_v27  ;;  %5720 = vmatpush.msrb.mxu0 %v6669_v51  ;;  %v6675_v27 = vld [vmem:[#allocation2 + $0x88] sm:$0xff] }
 0x81d   : > { %v4547_v60 = vmul.f32 %v4281_v48, %v8645_v46 }
 0x81e   : > { %v4285_v22 = vmul.f32 0.5, %v4284_v28  ;;  %v4021_v62 = vpop.f32.mrf.mxu3  ;;  %5721 = vmatpush.msrb.mxu0 %v6670_v11 }
 0x81f   : > { %v8858_v47 = vsub.f32 %v8670_v57, %v4021_v62  ;;  %v4581_v9 = vmul.f32 %v8784_v61, %v4547_v60 }
 0x820   : > { %v4286_v32 = vsub.f32 1.5, %v4285_v22  ;;  %v4150_v5 = vpop.f32.mrf.mxu1  ;;  %5722 = vmatpush.msrb.mxu0 %v6671_v13 }
 0x821   : > { %v6489_v7 = vpop.eup %6488  ;;  %v4101_v50 = vmul.f32 %v8858_v47, %v8858_v47  ;;  %v4151_v43 = vadd.f32 1e-05, %v4150_v5  ;;  %v4615_v46 = vadd.f32 %v8788_v33, %v4581_v9 }
 0x822   : > { %v4287_v38 = vmul.f32 %v6487_v59, %v4286_v32  ;;  %v4293_v57 = vmul.f32 %v6489_v7, %v8850_v18  ;;  %5723 = vmatpush.msrb.mxu0 %v6672_v29  ;;  %vm4299_vm1 = vweird.f32 %v6489_v7 }
 0x823   : > { %6490 = vrsqrt.f32 %v4151_v43  ;;  %4197 = vmatmul.f32.gmra.mxu1 %v4101_v50  ;;  %4806 = vmatmul.f32.gmra.mxu2 %v4615_v46  ;;  %vm4300_vm10 = vmor %vm4298_vm9, %vm4299_vm1  ;;  %vm4308_vm12 = vweird.f32 %v4151_v43 }
 0x824   : > { %v4294_v8 = vmul.f32 %v6489_v7, %v4293_v57  ;;  %v4291_v36 = vsel %vm4290_vm0, %v6487_v59, %v4287_v38  ;;  %5724 = vmatpush.msrb.mxu0 %v6673_v40 }
 0x825   : > { %v4548_v24 = vmul.f32 %v4291_v36, %v8655_v0 }
 0x826   : > { %v4295_v25 = vmul.f32 0.5, %v4294_v8  ;;  %v4024_v12 = vpop.f32.mrf.mxu3  ;;  %5725 = vmatpush.msrb.mxu0 %v6674_v52 }
 0x827   : > { %v8868_v35 = vsub.f32 %v8680_v39, %v4024_v12  ;;  %v4582_v58 = vmul.f32 %v8784_v61, %v4548_v24  ;;  %v6676_v39 = vld [vmem:[#allocation2 + $0x80] sm:$0xff] }
 0x828   : > { %v4296_v20 = vsub.f32 1.5, %v4295_v25  ;;  %v4153_v17 = vpop.f32.mrf.mxu1  ;;  %5726 = vmatpush.msrb.mxu0 %v6675_v27 }
 0x829   : > { %v6491_v44 = vpop.eup %6490  ;;  %v4102_v59 = vmul.f32 %v8868_v35, %v8868_v35  ;;  %v4154_v3 = vadd.f32 1e-05, %v4153_v17  ;;  %v4616_v0 = vadd.f32 %v8788_v33, %v4582_v58 }
 0x82a   : > { %v4297_v28 = vmul.f32 %v6489_v7, %v4296_v20  ;;  %v4303_v48 = vmul.f32 %v6491_v44, %v4151_v43  ;;  %5727 = vmatpush.msrb.mxu0 %v6676_v39  ;;  %vm4309_vm11 = vweird.f32 %v6491_v44 }
 0x82b   : > { %6492 = vrsqrt.f32 %v4154_v3  ;;  %4200 = vmatmul.f32.gmra.mxu1 %v4102_v59  ;;  %4809 = vmatmul.f32.gmra.mxu2 %v4616_v0  ;;  %vm4310_vm13 = vmor %vm4308_vm12, %vm4309_vm11  ;;  %vm4318_vm15 = vweird.f32 %v4154_v3 }
 0x82c   : > { %v4304_v51 = vmul.f32 %v6491_v44, %v4303_v48  ;;  %v4301_v60 = vsel %vm4300_vm10, %v6489_v7, %v4297_v28 }
 0x82d   : > { %v4549_v22 = vmul.f32 %v4301_v60, %v8665_v34 }
 0x82e   : > { %v4305_v62 = vmul.f32 0.5, %v4304_v51  ;;  %v4027_v11 = vpop.f32.mrf.mxu3 }
 0x82f   : > { %v8877_v9 = vsub.f32 %v8690_v41, %v4027_v11  ;;  %v4583_v32 = vmul.f32 %v8784_v61, %v4549_v22 }
 0x830   : > { %v4306_v5 = vsub.f32 1.5, %v4305_v62  ;;  %v4156_v18 = vpop.f32.mrf.mxu1 }
 0x831   : > { %v6493_v13 = vpop.eup %6492  ;;  %v4103_v50 = vmul.f32 %v8877_v9, %v8877_v9  ;;  %v4157_v46 = vadd.f32 1e-05, %v4156_v18  ;;  %v4617_v38 = vadd.f32 %v8788_v33, %v4583_v32 }
 0x832   : > { %v4307_v7 = vmul.f32 %v6491_v44, %v4306_v5  ;;  %v4313_v34 = vmul.f32 %v6493_v13, %v4154_v3  ;;  %vm4319_vm14 = vweird.f32 %v6493_v13 }
 0x833   : > { %6494 = vrsqrt.f32 %v4157_v46  ;;  %4203 = vmatmul.f32.gmra.mxu1 %v4103_v50  ;;  %4812 = vmatmul.f32.gmra.mxu2 %v4617_v38  ;;  %vm4320_vm2 = vmor %vm4318_vm15, %vm4319_vm14  ;;  %vm4328_vm4 = vweird.f32 %v4157_v46 }
 0x834   : > { %v4314_v41 = vmul.f32 %v6493_v13, %v4313_v34  ;;  %v4311_v57 = vsel %vm4310_vm13, %v6491_v44, %v4307_v7 }
 0x835   : > { %v4550_v29 = vmul.f32 %v4311_v57, %v8675_v42 }
 0x836   : > { %v4315_v8 = vmul.f32 0.5, %v4314_v41  ;;  %v4030_v36 = vpop.f32.mrf.mxu3 }
 0x837   : > { %v8885_v40 = vsub.f32 %v8700_v54, %v4030_v36  ;;  %v4584_v24 = vmul.f32 %v8784_v61, %v4550_v29 }
 0x838   : > { %v4316_v25 = vsub.f32 1.5, %v4315_v8  ;;  %v4159_v12 = vpop.f32.mrf.mxu1 }
 0x839   : > { %v6495_v43 = vpop.eup %6494  ;;  %v4104_v52 = vmul.f32 %v8885_v40, %v8885_v40  ;;  %v4160_v58 = vadd.f32 1e-05, %v4159_v12  ;;  %v4618_v20 = vadd.f32 %v8788_v33, %v4584_v24 }
 0x83a   : > { %v4317_v17 = vmul.f32 %v6493_v13, %v4316_v25  ;;  %v4323_v42 = vmul.f32 %v6495_v43, %v4157_v46  ;;  %vm4329_vm3 = vweird.f32 %v6495_v43 }
 0x83b   : > { %6496 = vrsqrt.f32 %v4160_v58  ;;  %4206 = vmatmul.f32.gmra.mxu1 %v4104_v52  ;;  %4815 = vmatmul.f32.gmra.mxu2 %v4618_v20  ;;  %vm4330_vm5 = vmor %vm4328_vm4, %vm4329_vm3  ;;  %vm4338_vm7 = vweird.f32 %v4160_v58 }
 0x83c   : > { %v4324_v54 = vmul.f32 %v6495_v43, %v4323_v42  ;;  %v4321_v27 = vsel %vm4320_vm2, %v6493_v13, %v4317_v17 }
 0x83d   : > { %v4551_v44 = vmul.f32 %v4321_v27, %v8685_v1 }
 0x83e   : > { %v4325_v59 = vmul.f32 0.5, %v4324_v54  ;;  %v4033_v0 = vpop.f32.mrf.mxu3 }
 0x83f   : > { %v8893_v28 = vsub.f32 %v8710_v21, %v4033_v0  ;;  %v4585_v48 = vmul.f32 %v8784_v61, %v4551_v44 }
 0x840   : > { %v4326_v39 = vsub.f32 1.5, %v4325_v59  ;;  %v4162_v51 = vpop.f32.mrf.mxu1 }
 0x841   : > { %v6497_v3 = vpop.eup %6496  ;;  %v4105_v60 = vmul.f32 %v8893_v28, %v8893_v28  ;;  %v4163_v22 = vadd.f32 1e-05, %v4162_v51  ;;  %v4619_v62 = vadd.f32 %v8788_v33, %v4585_v48 }
 0x842   : > { %v4327_v11 = vmul.f32 %v6495_v43, %v4326_v39  ;;  %v4333_v1 = vmul.f32 %v6497_v3, %v4160_v58  ;;  %vm4339_vm6 = vweird.f32 %v6497_v3 }
 0x843   : > { %6498 = vrsqrt.f32 %v4163_v22  ;;  %4209 = vmatmul.f32.gmra.mxu1 %v4105_v60  ;;  %4818 = vmatmul.f32.gmra.mxu2 %v4619_v62  ;;  %vm4340_vm8 = vmor %vm4338_vm7, %vm4339_vm6  ;;  %vm4348_vm1 = vweird.f32 %v4163_v22 }
 0x844   : > { %v4334_v21 = vmul.f32 %v6497_v3, %v4333_v1  ;;  %v4331_v32 = vsel %vm4330_vm5, %v6495_v43, %v4327_v11 }
 0x845   : > { %v4552_v5 = vmul.f32 %v4331_v32, %v8695_v53 }
 0x846   : > { %v4335_v18 = vmul.f32 0.5, %v4334_v21  ;;  %v4036_v13 = vpop.f32.mrf.mxu3 }
 0x847   : > { %v8901_v50 = vsub.f32 %v8720_v10, %v4036_v13  ;;  %v4586_v38 = vmul.f32 %v8784_v61, %v4552_v5 }
 0x848   : > { %v4336_v7 = vsub.f32 1.5, %v4335_v18  ;;  %v4165_v34 = vpop.f32.mrf.mxu1 }
 0x849   : > { %v6499_v46 = vpop.eup %6498  ;;  %v4106_v41 = vmul.f32 %v8901_v50, %v8901_v50  ;;  %v4166_v57 = vadd.f32 1e-05, %v4165_v34  ;;  %v4620_v29 = vadd.f32 %v8788_v33, %v4586_v38 }
 0x84a   : > { %v4337_v8 = vmul.f32 %v6497_v3, %v4336_v7  ;;  %v4343_v53 = vmul.f32 %v6499_v46, %v4163_v22  ;;  %vm4349_vm0 = vweird.f32 %v6499_v46 }
 0x84b   : > { %6500 = vrsqrt.f32 %v4166_v57  ;;  %4212 = vmatmul.f32.gmra.mxu1 %v4106_v41  ;;  %4821 = vmatmul.f32.gmra.mxu2 %v4620_v29  ;;  %vm4350_vm9 = vmor %vm4348_vm1, %vm4349_vm0  ;;  %vm4358_vm11 = vweird.f32 %v4166_v57 }
 0x84c   : > { %v4344_v10 = vmul.f32 %v6499_v46, %v4343_v53  ;;  %v4341_v36 = vsel %vm4340_vm8, %v6497_v3, %v4337_v8 }
 0x84d   : > { %v4553_v24 = vmul.f32 %v4341_v36, %v8705_v16 }
 0x84e   : > { %v4345_v25 = vmul.f32 0.5, %v4344_v10  ;;  %v4039_v12 = vpop.f32.mrf.mxu3 }
 0x84f   : > { %v8909_v43 = vsub.f32 %v8730_v6, %v4039_v12  ;;  %v4587_v52 = vmul.f32 %v8784_v61, %v4553_v24 }
 0x850   : > { %v4346_v20 = vsub.f32 1.5, %v4345_v25  ;;  %v4168_v17 = vpop.f32.mrf.mxu1 }
 0x851   : > { %v6501_v58 = vpop.eup %6500  ;;  %v4107_v42 = vmul.f32 %v8909_v43, %v8909_v43  ;;  %v4169_v54 = vadd.f32 1e-05, %v4168_v17  ;;  %v4621_v27 = vadd.f32 %v8788_v33, %v4587_v52 }
 0x852   : > { %v4347_v44 = vmul.f32 %v6499_v46, %v4346_v20  ;;  %v4353_v16 = vmul.f32 %v6501_v58, %v4166_v57  ;;  %vm4359_vm10 = vweird.f32 %v6501_v58 }
 0x853   : > { %6502 = vrsqrt.f32 %v4169_v54  ;;  %4215 = vmatmul.f32.gmra.mxu1 %v4107_v42  ;;  %4824 = vmatmul.f32.gmra.mxu2 %v4621_v27  ;;  %vm4360_vm12 = vmor %vm4358_vm11, %vm4359_vm10  ;;  %vm4368_vm14 = vweird.f32 %v4169_v54 }
 0x854   : > { %v4354_v6 = vmul.f32 %v6501_v58, %v4353_v16  ;;  %v4351_v59 = vsel %vm4350_vm9, %v6499_v46, %v4347_v44 }
 0x855   : > { %v4554_v0 = vmul.f32 %v4351_v59, %v8715_v14 }
 0x856   : > { %v4355_v48 = vmul.f32 0.5, %v4354_v6  ;;  %v4042_v39 = vpop.f32.mrf.mxu3 }
 0x857   : > { %v8917_v51 = vsub.f32 %v8743_v4, %v4042_v39  ;;  %v4588_v3 = vmul.f32 %v8784_v61, %v4554_v0 }
 0x858   : > { %v4356_v60 = vsub.f32 1.5, %v4355_v48  ;;  %v4171_v62 = vpop.f32.mrf.mxu1 }
 0x859   : > { %v6503_v22 = vpop.eup %6502  ;;  %v4108_v11 = vmul.f32 %v8917_v51, %v8917_v51  ;;  %v4172_v1 = vadd.f32 1e-05, %v4171_v62  ;;  %v4622_v21 = vadd.f32 %v8788_v33, %v4588_v3 }
 0x85a   : > { %v4357_v32 = vmul.f32 %v6501_v58, %v4356_v60  ;;  %v4363_v14 = vmul.f32 %v6503_v22, %v4169_v54  ;;  %vm4369_vm13 = vweird.f32 %v6503_v22 }
 0x85b   : > { %6504 = vrsqrt.f32 %v4172_v1  ;;  %4218 = vmatmul.f32.gmra.mxu1 %v4108_v11  ;;  %4827 = vmatmul.f32.gmra.mxu2 %v4622_v21  ;;  %vm4370_vm15 = vmor %vm4368_vm14, %vm4369_vm13  ;;  %vm4378_vm3 = vweird.f32 %v4172_v1 }
 0x85c   : > { %v4364_v4 = vmul.f32 %v6503_v22, %v4363_v14  ;;  %v4361_v5 = vsel %vm4360_vm12, %v6501_v58, %v4357_v32 }
 0x85d   : > { %v4555_v18 = vmul.f32 %v4361_v5, %v8725_v19 }
 0x85e   : > { %v4365_v13 = vmul.f32 0.5, %v4364_v4 }
 0x85f   : > { %v4589_v38 = vmul.f32 %v8784_v61, %v4555_v18 }
 0x860   : > { %v4366_v7 = vsub.f32 1.5, %v4365_v13  ;;  %v4174_v34 = vpop.f32.mrf.mxu1 }
 0x861   : > { %v6505_v46 = vpop.eup %6504  ;;  %v4175_v41 = vadd.f32 1e-05, %v4174_v34  ;;  %v4623_v29 = vadd.f32 %v8788_v33, %v4589_v38 }
 0x862   : > { %v4367_v57 = vmul.f32 %v6503_v22, %v4366_v7  ;;  %v4373_v8 = vmul.f32 %v6505_v46, %v4172_v1  ;;  %vm4379_vm2 = vweird.f32 %v6505_v46 }
 0x863   : > { %6506 = vrsqrt.f32 %v4175_v41  ;;  %4830 = vmatmul.f32.gmra.mxu2 %v4623_v29  ;;  %vm4380_vm4 = vmor %vm4378_vm3, %vm4379_vm2  ;;  %vm4388_vm6 = vweird.f32 %v4175_v41 }
 0x864   : > { %v4374_v53 = vmul.f32 %v6505_v46, %v4373_v8  ;;  %v4371_v10 = vsel %vm4370_vm15, %v6503_v22, %v4367_v57 }
 0x865   : > { %v4556_v19 = vmul.f32 %v4371_v10, %v8737_v15  ;;  %v8938_v14 = vpop.f32.mrf.mxu0 }
 0x866   : > { %v4375_v36 = vmul.f32 0.5, %v4374_v53 }
 0x867   : > { %v4590_v24 = vmul.f32 %v8784_v61, %v4556_v19 }
 0x868   : > { %v4376_v25 = vsub.f32 1.5, %v4375_v36  ;;  %v4177_v12 = vpop.f32.mrf.mxu1 }
 0x869   : > { %v6507_v52 = vpop.eup %6506  ;;  %v4178_v20 = vadd.f32 1e-05, %v4177_v12  ;;  %v4624_v17 = vadd.f32 %v8788_v33, %v4590_v24 }
 0x86a   : > { %v4377_v58 = vmul.f32 %v6505_v46, %v4376_v25  ;;  %v4383_v42 = vmul.f32 %v6507_v52, %v4175_v41  ;;  %vm4389_vm5 = vweird.f32 %v6507_v52 }
 0x86b   : > { %6508 = vrsqrt.f32 %v4178_v20  ;;  %4833 = vmatmul.f32.gmra.mxu2 %v4624_v17  ;;  %v8929_v44 = vpop.f32.mrf.mxu2  ;;  %vm4390_vm7 = vmor %vm4388_vm6, %vm4389_vm5  ;;  %vm4398_vm0 = vweird.f32 %v4178_v20 }
 0x86c   : > { %v4381_v54 = vsel %vm4380_vm4, %v6505_v46, %v4377_v58  ;;  %v4384_v27 = vmul.f32 %v6507_v52, %v4383_v42  ;;  %v4904_v7 = vperm.slane %v8929_v44, 0 }
 0x86d   : > { %v4557_v15 = vmul.f32 %v4381_v54, %v8748_v2 }
 0x86e   : > { %v4385_v16 = vmul.f32 0.5, %v4384_v27  ;;  %v4936_v29 = vmul.f32 %v4904_v7, %v8938_v14 }
 0x86f   : > { %v4591_v6 = vmul.f32 %v8784_v61, %v4557_v15  ;;  %v4890_v15 = vrot.slane %v8929_v44, 1 }
 0x870   : > { %v4386_v59 = vsub.f32 1.5, %v4385_v16  ;;  %v4180_v0 = vpop.f32.mrf.mxu1 }
 0x871   : > { %v6509_v48 = vpop.eup %6508  ;;  %v4181_v39 = vadd.f32 1e-05, %v4180_v0  ;;  %v4625_v3 = vadd.f32 %v8788_v33, %v4591_v6 }
 0x872   : > { %v4387_v60 = vmul.f32 %v6507_v52, %v4386_v59  ;;  %v4393_v62 = vmul.f32 %v6509_v48, %v4178_v20  ;;  %vm4399_vm8 = vweird.f32 %v6509_v48  ;;  %v8946_v20 = vpop.f32.mrf.mxu0 }
 0x873   : > { %6510 = vrsqrt.f32 %v4181_v39  ;;  %4836 = vmatmul.f32.gmra.mxu2 %v4625_v3  ;;  %v8935_v21 = vpop.f32.mrf.mxu2  ;;  %vm4400_vm1 = vmor %vm4398_vm0, %vm4399_vm8  ;;  %vm4408_vm10 = vweird.f32 %v4181_v39  ;;  %v4937_v54 = vmul.f32 %v4904_v7, %v8946_v20 }
 0x874   : > { %v4391_v22 = vsel %vm4390_vm7, %v6507_v52, %v4387_v60  ;;  %v4394_v11 = vmul.f32 %v6509_v48, %v4393_v62 }
 0x875   : > { %v4558_v2 = vmul.f32 %v4391_v22, %v8754_v23  ;;  %v4905_v22 = vperm.slane %v4890_v15, 0 }
 0x876   : > { %v4395_v1 = vmul.f32 0.5, %v4394_v11 }
 0x877   : > { %v4592_v32 = vmul.f32 %v8784_v61, %v4558_v2 }
 0x878   : > { %v4396_v4 = vsub.f32 1.5, %v4395_v1  ;;  %v4183_v5 = vpop.f32.mrf.mxu1 }
 0x879   : > { %v6511_v18 = vpop.eup %6510  ;;  %v4184_v13 = vadd.f32 1e-05, %v4183_v5  ;;  %v4626_v38 = vadd.f32 %v8788_v33, %v4592_v32  ;;  %v4938_v32 = vmul.f32 %v4905_v22, %v8938_v14 }
 0x87a   : > { %v4397_v34 = vmul.f32 %v6509_v48, %v4396_v4  ;;  %v4403_v46 = vmul.f32 %v6511_v18, %v4181_v39  ;;  %vm4409_vm9 = vweird.f32 %v6511_v18 }
 0x87b   : > { %6512 = vrsqrt.f32 %v4184_v13  ;;  %4839 = vmatmul.f32.gmra.mxu2 %v4626_v38  ;;  %vm4410_vm11 = vmor %vm4408_vm10, %vm4409_vm9  ;;  %vm4418_vm13 = vweird.f32 %v4184_v13 }
 0x87c   : > { %v4401_v23 = vsel %vm4400_vm1, %v6509_v48, %v4397_v34  ;;  %v4404_v41 = vmul.f32 %v6511_v18, %v4403_v46 }
 0x87d   : > { %v4559_v57 = vmul.f32 %v4401_v23, %v8762_v37 }
 0x87e   : > { %v4405_v8 = vmul.f32 0.5, %v4404_v41  ;;  %v4792_v53 = vpop.f32.mrf.mxu2 }
 0x87f   : > { %v4968_v10 = vmul.f32 %v4936_v29, %v4792_v53  ;;  %v4593_v19 = vmul.f32 %v8784_v61, %v4559_v57  ;;  %v4939_v53 = vmul.f32 %v4905_v22, %v8946_v20 }
 0x880   : > { %v4406_v36 = vsub.f32 1.5, %v4405_v8  ;;  %v4186_v24 = vpop.f32.mrf.mxu1 }
 0x881   : > { %v6513_v25 = vpop.eup %6512  ;;  %v4187_v12 = vadd.f32 1e-05, %v4186_v24  ;;  %5016 = vmatmul.f32.vlgmr.msra.gmra.mxu0 %v4968_v10  ;;  %v4627_v52 = vadd.f32 %v8788_v33, %v4593_v19  ;;  %v4891_v19 = vrot.slane %v8929_v44, 2 }
 0x882   : > { %v4407_v17 = vmul.f32 %v6511_v18, %v4406_v36  ;;  %v4413_v58 = vmul.f32 %v6513_v25, %v4184_v13  ;;  %vm4419_vm12 = vweird.f32 %v6513_v25 }
 0x883   : > { %6514 = vrsqrt.f32 %v4187_v12  ;;  %4842 = vmatmul.f32.gmra.mxu2 %v4627_v52  ;;  %vm4420_vm14 = vmor %vm4418_vm13, %vm4419_vm12  ;;  %vm4428_vm2 = vweird.f32 %v4187_v12 }
 0x884   : > { %v4411_v37 = vsel %vm4410_vm11, %v6511_v18, %v4407_v17  ;;  %v4414_v42 = vmul.f32 %v6513_v25, %v4413_v58 }
 0x885   : > { %v4560_v27 = vmul.f32 %v4411_v37, %v8775_v31 }
 0x886   : > { %v4415_v16 = vmul.f32 0.5, %v4414_v42  ;;  %v4795_v6 = vpop.f32.mrf.mxu2 }
 0x887   : > { %v4969_v59 = vmul.f32 %v4937_v54, %v4795_v6  ;;  %v4594_v0 = vmul.f32 %v8784_v61, %v4560_v27  ;;  %v4906_v54 = vperm.slane %v4891_v19, 0 }
 0x888   : > { %v4416_v48 = vsub.f32 1.5, %v4415_v16  ;;  %v4189_v39 = vpop.f32.mrf.mxu1 }
 0x889   : > { %v6515_v3 = vpop.eup %6514  ;;  %v4190_v60 = vadd.f32 1e-05, %v4189_v39  ;;  %5019 = vmatmul.f32.gmra.mxu0 %v4969_v59  ;;  %v4628_v62 = vadd.f32 %v8788_v33, %v4594_v0  ;;  %v4940_v6 = vmul.f32 %v4906_v54, %v8938_v14 }
 0x88a   : > { %v4417_v11 = vmul.f32 %v6513_v25, %v4416_v48  ;;  %v4423_v2 = vmul.f32 %v6515_v3, %v4187_v12  ;;  %vm4429_vm15 = vweird.f32 %v6515_v3 }
 0x88b   : > { %6516 = vrsqrt.f32 %v4190_v60  ;;  %4845 = vmatmul.f32.gmra.mxu2 %v4628_v62  ;;  %vm4430_vm3 = vmor %vm4428_vm2, %vm4429_vm15  ;;  %vm4438_vm5 = vweird.f32 %v4190_v60 }
 0x88c   : > { %v4421_v31 = vsel %vm4420_vm14, %v6513_v25, %v4417_v11  ;;  %v4424_v1 = vmul.f32 %v6515_v3, %v4423_v2 }
 0x88d   : > { %v4561_v4 = vmul.f32 %v4421_v31, %v8792_v56 }
 0x88e   : > { %v4425_v5 = vmul.f32 0.5, %v4424_v1  ;;  %v4798_v18 = vpop.f32.mrf.mxu2 }
 0x88f   : > { %v4970_v38 = vmul.f32 %v4938_v32, %v4798_v18  ;;  %v4595_v7 = vmul.f32 %v8784_v61, %v4561_v4  ;;  %v4941_v4 = vmul.f32 %v4906_v54, %v8946_v20  ;;  %v4892_v18 = vrot.slane %v8929_v44, 3 }
 0x890   : > { %v4426_v34 = vsub.f32 1.5, %v4425_v5  ;;  %v4192_v46 = vpop.f32.mrf.mxu1 }
 0x891   : > { %v6517_v23 = vpop.eup %6516  ;;  %v4193_v13 = vadd.f32 1e-05, %v4192_v46  ;;  %5022 = vmatmul.f32.gmra.mxu0 %v4970_v38  ;;  %v4629_v41 = vadd.f32 %v8788_v33, %v4595_v7 }
 0x892   : > { %v4427_v29 = vmul.f32 %v6515_v3, %v4426_v34  ;;  %v4433_v57 = vmul.f32 %v6517_v23, %v4190_v60  ;;  %vm4439_vm4 = vweird.f32 %v6517_v23 }
 0x893   : > { %6518 = vrsqrt.f32 %v4193_v13  ;;  %4848 = vmatmul.f32.gmra.mxu2 %v4629_v41  ;;  %vm4440_vm6 = vmor %vm4438_vm5, %vm4439_vm4  ;;  %vm4448_vm8 = vweird.f32 %v4193_v13 }
 0x894   : > { %v4431_v56 = vsel %vm4430_vm3, %v6515_v3, %v4427_v29  ;;  %v4434_v8 = vmul.f32 %v6517_v23, %v4433_v57 }
 0x895   : > { %v4562_v10 = vmul.f32 %v4431_v56, %v8805_v55  ;;  %v4907_v56 = vperm.slane %v4892_v18, 0 }
 0x896   : > { %v4435_v36 = vmul.f32 0.5, %v4434_v8  ;;  %v4801_v24 = vpop.f32.mrf.mxu2 }
 0x897   : > { %v4971_v25 = vmul.f32 %v4939_v53, %v4801_v24  ;;  %v4596_v52 = vmul.f32 %v8784_v61, %v4562_v10  ;;  %v4942_v19 = vmul.f32 %v4907_v56, %v8938_v14 }
 0x898   : > { %v4436_v17 = vsub.f32 1.5, %v4435_v36  ;;  %v4195_v12 = vpop.f32.mrf.mxu1 }
 0x899   : > { %v6519_v58 = vpop.eup %6518  ;;  %v4196_v37 = vadd.f32 1e-05, %v4195_v12  ;;  %5025 = vmatmul.f32.gmra.mxu0 %v4971_v25  ;;  %v4630_v42 = vadd.f32 %v8788_v33, %v4596_v52  ;;  %v8973_v52 = vld [vmem:[#allocation2 + $0x590] ss:$0 sm:$0xff] }
 0x89a   : > { %v4437_v27 = vmul.f32 %v6517_v23, %v4436_v17  ;;  %v4443_v15 = vmul.f32 %v6519_v58, %v4193_v13  ;;  %vm4449_vm7 = vweird.f32 %v6519_v58 }
 0x89b   : > { %6520 = vrsqrt.f32 %v4196_v37  ;;  %4851 = vmatmul.f32.gmra.mxu2 %v4630_v42  ;;  %vm4450_vm0 = vmor %vm4448_vm8, %vm4449_vm7  ;;  %vm4458_vm9 = vweird.f32 %v4196_v37  ;;  %v8976_v42 = vld [vmem:[#allocation2 + $0x598] ss:$0 sm:$0xff] }
 0x89c   : > { %v4441_v55 = vsel %vm4440_vm6, %v6517_v23, %v4437_v27  ;;  %v4444_v16 = vmul.f32 %v6519_v58, %v4443_v15 }
 0x89d   : > { %v4563_v59 = vmul.f32 %v4441_v55, %v8819_v30 }
 0x89e   : > { %v4445_v0 = vmul.f32 0.5, %v4444_v16  ;;  %v4804_v48 = vpop.f32.mrf.mxu2  ;;  %v4943_v16 = vmul.f32 %v4907_v56, %v8946_v20 }
 0x89f   : > { %v4972_v39 = vmul.f32 %v4940_v6, %v4804_v48  ;;  %v4597_v3 = vmul.f32 %v8784_v61, %v4563_v59  ;;  %v4893_v59 = vrot.slane %v8929_v44, 4 }
 0x8a0   : > { %v4446_v62 = vsub.f32 1.5, %v4445_v0  ;;  %v4198_v22 = vpop.f32.mrf.mxu1 }
 0x8a1   : > { %v6521_v11 = vpop.eup %6520  ;;  %v4199_v60 = vadd.f32 1e-05, %v4198_v22  ;;  %5028 = vmatmul.f32.gmra.mxu0 %v4972_v39  ;;  %v4631_v2 = vadd.f32 %v8788_v33, %v4597_v3 }
 0x8a2   : > { %v4447_v31 = vmul.f32 %v6519_v58, %v4446_v62  ;;  %v4453_v1 = vmul.f32 %v6521_v11, %v4196_v37  ;;  %vm4459_vm1 = vweird.f32 %v6521_v11 }
 0x8a3   : > { %6522 = vrsqrt.f32 %v4199_v60  ;;  %4854 = vmatmul.f32.gmra.mxu2 %v4631_v2  ;;  %vm4460_vm10 = vmor %vm4458_vm9, %vm4459_vm1  ;;  %vm4468_vm12 = vweird.f32 %v4199_v60 }
 0x8a4   : > { %v4451_v30 = vsel %vm4450_vm0, %v6519_v58, %v4447_v31  ;;  %v4454_v32 = vmul.f32 %v6521_v11, %v4453_v1  ;;  %v4908_v31 = vperm.slane %v4893_v59, 0 }
 0x8a5   : > { %v4564_v5 = vmul.f32 %v4451_v30, %v8832_v26 }
 0x8a6   : > { %v4455_v38 = vmul.f32 0.5, %v4454_v32  ;;  %v4807_v7 = vpop.f32.mrf.mxu2 }
 0x8a7   : > { %v4973_v34 = vmul.f32 %v4941_v4, %v4807_v7  ;;  %v4598_v46 = vmul.f32 %v8784_v61, %v4564_v5  ;;  %v4944_v4 = vmul.f32 %v4908_v31, %v8938_v14 }
 0x8a8   : > { %v4456_v23 = vsub.f32 1.5, %v4455_v38  ;;  %v4201_v13 = vpop.f32.mrf.mxu1 }
 0x8a9   : > { %v6523_v41 = vpop.eup %6522  ;;  %v4202_v29 = vadd.f32 1e-05, %v4201_v13  ;;  %5031 = vmatmul.f32.gmra.mxu0 %v4973_v34  ;;  %v4632_v57 = vadd.f32 %v8788_v33, %v4598_v46 }
 0x8aa   : > { %v4457_v8 = vmul.f32 %v6521_v11, %v4456_v23  ;;  %v4463_v53 = vmul.f32 %v6523_v41, %v4199_v60  ;;  %vm4469_vm11 = vweird.f32 %v6523_v41 }
 0x8ab   : > { %6524 = vrsqrt.f32 %v4202_v29  ;;  %4857 = vmatmul.f32.gmra.mxu2 %v4632_v57  ;;  %vm4470_vm13 = vmor %vm4468_vm12, %vm4469_vm11  ;;  %vm4478_vm15 = vweird.f32 %v4202_v29 }
 0x8ac   : > { %v4461_v26 = vsel %vm4460_vm10, %v6521_v11, %v4457_v8  ;;  %v4464_v10 = vmul.f32 %v6523_v41, %v4463_v53  ;;  %v4945_v53 = vmul.f32 %v4908_v31, %v8946_v20 }
 0x8ad   : > { %v4565_v61 = vmul.f32 %v4461_v26, %v8845_v63 }
 0x8ae   : > { %v4465_v36 = vmul.f32 0.5, %v4464_v10  ;;  %v4810_v24 = vpop.f32.mrf.mxu2  ;;  %v4894_v10 = vrot.slane %v8929_v44, 5 }
 0x8af   : > { %v4974_v25 = vmul.f32 %v4942_v19, %v4810_v24  ;;  %v4599_v33 = vmul.f32 %v8973_v52, %v4565_v61 }
 0x8b0   : > { %v4466_v17 = vsub.f32 1.5, %v4465_v36  ;;  %v4204_v12 = vpop.f32.mrf.mxu1 }
 0x8b1   : > { %v6525_v58 = vpop.eup %6524  ;;  %v4205_v37 = vadd.f32 1e-05, %v4204_v12  ;;  %5034 = vmatmul.f32.gmra.mxu0 %v4974_v25  ;;  %v4633_v54 = vadd.f32 %v8976_v42, %v4599_v33 }
 0x8b2   : > { %v4467_v27 = vmul.f32 %v6523_v41, %v4466_v17  ;;  %v4473_v63 = vmul.f32 %v6525_v58, %v4202_v29  ;;  %vm4479_vm14 = vweird.f32 %v6525_v58 }
 0x8b3   : > { %6526 = vrsqrt.f32 %v4205_v37  ;;  %4860 = vmatmul.f32.gmra.mxu2 %v4633_v54  ;;  %vm4480_vm2 = vmor %vm4478_vm15, %vm4479_vm14  ;;  %vm4488_vm4 = vweird.f32 %v4205_v37 }
 0x8b4   : > { %v4471_v15 = vsel %vm4470_vm13, %v6523_v41, %v4467_v27  ;;  %v4474_v55 = vmul.f32 %v6525_v58, %v4473_v63 }
 0x8b5   : > { %v4566_v6 = vmul.f32 %v4471_v15, %v8858_v47 }
 0x8b6   : > { %v4475_v0 = vmul.f32 0.5, %v4474_v55  ;;  %v4813_v48 = vpop.f32.mrf.mxu2 }
 0x8b7   : > { %v4975_v39 = vmul.f32 %v4943_v16, %v4813_v48  ;;  %v4600_v3 = vmul.f32 %v8973_v52, %v4566_v6 }
 0x8b8   : > { %v4476_v62 = vsub.f32 1.5, %v4475_v0  ;;  %v4207_v22 = vpop.f32.mrf.mxu1 }
 0x8b9   : > { %v6527_v11 = vpop.eup %6526  ;;  %v4208_v60 = vadd.f32 1e-05, %v4207_v22  ;;  %5037 = vmatmul.f32.gmra.mxu0 %v4975_v39  ;;  %v4634_v2 = vadd.f32 %v8976_v42, %v4600_v3 }
 0x8ba   : > { %v4477_v1 = vmul.f32 %v6525_v58, %v4476_v62  ;;  %v4483_v30 = vmul.f32 %v6527_v11, %v4205_v37  ;;  %vm4489_vm3 = vweird.f32 %v6527_v11  ;;  %v4909_v37 = vperm.slane %v4894_v10, 0 }
 0x8bb   : > { %6528 = vrsqrt.f32 %v4208_v60  ;;  %4863 = vmatmul.f32.gmra.mxu2 %v4634_v2  ;;  %vm4490_vm5 = vmor %vm4488_vm4, %vm4489_vm3  ;;  %vm4498_vm7 = vweird.f32 %v4208_v60 }
 0x8bc   : > { %v4481_v47 = vsel %vm4480_vm2, %v6525_v58, %v4477_v1  ;;  %v4484_v32 = vmul.f32 %v6527_v11, %v4483_v30  ;;  %v4946_v15 = vmul.f32 %v4909_v37, %v8938_v14  ;;  %v4947_v31 = vmul.f32 %v4909_v37, %v8946_v20 }
 0x8bd   : > { %v4567_v5 = vmul.f32 %v4481_v47, %v8868_v35  ;;  %v4895_v30 = vrot.slane %v8929_v44, 6 }
 0x8be   : > { %v4485_v18 = vmul.f32 0.5, %v4484_v32  ;;  %v4816_v38 = vpop.f32.mrf.mxu2 }
 0x8bf   : > { %v4976_v7 = vmul.f32 %v4944_v4, %v4816_v38  ;;  %v4601_v34 = vmul.f32 %v8973_v52, %v4567_v5 }
 0x8c0   : > { %v4486_v46 = vsub.f32 1.5, %v4485_v18  ;;  %v4210_v23 = vpop.f32.mrf.mxu1 }
 0x8c1   : > { %v6529_v13 = vpop.eup %6528  ;;  %v4211_v41 = vadd.f32 1e-05, %v4210_v23  ;;  %5040 = vmatmul.f32.gmra.mxu0 %v4976_v7  ;;  %v4635_v29 = vadd.f32 %v8976_v42, %v4601_v34  ;;  %v4910_v23 = vperm.slane %v4895_v30, 0 }
 0x8c2   : > { %v4487_v57 = vmul.f32 %v6527_v11, %v4486_v46  ;;  %v4493_v56 = vmul.f32 %v6529_v13, %v4208_v60  ;;  %vm4499_vm6 = vweird.f32 %v6529_v13 }
 0x8c3   : > { %6530 = vrsqrt.f32 %v4211_v41  ;;  %4866 = vmatmul.f32.gmra.mxu2 %v4635_v29  ;;  %vm4500_vm8 = vmor %vm4498_vm7, %vm4499_vm6  ;;  %vm4508_vm1 = vweird.f32 %v4211_v41 }
 0x8c4   : > { %v4491_v35 = vsel %vm4490_vm5, %v6527_v11, %v4487_v57  ;;  %v4494_v8 = vmul.f32 %v6529_v13, %v4493_v56  ;;  %v4948_v57 = vmul.f32 %v4910_v23, %v8938_v14 }
 0x8c5   : > { %v4568_v26 = vmul.f32 %v4491_v35, %v8877_v9 }
 0x8c6   : > { %v4495_v19 = vmul.f32 0.5, %v4494_v8  ;;  %v4819_v61 = vpop.f32.mrf.mxu2 }
 0x8c7   : > { %v4977_v36 = vmul.f32 %v4945_v53, %v4819_v61  ;;  %v4602_v24 = vmul.f32 %v8973_v52, %v4568_v26 }
 0x8c8   : > { %v4496_v25 = vsub.f32 1.5, %v4495_v19  ;;  %v4213_v33 = vpop.f32.mrf.mxu1 }
 0x8c9   : > { %v6531_v17 = vpop.eup %6530  ;;  %v4214_v12 = vadd.f32 1e-05, %v4213_v33  ;;  %5043 = vmatmul.f32.gmra.mxu0 %v4977_v36  ;;  %v4636_v58 = vadd.f32 %v8976_v42, %v4602_v24 }
 0x8ca   : > { %v4497_v54 = vmul.f32 %v6529_v13, %v4496_v25  ;;  %v4503_v27 = vmul.f32 %v6531_v17, %v4211_v41  ;;  %vm4509_vm0 = vweird.f32 %v6531_v17 }
 0x8cb   : > { %6532 = vrsqrt.f32 %v4214_v12  ;;  %4869 = vmatmul.f32.gmra.mxu2 %v4636_v58  ;;  %vm4510_vm9 = vmor %vm4508_vm1, %vm4509_vm0  ;;  %vm4518_vm11 = vweird.f32 %v4214_v12 }
 0x8cc   : > { %v4501_v9 = vsel %vm4500_vm8, %v6529_v13, %v4497_v54  ;;  %v4504_v63 = vmul.f32 %v6531_v17, %v4503_v27 }
 0x8cd   : > { %v4569_v55 = vmul.f32 %v4501_v9, %v8885_v40 }
 0x8ce   : > { %v4505_v16 = vmul.f32 0.5, %v4504_v63  ;;  %v4822_v6 = vpop.f32.mrf.mxu2 }
 0x8cf   : > { %v4978_v59 = vmul.f32 %v4946_v15, %v4822_v6  ;;  %v4603_v0 = vmul.f32 %v8973_v52, %v4569_v55 }
 0x8d0   : > { %v4506_v48 = vsub.f32 1.5, %v4505_v16  ;;  %v4216_v39 = vpop.f32.mrf.mxu1  ;;  %v9011_v16 = vpop.f32.mrf.mxu0 }
 0x8d1   : > { %v6533_v3 = vpop.eup %6532  ;;  %v4217_v62 = vadd.f32 1e-05, %v4216_v39  ;;  %5046 = vmatmul.f32.gmra.mxu0 %v4978_v59  ;;  %v4637_v22 = vadd.f32 %v8976_v42, %v4603_v0 }
 0x8d2   : > { %v4507_v11 = vmul.f32 %v6531_v17, %v4506_v48  ;;  %v4513_v60 = vmul.f32 %v6533_v3, %v4214_v12  ;;  %vm4519_vm10 = vweird.f32 %v6533_v3  ;;  %v4896_v12 = vrot.slane %v8929_v44, 7 }
 0x8d3   : > { %6534 = vrsqrt.f32 %v4217_v62  ;;  %4872 = vmatmul.f32.gmra.mxu2 %v4637_v22  ;;  %vm4520_vm12 = vmor %vm4518_vm11, %vm4519_vm10  ;;  %vm4528_vm14 = vweird.f32 %v4217_v62 }
 0x8d4   : > { %v4511_v40 = vsel %vm4510_vm9, %v6531_v17, %v4507_v11  ;;  %v4514_v2 = vmul.f32 %v6533_v3, %v4513_v60  ;;  %v4911_v15 = vperm.slane %v4896_v12, 0 }
 0x8d5   : > { %v4570_v1 = vmul.f32 %v4511_v40, %v8893_v28  ;;  %v4912_v40 = vperm.slane %v8935_v21, 0 }
 0x8d6   : > { %v4515_v47 = vmul.f32 0.5, %v4514_v2  ;;  %v4825_v32 = vpop.f32.mrf.mxu2  ;;  %v4950_v44 = vmul.f32 %v4911_v15, %v8938_v14 }
 0x8d7   : > { %v4979_v4 = vmul.f32 %v4947_v31, %v4825_v32  ;;  %v4604_v5 = vmul.f32 %v8973_v52, %v4570_v1  ;;  %v4897_v1 = vrot.slane %v8935_v21, 1  ;;  %v5433_v32 = vld [vmem:[#allocation2 + $0xc40] sm:$0xff] }
 0x8d8   : > { %v4516_v18 = vsub.f32 1.5, %v4515_v47  ;;  %v4219_v38 = vpop.f32.mrf.mxu1  ;;  %v9018_v22 = vpop.f32.mrf.mxu0 }
 0x8d9   : > { %v6535_v7 = vpop.eup %6534  ;;  %v4220_v34 = vadd.f32 1e-05, %v4219_v38  ;;  %5049 = vmatmul.f32.gmra.mxu0 %v4979_v4  ;;  %v4638_v46 = vadd.f32 %v8976_v42, %v4604_v5  ;;  %v4913_v5 = vperm.slane %v4897_v1, 0 }
 0x8da   : > { %v4517_v13 = vmul.f32 %v6533_v3, %v4516_v18  ;;  %v4523_v41 = vmul.f32 %v6535_v7, %v4217_v62  ;;  %vm4529_vm13 = vweird.f32 %v6535_v7  ;;  %v4951_v62 = vmul.f32 %v4911_v15, %v8946_v20 }
 0x8db   : > { %6536 = vrsqrt.f32 %v4220_v34  ;;  %4875 = vmatmul.f32.gmra.mxu2 %v4638_v46  ;;  %vm4530_vm15 = vmor %vm4528_vm14, %vm4529_vm13  ;;  %vm4538_vm3 = vweird.f32 %v4220_v34  ;;  %v4954_v18 = vmul.f32 %v4913_v5, %v8938_v14  ;;  %v4955_v46 = vmul.f32 %v4913_v5, %v8946_v20 }
 0x8dc   : > { %v4521_v28 = vsel %vm4520_vm12, %v6533_v3, %v4517_v13  ;;  %v4524_v29 = vmul.f32 %v6535_v7, %v4523_v41  ;;  %v5434_v3 = vld [vmem:[#allocation2 + $0xc48] sm:$0xff] }
 0x8dd   : > { %v4571_v56 = vmul.f32 %v4521_v28, %v8901_v50  ;;  %v4949_v50 = vmul.f32 %v4910_v23, %v8946_v20  ;;  %5437 = vmatpush.msra.mxu3 %v5434_v3  ;;  %v4898_v23 = vrot.slane %v8935_v21, 2  ;;  %v5432_v28 = vld [vmem:[#allocation2 + $0xc38] sm:$0xff]  ;;  %v5429_v3 = vld [vmem:[#allocation2 + $0xc20] sm:$0xff] }
 0x8de   : > { %v4525_v35 = vmul.f32 0.5, %v4524_v29  ;;  %v4828_v8 = vpop.f32.mrf.mxu2 }
 0x8df   : > { %v4980_v53 = vmul.f32 %v4948_v57, %v4828_v8  ;;  %v4605_v26 = vmul.f32 %v8973_v52, %v4571_v56  ;;  %5438 = vmatpush.msra.mxu3 %v5433_v32  ;;  %v4914_v57 = vperm.slane %v4898_v23, 0  ;;  %v4902_v32 = vrot.slane %v8935_v21, 6 }
 0x8e0   : > { %v4526_v10 = vsub.f32 1.5, %v4525_v35 }
 0x8e1   : > { %v6537_v19 = vpop.eup %6536  ;;  %5052 = vmatmul.f32.gmra.mxu0 %v4980_v53  ;;  %v4639_v61 = vadd.f32 %v8976_v42, %v4605_v26  ;;  %5439 = vmatpush.msra.mxu3 %v5432_v28  ;;  %v4956_v56 = vmul.f32 %v4914_v57, %v8938_v14  ;;  %v4957_v26 = vmul.f32 %v4914_v57, %v8946_v20 }
 0x8e2   : > { %v4527_v36 = vmul.f32 %v6535_v7, %v4526_v10  ;;  %v4533_v24 = vmul.f32 %v6537_v19, %v4220_v34  ;;  %vm4539_vm2 = vweird.f32 %v6537_v19  ;;  %v4899_v10 = vrot.slane %v8935_v21, 3 }
 0x8e3   : > { %4878 = vmatmul.f32.gmra.mxu2 %v4639_v61  ;;  %vm4540_vm4 = vmor %vm4538_vm3, %vm4539_vm2 }
 0x8e4   : > { %v4531_v25 = vsel %vm4530_vm15, %v6535_v7, %v4527_v36  ;;  %v4534_v33 = vmul.f32 %v6537_v19, %v4533_v24  ;;  %v5431_v36 = vld [vmem:[#allocation2 + $0xc30] sm:$0xff] }
 0x8e5   : > { %v4572_v17 = vmul.f32 %v4531_v25, %v8909_v43  ;;  %5440 = vmatpush.msra.mxu3 %v5431_v36  ;;  %v4915_v25 = vperm.slane %v4899_v10, 0 }
 0x8e6   : > { %v4535_v58 = vmul.f32 0.5, %v4534_v33  ;;  %v4831_v37 = vpop.f32.mrf.mxu2 }
 0x8e7   : > { %v4981_v54 = vmul.f32 %v4949_v50, %v4831_v37  ;;  %v4606_v27 = vmul.f32 %v8973_v52, %v4572_v17  ;;  %v4958_v33 = vmul.f32 %v4915_v25, %v8938_v14  ;;  %v4900_v37 = vrot.slane %v8935_v21, 4 }
 0x8e8   : > { %v4536_v9 = vsub.f32 1.5, %v4535_v58  ;;  %v4959_v58 = vmul.f32 %v4915_v25, %v8946_v20 }
 0x8e9   : > { %5055 = vmatmul.f32.gmra.mxu0 %v4981_v54  ;;  %v4640_v63 = vadd.f32 %v8976_v42, %v4606_v27  ;;  %v4916_v15 = vperm.slane %v4900_v37, 0 }
 0x8ea   : > { %v4537_v55 = vmul.f32 %v6537_v19, %v4536_v9  ;;  %v5430_v9 = vld [vmem:[#allocation2 + $0xc28] sm:$0xff] }
 0x8eb   : > { %4881 = vmatmul.f32.gmra.mxu2 %v4640_v63  ;;  %5441 = vmatpush.msra.mxu3 %v5430_v9 }
 0x8ec   : > { %v4541_v43 = vsel %vm4540_vm4, %v6537_v19, %v4537_v55  ;;  %v4960_v55 = vmul.f32 %v4916_v15, %v8938_v14 }
 0x8ed   : > { %v4573_v6 = vmul.f32 %v4541_v43, %v8917_v51  ;;  %v4952_v51 = vmul.f32 %v4912_v40, %v8938_v14  ;;  %5442 = vmatpush.msra.mxu3 %v5429_v3 }
 0x8ee   : > { %v4834_v59 = vpop.f32.mrf.mxu2 }
 0x8ef   : > { %v4982_v0 = vmul.f32 %v4950_v44, %v4834_v59  ;;  %v4607_v48 = vmul.f32 %v8973_v52, %v4573_v6  ;;  %v4961_v59 = vmul.f32 %v4916_v15, %v8946_v20  ;;  %v5289_v15 = vperm.slane %v9011_v16, 0 }
 0x8f1   : > { %5058 = vmatmul.f32.gmra.mxu0 %v4982_v0  ;;  %v4641_v39 = vadd.f32 %v8976_v42, %v4607_v48  ;;  %v4953_v42 = vmul.f32 %v4912_v40, %v8946_v20  ;;  %v4901_v0 = vrot.slane %v8935_v21, 5 }
 0x8f3   : > { %4884 = vmatmul.f32.gmra.mxu2 %v4641_v39 }
 0x8f6   : > { %v4837_v11 = vpop.f32.mrf.mxu2 }
 0x8f7   : > { %v4983_v60 = vmul.f32 %v4951_v62, %v4837_v11  ;;  %v4917_v11 = vperm.slane %v4901_v0, 0  ;;  %v4903_v0 = vrot.slane %v8935_v21, 7  ;;  %v5279_v21 = vrot.slane %v9011_v16, 5 }
 0x8f9   : > { %5061 = vmatmul.f32.gmra.mxu0 %v4983_v60  ;;  %v4962_v60 = vmul.f32 %v4917_v11, %v8938_v14 }
 0x8fe   : > { %v4840_v2 = vpop.f32.mrf.mxu2  ;;  %v9022_v31 = vpop.f32.mrf.mxu0 }
 0x8ff   : > { %v4984_v52 = vmul.f32 %v4952_v51, %v4840_v2 }
 0x901   : > { %5064 = vmatmul.f32.gmra.mxu0 %v4984_v52 }
 0x906   : > { %v4843_v30 = vpop.f32.mrf.mxu2  ;;  %v9026_v47 = vpop.f32.mrf.mxu0 }
 0x907   : > { %v4985_v4 = vmul.f32 %v4953_v42, %v4843_v30  ;;  %v6216_v42 = vclamps-f32 %v9026_v47, 5.0  ;;  %v4963_v30 = vmul.f32 %v4917_v11, %v8946_v20  ;;  %v4918_v47 = vperm.slane %v4902_v32, 0  ;;  %v5427_v32 = vld [vmem:[#allocation2 + $0xc10] sm:$0xff] }
 0x909   : > { %5067 = vmatmul.f32.gmra.mxu0 %v4985_v4  ;;  %v6215_v4 = vclamps-f32 %v9022_v31, 5.0 }
 0x90b   : > { %v5177_v57 = vmul.f32 1.442695, %v6215_v4 }
 0x90e   : > { %v4846_v38 = vpop.f32.mrf.mxu2  ;;  %v9029_v7 = vpop.f32.mrf.mxu0 }
 0x90f   : > { %v4986_v34 = vmul.f32 %v4954_v18, %v4846_v38  ;;  %v5428_v38 = vld [vmem:[#allocation2 + $0xc18] sm:$0xff]  ;;  %v6217_v28 = vclamps-f32 %v9029_v7, 5.0 }
 0x910   : > { %5443 = vmatpush.msra.mxu3 %v5428_v38 }
 0x911   : > { %5070 = vmatmul.f32.gmra.mxu0 %v4986_v34 }
 0x912   : > { %5444 = vmatpush.msra.mxu3 %v5427_v32 }
 0x916   : > { %v4849_v13 = vpop.f32.mrf.mxu2  ;;  %v5026_v41 = vpop.f32.mrf.mxu0 }
 0x917   : > { %v4987_v29 = vmul.f32 %v4955_v46, %v4849_v13  ;;  %v6218_v52 = vclamps-f32 %v5026_v41, 5.0  ;;  %v5179_v13 = vmul.f32 1.442695, %v6216_v42 }
 0x919   : > { %5073 = vmatmul.f32.gmra.mxu0 %v4987_v29  ;;  %v5183_v34 = vmul.f32 1.442695, %v6218_v52 }
 0x91b   : > { %6538 = vpow2.f32 %v5183_v34 }
 0x91c   : > { %6540 = vpow2.f32 %v5179_v13 }
 0x91e   : > { %v4852_v35 = vpop.f32.mrf.mxu2  ;;  %v9034_v8 = vpop.f32.mrf.mxu0 }
 0x91f   : > { %v4988_v53 = vmul.f32 %v4956_v56, %v4852_v35  ;;  %v6219_v56 = vclamps-f32 %v9034_v8, 5.0 }
 0x921   : > { %5076 = vmatmul.f32.gmra.mxu0 %v4988_v53  ;;  %v5181_v53 = vmul.f32 1.442695, %v6217_v28  ;;  %v5185_v7 = vmul.f32 1.442695, %v6219_v56  ;;  %v9454_v28 = vld [vmem:[#allocation46_spill] sm:$0xff]  ;;  %v9455_v56 = vld [vmem:[#allocation41_spill] sm:$0xff] }
 0x926   : > { %v4855_v19 = vpop.f32.mrf.mxu2  ;;  %v5032_v61 = vpop.f32.mrf.mxu0 }
 0x927   : > { %v4989_v24 = vmul.f32 %v4957_v26, %v4855_v19  ;;  %v6220_v1 = vclamps-f32 %v5032_v61, 5.0  ;;  %v4964_v19 = vmul.f32 %v4918_v47, %v8938_v14 }
 0x929   : > { %5079 = vmatmul.f32.gmra.mxu0 %v4989_v24  ;;  %v5187_v41 = vmul.f32 1.442695, %v6220_v1 }
 0x92b   : > { %6542 = vpow2.f32 %v5187_v41 }
 0x92c   : > { %6544 = vpow2.f32 %v5177_v57 }
 0x92e   : > { %v4858_v50 = vpop.f32.mrf.mxu2  ;;  %v9039_v17 = vpop.f32.mrf.mxu0 }
 0x92f   : > { %v4990_v12 = vmul.f32 %v4958_v33, %v4858_v50  ;;  %v6221_v26 = vclamps-f32 %v9039_v17, 5.0  ;;  %v5275_v33 = vrot.slane %v9011_v16, 1  ;;  %v5276_v17 = vrot.slane %v9011_v16, 2 }
 0x931   : > { %5082 = vmatmul.f32.gmra.mxu0 %v4990_v12  ;;  %v5189_v50 = vmul.f32 1.442695, %v6221_v26  ;;  %v6539_v12 = vpop.eup %6538 }
 0x932   : > { %v6541_v37 = vpop.eup %6540 }
 0x936   : > { %v4861_v54 = vpop.f32.mrf.mxu2  ;;  %v5038_v27 = vpop.f32.mrf.mxu0 }
 0x937   : > { %v4991_v63 = vmul.f32 %v4959_v58, %v4861_v54  ;;  %v6222_v46 = vclamps-f32 %v5038_v27, 5.0  ;;  %v5277_v54 = vrot.slane %v9011_v16, 3 }
 0x939   : > { %5085 = vmatmul.f32.gmra.mxu0 %v4991_v63  ;;  %v5191_v35 = vmul.f32 1.442695, %v6222_v46  ;;  %v6543_v63 = vpop.eup %6542  ;;  %v5292_v52 = vperm.slane %v5277_v54, 0  ;;  %v9453_v46 = vld [vmem:[#allocation39_spill] sm:$0xff] }
 0x93b   : > { %6546 = vpow2.f32 %v5191_v35 }
 0x93c   : > { %6548 = vpow2.f32 %v5181_v53 }
 0x93e   : > { %v4864_v43 = vpop.f32.mrf.mxu2  ;;  %v9044_v44 = vpop.f32.mrf.mxu0 }
 0x93f   : > { %v4992_v6 = vmul.f32 %v4960_v55, %v4864_v43  ;;  %v6223_v61 = vclamps-f32 %v9044_v44, 5.0  ;;  %v5278_v55 = vrot.slane %v9011_v16, 4  ;;  %v6545_v43 = vpop.eup %6544  ;;  %v5290_v44 = vperm.slane %v5275_v33, 0 }
 0x941   : > { %5088 = vmatmul.f32.gmra.mxu0 %v4992_v6  ;;  %v5193_v27 = vmul.f32 1.442695, %v6223_v61  ;;  %v9450_v6 = vld [vmem:[#allocation42_spill] sm:$0xff]  ;;  %v9457_v61 = vld [vmem:[#allocation43_spill] sm:$0xff] }
 0x946   : > { %v4867_v48 = vpop.f32.mrf.mxu2  ;;  %v5044_v39 = vpop.f32.mrf.mxu0 }
 0x947   : > { %v4993_v62 = vmul.f32 %v4961_v59, %v4867_v48  ;;  %v6224_v29 = vclamps-f32 %v5044_v39, 5.0  ;;  %v5244_v59 = vmul.f32 %v6539_v12, %v9450_v6  ;;  %v6547_v48 = vpop.eup %6546  ;;  %v9451_v39 = vld [vmem:[#allocation40_spill] sm:$0xff] }
 0x948   : > { %v5242_v3 = vmul.f32 %v6541_v37, %v9451_v39  ;;  %v5248_v41 = vmul.f32 %v6547_v48, %v9454_v28 }
 0x949   : > { %5091 = vmatmul.f32.gmra.mxu0 %v4993_v62  ;;  %v5195_v10 = vmul.f32 1.442695, %v6224_v29  ;;  %v5291_v62 = vperm.slane %v5276_v17, 0  ;;  %v5324_v13 = vmul.f32 %v5290_v44, %v5244_v59  ;;  %v4919_v29 = vperm.slane %v4903_v0, 0  ;;  %v9458_v17 = vld [vmem:[#allocation52_spill] sm:$0xff] }
 0x94a   : > { %v5322_v57 = vmul.f32 %v5289_v15, %v5242_v3  ;;  %v5398_v26 = vadd.f32 %v5244_v59, %v5242_v3  ;;  %v5328_v12 = vmul.f32 %v5292_v52, %v5248_v41 }
 0x94b   : > { %6550 = vpow2.f32 %v5195_v10 }
 0x94c   : > { %6552 = vpow2.f32 %v5185_v7  ;;  %v5368_v33 = vadd.f32 %v5324_v13, %v5322_v57  ;;  %v9463_v57 = vld [vmem:[#allocation54_spill] sm:$0xff] }
 0x94e   : > { %v4870_v40 = vpop.f32.mrf.mxu2  ;;  %v9049_v51 = vpop.f32.mrf.mxu0 }
 0x94f   : > { %v4994_v2 = vmul.f32 %v4962_v60, %v4870_v40  ;;  %v6225_v58 = vclamps-f32 %v9049_v51, 5.0  ;;  %v4965_v60 = vmul.f32 %v4918_v47, %v8946_v20  ;;  %v6549_v40 = vpop.eup %6548  ;;  %v9452_v51 = vld [vmem:[#allocation44_spill] sm:$0xff] }
 0x950   : > { %v5243_v35 = vmul.f32 %v6549_v40, %v9455_v56 }
 0x951   : > { %5094 = vmatmul.f32.gmra.mxu0 %v4994_v2  ;;  %v5197_v11 = vmul.f32 1.442695, %v6225_v58  ;;  %v5246_v2 = vmul.f32 %v6543_v63, %v9452_v51  ;;  %v6551_v4 = vpop.eup %6550  ;;  %v4966_v63 = vmul.f32 %v4919_v29, %v8938_v14 }
 0x952   : > { %v6553_v34 = vpop.eup %6552  ;;  %v5323_v54 = vmul.f32 %v5290_v44, %v5243_v35 }
 0x953   : > { %v5326_v10 = vmul.f32 %v5291_v62, %v5246_v2 }
 0x956   : > { %v4873_v5 = vpop.f32.mrf.mxu2  ;;  %v5050_v18 = vpop.f32.mrf.mxu0 }
 0x957   : > { %v4995_v23 = vmul.f32 %v4963_v30, %v4873_v5  ;;  %v6226_v31 = vclamps-f32 %v5050_v18, 5.0  ;;  %v5293_v5 = vperm.slane %v5278_v55, 0 }
 0x959   : > { %5097 = vmatmul.f32.gmra.mxu0 %v4995_v23  ;;  %v5199_v25 = vmul.f32 1.442695, %v6226_v31  ;;  %v5241_v23 = vmul.f32 %v6545_v43, %v9453_v46  ;;  %v5369_v43 = vadd.f32 %v5368_v33, %v5326_v10 }
 0x95b   : > { %6554 = vpow2.f32 %v5199_v25  ;;  %v5280_v25 = vrot.slane %v9011_v16, 6  ;;  %v5321_v37 = vmul.f32 %v5289_v15, %v5241_v23  ;;  %v5383_v55 = vadd.f32 %v5243_v35, %v5241_v23 }
 0x95c   : > { %6556 = vpow2.f32 %v5189_v50  ;;  %v5399_v50 = vadd.f32 %v5398_v26, %v5246_v2 }
 0x95d   : > { %6558 = vpow2.f32 %v5193_v27  ;;  %v9459_v27 = vld [vmem:[#allocation45_spill] sm:$0xff]  ;;  %v5353_v32 = vadd.f32 %v5323_v54, %v5321_v37 }
 0x95e   : > { %v4876_v36 = vpop.f32.mrf.mxu2  ;;  %v5053_v24 = vpop.f32.mrf.mxu0  ;;  %6560 = vpow2.f32 %v5197_v11  ;;  %v5400_v6 = vadd.f32 %v5399_v50, %v5248_v41  ;;  %v9460_v11 = vld [vmem:[#allocation47_spill] sm:$0xff]  ;;  %v9464_v54 = vld [vmem:[#allocation57_spill] sm:$0xff] }
 0x95f   : > { %v4996_v8 = vmul.f32 %v4964_v19, %v4876_v36  ;;  %v6227_v9 = vclamps-f32 %v5053_v24, 5.0  ;;  %v9456_v19 = vld [vmem:[#allocation48_spill] sm:$0xff]  ;;  %v5245_v36 = vmul.f32 %v6553_v34, %v9457_v61  ;;  %v5294_v24 = vperm.slane %v5279_v21, 0 }
 0x960   : > { %v5250_v7 = vmul.f32 %v6551_v4, %v9456_v19 }
 0x961   : > { %5100 = vmatmul.f32.gmra.mxu0 %v4996_v8  ;;  %v5201_v42 = vmul.f32 1.442695, %v6227_v9  ;;  %v6555_v47 = vpop.eup %6554  ;;  %v5325_v3 = vmul.f32 %v5291_v62, %v5245_v36  ;;  %v5384_v14 = vadd.f32 %v5383_v55, %v5245_v36  ;;  %v9462_v62 = vld [vmem:[#allocation55_spill] sm:$0xff] }
 0x962   : > { %v6557_v53 = vpop.eup %6556  ;;  %v5252_v58 = vmul.f32 %v6555_v47, %v9458_v17  ;;  %v5330_v59 = vmul.f32 %v5293_v5, %v5250_v7  ;;  %v5401_v15 = vadd.f32 %v5400_v6, %v5250_v7 }
 0x963   : > { %6562 = vpow2.f32 %v5201_v42  ;;  %v6559_v8 = vpop.eup %6558  ;;  %v5247_v9 = vmul.f32 %v6557_v53, %v9459_v27  ;;  %v5370_v42 = vadd.f32 %v5369_v43, %v5328_v12  ;;  %v5354_v13 = vadd.f32 %v5353_v32, %v5325_v3 }
 0x964   : > { %v6561_v39 = vpop.eup %6560  ;;  %v5332_v44 = vmul.f32 %v5294_v24, %v5252_v58  ;;  %v5402_v46 = vadd.f32 %v5401_v15, %v5252_v58  ;;  %v5281_v53 = vrot.slane %v9011_v16, 7  ;;  %v9466_v15 = vld [vmem:[#allocation61_spill] sm:$0xff] }
 0x965   : > { %v5327_v4 = vmul.f32 %v5292_v52, %v5247_v9  ;;  %v5385_v28 = vadd.f32 %v5384_v14, %v5247_v9  ;;  %v4967_v52 = vmul.f32 %v4919_v29, %v8946_v20 }
 0x966   : > { %v4879_v1 = vpop.f32.mrf.mxu2  ;;  %v5056_v30 = vpop.f32.mrf.mxu0  ;;  %v5296_v29 = vperm.slane %v5281_v53, 0 }
 0x967   : > { %v4997_v18 = vmul.f32 %v4965_v60, %v4879_v1  ;;  %v6228_v38 = vclamps-f32 %v5056_v30, 5.0  ;;  %v5249_v60 = vmul.f32 %v6559_v8, %v9460_v11  ;;  %v5295_v1 = vperm.slane %v5280_v25, 0  ;;  %v5426_v25 = vld [vmem:[#allocation2 + $0xc08] sm:$0xff] }
 0x968   : > { %v5355_v26 = vadd.f32 %v5354_v13, %v5327_v4  ;;  %5445 = vmatpush.msra.mxu3 %v5426_v25 }
 0x969   : > { %v5203_v31 = vmul.f32 1.442695, %v6228_v38  ;;  %5103 = vmatmul.f32.gmra.mxu0 %v4997_v18  ;;  %v6563_v2 = vpop.eup %6562  ;;  %v5371_v18 = vadd.f32 %v5370_v42, %v5330_v59  ;;  %v9461_v38 = vld [vmem:[#allocation50_spill] sm:$0xff]  ;;  %v5329_v41 = vmul.f32 %v5293_v5, %v5249_v60  ;;  %v5386_v10 = vadd.f32 %v5385_v28, %v5249_v60 }
 0x96a   : > { %v5251_v34 = vmul.f32 %v6561_v39, %v9461_v38  ;;  %v5253_v56 = vmul.f32 %v6563_v2, %v9463_v57  ;;  %v5282_v28 = vrot.slane %v9018_v22, 1 }
 0x96b   : > { %6564 = vpow2.f32 %v5203_v31  ;;  %v5372_v47 = vadd.f32 %v5371_v18, %v5332_v44  ;;  %v5356_v5 = vadd.f32 %v5355_v26, %v5329_v41 }
 0x96c   : > { %v5331_v19 = vmul.f32 %v5294_v24, %v5251_v34  ;;  %v5387_v50 = vadd.f32 %v5386_v10, %v5251_v34  ;;  %v5333_v12 = vmul.f32 %v5295_v1, %v5253_v56  ;;  %v9467_v34 = vld [vmem:[#allocation63_spill] sm:$0xff] }
 0x96e   : > { %v4882_v0 = vpop.f32.mrf.mxu2  ;;  %v5059_v48 = vpop.f32.mrf.mxu0  ;;  %v5357_v37 = vadd.f32 %v5356_v5, %v5331_v19  ;;  %v5388_v16 = vadd.f32 %v5387_v50, %v5253_v56 }
 0x96f   : > { %v4998_v40 = vmul.f32 %v4966_v63, %v4882_v0  ;;  %v6229_v51 = vclamps-f32 %v5059_v48, 5.0  ;;  %v9465_v0 = vld [vmem:[#allocation59_spill] sm:$0xff] }
 0x970   : > { %v5358_v24 = vadd.f32 %v5357_v37, %v5333_v12  ;;  %v5423_v37 = vld [vmem:[#allocation2 + $0xbf0] sm:$0xff] }
 0x971   : > { %v6565_v30 = vpop.eup %6564  ;;  %v5205_v21 = vmul.f32 1.442695, %v6229_v51  ;;  %5106 = vmatmul.f32.gmra.mxu0 %v4998_v40  ;;  %v5425_v40 = vld [vmem:[#allocation2 + $0xc00] sm:$0xff] }
 0x972   : > { %v5254_v23 = vmul.f32 %v6565_v30, %v9462_v62  ;;  %5446 = vmatpush.msra.mxu3 %v5425_v40 }
 0x973   : > { %6566 = vpow2.f32 %v5205_v21 }
 0x974   : > { %v5334_v35 = vmul.f32 %v5295_v1, %v5254_v23  ;;  %v5403_v31 = vadd.f32 %v5402_v46, %v5254_v23  ;;  %v5297_v1 = vperm.slane %v9018_v22, 0 }
 0x976   : > { %v5373_v7 = vadd.f32 %v5372_v47, %v5334_v35  ;;  %v4885_v61 = vpop.f32.mrf.mxu2  ;;  %v5062_v36 = vpop.f32.mrf.mxu0  ;;  %v5424_v47 = vld [vmem:[#allocation2 + $0xbf8] sm:$0xff] }
 0x977   : > { %v4999_v8 = vmul.f32 %v4967_v52, %v4885_v61  ;;  %v6230_v33 = vclamps-f32 %v5062_v36, 5.0  ;;  %5447 = vmatpush.msra.mxu3 %v5424_v47  ;;  %v5298_v52 = vperm.slane %v5282_v28, 0  ;;  %v9109_v47 = vld [vmem:[#allocation2 + $0xf0] sm:$0xff] }
 0x979   : > { %v6567_v17 = vpop.eup %6566  ;;  %v5207_v58 = vmul.f32 1.442695, %v6230_v33  ;;  %5109 = vmatmul.f32.gmra.mxu0 %v4999_v8  ;;  %v9469_v8 = vld [vmem:[#allocation65_spill] sm:$0xff]  ;;  %5448 = vmatpush.msra.mxu3 %v5423_v37  ;;  %v5284_v37 = vrot.slane %v9018_v22, 3 }
 0x97a   : > { %v5255_v20 = vmul.f32 %v6567_v17, %v9464_v54  ;;  %v5283_v17 = vrot.slane %v9018_v22, 2 }
 0x97b   : > { %6568 = vpow2.f32 %v5207_v58 }
 0x97c   : > { %v5335_v27 = vmul.f32 %v5296_v29, %v5255_v20  ;;  %v5389_v9 = vadd.f32 %v5388_v16, %v5255_v20 }
 0x97e   : > { %v5359_v63 = vadd.f32 %v5358_v24, %v5335_v27  ;;  %v5065_v55 = vpop.f32.mrf.mxu0  ;;  %v5299_v27 = vperm.slane %v5283_v17, 0  ;;  %v9123_v17 = vld [vmem:[#allocation2 + $0xd0] sm:$0xff] }
 0x97f   : > { %v6231_v43 = vclamps-f32 %v5065_v55, 5.0 }
 0x981   : > { %v6569_v6 = vpop.eup %6568  ;;  %v5209_v59 = vmul.f32 1.442695, %v6231_v43 }
 0x982   : > { %v5256_v48 = vmul.f32 %v6569_v6, %v9465_v0 }
 0x983   : > { %6570 = vpow2.f32 %v5209_v59  ;;  %v9471_v59 = vld [vmem:[#allocation67_spill] sm:$0xff] }
 0x984   : > { %v5336_v39 = vmul.f32 %v5296_v29, %v5256_v48  ;;  %v5404_v3 = vadd.f32 %v5403_v31, %v5256_v48  ;;  %v9468_v31 = vld [vmem:[#allocation64_spill] sm:$0xff]  ;;  %v9470_v29 = vld [vmem:[#allocation66_spill] sm:$0xff] }
 0x986   : > { %v5374_v11 = vadd.f32 %v5373_v7, %v5336_v39  ;;  %v5068_v60 = vpop.f32.mrf.mxu0 }
 0x987   : > { %v6232_v51 = vclamps-f32 %v5068_v60, 5.0 }
 0x989   : > { %v6571_v2 = vpop.eup %6570  ;;  %v5211_v42 = vmul.f32 1.442695, %v6232_v51  ;;  %v5421_v51 = vld [vmem:[#allocation2 + $0xbe0] sm:$0xff] }
 0x98a   : > { %v5257_v44 = vmul.f32 %v6571_v2, %v9466_v15  ;;  %v5420_v15 = vld [vmem:[#allocation2 + $0xbd8] sm:$0xff] }
 0x98b   : > { %6572 = vpow2.f32 %v5211_v42 }
 0x98c   : > { %v5337_v30 = vmul.f32 %v5297_v1, %v5257_v44  ;;  %v5390_v32 = vadd.f32 %v5389_v9, %v5257_v44 }
 0x98e   : > { %v5360_v14 = vadd.f32 %v5359_v63, %v5337_v30  ;;  %v5071_v4 = vpop.f32.mrf.mxu0 }
 0x98f   : > { %v6233_v21 = vclamps-f32 %v5071_v4, 5.0 }
 0x991   : > { %v6573_v18 = vpop.eup %6572  ;;  %v5213_v38 = vmul.f32 1.442695, %v6233_v21 }
 0x992   : > { %v5258_v46 = vmul.f32 %v6573_v18, %v9467_v34  ;;  %v5419_v34 = vld [vmem:[#allocation2 + $0xbd0] sm:$0xff] }
 0x993   : > { %6574 = vpow2.f32 %v5213_v38 }
 0x994   : > { %v5338_v62 = vmul.f32 %v5297_v1, %v5258_v46  ;;  %v5405_v23 = vadd.f32 %v5404_v3, %v5258_v46  ;;  %v5422_v3 = vld [vmem:[#allocation2 + $0xbe8] sm:$0xff] }
 0x995   : > { %5449 = vmatpush.msra.mxu3 %v5422_v3  ;;  %v5286_v3 = vrot.slane %v9018_v22, 5 }
 0x996   : > { %v5375_v13 = vadd.f32 %v5374_v11, %v5338_v62  ;;  %v5074_v41 = vpop.f32.mrf.mxu0 }
 0x997   : > { %v6234_v57 = vclamps-f32 %v5074_v41, 5.0  ;;  %5450 = vmatpush.msra.mxu3 %v5421_v51  ;;  %v9476_v51 = vld [vmem:[#allocation69_spill] sm:$0xff] }
 0x999   : > { %v6575_v56 = vpop.eup %6574  ;;  %v5215_v35 = vmul.f32 1.442695, %v6234_v57  ;;  %5451 = vmatpush.msra.mxu3 %v5420_v15  ;;  %v9139_v15 = vld [vmem:[#allocation2 + $0xb8] sm:$0xff] }
 0x99a   : > { %v5259_v53 = vmul.f32 %v6575_v56, %v9468_v31  ;;  %v9112_v56 = vld [vmem:[#allocation2 + $0xe8] sm:$0xff] }
 0x99b   : > { %6576 = vpow2.f32 %v5215_v35  ;;  %5452 = vmatpush.msra.mxu3 %v5419_v34 }
 0x99c   : > { %v5339_v26 = vmul.f32 %v5298_v52, %v5259_v53  ;;  %v5391_v10 = vadd.f32 %v5390_v32, %v5259_v53 }
 0x99e   : > { %v5361_v19 = vadd.f32 %v5360_v14, %v5339_v26  ;;  %v5077_v7 = vpop.f32.mrf.mxu0 }
 0x99f   : > { %v6235_v61 = vclamps-f32 %v5077_v7, 5.0 }
 0x9a1   : > { %v6577_v36 = vpop.eup %6576  ;;  %v5217_v25 = vmul.f32 1.442695, %v6235_v61  ;;  %v9472_v61 = vld [vmem:[#allocation68_spill] sm:$0xff] }
 0x9a2   : > { %v5260_v33 = vmul.f32 %v6577_v36, %v9469_v8 }
 0x9a3   : > { %6578 = vpow2.f32 %v5217_v25  ;;  %v9119_v25 = vld [vmem:[#allocation2 + $0xd8] sm:$0xff] }
 0x9a4   : > { %v5340_v5 = vmul.f32 %v5298_v52, %v5260_v33  ;;  %v5406_v50 = vadd.f32 %v5405_v23, %v5260_v33  ;;  %v9106_v23 = vld [vmem:[#allocation2 + $0xf8] sm:$0xff] }
 0x9a5   : > { %5489 = vmatpush.msrb.mxu3 %v9106_v23 }
 0x9a6   : > { %v5376_v12 = vadd.f32 %v5375_v13, %v5340_v5  ;;  %v5080_v58 = vpop.f32.mrf.mxu0 }
 0x9a7   : > { %v6236_v16 = vclamps-f32 %v5080_v58, 5.0  ;;  %5490 = vmatpush.msrb.mxu3 %v9109_v47 }
 0x9a9   : > { %v6579_v54 = vpop.eup %6578  ;;  %v5219_v20 = vmul.f32 1.442695, %v6236_v16  ;;  %5491 = vmatpush.msrb.mxu3 %v9112_v56 }
 0x9aa   : > { %v5261_v24 = vmul.f32 %v6579_v54, %v9470_v29  ;;  %v9474_v54 = vld [vmem:[#allocation72_spill] sm:$0xff] }
 0x9ab   : > { %6580 = vpow2.f32 %v5219_v20  ;;  %v9129_v29 = vld [vmem:[#allocation2 + $0xc8] sm:$0xff] }
 0x9ac   : > { %v5341_v9 = vmul.f32 %v5299_v27, %v5261_v24  ;;  %v9097_v63 = vadd.f32 %v5391_v10, %v5261_v24  ;;  %v9115_v10 = vld [vmem:[#allocation2 + $0xe0] sm:$0xff] }
 0x9ad   : > { %5492 = vmatpush.msrb.mxu3 %v9115_v10 }
 0x9ae   : > { %v9099_v55 = vadd.f32 %v5361_v19, %v5341_v9  ;;  %v5083_v43 = vpop.f32.mrf.mxu0 }
 0x9af   : > { %v6237_v30 = vclamps-f32 %v5083_v43, 5.0  ;;  %5493 = vmatpush.msrb.mxu3 %v9119_v25  ;;  %v9475_v43 = vld [vmem:[#allocation74_spill] sm:$0xff] }
 0x9b1   : > { %v6581_v6 = vpop.eup %6580  ;;  %v5221_v14 = vmul.f32 1.442695, %v6237_v30  ;;  %5494 = vmatpush.msrb.mxu3 %v9123_v17 }
 0x9b2   : > { %v5262_v0 = vmul.f32 %v6581_v6, %v9471_v59 }
 0x9b3   : > { %6582 = vpow2.f32 %v5221_v14  ;;  %5495 = vmatpush.msrb.mxu3 %v9129_v29 }
 0x9b4   : > { %v5342_v48 = vmul.f32 %v5299_v27, %v5262_v0  ;;  %v9102_v39 = vadd.f32 %v5406_v50, %v5262_v0  ;;  %v9473_v50 = vld [vmem:[#allocation70_spill] sm:$0xff]  ;;  %v5285_v27 = vrot.slane %v9018_v22, 4  ;;  %v9134_v0 = vld [vmem:[#allocation2 + $0xc0] sm:$0xff] }
 0x9b5   : > { %5496 = vmatpush.msrb.mxu3 %v9134_v0 }
 0x9b6   : > { %v9104_v11 = vadd.f32 %v5376_v12, %v5342_v48  ;;  %v5086_v60 = vpop.f32.mrf.mxu0  ;;  %v5301_v30 = vperm.slane %v5285_v27, 0 }
 0x9b7   : > { %v6238_v46 = vclamps-f32 %v5086_v60, 5.0  ;;  %5497 = vmatpush.msrb.mxu3 %v9139_v15 }
 0x9b9   : > { %v5223_v57 = vmul.f32 1.442695, %v6238_v46  ;;  %v6583_v35 = vpop.eup %6582  ;;  %v9145_v46 = vld [vmem:[#allocation2 + $0xb0] sm:$0xff] }
 0x9ba   : > { %v5263_v36 = vmul.f32 %v6583_v35, %v9472_v61  ;;  %5498 = vmatpush.msrb.mxu3 %v9145_v46  ;;  %v9479_v35 = vld [vmem:[#allocation73_spill] sm:$0xff] }
 0x9bc   : > { %v5393_v16 = vadd.f32 %v9097_v63, %v5263_v36  ;;  %v5300_v63 = vperm.slane %v5284_v37, 0 }
 0x9be   : > { %v5089_v40 = vpop.f32.mrf.mxu0 }
 0x9bf   : > { %v6239_v32 = vclamps-f32 %v5089_v40, 5.0 }
 0x9c1   : > { %v5225_v21 = vmul.f32 1.442695, %v6239_v32  ;;  %v5287_v32 = vrot.slane %v9018_v22, 6 }
 0x9c3   : > { %6584 = vpow2.f32 %v5225_v21 }
 0x9c6   : > { %v5092_v2 = vpop.f32.mrf.mxu0 }
 0x9c7   : > { %v6240_v13 = vclamps-f32 %v5092_v2, 5.0 }
 0x9c9   : > { %v5227_v31 = vmul.f32 1.442695, %v6240_v13  ;;  %v6585_v19 = vpop.eup %6584 }
 0x9ca   : > { %v5265_v12 = vmul.f32 %v6585_v19, %v9473_v50 }
 0x9cc   : > { %v5394_v9 = vadd.f32 %v5393_v16, %v5265_v12  ;;  %v5345_v13 = vmul.f32 %v5301_v30, %v5265_v12 }
 0x9ce   : > { %v5095_v42 = vpop.f32.mrf.mxu0 }
 0x9cf   : > { %v6241_v4 = vclamps-f32 %v5095_v42, 5.0 }
 0x9d1   : > { %v5229_v62 = vmul.f32 1.442695, %v6241_v4  ;;  %v9477_v4 = vld [vmem:[#allocation71_spill] sm:$0xff] }
 0x9d3   : > { %6586 = vpow2.f32 %v5229_v62 }
 0x9d6   : > { %v5098_v44 = vpop.f32.mrf.mxu0 }
 0x9d7   : > { %v6242_v41 = vclamps-f32 %v5098_v44, 5.0 }
 0x9d9   : > { %v5231_v52 = vmul.f32 1.442695, %v6242_v41  ;;  %v6587_v8 = vpop.eup %6586  ;;  %v5288_v41 = vrot.slane %v9018_v22, 7 }
 0x9da   : > { %v5267_v20 = vmul.f32 %v6587_v8, %v9474_v54 }
 0x9db   : > { %v5304_v50 = vperm.slane %v5288_v41, 0 }
 0x9dc   : > { %v5395_v42 = vadd.f32 %v5394_v9, %v5267_v20  ;;  %v9163_v9 = vld [vmem:[#allocation2 + $0x90] sm:$0xff] }
 0x9de   : > { %v5101_v1 = vpop.f32.mrf.mxu0 }
 0x9df   : > { %v6243_v18 = vclamps-f32 %v5101_v1, 5.0  ;;  %v5343_v1 = vmul.f32 %v5300_v63, %v5263_v36  ;;  %v9480_v36 = vld [vmem:[#allocation75_spill] sm:$0xff] }
 0x9e1   : > { %v5233_v28 = vmul.f32 1.442695, %v6243_v18 }
 0x9e3   : > { %6588 = vpow2.f32 %v5233_v28  ;;  %v5302_v28 = vperm.slane %v5286_v3, 0 }
 0x9e4   : > { %6590 = vpow2.f32 %v5223_v57 }
 0x9e5   : > { %6592 = vpow2.f32 %v5227_v31  ;;  %v5347_v19 = vmul.f32 %v5302_v28, %v5267_v20 }
 0x9e6   : > { %v5104_v38 = vpop.f32.mrf.mxu0  ;;  %6594 = vpow2.f32 %v5231_v52  ;;  %v9151_v52 = vld [vmem:[#allocation2 + $0xa8] sm:$0xff] }
 0x9e7   : > { %v6244_v53 = vclamps-f32 %v5104_v38, 5.0  ;;  %v9478_v38 = vld [vmem:[#allocation76_spill] sm:$0xff]  ;;  %5499 = vmatpush.msrb.mxu3 %v9151_v52 }
 0x9e9   : > { %v5235_v33 = vmul.f32 1.442695, %v6244_v53  ;;  %v6589_v58 = vpop.eup %6588 }
 0x9ea   : > { %v6591_v24 = vpop.eup %6590  ;;  %v5269_v6 = vmul.f32 %v6589_v58, %v9475_v43  ;;  %v9159_v58 = vld [vmem:[#allocation2 + $0x98] sm:$0xff] }
 0x9eb   : > { %v6593_v48 = vpop.eup %6592  ;;  %v5264_v2 = vmul.f32 %v6591_v24, %v9476_v51  ;;  %v9481_v24 = vld [vmem:[#allocation77_spill] sm:$0xff] }
 0x9ec   : > { %v6595_v40 = vpop.eup %6594  ;;  %v5266_v21 = vmul.f32 %v6593_v48, %v9477_v4  ;;  %v5396_v18 = vadd.f32 %v5395_v42, %v5269_v6  ;;  %v9166_v48 = vld [vmem:[#allocation2 + $0x88] sm:$0xff] }
 0x9ed   : > { %v5408_v57 = vadd.f32 %v9102_v39, %v5264_v2  ;;  %v5268_v31 = vmul.f32 %v6595_v40, %v9479_v35  ;;  %v5344_v37 = vmul.f32 %v5300_v63, %v5264_v2  ;;  %v9170_v2 = vld [vmem:[#allocation2 + $0x80] sm:$0xff] }
 0x9ee   : > { %v5107_v26 = vpop.f32.mrf.mxu0  ;;  %v5346_v43 = vmul.f32 %v5301_v30, %v5266_v21  ;;  %v5642_v35 = vld [vmem:[#allocation2 + $0xea0] sm:$0xff] }
 0x9ef   : > { %v6245_v7 = vclamps-f32 %v5107_v26, 5.0  ;;  %v5363_v26 = vadd.f32 %v9099_v55, %v5343_v1  ;;  %v5409_v61 = vadd.f32 %v5408_v57, %v5266_v21  ;;  %v5378_v3 = vadd.f32 %v9104_v11, %v5344_v37  ;;  %v6326_v11 = vld [vmem:[#allocation2 + $0xc50] ss:$0 sm:$0xff]  ;;  %v5643_v57 = vld [vmem:[#allocation2 + $0xea8] sm:$0xff] }
 0x9f0   : > { %5683 = vmatpush.msrb.mxu2 %v5643_v57  ;;  %v5598_v37 = vld [vmem:[#allocation2 + $0xe08] sm:$0xff]  ;;  %v5587_v57 = vld [vmem:[#allocation2 + $0xdb0] sm:$0xff] }
 0x9f1   : > { %v5237_v5 = vmul.f32 1.442695, %v6245_v7  ;;  %v5303_v7 = vperm.slane %v5287_v32, 0  ;;  %v5364_v22 = vadd.f32 %v5363_v26, %v5345_v13  ;;  %v5410_v12 = vadd.f32 %v5409_v61, %v5268_v31  ;;  %v5600_v26 = vld [vmem:[#allocation2 + $0xe18] sm:$0xff]  ;;  %v5640_v61 = vld [vmem:[#allocation2 + $0xe90] sm:$0xff] }
 0x9f2   : > { %v5379_v1 = vadd.f32 %v5378_v3, %v5346_v43  ;;  %5684 = vmatpush.msrb.mxu2 %v5642_v35  ;;  %v5595_v43 = vld [vmem:[#allocation2 + $0xdf0] sm:$0xff]  ;;  %v5550_v3 = vld [vmem:[#allocation2 + $0xd60] sm:$0xff] }
 0x9f3   : > { %6596 = vpow2.f32 %v5237_v5  ;;  %v9156_v5 = vld [vmem:[#allocation2 + $0xa0] sm:$0xff]  ;;  %v5349_v39 = vmul.f32 %v5303_v7, %v5269_v6  ;;  %v5365_v16 = vadd.f32 %v5364_v22, %v5347_v19  ;;  %v5556_v19 = vld [vmem:[#allocation2 + $0xd90] sm:$0xff] }
 0x9f4   : > { %6598 = vpow2.f32 %v5235_v33  ;;  %5500 = vmatpush.msrb.mxu3 %v9156_v5 }
 0x9f5   : > { %v5366_v6 = vadd.f32 %v5365_v16, %v5349_v39  ;;  %v5554_v16 = vld [vmem:[#allocation2 + $0xd80] sm:$0xff] }
 0x9f6   : > { %v5110_v59 = vpop.f32.mrf.mxu0  ;;  %5501 = vmatpush.msrb.mxu3 %v9159_v58 }
 0x9f7   : > { %v6246_v60 = vclamps-f32 %v5110_v59, 5.0 }
 0x9f8   : > { %5502 = vmatpush.msrb.mxu3 %v9163_v9 }
 0x9f9   : > { %v6597_v44 = vpop.eup %6596  ;;  %v5239_v14 = vmul.f32 1.442695, %v6246_v60  ;;  %v5348_v60 = vmul.f32 %v5302_v28, %v5268_v31  ;;  %v5641_v31 = vld [vmem:[#allocation2 + $0xe98] sm:$0xff] }
 0x9fa   : > { %v5271_v34 = vmul.f32 %v6597_v44, %v9478_v38  ;;  %v6599_v62 = vpop.eup %6598  ;;  %5503 = vmatpush.msrb.mxu3 %v9166_v48  ;;  %5685 = vmatpush.msrb.mxu2 %v5641_v31 }
 0x9fb   : > { %6600 = vpow2.f32 %v5239_v14  ;;  %v5270_v8 = vmul.f32 %v6599_v62, %v9480_v36  ;;  %v5380_v32 = vadd.f32 %v5379_v1, %v5348_v60  ;;  %v5638_v36 = vld [vmem:[#allocation2 + $0xe80] sm:$0xff]  ;;  %v5591_v1 = vld [vmem:[#allocation2 + $0xdd0] sm:$0xff] }
 0x9fc   : > { %v5397_v53 = vadd.f32 %v5396_v18, %v5271_v34  ;;  %v5351_v54 = vmul.f32 %v5304_v50, %v5271_v34  ;;  %5504 = vmatpush.msrb.mxu3 %v9170_v2  ;;  %5686 = vmatpush.msrb.mxu2 %v5640_v61  ;;  %v5593_v60 = vld [vmem:[#allocation2 + $0xde0] sm:$0xff] }
 0x9fd   : > { %v5411_v20 = vadd.f32 %v5410_v12, %v5270_v8  ;;  %v5350_v44 = vmul.f32 %v5303_v7, %v5270_v8  ;;  %v5599_v7 = vld [vmem:[#allocation2 + $0xe10] sm:$0xff]  ;;  %v5630_v61 = vld [vmem:[#allocation2 + $0xe40] sm:$0xff] }
 0x9fe   : > { %v5413_v33 = vadd.f32 1e-06, %v5397_v53  ;;  %v5367_v63 = vadd.f32 %v5366_v6, %v5351_v54  ;;  %v5557_v53 = vld [vmem:[#allocation2 + $0xd98] sm:$0xff]  ;;  %v5597_v54 = vld [vmem:[#allocation2 + $0xe00] sm:$0xff]  ;;  %v5551_v6 = vld [vmem:[#allocation2 + $0xd68] sm:$0xff] }
 0x9ff   : > { %v5381_v14 = vadd.f32 %v5380_v32, %v5350_v44  ;;  %5560 = vmatpush.msrb.mxu1 %v5557_v53  ;;  %v5548_v44 = vld [vmem:[#allocation2 + $0xd50] sm:$0xff]  ;;  %v5547_v32 = vld [vmem:[#allocation2 + $0xd48] sm:$0xff] }
 0xa00   : > { %6602 = vrcp.f32 %v5413_v33  ;;  %v5631_v53 = vld [vmem:[#allocation2 + $0xe48] sm:$0xff] }
 0xa01   : > { %v6601_v55 = vpop.eup %6600  ;;  %5561 = vmatpush.msrb.mxu1 %v5556_v19  ;;  %v5543_v19 = vld [vmem:[#allocation2 + $0xd28] sm:$0xff] }
 0xa02   : > { %v5272_v27 = vmul.f32 %v6601_v55, %v9481_v24  ;;  %v5555_v55 = vld [vmem:[#allocation2 + $0xd88] sm:$0xff]  ;;  %v5596_v24 = vld [vmem:[#allocation2 + $0xdf8] sm:$0xff] }
 0xa03   : > { %5562 = vmatpush.msrb.mxu1 %v5555_v55  ;;  %v5628_v55 = vld [vmem:[#allocation2 + $0xe30] sm:$0xff] }
 0xa04   : > { %v5412_v59 = vadd.f32 %v5411_v20, %v5272_v27  ;;  %v5352_v30 = vmul.f32 %v5304_v50, %v5272_v27  ;;  %v5553_v20 = vld [vmem:[#allocation2 + $0xd78] sm:$0xff]  ;;  %v5552_v27 = vld [vmem:[#allocation2 + $0xd70] sm:$0xff] }
 0xa05   : > { %5563 = vmatpush.msrb.mxu1 %v5554_v16 }
 0xa06   : > { %v6603_v40 = vpop.eup %6602  ;;  %v5414_v51 = vadd.f32 1e-06, %v5412_v59  ;;  %v5382_v4 = vadd.f32 %v5381_v14, %v5352_v30  ;;  %v5594_v59 = vld [vmem:[#allocation2 + $0xde8] sm:$0xff] }
 0xa07   : > { %v5417_v42 = vmul.f32 %v6603_v40, %v5367_v63  ;;  %5564 = vmatpush.msrb.mxu1 %v5553_v20  ;;  %v5549_v63 = vld [vmem:[#allocation2 + $0xd58] sm:$0xff]  ;;  %v5590_v14 = vld [vmem:[#allocation2 + $0xdc8] sm:$0xff] }
 0xa08   : > { %6604 = vrcp.f32 %v5414_v51  ;;  %v5592_v40 = vld [vmem:[#allocation2 + $0xdd8] sm:$0xff]  ;;  %v5636_v51 = vld [vmem:[#allocation2 + $0xe70] sm:$0xff] }
 0xa09   : > { %5453 = vmatmul.f32.vlgmr.msra.gmra.mxu3 %v5417_v42  ;;  %5565 = vmatpush.msrb.mxu1 %v5552_v27  ;;  %v6327_v27 = vld [vmem:[#allocation2 + $0xce0] ss:$0 sm:$0xff] }
 0xa0a   : > { %5603 = vmatpush.msra.mxu3 %v5600_v26 }
 0xa0b   : > { %5566 = vmatpush.msrb.mxu1 %v5551_v6 }
 0xa0c   : > { %5604 = vmatpush.msra.mxu3 %v5599_v7  ;;  %v5586_v7 = vld [vmem:[#allocation2 + $0xda8] sm:$0xff] }
 0xa0d   : > { %5567 = vmatpush.msrb.mxu1 %v5550_v3 }
 0xa0e   : > { %v6605_v21 = vpop.eup %6604  ;;  %5605 = vmatpush.msra.mxu3 %v5598_v37 }
 0xa0f   : > { %v5418_v18 = vmul.f32 %v6605_v21, %v5382_v4  ;;  %5568 = vmatpush.msrb.mxu1 %v5549_v63  ;;  %v5635_v4 = vld [vmem:[#allocation2 + $0xe68] sm:$0xff]  ;;  %v5634_v21 = vld [vmem:[#allocation2 + $0xe60] sm:$0xff] }
 0xa10   : > { %5606 = vmatpush.msra.mxu3 %v5597_v54  ;;  %v5657_v54 = vld [vmem:[#allocation2 + $0xf18] sm:$0xff]  ;;  %v5655_v63 = vld [vmem:[#allocation2 + $0xf08] sm:$0xff] }
 0xa11   : > { %5456 = vmatmul.f32.gmra.mxu3 %v5418_v18  ;;  %5569 = vmatpush.msrb.mxu1 %v5548_v44  ;;  %v5546_v18 = vld [vmem:[#allocation2 + $0xd40] sm:$0xff] }
 0xa12   : > { %5607 = vmatpush.msra.mxu3 %v5596_v24 }
 0xa13   : > { %5570 = vmatpush.msrb.mxu1 %v5547_v32  ;;  %v5650_v32 = vld [vmem:[#allocation2 + $0xee0] sm:$0xff] }
 0xa14   : > { %5608 = vmatpush.msra.mxu3 %v5595_v43  ;;  %v5656_v43 = vld [vmem:[#allocation2 + $0xf10] sm:$0xff] }
 0xa15   : > { %5571 = vmatpush.msrb.mxu1 %v5546_v18 }
 0xa16   : > { %5609 = vmatpush.msra.mxu3 %v5594_v59 }
 0xa18   : > { %5610 = vmatpush.msra.mxu3 %v5593_v60  ;;  %v6328_v60 = vld [vmem:[#allocation2 + $0xce8] ss:$0 sm:$0xff] }
 0xa1a   : > { %5611 = vmatpush.msra.mxu3 %v5592_v40 }
 0xa1c   : > { %5612 = vmatpush.msra.mxu3 %v5591_v1 }
 0xa1e   : > { %5613 = vmatpush.msra.mxu3 %v5590_v14 }
 0xa8c   : > { %v5454_v38 = vpop.f32.mrf.mxu3 }
 0xa8d   : > { %v5455_v34 = vadd.f32 %v6326_v11, %v5454_v38  ;;  %v5633_v38 = vld [vmem:[#allocation2 + $0xe58] sm:$0xff] }
 0xa8f   : > { %v5460_v62 = vadd.f32 %v5455_v34, %v8759_v49  ;;  %v5639_v49 = vld [vmem:[#allocation2 + $0xe88] sm:$0xff]  ;;  %v5545_v34 = vld [vmem:[#allocation2 + $0xd38] sm:$0xff] }
 0xa90   : > { %5687 = vmatpush.msrb.mxu2 %v5639_v49  ;;  %5572 = vmatpush.msrb.mxu1 %v5545_v34 }
 0xa91   : > { %5478 = vmatmul.f32.vlgmr.msra.gmra.mxu1 %v5460_v62 }
 0xa92   : > { %5688 = vmatpush.msrb.mxu2 %v5638_v36  ;;  %v5542_v36 = vld [vmem:[#allocation2 + $0xd20] sm:$0xff] }
 0xa94   : > { %v5457_v13 = vpop.f32.mrf.mxu3 }
 0xa95   : > { %v5458_v28 = vadd.f32 %v6326_v11, %v5457_v13  ;;  %v5589_v11 = vld [vmem:[#allocation2 + $0xdc0] sm:$0xff]  ;;  %v5632_v13 = vld [vmem:[#allocation2 + $0xe50] sm:$0xff] }
 0xa96   : > { %5614 = vmatpush.msra.mxu3 %v5589_v11 }
 0xa97   : > { %v5461_v41 = vadd.f32 %v5458_v28, %v8772_v45  ;;  %v5637_v45 = vld [vmem:[#allocation2 + $0xe78] sm:$0xff] }
 0xa98   : > { %5689 = vmatpush.msrb.mxu2 %v5637_v45  ;;  %v5585_v45 = vld [vmem:[#allocation2 + $0xda0] sm:$0xff] }
 0xa99   : > { %5481 = vmatmul.f32.gmra.mxu1 %v5461_v41 }
 0xa9a   : > { %5690 = vmatpush.msrb.mxu2 %v5636_v51  ;;  %v5654_v51 = vld [vmem:[#allocation2 + $0xf00] sm:$0xff] }
 0xa9c   : > { %5691 = vmatpush.msrb.mxu2 %v5635_v4  ;;  %v6330_v4 = vld [vmem:[#allocation2 + $0xe28] ss:$0 sm:$0xff] }
 0xa9e   : > { %5692 = vmatpush.msrb.mxu2 %v5634_v21 }
 0xaa0   : > { %5693 = vmatpush.msrb.mxu2 %v5633_v38 }
 0xaa2   : > { %5694 = vmatpush.msrb.mxu2 %v5632_v13 }
 0xaa4   : > { %5695 = vmatpush.msrb.mxu2 %v5631_v53 }
 0xaa6   : > { %5696 = vmatpush.msrb.mxu2 %v5630_v61 }
 0xb0e   : > { %v5479_v8 = vpop.f32.mrf.mxu1 }
 0xb0f   : > { %v9175_v33 = vsub.f32 %v5460_v62, %v5479_v8  ;;  %v5588_v62 = vld [vmem:[#allocation2 + $0xdb8] sm:$0xff] }
 0xb10   : > { %5615 = vmatpush.msra.mxu3 %v5588_v62  ;;  %v5629_v8 = vld [vmem:[#allocation2 + $0xe38] sm:$0xff] }
 0xb11   : > { %v5487_v22 = vmul.f32 %v9175_v33, %v9175_v33  ;;  %5697 = vmatpush.msrb.mxu2 %v5629_v8 }
 0xb12   : > { %5616 = vmatpush.msra.mxu3 %v5587_v57 }
 0xb13   : > { %5505 = vmatmul.f32.vlgmr.msrb.gmra.mxu3 %v5487_v22  ;;  %v5659_v22 = vld [vmem:[#allocation2 + $0xf28] sm:$0xff]  ;;  %5698 = vmatpush.msrb.mxu2 %v5628_v55 }
 0xb14   : > { %5617 = vmatpush.msra.mxu3 %v5586_v7 }
 0xb16   : > { %v5482_v39 = vpop.f32.mrf.mxu1  ;;  %5618 = vmatpush.msra.mxu3 %v5585_v45 }
 0xb17   : > { %v9179_v50 = vsub.f32 %v5461_v41, %v5482_v39  ;;  %v5544_v41 = vld [vmem:[#allocation2 + $0xd30] sm:$0xff] }
 0xb18   : > { %5573 = vmatpush.msrb.mxu1 %v5544_v41  ;;  %5739 = vmatpush.msrb.mxu3 %v9106_v23 }
 0xb19   : > { %v5488_v12 = vmul.f32 %v9179_v50, %v9179_v50 }
 0xb1a   : > { %5574 = vmatpush.msrb.mxu1 %v5543_v19  ;;  %5740 = vmatpush.msrb.mxu3 %v9109_v47  ;;  %v5653_v47 = vld [vmem:[#allocation2 + $0xef8] sm:$0xff] }
 0xb1b   : > { %5508 = vmatmul.f32.gmra.mxu3 %v5488_v12  ;;  %v5658_v12 = vld [vmem:[#allocation2 + $0xf20] sm:$0xff] }
 0xb1c   : > { %5575 = vmatpush.msrb.mxu1 %v5542_v36  ;;  %5741 = vmatpush.msrb.mxu3 %v9112_v56  ;;  %v5652_v56 = vld [vmem:[#allocation2 + $0xef0] sm:$0xff] }
 0xb1e   : > { %5660 = vmatpush.msra.mxu1 %v5659_v22  ;;  %5742 = vmatpush.msrb.mxu3 %v9115_v10 }
 0xb20   : > { %5661 = vmatpush.msra.mxu1 %v5658_v12  ;;  %5743 = vmatpush.msrb.mxu3 %v9119_v25 }
 0xb22   : > { %5662 = vmatpush.msra.mxu1 %v5657_v54  ;;  %5744 = vmatpush.msrb.mxu3 %v9123_v17  ;;  %v5649_v17 = vld [vmem:[#allocation2 + $0xed8] sm:$0xff]  ;;  %v5821_v54 = vld [vmem:[#allocation2 + $0x11c0] sm:$0xff] }
 0xb24   : > { %5663 = vmatpush.msra.mxu1 %v5656_v43  ;;  %5745 = vmatpush.msrb.mxu3 %v9129_v29  ;;  %v5648_v29 = vld [vmem:[#allocation2 + $0xed0] sm:$0xff]  ;;  %v5820_v43 = vld [vmem:[#allocation2 + $0x11b8] sm:$0xff] }
 0xb26   : > { %5664 = vmatpush.msra.mxu1 %v5655_v63  ;;  %5746 = vmatpush.msrb.mxu3 %v9134_v0  ;;  %v5647_v0 = vld [vmem:[#allocation2 + $0xec8] sm:$0xff] }
 0xb28   : > { %5665 = vmatpush.msra.mxu1 %v5654_v51  ;;  %5747 = vmatpush.msrb.mxu3 %v9139_v15  ;;  %v5646_v15 = vld [vmem:[#allocation2 + $0xec0] sm:$0xff] }
 0xb2a   : > { %5666 = vmatpush.msra.mxu1 %v5653_v47  ;;  %5748 = vmatpush.msrb.mxu3 %v9145_v46  ;;  %v5645_v46 = vld [vmem:[#allocation2 + $0xeb8] sm:$0xff] }
 0xb2c   : > { %5667 = vmatpush.msra.mxu1 %v5652_v56  ;;  %5749 = vmatpush.msrb.mxu3 %v9151_v52  ;;  %v5644_v52 = vld [vmem:[#allocation2 + $0xeb0] sm:$0xff] }
 0xb2d   : > { %v5860_v56 = vld [vmem:[#allocation2 + $0x1250] sm:$0xff] }
 0xb2e   : > { %5750 = vmatpush.msrb.mxu3 %v9156_v5  ;;  %v6329_v5 = vld [vmem:[#allocation2 + $0xe20] ss:$0 sm:$0xff]  ;;  %5862 = vmatpush.msra.mxu2 %v5860_v56 }
 0xb2f   : > { %v5887_v56 = vld [vmem:[#allocation2 + $0x1280] sm:$0xff] }
 0xb30   : > { %5751 = vmatpush.msrb.mxu3 %v9159_v58 }
 0xb32   : > { %5752 = vmatpush.msrb.mxu3 %v9163_v9 }
 0xb34   : > { %5753 = vmatpush.msrb.mxu3 %v9166_v48 }
 0xb36   : > { %5754 = vmatpush.msrb.mxu3 %v9170_v2 }
 0xb96   : > { %v5506_v42 = vpop.f32.mrf.mxu3 }
 0xb97   : > { %v9183_v30 = vadd.f32 1e-05, %v5506_v42 }
 0xb99   : > { %6606 = vrsqrt.f32 %v9183_v30  ;;  %vm5518_vm6 = vweird.f32 %v9183_v30 }
 0xb9e   : > { %v5509_v28 = vpop.f32.mrf.mxu3 }
 0xb9f   : > { %v6607_v35 = vpop.eup %6606  ;;  %v9186_v31 = vadd.f32 1e-05, %v5509_v28  ;;  %v6331_v28 = vld [vmem:[#allocation2 + $0xf30] ss:$0 sm:$0xff] }
 0xba0   : > { %v5513_v26 = vmul.f32 %v6607_v35, %v9183_v30  ;;  %vm5519_vm5 = vweird.f32 %v6607_v35  ;;  %v5651_v30 = vld [vmem:[#allocation2 + $0xee8] sm:$0xff] }
 0xba1   : > { %6608 = vrsqrt.f32 %v9186_v31  ;;  %vm5520_vm7 = vmor %vm5518_vm6, %vm5519_vm5  ;;  %vm5528_vm0 = vweird.f32 %v9186_v31  ;;  %5668 = vmatpush.msra.mxu1 %v5651_v30  ;;  %v5814_v30 = vld [vmem:[#allocation2 + $0x1188] sm:$0xff] }
 0xba2   : > { %v5514_v49 = vmul.f32 %v6607_v35, %v5513_v26 }
 0xba3   : > { %5669 = vmatpush.msra.mxu1 %v5650_v32  ;;  %v5858_v32 = vld [vmem:[#allocation2 + $0x1240] sm:$0xff] }
 0xba4   : > { %v5515_v39 = vmul.f32 0.5, %v5514_v49 }
 0xba5   : > { %5670 = vmatpush.msra.mxu1 %v5649_v17 }
 0xba6   : > { %v5516_v37 = vsub.f32 1.5, %v5515_v39 }
 0xba7   : > { %v6609_v16 = vpop.eup %6608  ;;  %5671 = vmatpush.msra.mxu1 %v5648_v29  ;;  %v5813_v29 = vld [vmem:[#allocation2 + $0x1180] sm:$0xff] }
 0xba8   : > { %v5517_v20 = vmul.f32 %v6607_v35, %v5516_v37  ;;  %v5523_v24 = vmul.f32 %v6609_v16, %v9186_v31  ;;  %vm5529_vm8 = vweird.f32 %v6609_v16 }
 0xba9   : > { %vm5530_vm1 = vmor %vm5528_vm0, %vm5529_vm8  ;;  %5672 = vmatpush.msra.mxu1 %v5647_v0  ;;  %v5857_v0 = vld [vmem:[#allocation2 + $0x1238] sm:$0xff] }
 0xbaa   : > { %v5521_v6 = vsel %vm5520_vm7, %v6607_v35, %v5517_v20  ;;  %v5524_v59 = vmul.f32 %v6609_v16, %v5523_v24 }
 0xbab   : > { %v5532_v3 = vmul.f32 %v5521_v6, %v9175_v33  ;;  %5673 = vmatpush.msra.mxu1 %v5646_v15 }
 0xbac   : > { %v5525_v23 = vmul.f32 0.5, %v5524_v59  ;;  %v5819_v59 = vld [vmem:[#allocation2 + $0x11b0] sm:$0xff] }
 0xbad   : > { %v5536_v40 = vmul.f32 %v6327_v27, %v5532_v3  ;;  %5674 = vmatpush.msra.mxu1 %v5645_v46 }
 0xbae   : > { %v5526_v42 = vsub.f32 1.5, %v5525_v23  ;;  %v5817_v23 = vld [vmem:[#allocation2 + $0x11a0] sm:$0xff] }
 0xbaf   : > { %v9197_v44 = vadd.f32 %v6328_v60, %v5536_v40  ;;  %5675 = vmatpush.msra.mxu1 %v5644_v52  ;;  %v6332_v52 = vld [vmem:[#allocation2 + $0xd00] ss:$0 sm:$0xff] }
 0xbb0   : > { %v5527_v1 = vmul.f32 %v6609_v16, %v5526_v42  ;;  %v5816_v42 = vld [vmem:[#allocation2 + $0x1198] sm:$0xff] }
 0xbb1   : > { %5576 = vmatmul.f32.vlgmr.msrb.gmra.mxu1 %v9197_v44  ;;  %5619 = vmatmul.f32.vlgmr.msra.gmra.mxu3 %v9197_v44 }
 0xbb2   : > { %v5531_v33 = vsel %vm5530_vm1, %v6609_v16, %v5527_v1  ;;  %v5822_v16 = vld [vmem:[#allocation2 + $0x11c8] sm:$0xff]  ;;  %v5815_v1 = vld [vmem:[#allocation2 + $0x1190] sm:$0xff] }
 0xbb3   : > { %v5533_v10 = vmul.f32 %v5531_v33, %v9179_v50  ;;  %5824 = vmatpush.msrb.mxu1 %v5822_v16  ;;  %v5859_v33 = vld [vmem:[#allocation2 + $0x1248] sm:$0xff] }
 0xbb4   : > { %5863 = vmatpush.msra.mxu2 %v5859_v33  ;;  %v5886_v33 = vld [vmem:[#allocation2 + $0x1278] sm:$0xff] }
 0xbb5   : > { %v5537_v25 = vmul.f32 %v6327_v27, %v5533_v10  ;;  %5825 = vmatpush.msrb.mxu1 %v5821_v54 }
 0xbb6   : > { %5864 = vmatpush.msra.mxu2 %v5858_v32 }
 0xbb7   : > { %v5541_v14 = vadd.f32 %v6328_v60, %v5537_v25  ;;  %5826 = vmatpush.msrb.mxu1 %v5820_v43  ;;  %v5818_v60 = vld [vmem:[#allocation2 + $0x11a8] sm:$0xff]  ;;  %v6799_v25 = vmov 16.0   ;;  %v5846_v43 = vld [vmem:[#allocation2 + $0x11e0] sm:$0xff] }
 0xbb8   : > { %5865 = vmatpush.msra.mxu2 %v5857_v0  ;;  %v5861_v0 = vld [vmem:[#allocation2 + $0x1258] sm:$0x1] }
 0xbb9   : > { %5579 = vmatmul.f32.gmra.mxu1 %v5541_v14  ;;  %5622 = vmatmul.f32.gmra.mxu3 %v5541_v14 }
 0xbba   : > { %5827 = vmatpush.msrb.mxu1 %v5819_v59  ;;  %v5898_v59 = vld [vmem:[#allocation2 + $0x12d8] sm:$0xff] }
 0xbbb   : > { %5900 = vmatpush.msra.mxu0 %v5898_v59 }
 0xbbc   : > { %5828 = vmatpush.msrb.mxu1 %v5818_v60  ;;  %v5896_v60 = vld [vmem:[#allocation2 + $0x12c8] sm:$0xff] }
 0xbbe   : > { %5829 = vmatpush.msrb.mxu1 %v5817_v23  ;;  %v5894_v23 = vld [vmem:[#allocation2 + $0x12b8] sm:$0xff] }
 0xbc0   : > { %5830 = vmatpush.msrb.mxu1 %v5816_v42  ;;  %v5891_v42 = vld [vmem:[#allocation2 + $0x12a0] sm:$0xff] }
 0xbc2   : > { %5831 = vmatpush.msrb.mxu1 %v5815_v1  ;;  %v5888_v1 = vld [vmem:[#allocation2 + $0x1288] sm:$0xff] }
 0xbc4   : > { %5832 = vmatpush.msrb.mxu1 %v5814_v30 }
 0xbc6   : > { %5833 = vmatpush.msrb.mxu1 %v5813_v29  ;;  %v5883_v29 = vld [vmem:[#allocation2 + $0x1260] sm:$0xff] }
 0xc2e   : > { %v5577_v58 = vpop.f32.mrf.mxu1 }
 0xc2f   : > { %v5578_v50 = vadd.f32 %v6329_v5, %v5577_v58  ;;  %v5856_v58 = vld [vmem:[#allocation2 + $0x1230] sm:$0xff] }
 0xc30   : > { %5866 = vmatpush.msra.mxu2 %v5856_v58 }
 0xc31   : > { %v5583_v9 = vmax.f32 %v5578_v50, 0.0 }
 0xc33   : > { %5699 = vmatmul.f32.vlgmr.msrb.gmra.mxu2 %v5583_v9 }
 0xc34   : > { %v5620_v48 = vpop.f32.mrf.mxu3 }
 0xc35   : > { %v5621_v2 = vadd.f32 %v6330_v4, %v5620_v48  ;;  %v5855_v48 = vld [vmem:[#allocation2 + $0x1228] sm:$0xff] }
 0xc36   : > { %v5580_v21 = vpop.f32.mrf.mxu1  ;;  %5867 = vmatpush.msra.mxu2 %v5855_v48 }
 0xc37   : > { %v5626_v18 = vmax.f32 %v5621_v2, 0.0  ;;  %v5581_v11 = vadd.f32 %v6329_v5, %v5580_v21  ;;  %v5812_v5 = vld [vmem:[#allocation2 + $0x1178] sm:$0xff] }
 0xc38   : > { %5834 = vmatpush.msrb.mxu1 %v5812_v5  ;;  %v5899_v5 = vld [vmem:[#allocation2 + $0x12e0] sm:$0x1] }
 0xc39   : > { %v5584_v38 = vmax.f32 %v5581_v11, 0.0  ;;  %5676 = vmatmul.f32.vlgmr.msra.gmra.mxu1 %v5626_v18  ;;  %v6333_v18 = vld [vmem:[#allocation2 + $0xd08] ss:$0 sm:$0xff] }
 0xc3b   : > { %5702 = vmatmul.f32.gmra.mxu2 %v5584_v38  ;;  %v5810_v38 = vld [vmem:[#allocation2 + $0x1168] sm:$0xff] }
 0xc3c   : > { %v5623_v34 = vpop.f32.mrf.mxu3 }
 0xc3d   : > { %v5624_v62 = vadd.f32 %v6330_v4, %v5623_v34  ;;  %v5811_v4 = vld [vmem:[#allocation2 + $0x1170] sm:$0xff]  ;;  %v5854_v34 = vld [vmem:[#allocation2 + $0x1220] sm:$0xff] }
 0xc3e   : > { %5835 = vmatpush.msrb.mxu1 %v5811_v4  ;;  %5868 = vmatpush.msra.mxu2 %v5854_v34 }
 0xc3f   : > { %v5627_v13 = vmax.f32 %v5624_v62, 0.0 }
 0xc40   : > { %5836 = vmatpush.msrb.mxu1 %v5810_v38 }
 0xc41   : > { %5679 = vmatmul.f32.gmra.mxu1 %v5627_v13 }
 0xcb6   : > { %v5677_v41 = vpop.f32.mrf.mxu1  ;;  %v5700_v57 = vpop.f32.mrf.mxu2 }
 0xcb7   : > { %v5701_v35 = vadd.f32 %v5700_v57, %v5677_v41  ;;  %v5853_v41 = vld [vmem:[#allocation2 + $0x1218] sm:$0xff] }
 0xcb8   : > { %5869 = vmatpush.msra.mxu2 %v5853_v41 }
 0xcb9   : > { %v5708_v31 = vadd.f32 %v6331_v28, %v5701_v35 }
 0xcbb   : > { %v5710_v53 = vadd.f32 %v5708_v31, %v9197_v44  ;;  %v5808_v31 = vld [vmem:[#allocation2 + $0x1158] sm:$0xff] }
 0xcbd   : > { %5728 = vmatmul.f32.vlgmr.msrb.gmra.mxu0 %v5710_v53 }
 0xcbe   : > { %v5680_v26 = vpop.f32.mrf.mxu1  ;;  %v5703_v19 = vpop.f32.mrf.mxu2 }
 0xcbf   : > { %v5704_v7 = vadd.f32 %v5703_v19, %v5680_v26 }
 0xcc1   : > { %v5709_v61 = vadd.f32 %v6331_v28, %v5704_v7  ;;  %v5809_v28 = vld [vmem:[#allocation2 + $0x1160] sm:$0xff]  ;;  %v5807_v7 = vld [vmem:[#allocation2 + $0x1150] sm:$0xff] }
 0xcc2   : > { %5837 = vmatpush.msrb.mxu1 %v5809_v28 }
 0xcc3   : > { %v5711_v49 = vadd.f32 %v5709_v61, %v5541_v14  ;;  %v5851_v61 = vld [vmem:[#allocation2 + $0x1208] sm:$0xff] }
 0xcc4   : > { %5838 = vmatpush.msrb.mxu1 %v5808_v31 }
 0xcc5   : > { %5731 = vmatmul.f32.gmra.mxu0 %v5711_v49 }
 0xcc6   : > { %5839 = vmatpush.msrb.mxu1 %v5807_v7 }
 0xd3a   : > { %v5729_v36 = vpop.f32.mrf.mxu0 }
 0xd3b   : > { %v5735_v45 = vsub.f32 %v5710_v53, %v5729_v36  ;;  %v5852_v53 = vld [vmem:[#allocation2 + $0x1210] sm:$0xff]  ;;  %v5850_v36 = vld [vmem:[#allocation2 + $0x1200] sm:$0xff] }
 0xd3c   : > { %5870 = vmatpush.msra.mxu2 %v5852_v53 }
 0xd3d   : > { %v5737_v8 = vmul.f32 %v5735_v45, %v5735_v45 }
 0xd3e   : > { %5871 = vmatpush.msra.mxu2 %v5851_v61 }
 0xd3f   : > { %5755 = vmatmul.f32.vlgmr.msrb.gmra.mxu3 %v5737_v8 }
 0xd40   : > { %5872 = vmatpush.msra.mxu2 %v5850_v36 }
 0xd42   : > { %v5732_v22 = vpop.f32.mrf.mxu0 }
 0xd43   : > { %v9216_v39 = vsub.f32 %v5711_v49, %v5732_v22  ;;  %v5849_v22 = vld [vmem:[#allocation2 + $0x11f8] sm:$0xff] }
 0xd44   : > { %5873 = vmatpush.msra.mxu2 %v5849_v22 }
 0xd45   : > { %v5738_v12 = vmul.f32 %v9216_v39, %v9216_v39 }
 0xd47   : > { %5758 = vmatmul.f32.gmra.mxu3 %v5738_v12  ;;  %v5848_v12 = vld [vmem:[#allocation2 + $0x11f0] sm:$0xff] }
 0xd48   : > { %5874 = vmatpush.msra.mxu2 %v5848_v12 }
 0xdc2   : > { %v5756_v55 = vpop.f32.mrf.mxu3 }
 0xdc3   : > { %v5757_v37 = vadd.f32 1e-05, %v5756_v55 }
 0xdc5   : > { %6610 = vrsqrt.f32 %v5757_v37  ;;  %vm5768_vm10 = vweird.f32 %v5757_v37 }
 0xdca   : > { %v5759_v20 = vpop.f32.mrf.mxu3 }
 0xdcb   : > { %v6611_v24 = vpop.eup %6610  ;;  %v5760_v27 = vadd.f32 1e-05, %v5759_v20 }
 0xdcc   : > { %v5763_v6 = vmul.f32 %v6611_v24, %v5757_v37  ;;  %vm5769_vm9 = vweird.f32 %v6611_v24 }
 0xdcd   : > { %6612 = vrsqrt.f32 %v5760_v27  ;;  %vm5770_vm11 = vmor %vm5768_vm10, %vm5769_vm9  ;;  %vm5778_vm13 = vweird.f32 %v5760_v27 }
 0xdce   : > { %v5764_v3 = vmul.f32 %v6611_v24, %v5763_v6  ;;  %6614 = vrcp.f32 %v6799_v25  ;;  %v5845_v6 = vld [vmem:[#allocation2 + $0x11d8] sm:$0xff] }
 0xdd0   : > { %v5765_v63 = vmul.f32 0.5, %v5764_v3  ;;  %v5897_v3 = vld [vmem:[#allocation2 + $0x12d0] sm:$0xff] }
 0xdd1   : > { %5901 = vmatpush.msra.mxu0 %v5897_v3 }
 0xdd2   : > { %v5766_v40 = vsub.f32 1.5, %v5765_v63  ;;  %v5895_v63 = vld [vmem:[#allocation2 + $0x12c0] sm:$0xff] }
 0xdd3   : > { %v6613_v51 = vpop.eup %6612  ;;  %5902 = vmatpush.msra.mxu0 %v5896_v60 }
 0xdd4   : > { %v5767_v44 = vmul.f32 %v6611_v24, %v5766_v40  ;;  %v5773_v47 = vmul.f32 %v6613_v51, %v5760_v27  ;;  %vm5779_vm12 = vweird.f32 %v6613_v51  ;;  %v6615_v9 = vpop.eup %6614  ;;  %v5847_v27 = vld [vmem:[#allocation2 + $0x11e8] sm:$0xff]  ;;  %v5893_v40 = vld [vmem:[#allocation2 + $0x12b0] sm:$0xff] }
 0xdd5   : > { %vm5780_vm14 = vmor %vm5778_vm13, %vm5779_vm12  ;;  %v5800_v62 = vmul.f32 16.0, %v6615_v9  ;;  %vm5804_vm15 = vweird.f32 %v6615_v9  ;;  %5875 = vmatpush.msra.mxu2 %v5847_v27  ;;  %5903 = vmatpush.msra.mxu0 %v5895_v63 }
 0xdd6   : > { %v5774_v10 = vmul.f32 %v6613_v51, %v5773_v47  ;;  %v5771_v14 = vsel %vm5770_vm11, %v6611_v24, %v5767_v44  ;;  %v5890_v44 = vld [vmem:[#allocation2 + $0x1298] sm:$0xff]  ;;  %v5889_v47 = vld [vmem:[#allocation2 + $0x1290] sm:$0xff] }
 0xdd7   : > { %v5782_v46 = vmul.f32 %v5771_v14, %v5735_v45  ;;  %v5801_v26 = vsub.f32 1.0, %v5800_v62  ;;  %5876 = vmatpush.msra.mxu2 %v5846_v43  ;;  %5904 = vmatpush.msra.mxu0 %v5894_v23  ;;  %v5885_v14 = vld [vmem:[#allocation2 + $0x1270] sm:$0xff] }
 0xdd8   : > { %v5775_v17 = vmul.f32 0.5, %v5774_v10  ;;  %v5823_v10 = vld [vmem:[#allocation2 + $0x11d0] sm:$0x1] }
 0xdd9   : > { %v5786_v21 = vmul.f32 %v6332_v52, %v5782_v46  ;;  %v5802_v45 = vmul.f32 %v6615_v9, %v5801_v26  ;;  %5877 = vmatpush.msra.mxu2 %v5845_v6  ;;  %5905 = vmatpush.msra.mxu0 %v5893_v40 }
 0xdda   : > { %v5776_v15 = vsub.f32 1.5, %v5775_v17  ;;  %v5884_v17 = vld [vmem:[#allocation2 + $0x1268] sm:$0xff] }
 0xddb   : > { %v5790_v57 = vadd.f32 %v6333_v18, %v5786_v21  ;;  %v5803_v55 = vadd.f32 %v6615_v9, %v5802_v45 }
 0xddc   : > { %v5777_v50 = vmul.f32 %v6613_v51, %v5776_v15 }
 0xddd   : > { %v5805_v54 = vsel %vm5804_vm15, %v6615_v9, %v5803_v55 }
 0xdde   : > { %v5781_v2 = vsel %vm5780_vm14, %v6613_v51, %v5777_v50  ;;  %v5892_v51 = vld [vmem:[#allocation2 + $0x12a8] sm:$0xff] }
 0xddf   : > { %v5783_v11 = vmul.f32 %v5781_v2, %v9216_v39  ;;  %5906 = vmatpush.msra.mxu0 %v5892_v51 }
 0xde1   : > { %v5787_v13 = vmul.f32 %v6332_v52, %v5783_v11  ;;  %5907 = vmatpush.msra.mxu0 %v5891_v42 }
 0xde3   : > { %v5791_v35 = vadd.f32 %v6333_v18, %v5787_v13  ;;  %5908 = vmatpush.msra.mxu0 %v5890_v44 }
 0xde5   : > { %v5792_v19 = vadd.f32 %v5791_v35, %v5790_v57  ;;  %5909 = vmatpush.msra.mxu0 %v5889_v47 }
 0xde7   : > { %v5793_v49 = vrot.slane %v5792_v19, 4  ;;  %5910 = vmatpush.msra.mxu0 %v5888_v1 }
 0xde9   : > { %v5794_v8 = vadd.f32 %v5793_v49, %v5792_v19  ;;  %5911 = vmatpush.msra.mxu0 %v5887_v56 }
 0xdeb   : > { %v5795_v39 = vrot.slane %v5794_v8, 2  ;;  %5912 = vmatpush.msra.mxu0 %v5886_v33 }
 0xded   : > { %v5796_v37 = vadd.f32 %v5795_v39, %v5794_v8  ;;  %5913 = vmatpush.msra.mxu0 %v5885_v14 }
 0xdef   : > { %v5797_v16 = vrot.slane %v5796_v37, 1  ;;  %5914 = vmatpush.msra.mxu0 %v5884_v17 }
 0xdf1   : > { %v5798_v20 = vadd.f32 %v5797_v16, %v5796_v37  ;;  %5915 = vmatpush.msra.mxu0 %v5883_v29 }
 0xdf3   : > { %v5806_v24 = vmul.f32 %v5805_v54, %v5798_v20 }
 0xdf5   : > { %5840 = vmatmul.f32.vlgmr.msrb.gmra.mxu1 %v5806_v24 }
 0xe72   : > { %v5841_v30 = vpop.f32.mrf.mxu1 }
 0xe73   : > { %v5842_v25 = vadd.f32 %v5841_v30, %v5823_v10 }
 0xe75   : > { %v5844_v32 = vmax.f32 %v5842_v25, 0.0 }
 0xe77   : > { %5878 = vmatmul.f32.vlgmr.msra.gmra.mxu2 %v5844_v32 }
 0xefa   : > { %v5879_v15 = vpop.f32.mrf.mxu2 }
 0xefb   : > { %v5880_v46 = vadd.f32 %v5879_v15, %v5861_v0 }
 0xefd   : > { %v5882_v52 = vmax.f32 %v5880_v46, 0.0 }
 0xeff   : > { %5916 = vmatmul.f32.vlgmr.msra.gmra.mxu0 %v5882_v52 }
 0xf7c   : > { %v5917_v58 = vpop.f32.mrf.mxu0 }
 0xf7d   : > { %v5918_v50 = vadd.f32 %v5917_v58, %v5899_v5 }
 0xf7f   : > { %5920 = vst [vmem:[%s319_s9] sm:$0x1] %v5918_v50 }
 0xf80 PF: > { %p16_p1 = scmp.ge.s32.totalorder %s6873_s30, 4   ;;  %s9482_s18 = smov %s6785_s19 }
 0xf81   : > { %s9483_s19 = smov %s6789_s20  ;;  %s9484_s20 = smov %s6886_s10 }
 0xf82   : > { %s9485_s21 = smov %s6873_s30  ;;  %18 = sbr.rel (!%p16_p1) target bundleno = 4 (0x4), region = 94 }
 0xf87   :  { %5938 = vsyncpa [#allocation3], 1 }
 0xf88   :  { %5940 = vsyncpa [#allocation3 + $0x1], 1 }
 0xf89   :  { %5941 = vsyncpa [#allocation5], 1 }
 0xf8a   :  { %5943 = vsyncpa [#allocation5 + $0x1], 1 }

</bundles_post_ra>
